<compile_context>
chip_gen: v6e
topology: v6e:2x2x1
jax: 0.10.0
libtpu: 0.0.40
codegen_flags: <defaults>
</compile_context>

<pallas_src>
import math
import functools

import jax
import jax.numpy as jnp
from jax.experimental import pallas as pl
from jax.experimental.pallas import tpu as pltpu

_EPS = 1e-5                    # PyTorch BatchNorm2d default eps
_LANES = 128                   # channel padding granularity (lane width)
_TARGET_TILE_H = 128           # desired output rows per grid step (clipped by H / VMEM)
_VMEM_TILE_BUDGET = 20 << 20   # tile chooser keeps the per-step estimate under this
_VMEM_LIMIT = 40 << 20         # explicit scoped-VMEM limit: < v7x 64 MiB physical,
                               # > v5e's 16 MiB scoped default


def _round_up(x, m):
    return (x + m - 1) // m * m


def _apply_act(y, activation):
    if activation == 'relu':
        return jnp.maximum(y, 0.0)
    elif activation == 'leaky_relu':
        return jnp.where(y >= 0.0, y, 0.2 * y)
    elif activation == 'swish':
        return y * jax.nn.sigmoid(y)
    else:
        raise Exception('Incorrect activation!')


# --------------------------------------------------------------------------------------
# VMEM budgeting / tile selection
# --------------------------------------------------------------------------------------

def _vmem_estimate_bytes(tile_h, w, ci, co, size, in_b, out_b):
    """Rough per-step VMEM footprint (double-buffered pipelined blocks + scratch)."""
    p = size // 2
    halo_in = 2 * 8 * w * ci * in_b                      # xu + xd neighbour blocks
    main_in = tile_h * w * ci * in_b                     # current input tile
    win = (tile_h + 2 * p) * (w + 2 * p) * ci * in_b     # staged window scratch
    acc = tile_h * w * co * 4                            # f32 accumulator value
    tap = tile_h * w * ci * in_b                         # one live tap operand
    y_out = tile_h * w * co * out_b                      # output tile
    wts = size * size * ci * co * in_b                   # packed weights (resident)
    return 2 * (halo_in + main_in + y_out) + 2 * wts + win + acc + tap


def _choose_tile_h(h, w, ci, co, size, in_b, out_b,
                   target=_TARGET_TILE_H, budget=_VMEM_TILE_BUDGET):
    best = 8
    th = 8
    while th <= min(h, target):
        if h % th == 0 and _vmem_estimate_bytes(th, w, ci, co, size, in_b, out_b) <= budget:
            best = th
        th += 8
    return best


# --------------------------------------------------------------------------------------
# Kernel 1: (optionally fused input BN+act) conv(size x size) + partial BN stats
# --------------------------------------------------------------------------------------

def _make_conv_stats_kernel(size, tile_h, w_out, out_c, fuse_in, activation, mxu_dtype):
    p = size // 2

    def kernel(*refs):
        if fuse_in:
            (xu_ref, xc_ref, xd_ref, w_ref, sc_ref, sh_ref,
             y_ref, st_ref, win_ref) = refs
        else:
            xu_ref, xc_ref, xd_ref, w_ref, y_ref, st_ref, win_ref = refs
            sc_ref = sh_ref = None

        j = pl.program_id(1)
        n_h = pl.num_programs(1)
        ci = xc_ref.shape[-1]
        th = tile_h

        def prep(rows, valid=None):
            # Previous-layer BN + activation (fused path), boundary-row masking and the
            # zero W-halo columns are all produced here in f32 (v5e has no bf16 VPU);
            # cast to the MXU operand dtype only at the end.
            v = rows.astype(jnp.float32)
            if fuse_in:
                v = _apply_act(v * sc_ref[...] + sh_ref[...], activation)
            if valid is not None:
                v = v * valid                                  # zero pad AFTER BN+act
            zc = jnp.zeros((v.shape[0], p, v.shape[2]), jnp.float32)
            return jnp.concatenate([zc, v, zc], axis=1).astype(mxu_dtype)

        top_valid = (j > 0).astype(jnp.float32)
        bot_valid = (j < n_h - 1).astype(jnp.float32)

        # Stage the (TH+2p, W+2p, Ci) window once.  Row halos come from the clamped
        # neighbour blocks and are masked to zero at the image boundary (this
        # reproduces the conv's zero padding without padded rows/columns in HBM).
        win_ref[0:p] = prep(xu_ref[0, 8 - p:8], top_valid)
        win_ref[p:p + th] = prep(xc_ref[0])
        win_ref[p + th:p + th + p] = prep(xd_ref[0, 0:p], bot_valid)

        # size^2 tap matmuls accumulated into an f32 accumulator (no im2col patch).
        acc = jnp.zeros((th * w_out, out_c), jnp.float32)
        for dy in range(size):
            for dx in range(size):
                slab = win_ref[dy:dy + th, dx:dx + w_out, :]           # (TH, W, Ci)
                acc = acc + jnp.dot(slab.reshape(th * w_out, ci),
                                    w_ref[dy * size + dx],
                                    preferred_element_type=jnp.float32)

        y_ref[...] = acc.reshape(1, th, w_out, out_c).astype(y_ref.dtype)
        # Partial BatchNorm statistics for this tile, single (2, Co) store.
        # NOTE: variance is later formed as E[x^2]-E[x]^2 from f32 sums; adequate here,
        # Welford-style combination would be needed for extreme N*H*W / offsets.
        ssum = jnp.sum(acc, axis=0, keepdims=True)
        ssq = jnp.sum(acc * acc, axis=0, keepdims=True)
        st_ref[0, 0] = jnp.concatenate([ssum, ssq], axis=0)

    return kernel


def _conv_stats(x, w_packed, scale=None, shift=None, *, size, tile_h, out_c,
                activation, store_dtype, mxu_dtype):
    """x: (N, H, W, Ci) (no spatial padding).  Returns conv output (N, H, W, out_c)
       in store_dtype and partial stats (N, nH, 2, out_c) f32.  If scale/shift are
       given, BN+activation of the PREVIOUS layer is fused into the input path."""
    n, h, w, ci = x.shape
    p = size // 2
    n_h = h // tile_h
    th8 = tile_h // 8
    h8 = h // 8
    fuse = scale is not None

    in_specs = [
        # 8-row block above (clamped at the top boundary)
        pl.BlockSpec((1, 8, w, ci),
                     lambda i, j: (i, jnp.maximum(j * th8 - 1, 0), 0, 0)),
        # current tile rows
        pl.BlockSpec((1, tile_h, w, ci), lambda i, j: (i, j, 0, 0)),
        # 8-row block below (clamped at the bottom boundary)
        pl.BlockSpec((1, 8, w, ci),
                     lambda i, j: (i, jnp.minimum((j + 1) * th8, h8 - 1), 0, 0)),
        # packed weights (constant block index -> resident)
        pl.BlockSpec(w_packed.shape, lambda i, j: (0, 0, 0)),
    ]
    args = [x, x, x, w_packed]
    if fuse:
        in_specs += [pl.BlockSpec((1, ci), lambda i, j: (0, 0)),
                     pl.BlockSpec((1, ci), lambda i, j: (0, 0))]
        args += [scale, shift]

    y, st = pl.pallas_call(
        _make_conv_stats_kernel(size, tile_h, w, out_c, fuse, activation, mxu_dtype),
        grid=(n, n_h),
        in_specs=in_specs,
        out_specs=(
            pl.BlockSpec((1, tile_h, w, out_c), lambda i, j: (i, j, 0, 0)),
            pl.BlockSpec((1, 1, 2, out_c), lambda i, j: (i, j, 0, 0)),
        ),
        out_shape=(
            jax.ShapeDtypeStruct((n, h, w, out_c), store_dtype),
            jax.ShapeDtypeStruct((n, n_h, 2, out_c), jnp.float32),
        ),
        scratch_shapes=[pltpu.VMEM((tile_h + 2 * p, w + 2 * p, ci), mxu_dtype)],
        compiler_params=pltpu.CompilerParams(
            dimension_semantics=("parallel", "parallel"),
            vmem_limit_bytes=_VMEM_LIMIT),
    )(*args)
    return y, st


# --------------------------------------------------------------------------------------
# Kernel 2: final BatchNorm affine (precomputed scale/shift) + activation (dense store)
# --------------------------------------------------------------------------------------

def _make_norm_act_kernel(activation):
    def kernel(y_ref, sc_ref, sh_ref, o_ref):
        z = y_ref[0].astype(jnp.float32) * sc_ref[...] + sh_ref[...]
        o_ref[0] = _apply_act(z, activation).astype(o_ref.dtype)
    return kernel


def _norm_act(y, scale, shift, activation, *, tile_h):
    n, h, w, c = y.shape
    n_h = h // tile_h
    return pl.pallas_call(
        _make_norm_act_kernel(activation),
        grid=(n, n_h),
        in_specs=[
            pl.BlockSpec((1, tile_h, w, c), lambda i, j: (i, j, 0, 0)),
            pl.BlockSpec((1, c), lambda i, j: (0, 0)),
            pl.BlockSpec((1, c), lambda i, j: (0, 0)),
        ],
        out_specs=pl.BlockSpec((1, tile_h, w, c), lambda i, j: (i, j, 0, 0)),
        out_shape=jax.ShapeDtypeStruct((n, h, w, c), jnp.float32),
        compiler_params=pltpu.CompilerParams(
            dimension_semantics=("parallel", "parallel"),
            vmem_limit_bytes=_VMEM_LIMIT),
    )(y, scale, shift)


# --------------------------------------------------------------------------------------
# Wrapper
# --------------------------------------------------------------------------------------

def _pack_weight(w_oihw, cin_p, cout_p, dtype):
    """(Cout, Cin, k, k) OIHW -> (k*k, cin_p, cout_p), tap-major, zero padded channels."""
    co, ci, kh, kw = w_oihw.shape
    w = jnp.transpose(w_oihw, (2, 3, 1, 0)).reshape(kh * kw, ci, co)
    wp = jnp.zeros((kh * kw, cin_p, cout_p), jnp.float32)
    wp = wp.at[:, :ci, :co].set(w)
    return wp.astype(dtype)


def _pad_vec(v, cp):
    out = jnp.zeros((cp,), jnp.float32)
    return out.at[:v.shape[0]].set(v)


def _bn_scale_shift(stats, gamma_p, beta_p, count):
    """Per-tile partial (sum, sumsq) -> per-channel (scale, shift) for y*scale+shift."""
    s = jnp.sum(stats, axis=(0, 1))                       # (2, Cp)
    mean = s[0] / count
    var = jnp.maximum(s[1] / count - mean * mean, 0.0)    # biased var (PyTorch training)
    inv = jax.lax.rsqrt(var + _EPS)
    scale = gamma_p * inv
    shift = beta_p - mean * scale
    return scale.reshape(1, -1), shift.reshape(1, -1)


@functools.partial(jax.jit, static_argnames=('activation', 'fast_mode', 'target_tile_h'))
def conv_block_forward(x_nchw, w1, gamma1, beta1, w2, gamma2, beta2,
                       activation='relu', fast_mode=False,
                       target_tile_h=_TARGET_TILE_H):
    """ConvBlock.forward (training-mode BatchNorm).  x: NCHW -> NCHW.
       fast_mode=True: bf16 MXU operands + bf16 HBM intermediates (v6e/v7x perf mode,
       ~1e-2 deviation from the exact f32 result)."""
    n, cin, h, w = x_nchw.shape
    cout, _, size, _ = w1.shape
    p = size // 2
    assert size % 2 == 1 and 1 <= p <= 8
    assert h % 8 == 0 and w % 8 == 0

    cin_p = _round_up(cin, _LANES)
    cout_p = _round_up(cout, _LANES)

    mxu_dtype = jnp.bfloat16 if fast_mode else jnp.float32
    store_dtype = jnp.bfloat16 if fast_mode else jnp.float32
    nbytes = 2 if fast_mode else 4

    tile_h = _choose_tile_h(h, w, max(cin_p, cout_p), cout_p, size, nbytes, nbytes,
                            target=target_tile_h)

    w1p = _pack_weight(w1, cin_p, cout_p, mxu_dtype)
    w2p = _pack_weight(w2, cout_p, cout_p, mxu_dtype)
    g1p, b1p = _pad_vec(gamma1, cout_p), _pad_vec(beta1, cout_p)
    g2p, b2p = _pad_vec(gamma2, cout_p), _pad_vec(beta2, cout_p)

    # NCHW -> NHWC, pad channels to a lane multiple once.  No spatial padding: the conv
    # kernels synthesize the zero halo in-register.  (In a full network the NHWC layout
    # and channel pad would be kept across blocks instead of converting per block.)
    x_nhwc = jnp.transpose(x_nchw, (0, 2, 3, 1))
    x_in = jnp.pad(x_nhwc, ((0, 0), (0, 0), (0, 0), (0, cin_p - cin))).astype(mxu_dtype)

    count = float(n * h * w)

    # conv1 + partial BN1 stats  ->  BN1 scale/shift (tiny XLA reduction)
    y1, st1 = _conv_stats(x_in, w1p, size=size, tile_h=tile_h, out_c=cout_p,
                          activation=activation, store_dtype=store_dtype,
                          mxu_dtype=mxu_dtype)
    sc1, sh1 = _bn_scale_shift(st1, g1p, b1p, count)

    # conv2 with BN1 + activation fused into its input path + partial BN2 stats
    y2, st2 = _conv_stats(y1, w2p, sc1, sh1, size=size, tile_h=tile_h, out_c=cout_p,
                          activation=activation, store_dtype=store_dtype,
                          mxu_dtype=mxu_dtype)
    sc2, sh2 = _bn_scale_shift(st2, g2p, b2p, count)

    # final BN2 + activation
    out = _norm_act(y2, sc2, sh2, activation, tile_h=tile_h)

    out = out[:, :, :, :cout]                             # drop channel padding
    return jnp.transpose(out, (0, 3, 1, 2))               # NHWC -> NCHW


# --------------------------------------------------------------------------------------
# Parameter init (mirrors module __init__) and pure-JAX reference
# --------------------------------------------------------------------------------------

def _xavier_uniform(key, shape):
    # shape is PyTorch conv layout (Cout, Cin, kh, kw)
    fan_in = shape[1] * shape[2] * shape[3]
    fan_out = shape[0] * shape[2] * shape[3]
    bound = math.sqrt(6.0 / (fan_in + fan_out))
    return jax.random.uniform(key, shape, jnp.float32, -bound, bound)


def _ref_forward(x, w1, g1, b1, w2, g2, b2, activation):
    def conv(xi, wk):
        pad = wk.shape[2] // 2
        return jax.lax.conv_general_dilated(
            xi, wk, window_strides=(1, 1), padding=((pad, pad), (pad, pad)),
            dimension_numbers=('NCHW', 'OIHW', 'NCHW'))

    def bn(xi, g, b):
        mean = jnp.mean(xi, axis=(0, 2, 3), keepdims=True)
        var = jnp.mean(jnp.square(xi - mean), axis=(0, 2, 3), keepdims=True)
        return ((xi - mean) * jax.lax.rsqrt(var + _EPS)
                * g.reshape(1, -1, 1, 1) + b.reshape(1, -1, 1, 1))

    h = _apply_act(bn(conv(x, w1), g1, b1), activation)
    return _apply_act(bn(conv(h, w2), g2, b2), activation)


if __name__ == "__main__":
    N, Cin, Cout, H, W = 2, 4, 8, 16, 16
    size = 3
    activation = 'relu'
    momentum = 0.1  # BatchNorm momentum: running-stat update only, no effect on forward
    # TODO(synk): running mean/var (momentum) state updates are not implemented.

    key = jax.random.PRNGKey(0)
    k1, k2, kx = jax.random.split(key, 3)
    w1 = _xavier_uniform(k1, (Cout, Cin, size, size))
    w2 = _xavier_uniform(k2, (Cout, Cout, size, size))
    gamma1 = jnp.ones((Cout,), jnp.float32)
    beta1 = jnp.zeros((Cout,), jnp.float32)
    gamma2 = jnp.ones((Cout,), jnp.float32)
    beta2 = jnp.zeros((Cout,), jnp.float32)
    x = jax.random.normal(kx, (N, Cin, H, W), jnp.float32)

    ref = _ref_forward(x, w1, gamma1, beta1, w2, gamma2, beta2, activation)

    # Exact (f32) path — matches PyTorch forward semantics.
    out = conv_block_forward(x, w1, gamma1, beta1, w2, gamma2, beta2,
                             activation=activation)
    out = jax.block_until_ready(out)
    assert out.shape == (N, Cout, H, W)
    max_err = float(jnp.max(jnp.abs(out - ref)))
    assert jnp.allclose(out, ref, atol=2e-3, rtol=2e-3), f"f32 max_err={max_err}"

    # Fast path (bf16 MXU operands + bf16 HBM intermediates), recommended on v6e/v7x;
    # small documented deviation from the exact f32 reference.
    out_fast = conv_block_forward(x, w1, gamma1, beta1, w2, gamma2, beta2,
                                  activation=activation, fast_mode=True)
    out_fast = jax.block_until_ready(out_fast)
    max_err_fast = float(jnp.max(jnp.abs(out_fast - ref)))
    assert jnp.allclose(out_fast, ref, atol=1e-1, rtol=1e-1), \
        f"bf16 max_err={max_err_fast}"

    print("KERNEL_OK")
</pallas_src>

<mosaic_0001>
module attributes {stable_mosaic.version = 11 : i64} {
  func.func @kernel(%arg0: i32, %arg1: i32, %arg2: memref<1x8x16x128xf32, #tpu.memory_space<vmem>>, %arg3: memref<1x16x16x128xf32, #tpu.memory_space<vmem>>, %arg4: memref<1x8x16x128xf32, #tpu.memory_space<vmem>>, %arg5: memref<9x128x128xf32, #tpu.memory_space<vmem>>, %arg6: memref<1x16x16x128xf32, #tpu.memory_space<vmem>>, %arg7: memref<1x1x2x128xf32, #tpu.memory_space<vmem>>, %arg8: memref<18x18x128xf32, #tpu.memory_space<vmem>>) attributes {dimension_semantics = [#tpu.dimension_semantics<parallel>, #tpu.dimension_semantics<parallel>], iteration_bounds = array<i64: 2, 1>, scalar_prefetch = 0 : i64, scratch_operands = 1 : i64, tpu.core_type = #tpu.core_type<tc>, window_params = [{transform_indices = @transform_0, window_bounds = array<i64: 1, 8, 16, 128>}, {transform_indices = @transform_1, window_bounds = array<i64: 1, 16, 16, 128>}, {transform_indices = @transform_2, window_bounds = array<i64: 1, 8, 16, 128>}, {pipeline_mode = #tpu.pipeline_mode<synchronous>, transform_indices = @transform_3, window_bounds = array<i64: 9, 128, 128>}, {transform_indices = @transform_4, window_bounds = array<i64: 1, 16, 16, 128>}, {transform_indices = @transform_5, window_bounds = array<i64: 1, 1, 2, 128>}]} {
    %c0_i32 = arith.constant 0 : i32
    %0 = arith.cmpi sgt, %arg1, %c0_i32 : i32
    %1 = arith.extui %0 : i1 to i32
    %2 = arith.sitofp %1 : i32 to f32
    %c0_i32_0 = arith.constant 0 : i32
    %3 = arith.cmpi slt, %arg1, %c0_i32_0 : i32
    %4 = arith.extui %3 : i1 to i32
    %5 = arith.sitofp %4 : i32 to f32
    %c0 = arith.constant 0 : index
    %c7 = arith.constant 7 : index
    %c0_1 = arith.constant 0 : index
    %c0_2 = arith.constant 0 : index
    %6 = vector.load %arg2[%c0, %c7, %c0_1, %c0_2] : memref<1x8x16x128xf32, #tpu.memory_space<vmem>>, vector<1x1x16x128xf32>
    %7 = vector.shape_cast %6 : vector<1x1x16x128xf32> to vector<1x16x128xf32>
    %8 = vector.broadcast %2 : f32 to vector<1x16x128xf32>
    %9 = arith.mulf %7, %8 : vector<1x16x128xf32>
    %cst = arith.constant 0.000000e+00 : f32
    %10 = vector.broadcast %cst : f32 to vector<1x1x128xf32>
    %11 = tpu.concatenate %10, %9, %10 in 1 : vector<1x1x128xf32>, vector<1x16x128xf32>, vector<1x1x128xf32> -> vector<1x18x128xf32>
    %c0_3 = arith.constant 0 : index
    %c0_4 = arith.constant 0 : index
    %c0_5 = arith.constant 0 : index
    %12 = vector.load %arg8[%c0_3, %c0_4, %c0_5] : memref<18x18x128xf32, #tpu.memory_space<vmem>>, vector<1x18x128xf32>
    tpu.vector_store %arg8[%c0_3, %c0_4, %c0_5], %11 {strides = array<i32>} : memref<18x18x128xf32, #tpu.memory_space<vmem>>, vector<1x18x128xf32>,
    %c0_6 = arith.constant 0 : index
    %c0_7 = arith.constant 0 : index
    %c0_8 = arith.constant 0 : index
    %c0_9 = arith.constant 0 : index
    %13 = vector.load %arg3[%c0_6, %c0_7, %c0_8, %c0_9] : memref<1x16x16x128xf32, #tpu.memory_space<vmem>>, vector<1x16x16x128xf32>
    %14 = vector.shape_cast %13 : vector<1x16x16x128xf32> to vector<16x16x128xf32>
    %cst_10 = arith.constant 0.000000e+00 : f32
    %15 = vector.broadcast %cst_10 : f32 to vector<16x1x128xf32>
    %16 = tpu.concatenate %15, %14, %15 in 1 : vector<16x1x128xf32>, vector<16x16x128xf32>, vector<16x1x128xf32> -> vector<16x18x128xf32>
    %c1 = arith.constant 1 : index
    %c0_11 = arith.constant 0 : index
    %c0_12 = arith.constant 0 : index
    %17 = vector.load %arg8[%c1, %c0_11, %c0_12] : memref<18x18x128xf32, #tpu.memory_space<vmem>>, vector<16x18x128xf32>
    tpu.vector_store %arg8[%c1, %c0_11, %c0_12], %16 {strides = array<i32>} : memref<18x18x128xf32, #tpu.memory_space<vmem>>, vector<16x18x128xf32>,
    %c0_13 = arith.constant 0 : index
    %c0_14 = arith.constant 0 : index
    %c0_15 = arith.constant 0 : index
    %c0_16 = arith.constant 0 : index
    %18 = vector.load %arg4[%c0_13, %c0_14, %c0_15, %c0_16] : memref<1x8x16x128xf32, #tpu.memory_space<vmem>>, vector<1x1x16x128xf32>
    %19 = vector.shape_cast %18 : vector<1x1x16x128xf32> to vector<1x16x128xf32>
    %20 = vector.broadcast %5 : f32 to vector<1x16x128xf32>
    %21 = arith.mulf %19, %20 : vector<1x16x128xf32>
    %cst_17 = arith.constant 0.000000e+00 : f32
    %22 = vector.broadcast %cst_17 : f32 to vector<1x1x128xf32>
    %23 = tpu.concatenate %22, %21, %22 in 1 : vector<1x1x128xf32>, vector<1x16x128xf32>, vector<1x1x128xf32> -> vector<1x18x128xf32>
    %c17 = arith.constant 17 : index
    %c0_18 = arith.constant 0 : index
    %c0_19 = arith.constant 0 : index
    %24 = vector.load %arg8[%c17, %c0_18, %c0_19] : memref<18x18x128xf32, #tpu.memory_space<vmem>>, vector<1x18x128xf32>
    tpu.vector_store %arg8[%c17, %c0_18, %c0_19], %23 {strides = array<i32>} : memref<18x18x128xf32, #tpu.memory_space<vmem>>, vector<1x18x128xf32>,
    %cst_20 = arith.constant 0.000000e+00 : f32
    %25 = vector.broadcast %cst_20 : f32 to vector<256x128xf32>
    %c0_21 = arith.constant 0 : index
    %c0_22 = arith.constant 0 : index
    %c0_23 = arith.constant 0 : index
    %26 = vector.load %arg8[%c0_21, %c0_22, %c0_23] : memref<18x18x128xf32, #tpu.memory_space<vmem>>, vector<16x16x128xf32>
    %27 = vector.shape_cast %26 : vector<16x16x128xf32> to vector<256x128xf32>
    %c0_24 = arith.constant 0 : index
    %c0_25 = arith.constant 0 : index
    %c0_26 = arith.constant 0 : index
    %28 = vector.load %arg5[%c0_24, %c0_25, %c0_26] : memref<9x128x128xf32, #tpu.memory_space<vmem>>, vector<1x128x128xf32>
    %29 = vector.shape_cast %28 : vector<1x128x128xf32> to vector<128x128xf32>
    %cst_27 = arith.constant dense<0.000000e+00> : vector<256x128xf32>
    %30 = tpu.matmul %27, %29, %cst_27 {dimension_numbers = #tpu.dot_dimension_numbers<[1], [0], [0], [1], [0, 0, 1, 1], [], []>} : vector<256x128xf32>, vector<128x128xf32>, vector<256x128xf32> -> vector<256x128xf32>
    %31 = arith.addf %25, %30 : vector<256x128xf32>
    %c0_28 = arith.constant 0 : index
    %c1_29 = arith.constant 1 : index
    %c0_30 = arith.constant 0 : index
    %32 = vector.load %arg8[%c0_28, %c1_29, %c0_30] : memref<18x18x128xf32, #tpu.memory_space<vmem>>, vector<16x16x128xf32>
    %33 = vector.shape_cast %32 : vector<16x16x128xf32> to vector<256x128xf32>
    %c1_31 = arith.constant 1 : index
    %c0_32 = arith.constant 0 : index
    %c0_33 = arith.constant 0 : index
    %34 = vector.load %arg5[%c1_31, %c0_32, %c0_33] : memref<9x128x128xf32, #tpu.memory_space<vmem>>, vector<1x128x128xf32>
    %35 = vector.shape_cast %34 : vector<1x128x128xf32> to vector<128x128xf32>
    %cst_34 = arith.constant dense<0.000000e+00> : vector<256x128xf32>
    %36 = tpu.matmul %33, %35, %cst_34 {dimension_numbers = #tpu.dot_dimension_numbers<[1], [0], [0], [1], [0, 0, 1, 1], [], []>} : vector<256x128xf32>, vector<128x128xf32>, vector<256x128xf32> -> vector<256x128xf32>
    %37 = arith.addf %31, %36 : vector<256x128xf32>
    %c0_35 = arith.constant 0 : index
    %c2 = arith.constant 2 : index
    %c0_36 = arith.constant 0 : index
    %38 = vector.load %arg8[%c0_35, %c2, %c0_36] : memref<18x18x128xf32, #tpu.memory_space<vmem>>, vector<16x16x128xf32>
    %39 = vector.shape_cast %38 : vector<16x16x128xf32> to vector<256x128xf32>
    %c2_37 = arith.constant 2 : index
    %c0_38 = arith.constant 0 : index
    %c0_39 = arith.constant 0 : index
    %40 = vector.load %arg5[%c2_37, %c0_38, %c0_39] : memref<9x128x128xf32, #tpu.memory_space<vmem>>, vector<1x128x128xf32>
    %41 = vector.shape_cast %40 : vector<1x128x128xf32> to vector<128x128xf32>
    %cst_40 = arith.constant dense<0.000000e+00> : vector<256x128xf32>
    %42 = tpu.matmul %39, %41, %cst_40 {dimension_numbers = #tpu.dot_dimension_numbers<[1], [0], [0], [1], [0, 0, 1, 1], [], []>} : vector<256x128xf32>, vector<128x128xf32>, vector<256x128xf32> -> vector<256x128xf32>
    %43 = arith.addf %37, %42 : vector<256x128xf32>
    %c1_41 = arith.constant 1 : index
    %c0_42 = arith.constant 0 : index
    %c0_43 = arith.constant 0 : index
    %44 = vector.load %arg8[%c1_41, %c0_42, %c0_43] : memref<18x18x128xf32, #tpu.memory_space<vmem>>, vector<16x16x128xf32>
    %45 = vector.shape_cast %44 : vector<16x16x128xf32> to vector<256x128xf32>
    %c3 = arith.constant 3 : index
    %c0_44 = arith.constant 0 : index
    %c0_45 = arith.constant 0 : index
    %46 = vector.load %arg5[%c3, %c0_44, %c0_45] : memref<9x128x128xf32, #tpu.memory_space<vmem>>, vector<1x128x128xf32>
    %47 = vector.shape_cast %46 : vector<1x128x128xf32> to vector<128x128xf32>
    %cst_46 = arith.constant dense<0.000000e+00> : vector<256x128xf32>
    %48 = tpu.matmul %45, %47, %cst_46 {dimension_numbers = #tpu.dot_dimension_numbers<[1], [0], [0], [1], [0, 0, 1, 1], [], []>} : vector<256x128xf32>, vector<128x128xf32>, vector<256x128xf32> -> vector<256x128xf32>
    %49 = arith.addf %43, %48 : vector<256x128xf32>
    %c1_47 = arith.constant 1 : index
    %c1_48 = arith.constant 1 : index
    %c0_49 = arith.constant 0 : index
    %50 = vector.load %arg8[%c1_47, %c1_48, %c0_49] : memref<18x18x128xf32, #tpu.memory_space<vmem>>, vector<16x16x128xf32>
    %51 = vector.shape_cast %50 : vector<16x16x128xf32> to vector<256x128xf32>
    %c4 = arith.constant 4 : index
    %c0_50 = arith.constant 0 : index
    %c0_51 = arith.constant 0 : index
    %52 = vector.load %arg5[%c4, %c0_50, %c0_51] : memref<9x128x128xf32, #tpu.memory_space<vmem>>, vector<1x128x128xf32>
    %53 = vector.shape_cast %52 : vector<1x128x128xf32> to vector<128x128xf32>
    %cst_52 = arith.constant dense<0.000000e+00> : vector<256x128xf32>
    %54 = tpu.matmul %51, %53, %cst_52 {dimension_numbers = #tpu.dot_dimension_numbers<[1], [0], [0], [1], [0, 0, 1, 1], [], []>} : vector<256x128xf32>, vector<128x128xf32>, vector<256x128xf32> -> vector<256x128xf32>
    %55 = arith.addf %49, %54 : vector<256x128xf32>
    %c1_53 = arith.constant 1 : index
    %c2_54 = arith.constant 2 : index
    %c0_55 = arith.constant 0 : index
    %56 = vector.load %arg8[%c1_53, %c2_54, %c0_55] : memref<18x18x128xf32, #tpu.memory_space<vmem>>, vector<16x16x128xf32>
    %57 = vector.shape_cast %56 : vector<16x16x128xf32> to vector<256x128xf32>
    %c5 = arith.constant 5 : index
    %c0_56 = arith.constant 0 : index
    %c0_57 = arith.constant 0 : index
    %58 = vector.load %arg5[%c5, %c0_56, %c0_57] : memref<9x128x128xf32, #tpu.memory_space<vmem>>, vector<1x128x128xf32>
    %59 = vector.shape_cast %58 : vector<1x128x128xf32> to vector<128x128xf32>
    %cst_58 = arith.constant dense<0.000000e+00> : vector<256x128xf32>
    %60 = tpu.matmul %57, %59, %cst_58 {dimension_numbers = #tpu.dot_dimension_numbers<[1], [0], [0], [1], [0, 0, 1, 1], [], []>} : vector<256x128xf32>, vector<128x128xf32>, vector<256x128xf32> -> vector<256x128xf32>
    %61 = arith.addf %55, %60 : vector<256x128xf32>
    %c2_59 = arith.constant 2 : index
    %c0_60 = arith.constant 0 : index
    %c0_61 = arith.constant 0 : index
    %62 = vector.load %arg8[%c2_59, %c0_60, %c0_61] : memref<18x18x128xf32, #tpu.memory_space<vmem>>, vector<16x16x128xf32>
    %63 = vector.shape_cast %62 : vector<16x16x128xf32> to vector<256x128xf32>
    %c6 = arith.constant 6 : index
    %c0_62 = arith.constant 0 : index
    %c0_63 = arith.constant 0 : index
    %64 = vector.load %arg5[%c6, %c0_62, %c0_63] : memref<9x128x128xf32, #tpu.memory_space<vmem>>, vector<1x128x128xf32>
    %65 = vector.shape_cast %64 : vector<1x128x128xf32> to vector<128x128xf32>
    %cst_64 = arith.constant dense<0.000000e+00> : vector<256x128xf32>
    %66 = tpu.matmul %63, %65, %cst_64 {dimension_numbers = #tpu.dot_dimension_numbers<[1], [0], [0], [1], [0, 0, 1, 1], [], []>} : vector<256x128xf32>, vector<128x128xf32>, vector<256x128xf32> -> vector<256x128xf32>
    %67 = arith.addf %61, %66 : vector<256x128xf32>
    %c2_65 = arith.constant 2 : index
    %c1_66 = arith.constant 1 : index
    %c0_67 = arith.constant 0 : index
    %68 = vector.load %arg8[%c2_65, %c1_66, %c0_67] : memref<18x18x128xf32, #tpu.memory_space<vmem>>, vector<16x16x128xf32>
    %69 = vector.shape_cast %68 : vector<16x16x128xf32> to vector<256x128xf32>
    %c7_68 = arith.constant 7 : index
    %c0_69 = arith.constant 0 : index
    %c0_70 = arith.constant 0 : index
    %70 = vector.load %arg5[%c7_68, %c0_69, %c0_70] : memref<9x128x128xf32, #tpu.memory_space<vmem>>, vector<1x128x128xf32>
    %71 = vector.shape_cast %70 : vector<1x128x128xf32> to vector<128x128xf32>
    %cst_71 = arith.constant dense<0.000000e+00> : vector<256x128xf32>
    %72 = tpu.matmul %69, %71, %cst_71 {dimension_numbers = #tpu.dot_dimension_numbers<[1], [0], [0], [1], [0, 0, 1, 1], [], []>} : vector<256x128xf32>, vector<128x128xf32>, vector<256x128xf32> -> vector<256x128xf32>
    %73 = arith.addf %67, %72 : vector<256x128xf32>
    %c2_72 = arith.constant 2 : index
    %c2_73 = arith.constant 2 : index
    %c0_74 = arith.constant 0 : index
    %74 = vector.load %arg8[%c2_72, %c2_73, %c0_74] : memref<18x18x128xf32, #tpu.memory_space<vmem>>, vector<16x16x128xf32>
    %75 = vector.shape_cast %74 : vector<16x16x128xf32> to vector<256x128xf32>
    %c8 = arith.constant 8 : index
    %c0_75 = arith.constant 0 : index
    %c0_76 = arith.constant 0 : index
    %76 = vector.load %arg5[%c8, %c0_75, %c0_76] : memref<9x128x128xf32, #tpu.memory_space<vmem>>, vector<1x128x128xf32>
    %77 = vector.shape_cast %76 : vector<1x128x128xf32> to vector<128x128xf32>
    %cst_77 = arith.constant dense<0.000000e+00> : vector<256x128xf32>
    %78 = tpu.matmul %75, %77, %cst_77 {dimension_numbers = #tpu.dot_dimension_numbers<[1], [0], [0], [1], [0, 0, 1, 1], [], []>} : vector<256x128xf32>, vector<128x128xf32>, vector<256x128xf32> -> vector<256x128xf32>
    %79 = arith.addf %73, %78 : vector<256x128xf32>
    %80 = vector.shape_cast %79 : vector<256x128xf32> to vector<1x16x16x128xf32>
    %c0_78 = arith.constant 0 : index
    %c0_79 = arith.constant 0 : index
    %c0_80 = arith.constant 0 : index
    %c0_81 = arith.constant 0 : index
    %81 = vector.load %arg6[%c0_78, %c0_79, %c0_80, %c0_81] : memref<1x16x16x128xf32, #tpu.memory_space<vmem>>, vector<1x16x16x128xf32>
    tpu.vector_store %arg6[%c0_78, %c0_79, %c0_80, %c0_81], %80 {strides = array<i32>} : memref<1x16x16x128xf32, #tpu.memory_space<vmem>>, vector<1x16x16x128xf32>,
    %cst_82 = arith.constant dense<0.000000e+00> : vector<128xf32>
    %82 = vector.multi_reduction <add>, %79, %cst_82 [0] : vector<256x128xf32> to vector<128xf32>
    %83 = vector.shape_cast %82 : vector<128xf32> to vector<1x128xf32>
    %84 = arith.mulf %79, %79 : vector<256x128xf32>
    %cst_83 = arith.constant dense<0.000000e+00> : vector<128xf32>
    %85 = vector.multi_reduction <add>, %84, %cst_83 [0] : vector<256x128xf32> to vector<128xf32>
    %86 = vector.shape_cast %85 : vector<128xf32> to vector<1x128xf32>
    %87 = tpu.concatenate %83, %86 in 0 : vector<1x128xf32>, vector<1x128xf32> -> vector<2x128xf32>
    %c0_84 = arith.constant 0 : index
    %c0_85 = arith.constant 0 : index
    %c0_86 = arith.constant 0 : index
    %c0_87 = arith.constant 0 : index
    %88 = vector.load %arg7[%c0_84, %c0_85, %c0_86, %c0_87] : memref<1x1x2x128xf32, #tpu.memory_space<vmem>>, vector<1x1x2x128xf32>
    %89 = vector.shape_cast %88 : vector<1x1x2x128xf32> to vector<2x128xf32>
    %90 = vector.shape_cast %87 : vector<2x128xf32> to vector<1x1x2x128xf32>
    tpu.vector_store %arg7[%c0_84, %c0_85, %c0_86, %c0_87], %90 {strides = array<i32>} : memref<1x1x2x128xf32, #tpu.memory_space<vmem>>, vector<1x1x2x128xf32>,
    return
  }
  func.func @transform_0(%arg0: i32, %arg1: i32) -> (i32, i32, i32, i32) {
    %c2_i32 = arith.constant 2 : i32
    %0 = arith.muli %arg1, %c2_i32 : i32
    %c1_i32 = arith.constant 1 : i32
    %1 = arith.subi %0, %c1_i32 : i32
    %c0_i32 = arith.constant 0 : i32
    %2 = arith.maxsi %1, %c0_i32 : i32
    %c0_i32_0 = arith.constant 0 : i32
    %c0_i32_1 = arith.constant 0 : i32
    %c0_i32_2 = arith.constant 0 : i32
    return %arg0, %2, %c0_i32_0, %c0_i32_1 : i32, i32, i32, i32
  }
  func.func @transform_1(%arg0: i32, %arg1: i32) -> (i32, i32, i32, i32) {
    %c0_i32 = arith.constant 0 : i32
    %c0_i32_0 = arith.constant 0 : i32
    %c0_i32_1 = arith.constant 0 : i32
    return %arg0, %arg1, %c0_i32, %c0_i32_0 : i32, i32, i32, i32
  }
  func.func @transform_2(%arg0: i32, %arg1: i32) -> (i32, i32, i32, i32) {
    %c1_i32 = arith.constant 1 : i32
    %0 = arith.addi %arg1, %c1_i32 : i32
    %c2_i32 = arith.constant 2 : i32
    %1 = arith.muli %0, %c2_i32 : i32
    %c1_i32_0 = arith.constant 1 : i32
    %2 = arith.minsi %1, %c1_i32_0 : i32
    %c0_i32 = arith.constant 0 : i32
    %c0_i32_1 = arith.constant 0 : i32
    %c0_i32_2 = arith.constant 0 : i32
    return %arg0, %2, %c0_i32, %c0_i32_1 : i32, i32, i32, i32
  }
  func.func @transform_3(%arg0: i32, %arg1: i32) -> (i32, i32, i32) {
    %c0_i32 = arith.constant 0 : i32
    %c0_i32_0 = arith.constant 0 : i32
    %c0_i32_1 = arith.constant 0 : i32
    %c0_i32_2 = arith.constant 0 : i32
    return %c0_i32, %c0_i32_0, %c0_i32_1 : i32, i32, i32
  }
  func.func @transform_4(%arg0: i32, %arg1: i32) -> (i32, i32, i32, i32) {
    %c0_i32 = arith.constant 0 : i32
    %c0_i32_0 = arith.constant 0 : i32
    %c0_i32_1 = arith.constant 0 : i32
    return %arg0, %arg1, %c0_i32, %c0_i32_0 : i32, i32, i32, i32
  }
  func.func @transform_5(%arg0: i32, %arg1: i32) -> (i32, i32, i32, i32) {
    %c0_i32 = arith.constant 0 : i32
    %c0_i32_0 = arith.constant 0 : i32
    %c0_i32_1 = arith.constant 0 : i32
    return %arg0, %arg1, %c0_i32, %c0_i32_0 : i32, i32, i32, i32
  }
}

module attributes {stable_mosaic.version = 11 : i64} {
  func.func @kernel(%arg0: i32, %arg1: i32, %arg2: memref<1x16x16x128xf32, #tpu.memory_space<vmem>>, %arg3: memref<1x128xf32, #tpu.memory_space<vmem>>, %arg4: memref<1x128xf32, #tpu.memory_space<vmem>>, %arg5: memref<1x16x16x128xf32, #tpu.memory_space<vmem>>) attributes {dimension_semantics = [#tpu.dimension_semantics<parallel>, #tpu.dimension_semantics<parallel>], iteration_bounds = array<i64: 2, 1>, scalar_prefetch = 0 : i64, scratch_operands = 0 : i64, tpu.core_type = #tpu.core_type<tc>, window_params = [{transform_indices = @transform_0, window_bounds = array<i64: 1, 16, 16, 128>}, {pipeline_mode = #tpu.pipeline_mode<synchronous>, transform_indices = @transform_1, window_bounds = array<i64: 1, 128>}, {pipeline_mode = #tpu.pipeline_mode<synchronous>, transform_indices = @transform_2, window_bounds = array<i64: 1, 128>}, {transform_indices = @transform_3, window_bounds = array<i64: 1, 16, 16, 128>}]} {
    %c0 = arith.constant 0 : index
    %c0_0 = arith.constant 0 : index
    %c0_1 = arith.constant 0 : index
    %c0_2 = arith.constant 0 : index
    %0 = vector.load %arg2[%c0, %c0_0, %c0_1, %c0_2] : memref<1x16x16x128xf32, #tpu.memory_space<vmem>>, vector<1x16x16x128xf32>
    %1 = vector.shape_cast %0 : vector<1x16x16x128xf32> to vector<16x16x128xf32>
    %c0_3 = arith.constant 0 : index
    %c0_4 = arith.constant 0 : index
    %2 = vector.load %arg3[%c0_3, %c0_4] : memref<1x128xf32, #tpu.memory_space<vmem>>, vector<1x128xf32>
    %3 = vector.shape_cast %2 : vector<1x128xf32> to vector<1x1x128xf32>
    %4 = vector.broadcast %3 : vector<1x1x128xf32> to vector<16x16x128xf32>
    %5 = arith.mulf %1, %4 : vector<16x16x128xf32>
    %c0_5 = arith.constant 0 : index
    %c0_6 = arith.constant 0 : index
    %6 = vector.load %arg4[%c0_5, %c0_6] : memref<1x128xf32, #tpu.memory_space<vmem>>, vector<1x128xf32>
    %7 = vector.shape_cast %6 : vector<1x128xf32> to vector<1x1x128xf32>
    %8 = vector.broadcast %7 : vector<1x1x128xf32> to vector<16x16x128xf32>
    %9 = arith.addf %5, %8 : vector<16x16x128xf32>
    %cst = arith.constant 0.000000e+00 : f32
    %10 = vector.broadcast %cst : f32 to vector<16x16x128xf32>
    %11 = arith.maximumf %9, %10 : vector<16x16x128xf32>
    %c0_7 = arith.constant 0 : index
    %c0_8 = arith.constant 0 : index
    %c0_9 = arith.constant 0 : index
    %c0_10 = arith.constant 0 : index
    %12 = vector.load %arg5[%c0_7, %c0_8, %c0_9, %c0_10] : memref<1x16x16x128xf32, #tpu.memory_space<vmem>>, vector<1x16x16x128xf32>
    %13 = vector.shape_cast %12 : vector<1x16x16x128xf32> to vector<16x16x128xf32>
    %14 = vector.shape_cast %11 : vector<16x16x128xf32> to vector<1x16x16x128xf32>
    tpu.vector_store %arg5[%c0_7, %c0_8, %c0_9, %c0_10], %14 {strides = array<i32>} : memref<1x16x16x128xf32, #tpu.memory_space<vmem>>, vector<1x16x16x128xf32>,
    return
  }
  func.func @transform_0(%arg0: i32, %arg1: i32) -> (i32, i32, i32, i32) {
    %c0_i32 = arith.constant 0 : i32
    %c0_i32_0 = arith.constant 0 : i32
    %c0_i32_1 = arith.constant 0 : i32
    return %arg0, %arg1, %c0_i32, %c0_i32_0 : i32, i32, i32, i32
  }
  func.func @transform_1(%arg0: i32, %arg1: i32) -> (i32, i32) {
    %c0_i32 = arith.constant 0 : i32
    %c0_i32_0 = arith.constant 0 : i32
    %c0_i32_1 = arith.constant 0 : i32
    return %c0_i32, %c0_i32_0 : i32, i32
  }
  func.func @transform_2(%arg0: i32, %arg1: i32) -> (i32, i32) {
    %c0_i32 = arith.constant 0 : i32
    %c0_i32_0 = arith.constant 0 : i32
    %c0_i32_1 = arith.constant 0 : i32
    return %c0_i32, %c0_i32_0 : i32, i32
  }
  func.func @transform_3(%arg0: i32, %arg1: i32) -> (i32, i32, i32, i32) {
    %c0_i32 = arith.constant 0 : i32
    %c0_i32_0 = arith.constant 0 : i32
    %c0_i32_1 = arith.constant 0 : i32
    return %arg0, %arg1, %c0_i32, %c0_i32_0 : i32, i32, i32, i32
  }
}

module attributes {stable_mosaic.version = 11 : i64} {
  func.func @kernel(%arg0: i32, %arg1: i32, %arg2: memref<1x8x16x128xf32, #tpu.memory_space<vmem>>, %arg3: memref<1x16x16x128xf32, #tpu.memory_space<vmem>>, %arg4: memref<1x8x16x128xf32, #tpu.memory_space<vmem>>, %arg5: memref<9x128x128xf32, #tpu.memory_space<vmem>>, %arg6: memref<1x128xf32, #tpu.memory_space<vmem>>, %arg7: memref<1x128xf32, #tpu.memory_space<vmem>>, %arg8: memref<1x16x16x128xf32, #tpu.memory_space<vmem>>, %arg9: memref<1x1x2x128xf32, #tpu.memory_space<vmem>>, %arg10: memref<18x18x128xf32, #tpu.memory_space<vmem>>) attributes {dimension_semantics = [#tpu.dimension_semantics<parallel>, #tpu.dimension_semantics<parallel>], iteration_bounds = array<i64: 2, 1>, scalar_prefetch = 0 : i64, scratch_operands = 1 : i64, tpu.core_type = #tpu.core_type<tc>, window_params = [{transform_indices = @transform_0, window_bounds = array<i64: 1, 8, 16, 128>}, {transform_indices = @transform_1, window_bounds = array<i64: 1, 16, 16, 128>}, {transform_indices = @transform_2, window_bounds = array<i64: 1, 8, 16, 128>}, {pipeline_mode = #tpu.pipeline_mode<synchronous>, transform_indices = @transform_3, window_bounds = array<i64: 9, 128, 128>}, {pipeline_mode = #tpu.pipeline_mode<synchronous>, transform_indices = @transform_4, window_bounds = array<i64: 1, 128>}, {pipeline_mode = #tpu.pipeline_mode<synchronous>, transform_indices = @transform_5, window_bounds = array<i64: 1, 128>}, {transform_indices = @transform_6, window_bounds = array<i64: 1, 16, 16, 128>}, {transform_indices = @transform_7, window_bounds = array<i64: 1, 1, 2, 128>}]} {
    %c0_i32 = arith.constant 0 : i32
    %0 = arith.cmpi sgt, %arg1, %c0_i32 : i32
    %1 = arith.extui %0 : i1 to i32
    %2 = arith.sitofp %1 : i32 to f32
    %c0_i32_0 = arith.constant 0 : i32
    %3 = arith.cmpi slt, %arg1, %c0_i32_0 : i32
    %4 = arith.extui %3 : i1 to i32
    %5 = arith.sitofp %4 : i32 to f32
    %c0 = arith.constant 0 : index
    %c7 = arith.constant 7 : index
    %c0_1 = arith.constant 0 : index
    %c0_2 = arith.constant 0 : index
    %6 = vector.load %arg2[%c0, %c7, %c0_1, %c0_2] : memref<1x8x16x128xf32, #tpu.memory_space<vmem>>, vector<1x1x16x128xf32>
    %7 = vector.shape_cast %6 : vector<1x1x16x128xf32> to vector<1x16x128xf32>
    %c0_3 = arith.constant 0 : index
    %c0_4 = arith.constant 0 : index
    %8 = vector.load %arg6[%c0_3, %c0_4] : memref<1x128xf32, #tpu.memory_space<vmem>>, vector<1x128xf32>
    %9 = vector.shape_cast %8 : vector<1x128xf32> to vector<1x1x128xf32>
    %10 = vector.broadcast %9 : vector<1x1x128xf32> to vector<1x16x128xf32>
    %11 = arith.mulf %7, %10 : vector<1x16x128xf32>
    %c0_5 = arith.constant 0 : index
    %c0_6 = arith.constant 0 : index
    %12 = vector.load %arg7[%c0_5, %c0_6] : memref<1x128xf32, #tpu.memory_space<vmem>>, vector<1x128xf32>
    %13 = vector.shape_cast %12 : vector<1x128xf32> to vector<1x1x128xf32>
    %14 = vector.broadcast %13 : vector<1x1x128xf32> to vector<1x16x128xf32>
    %15 = arith.addf %11, %14 : vector<1x16x128xf32>
    %cst = arith.constant 0.000000e+00 : f32
    %16 = vector.broadcast %cst : f32 to vector<1x16x128xf32>
    %17 = arith.maximumf %15, %16 : vector<1x16x128xf32>
    %18 = vector.broadcast %2 : f32 to vector<1x16x128xf32>
    %19 = arith.mulf %17, %18 : vector<1x16x128xf32>
    %cst_7 = arith.constant 0.000000e+00 : f32
    %20 = vector.broadcast %cst_7 : f32 to vector<1x1x128xf32>
    %21 = tpu.concatenate %20, %19, %20 in 1 : vector<1x1x128xf32>, vector<1x16x128xf32>, vector<1x1x128xf32> -> vector<1x18x128xf32>
    %c0_8 = arith.constant 0 : index
    %c0_9 = arith.constant 0 : index
    %c0_10 = arith.constant 0 : index
    %22 = vector.load %arg10[%c0_8, %c0_9, %c0_10] : memref<18x18x128xf32, #tpu.memory_space<vmem>>, vector<1x18x128xf32>
    tpu.vector_store %arg10[%c0_8, %c0_9, %c0_10], %21 {strides = array<i32>} : memref<18x18x128xf32, #tpu.memory_space<vmem>>, vector<1x18x128xf32>,
    %c0_11 = arith.constant 0 : index
    %c0_12 = arith.constant 0 : index
    %c0_13 = arith.constant 0 : index
    %c0_14 = arith.constant 0 : index
    %23 = vector.load %arg3[%c0_11, %c0_12, %c0_13, %c0_14] : memref<1x16x16x128xf32, #tpu.memory_space<vmem>>, vector<1x16x16x128xf32>
    %24 = vector.shape_cast %23 : vector<1x16x16x128xf32> to vector<16x16x128xf32>
    %c0_15 = arith.constant 0 : index
    %c0_16 = arith.constant 0 : index
    %25 = vector.load %arg6[%c0_15, %c0_16] : memref<1x128xf32, #tpu.memory_space<vmem>>, vector<1x128xf32>
    %26 = vector.shape_cast %25 : vector<1x128xf32> to vector<1x1x128xf32>
    %27 = vector.broadcast %26 : vector<1x1x128xf32> to vector<16x16x128xf32>
    %28 = arith.mulf %24, %27 : vector<16x16x128xf32>
    %c0_17 = arith.constant 0 : index
    %c0_18 = arith.constant 0 : index
    %29 = vector.load %arg7[%c0_17, %c0_18] : memref<1x128xf32, #tpu.memory_space<vmem>>, vector<1x128xf32>
    %30 = vector.shape_cast %29 : vector<1x128xf32> to vector<1x1x128xf32>
    %31 = vector.broadcast %30 : vector<1x1x128xf32> to vector<16x16x128xf32>
    %32 = arith.addf %28, %31 : vector<16x16x128xf32>
    %cst_19 = arith.constant 0.000000e+00 : f32
    %33 = vector.broadcast %cst_19 : f32 to vector<16x16x128xf32>
    %34 = arith.maximumf %32, %33 : vector<16x16x128xf32>
    %cst_20 = arith.constant 0.000000e+00 : f32
    %35 = vector.broadcast %cst_20 : f32 to vector<16x1x128xf32>
    %36 = tpu.concatenate %35, %34, %35 in 1 : vector<16x1x128xf32>, vector<16x16x128xf32>, vector<16x1x128xf32> -> vector<16x18x128xf32>
    %c1 = arith.constant 1 : index
    %c0_21 = arith.constant 0 : index
    %c0_22 = arith.constant 0 : index
    %37 = vector.load %arg10[%c1, %c0_21, %c0_22] : memref<18x18x128xf32, #tpu.memory_space<vmem>>, vector<16x18x128xf32>
    tpu.vector_store %arg10[%c1, %c0_21, %c0_22], %36 {strides = array<i32>} : memref<18x18x128xf32, #tpu.memory_space<vmem>>, vector<16x18x128xf32>,
    %c0_23 = arith.constant 0 : index
    %c0_24 = arith.constant 0 : index
    %c0_25 = arith.constant 0 : index
    %c0_26 = arith.constant 0 : index
    %38 = vector.load %arg4[%c0_23, %c0_24, %c0_25, %c0_26] : memref<1x8x16x128xf32, #tpu.memory_space<vmem>>, vector<1x1x16x128xf32>
    %39 = vector.shape_cast %38 : vector<1x1x16x128xf32> to vector<1x16x128xf32>
    %c0_27 = arith.constant 0 : index
    %c0_28 = arith.constant 0 : index
    %40 = vector.load %arg6[%c0_27, %c0_28] : memref<1x128xf32, #tpu.memory_space<vmem>>, vector<1x128xf32>
    %41 = vector.shape_cast %40 : vector<1x128xf32> to vector<1x1x128xf32>
    %42 = vector.broadcast %41 : vector<1x1x128xf32> to vector<1x16x128xf32>
    %43 = arith.mulf %39, %42 : vector<1x16x128xf32>
    %c0_29 = arith.constant 0 : index
    %c0_30 = arith.constant 0 : index
    %44 = vector.load %arg7[%c0_29, %c0_30] : memref<1x128xf32, #tpu.memory_space<vmem>>, vector<1x128xf32>
    %45 = vector.shape_cast %44 : vector<1x128xf32> to vector<1x1x128xf32>
    %46 = vector.broadcast %45 : vector<1x1x128xf32> to vector<1x16x128xf32>
    %47 = arith.addf %43, %46 : vector<1x16x128xf32>
    %cst_31 = arith.constant 0.000000e+00 : f32
    %48 = vector.broadcast %cst_31 : f32 to vector<1x16x128xf32>
    %49 = arith.maximumf %47, %48 : vector<1x16x128xf32>
    %50 = vector.broadcast %5 : f32 to vector<1x16x128xf32>
    %51 = arith.mulf %49, %50 : vector<1x16x128xf32>
    %cst_32 = arith.constant 0.000000e+00 : f32
    %52 = vector.broadcast %cst_32 : f32 to vector<1x1x128xf32>
    %53 = tpu.concatenate %52, %51, %52 in 1 : vector<1x1x128xf32>, vector<1x16x128xf32>, vector<1x1x128xf32> -> vector<1x18x128xf32>
    %c17 = arith.constant 17 : index
    %c0_33 = arith.constant 0 : index
    %c0_34 = arith.constant 0 : index
    %54 = vector.load %arg10[%c17, %c0_33, %c0_34] : memref<18x18x128xf32, #tpu.memory_space<vmem>>, vector<1x18x128xf32>
    tpu.vector_store %arg10[%c17, %c0_33, %c0_34], %53 {strides = array<i32>} : memref<18x18x128xf32, #tpu.memory_space<vmem>>, vector<1x18x128xf32>,
    %cst_35 = arith.constant 0.000000e+00 : f32
    %55 = vector.broadcast %cst_35 : f32 to vector<256x128xf32>
    %c0_36 = arith.constant 0 : index
    %c0_37 = arith.constant 0 : index
    %c0_38 = arith.constant 0 : index
    %56 = vector.load %arg10[%c0_36, %c0_37, %c0_38] : memref<18x18x128xf32, #tpu.memory_space<vmem>>, vector<16x16x128xf32>
    %57 = vector.shape_cast %56 : vector<16x16x128xf32> to vector<256x128xf32>
    %c0_39 = arith.constant 0 : index
    %c0_40 = arith.constant 0 : index
    %c0_41 = arith.constant 0 : index
    %58 = vector.load %arg5[%c0_39, %c0_40, %c0_41] : memref<9x128x128xf32, #tpu.memory_space<vmem>>, vector<1x128x128xf32>
    %59 = vector.shape_cast %58 : vector<1x128x128xf32> to vector<128x128xf32>
    %cst_42 = arith.constant dense<0.000000e+00> : vector<256x128xf32>
    %60 = tpu.matmul %57, %59, %cst_42 {dimension_numbers = #tpu.dot_dimension_numbers<[1], [0], [0], [1], [0, 0, 1, 1], [], []>} : vector<256x128xf32>, vector<128x128xf32>, vector<256x128xf32> -> vector<256x128xf32>
    %61 = arith.addf %55, %60 : vector<256x128xf32>
    %c0_43 = arith.constant 0 : index
    %c1_44 = arith.constant 1 : index
    %c0_45 = arith.constant 0 : index
    %62 = vector.load %arg10[%c0_43, %c1_44, %c0_45] : memref<18x18x128xf32, #tpu.memory_space<vmem>>, vector<16x16x128xf32>
    %63 = vector.shape_cast %62 : vector<16x16x128xf32> to vector<256x128xf32>
    %c1_46 = arith.constant 1 : index
    %c0_47 = arith.constant 0 : index
    %c0_48 = arith.constant 0 : index
    %64 = vector.load %arg5[%c1_46, %c0_47, %c0_48] : memref<9x128x128xf32, #tpu.memory_space<vmem>>, vector<1x128x128xf32>
    %65 = vector.shape_cast %64 : vector<1x128x128xf32> to vector<128x128xf32>
    %cst_49 = arith.constant dense<0.000000e+00> : vector<256x128xf32>
    %66 = tpu.matmul %63, %65, %cst_49 {dimension_numbers = #tpu.dot_dimension_numbers<[1], [0], [0], [1], [0, 0, 1, 1], [], []>} : vector<256x128xf32>, vector<128x128xf32>, vector<256x128xf32> -> vector<256x128xf32>
    %67 = arith.addf %61, %66 : vector<256x128xf32>
    %c0_50 = arith.constant 0 : index
    %c2 = arith.constant 2 : index
    %c0_51 = arith.constant 0 : index
    %68 = vector.load %arg10[%c0_50, %c2, %c0_51] : memref<18x18x128xf32, #tpu.memory_space<vmem>>, vector<16x16x128xf32>
    %69 = vector.shape_cast %68 : vector<16x16x128xf32> to vector<256x128xf32>
    %c2_52 = arith.constant 2 : index
    %c0_53 = arith.constant 0 : index
    %c0_54 = arith.constant 0 : index
    %70 = vector.load %arg5[%c2_52, %c0_53, %c0_54] : memref<9x128x128xf32, #tpu.memory_space<vmem>>, vector<1x128x128xf32>
    %71 = vector.shape_cast %70 : vector<1x128x128xf32> to vector<128x128xf32>
    %cst_55 = arith.constant dense<0.000000e+00> : vector<256x128xf32>
    %72 = tpu.matmul %69, %71, %cst_55 {dimension_numbers = #tpu.dot_dimension_numbers<[1], [0], [0], [1], [0, 0, 1, 1], [], []>} : vector<256x128xf32>, vector<128x128xf32>, vector<256x128xf32> -> vector<256x128xf32>
    %73 = arith.addf %67, %72 : vector<256x128xf32>
    %c1_56 = arith.constant 1 : index
    %c0_57 = arith.constant 0 : index
    %c0_58 = arith.constant 0 : index
    %74 = vector.load %arg10[%c1_56, %c0_57, %c0_58] : memref<18x18x128xf32, #tpu.memory_space<vmem>>, vector<16x16x128xf32>
    %75 = vector.shape_cast %74 : vector<16x16x128xf32> to vector<256x128xf32>
    %c3 = arith.constant 3 : index
    %c0_59 = arith.constant 0 : index
    %c0_60 = arith.constant 0 : index
    %76 = vector.load %arg5[%c3, %c0_59, %c0_60] : memref<9x128x128xf32, #tpu.memory_space<vmem>>, vector<1x128x128xf32>
    %77 = vector.shape_cast %76 : vector<1x128x128xf32> to vector<128x128xf32>
    %cst_61 = arith.constant dense<0.000000e+00> : vector<256x128xf32>
    %78 = tpu.matmul %75, %77, %cst_61 {dimension_numbers = #tpu.dot_dimension_numbers<[1], [0], [0], [1], [0, 0, 1, 1], [], []>} : vector<256x128xf32>, vector<128x128xf32>, vector<256x128xf32> -> vector<256x128xf32>
    %79 = arith.addf %73, %78 : vector<256x128xf32>
    %c1_62 = arith.constant 1 : index
    %c1_63 = arith.constant 1 : index
    %c0_64 = arith.constant 0 : index
    %80 = vector.load %arg10[%c1_62, %c1_63, %c0_64] : memref<18x18x128xf32, #tpu.memory_space<vmem>>, vector<16x16x128xf32>
    %81 = vector.shape_cast %80 : vector<16x16x128xf32> to vector<256x128xf32>
    %c4 = arith.constant 4 : index
    %c0_65 = arith.constant 0 : index
    %c0_66 = arith.constant 0 : index
    %82 = vector.load %arg5[%c4, %c0_65, %c0_66] : memref<9x128x128xf32, #tpu.memory_space<vmem>>, vector<1x128x128xf32>
    %83 = vector.shape_cast %82 : vector<1x128x128xf32> to vector<128x128xf32>
    %cst_67 = arith.constant dense<0.000000e+00> : vector<256x128xf32>
    %84 = tpu.matmul %81, %83, %cst_67 {dimension_numbers = #tpu.dot_dimension_numbers<[1], [0], [0], [1], [0, 0, 1, 1], [], []>} : vector<256x128xf32>, vector<128x128xf32>, vector<256x128xf32> -> vector<256x128xf32>
    %85 = arith.addf %79, %84 : vector<256x128xf32>
    %c1_68 = arith.constant 1 : index
    %c2_69 = arith.constant 2 : index
    %c0_70 = arith.constant 0 : index
    %86 = vector.load %arg10[%c1_68, %c2_69, %c0_70] : memref<18x18x128xf32, #tpu.memory_space<vmem>>, vector<16x16x128xf32>
    %87 = vector.shape_cast %86 : vector<16x16x128xf32> to vector<256x128xf32>
    %c5 = arith.constant 5 : index
    %c0_71 = arith.constant 0 : index
    %c0_72 = arith.constant 0 : index
    %88 = vector.load %arg5[%c5, %c0_71, %c0_72] : memref<9x128x128xf32, #tpu.memory_space<vmem>>, vector<1x128x128xf32>
    %89 = vector.shape_cast %88 : vector<1x128x128xf32> to vector<128x128xf32>
    %cst_73 = arith.constant dense<0.000000e+00> : vector<256x128xf32>
    %90 = tpu.matmul %87, %89, %cst_73 {dimension_numbers = #tpu.dot_dimension_numbers<[1], [0], [0], [1], [0, 0, 1, 1], [], []>} : vector<256x128xf32>, vector<128x128xf32>, vector<256x128xf32> -> vector<256x128xf32>
    %91 = arith.addf %85, %90 : vector<256x128xf32>
    %c2_74 = arith.constant 2 : index
    %c0_75 = arith.constant 0 : index
    %c0_76 = arith.constant 0 : index
    %92 = vector.load %arg10[%c2_74, %c0_75, %c0_76] : memref<18x18x128xf32, #tpu.memory_space<vmem>>, vector<16x16x128xf32>
    %93 = vector.shape_cast %92 : vector<16x16x128xf32> to vector<256x128xf32>
    %c6 = arith.constant 6 : index
    %c0_77 = arith.constant 0 : index
    %c0_78 = arith.constant 0 : index
    %94 = vector.load %arg5[%c6, %c0_77, %c0_78] : memref<9x128x128xf32, #tpu.memory_space<vmem>>, vector<1x128x128xf32>
    %95 = vector.shape_cast %94 : vector<1x128x128xf32> to vector<128x128xf32>
    %cst_79 = arith.constant dense<0.000000e+00> : vector<256x128xf32>
    %96 = tpu.matmul %93, %95, %cst_79 {dimension_numbers = #tpu.dot_dimension_numbers<[1], [0], [0], [1], [0, 0, 1, 1], [], []>} : vector<256x128xf32>, vector<128x128xf32>, vector<256x128xf32> -> vector<256x128xf32>
    %97 = arith.addf %91, %96 : vector<256x128xf32>
    %c2_80 = arith.constant 2 : index
    %c1_81 = arith.constant 1 : index
    %c0_82 = arith.constant 0 : index
    %98 = vector.load %arg10[%c2_80, %c1_81, %c0_82] : memref<18x18x128xf32, #tpu.memory_space<vmem>>, vector<16x16x128xf32>
    %99 = vector.shape_cast %98 : vector<16x16x128xf32> to vector<256x128xf32>
    %c7_83 = arith.constant 7 : index
    %c0_84 = arith.constant 0 : index
    %c0_85 = arith.constant 0 : index
    %100 = vector.load %arg5[%c7_83, %c0_84, %c0_85] : memref<9x128x128xf32, #tpu.memory_space<vmem>>, vector<1x128x128xf32>
    %101 = vector.shape_cast %100 : vector<1x128x128xf32> to vector<128x128xf32>
    %cst_86 = arith.constant dense<0.000000e+00> : vector<256x128xf32>
    %102 = tpu.matmul %99, %101, %cst_86 {dimension_numbers = #tpu.dot_dimension_numbers<[1], [0], [0], [1], [0, 0, 1, 1], [], []>} : vector<256x128xf32>, vector<128x128xf32>, vector<256x128xf32> -> vector<256x128xf32>
    %103 = arith.addf %97, %102 : vector<256x128xf32>
    %c2_87 = arith.constant 2 : index
    %c2_88 = arith.constant 2 : index
    %c0_89 = arith.constant 0 : index
    %104 = vector.load %arg10[%c2_87, %c2_88, %c0_89] : memref<18x18x128xf32, #tpu.memory_space<vmem>>, vector<16x16x128xf32>
    %105 = vector.shape_cast %104 : vector<16x16x128xf32> to vector<256x128xf32>
    %c8 = arith.constant 8 : index
    %c0_90 = arith.constant 0 : index
    %c0_91 = arith.constant 0 : index
    %106 = vector.load %arg5[%c8, %c0_90, %c0_91] : memref<9x128x128xf32, #tpu.memory_space<vmem>>, vector<1x128x128xf32>
    %107 = vector.shape_cast %106 : vector<1x128x128xf32> to vector<128x128xf32>
    %cst_92 = arith.constant dense<0.000000e+00> : vector<256x128xf32>
    %108 = tpu.matmul %105, %107, %cst_92 {dimension_numbers = #tpu.dot_dimension_numbers<[1], [0], [0], [1], [0, 0, 1, 1], [], []>} : vector<256x128xf32>, vector<128x128xf32>, vector<256x128xf32> -> vector<256x128xf32>
    %109 = arith.addf %103, %108 : vector<256x128xf32>
    %110 = vector.shape_cast %109 : vector<256x128xf32> to vector<1x16x16x128xf32>
    %c0_93 = arith.constant 0 : index
    %c0_94 = arith.constant 0 : index
    %c0_95 = arith.constant 0 : index
    %c0_96 = arith.constant 0 : index
    %111 = vector.load %arg8[%c0_93, %c0_94, %c0_95, %c0_96] : memref<1x16x16x128xf32, #tpu.memory_space<vmem>>, vector<1x16x16x128xf32>
    tpu.vector_store %arg8[%c0_93, %c0_94, %c0_95, %c0_96], %110 {strides = array<i32>} : memref<1x16x16x128xf32, #tpu.memory_space<vmem>>, vector<1x16x16x128xf32>,
    %cst_97 = arith.constant dense<0.000000e+00> : vector<128xf32>
    %112 = vector.multi_reduction <add>, %109, %cst_97 [0] : vector<256x128xf32> to vector<128xf32>
    %113 = vector.shape_cast %112 : vector<128xf32> to vector<1x128xf32>
    %114 = arith.mulf %109, %109 : vector<256x128xf32>
    %cst_98 = arith.constant dense<0.000000e+00> : vector<128xf32>
    %115 = vector.multi_reduction <add>, %114, %cst_98 [0] : vector<256x128xf32> to vector<128xf32>
    %116 = vector.shape_cast %115 : vector<128xf32> to vector<1x128xf32>
    %117 = tpu.concatenate %113, %116 in 0 : vector<1x128xf32>, vector<1x128xf32> -> vector<2x128xf32>
    %c0_99 = arith.constant 0 : index
    %c0_100 = arith.constant 0 : index
    %c0_101 = arith.constant 0 : index
    %c0_102 = arith.constant 0 : index
    %118 = vector.load %arg9[%c0_99, %c0_100, %c0_101, %c0_102] : memref<1x1x2x128xf32, #tpu.memory_space<vmem>>, vector<1x1x2x128xf32>
    %119 = vector.shape_cast %118 : vector<1x1x2x128xf32> to vector<2x128xf32>
    %120 = vector.shape_cast %117 : vector<2x128xf32> to vector<1x1x2x128xf32>
    tpu.vector_store %arg9[%c0_99, %c0_100, %c0_101, %c0_102], %120 {strides = array<i32>} : memref<1x1x2x128xf32, #tpu.memory_space<vmem>>, vector<1x1x2x128xf32>,
    return
  }
  func.func @transform_0(%arg0: i32, %arg1: i32) -> (i32, i32, i32, i32) {
    %c2_i32 = arith.constant 2 : i32
    %0 = arith.muli %arg1, %c2_i32 : i32
    %c1_i32 = arith.constant 1 : i32
    %1 = arith.subi %0, %c1_i32 : i32
    %c0_i32 = arith.constant 0 : i32
    %2 = arith.maxsi %1, %c0_i32 : i32
    %c0_i32_0 = arith.constant 0 : i32
    %c0_i32_1 = arith.constant 0 : i32
    %c0_i32_2 = arith.constant 0 : i32
    return %arg0, %2, %c0_i32_0, %c0_i32_1 : i32, i32, i32, i32
  }
  func.func @transform_1(%arg0: i32, %arg1: i32) -> (i32, i32, i32, i32) {
    %c0_i32 = arith.constant 0 : i32
    %c0_i32_0 = arith.constant 0 : i32
    %c0_i32_1 = arith.constant 0 : i32
    return %arg0, %arg1, %c0_i32, %c0_i32_0 : i32, i32, i32, i32
  }
  func.func @transform_2(%arg0: i32, %arg1: i32) -> (i32, i32, i32, i32) {
    %c1_i32 = arith.constant 1 : i32
    %0 = arith.addi %arg1, %c1_i32 : i32
    %c2_i32 = arith.constant 2 : i32
    %1 = arith.muli %0, %c2_i32 : i32
    %c1_i32_0 = arith.constant 1 : i32
    %2 = arith.minsi %1, %c1_i32_0 : i32
    %c0_i32 = arith.constant 0 : i32
    %c0_i32_1 = arith.constant 0 : i32
    %c0_i32_2 = arith.constant 0 : i32
    return %arg0, %2, %c0_i32, %c0_i32_1 : i32, i32, i32, i32
  }
  func.func @transform_3(%arg0: i32, %arg1: i32) -> (i32, i32, i32) {
    %c0_i32 = arith.constant 0 : i32
    %c0_i32_0 = arith.constant 0 : i32
    %c0_i32_1 = arith.constant 0 : i32
    %c0_i32_2 = arith.constant 0 : i32
    return %c0_i32, %c0_i32_0, %c0_i32_1 : i32, i32, i32
  }
  func.func @transform_4(%arg0: i32, %arg1: i32) -> (i32, i32) {
    %c0_i32 = arith.constant 0 : i32
    %c0_i32_0 = arith.constant 0 : i32
    %c0_i32_1 = arith.constant 0 : i32
    return %c0_i32, %c0_i32_0 : i32, i32
  }
  func.func @transform_5(%arg0: i32, %arg1: i32) -> (i32, i32) {
    %c0_i32 = arith.constant 0 : i32
    %c0_i32_0 = arith.constant 0 : i32
    %c0_i32_1 = arith.constant 0 : i32
    return %c0_i32, %c0_i32_0 : i32, i32
  }
  func.func @transform_6(%arg0: i32, %arg1: i32) -> (i32, i32, i32, i32) {
    %c0_i32 = arith.constant 0 : i32
    %c0_i32_0 = arith.constant 0 : i32
    %c0_i32_1 = arith.constant 0 : i32
    return %arg0, %arg1, %c0_i32, %c0_i32_0 : i32, i32, i32, i32
  }
  func.func @transform_7(%arg0: i32, %arg1: i32) -> (i32, i32, i32, i32) {
    %c0_i32 = arith.constant 0 : i32
    %c0_i32_0 = arith.constant 0 : i32
    %c0_i32_1 = arith.constant 0 : i32
    return %arg0, %arg1, %c0_i32, %c0_i32_0 : i32, i32, i32, i32
  }
}

</mosaic_0001>

<bundles_post_ra>
// kernel: conv_block_forward.5
= control target key start
LH: loop header
LB: loop body
LE: loop exit
PB: predicated region body
PF: predicated region fallthrough
CT: control target
= control target key end

     0   :  { %s568_s12 = smov 0   ;;  %s570_s13 = smov 0   ;;  %s743_s0 = inlined_call_operand.vmem [shape: f32[2,16,16,128], index: 0, kind: input, shape index: {}]   ;;  %s744_s1 = inlined_call_operand.vmem [shape: f32[1,128], index: 1, kind: input, shape index: {}]   ;;  %s745_s2 = inlined_call_operand.vmem [shape: f32[1,128], index: 2, kind: input, shape index: {}]   ;;  %s746_s3 = inlined_call_operand.vmem [shape: f32[2,16,16,128], index: 3, kind: output, shape index: {}]  }
   0x1   :  { %s572_s14 = smov 0  }
   0x2 LB: > { %s25_s15 = sadd.s32 1, %s542_s13  ;;  %p489_p0 = scmp.ge.s32.totalorder %s546_s14, 1  ;;  %s546_s14 = sphi %s572_s14, %s13_s14   ;;  %s542_s13 = sphi %s570_s13, %s748_s13   ;;  %s538_s12 = sphi %s568_s12, %s747_s12  }
   0x3   : > { %p27_p1 = scmp.ge.s32.totalorder %s25_s15, 2  ;;  %p159_p2 = scmp.lt.s32.totalorder %s546_s14, 3 }
   0x5   : > { %s750_s15 = smov (%p27_p1, %s25_s15), 0  ;;  %p160_p3 = pnand %p489_p0, %p159_p2 }
   0x6   : > { %p194_p4 = scmp.lt.s32.totalorder (!%p160_p3), %s538_s12, 1 }
   0x7   : > { %163 = sbr.rel (%p160_p3) target bundleno = 45 (0x2d), region = 32 }
   0xc   : > { %s752_s12 = smov (!%p194_p4, %s538_s12), 1  ;;  %v589_v0 = vld [vmem:[%s744_s1] ss:$0 sm:$0xff] }
   0xd   : > { %s498_s16 = sshll.u32 %s752_s12, 8  ;;  %v599_v1 = vld [vmem:[%s745_s2] ss:$0 sm:$0xff] }
   0xe   : > { %s594_s21 = scalar_lea.vmem %s743_s0, %s498_s16  ;;  %s622_s26 = scalar_lea.vmem %s746_s3, %s498_s16 }
   0xf   : > { %v215_v2 = vld [vmem:[%s594_s21] sm:$0xff]  ;;  %v216_v3 = vld [vmem:[%s594_s21 + $0x8] sm:$0xff]  ;;  %v217_v4 = vld [vmem:[%s594_s21 + $0x10] sm:$0xff] }
  0x10   : > { %v254_v5 = vmul.f32 %v589_v0, %v215_v2  ;;  %v255_v6 = vmul.f32 %v589_v0, %v216_v3  ;;  %v256_v7 = vmul.f32 %v589_v0, %v217_v4  ;;  %v218_v8 = vld [vmem:[%s594_s21 + $0x18] sm:$0xff]  ;;  %v219_v9 = vld [vmem:[%s594_s21 + $0x20] sm:$0xff]  ;;  %v220_v10 = vld [vmem:[%s594_s21 + $0x28] sm:$0xff] }
  0x11   : > { %v257_v11 = vmul.f32 %v589_v0, %v218_v8  ;;  %v258_v12 = vmul.f32 %v589_v0, %v219_v9  ;;  %v259_v13 = vmul.f32 %v589_v0, %v220_v10  ;;  %v221_v14 = vld [vmem:[%s594_s21 + $0x30] sm:$0xff]  ;;  %v222_v15 = vld [vmem:[%s594_s21 + $0x38] sm:$0xff]  ;;  %v223_v24 = vld [vmem:[%s594_s21 + $0x40] sm:$0xff] }
  0x12   : > { %v293_v16 = vadd.f32 %v599_v1, %v254_v5  ;;  %v294_v17 = vadd.f32 %v599_v1, %v255_v6  ;;  %v295_v18 = vadd.f32 %v599_v1, %v256_v7  ;;  %v260_v19 = vmul.f32 %v589_v0, %v221_v14  ;;  %v224_v25 = vld [vmem:[%s594_s21 + $0x48] sm:$0xff]  ;;  %v225_v26 = vld [vmem:[%s594_s21 + $0x50] sm:$0xff]  ;;  %v226_v31 = vld [vmem:[%s594_s21 + $0x58] sm:$0xff] }
  0x13   : > { %v296_v20 = vadd.f32 %v599_v1, %v257_v11  ;;  %v297_v21 = vadd.f32 %v599_v1, %v258_v12  ;;  %v298_v22 = vadd.f32 %v599_v1, %v259_v13  ;;  %v261_v23 = vmul.f32 %v589_v0, %v222_v15  ;;  %v227_v32 = vld [vmem:[%s594_s21 + $0x60] sm:$0xff]  ;;  %v228_v33 = vld [vmem:[%s594_s21 + $0x68] sm:$0xff]  ;;  %v229_v38 = vld [vmem:[%s594_s21 + $0x70] sm:$0xff] }
  0x14   : > { %v325_v27 = vmax.f32 %v293_v16, 0.0  ;;  %v326_v28 = vmax.f32 %v294_v17, 0.0  ;;  %v327_v29 = vmax.f32 %v295_v18, 0.0  ;;  %v299_v30 = vadd.f32 %v599_v1, %v260_v19  ;;  %v230_v43 = vld [vmem:[%s594_s21 + $0x78] sm:$0xff]  ;;  %v231_v56 = vld [vmem:[%s594_s21 + $0x80] sm:$0xff]  ;;  %v232_v57 = vld [vmem:[%s594_s21 + $0x88] sm:$0xff] }
  0x15   : > { %v328_v34 = vmax.f32 %v296_v20, 0.0  ;;  %v329_v35 = vmax.f32 %v297_v21, 0.0  ;;  %v330_v36 = vmax.f32 %v298_v22, 0.0  ;;  %v300_v37 = vadd.f32 %v599_v1, %v261_v23  ;;  %v233_v58 = vld [vmem:[%s594_s21 + $0x90] sm:$0xff]  ;;  %v234_v63 = vld [vmem:[%s594_s21 + $0x98] sm:$0xff]  ;;  %v235_v2 = vld [vmem:[%s594_s21 + $0xa0] sm:$0xff] }
  0x16   : > { %357 = vst [vmem:[%s622_s26] sm:$0xff] %v325_v27  ;;  %358 = vst [vmem:[%s622_s26 + $0x8] sm:$0xff] %v326_v28  ;;  %v331_v39 = vmax.f32 %v299_v30, 0.0  ;;  %v262_v40 = vmul.f32 %v589_v0, %v223_v24  ;;  %v263_v41 = vmul.f32 %v589_v0, %v224_v25  ;;  %v264_v42 = vmul.f32 %v589_v0, %v225_v26  ;;  %v236_v3 = vld [vmem:[%s594_s21 + $0xa8] sm:$0xff]  ;;  %v237_v8 = vld [vmem:[%s594_s21 + $0xb0] sm:$0xff] }
  0x17   : > { %359 = vst [vmem:[%s622_s26 + $0x10] sm:$0xff] %v327_v29  ;;  %360 = vst [vmem:[%s622_s26 + $0x18] sm:$0xff] %v328_v34  ;;  %v332_v44 = vmax.f32 %v300_v37, 0.0  ;;  %v265_v45 = vmul.f32 %v589_v0, %v226_v31  ;;  %v266_v46 = vmul.f32 %v589_v0, %v227_v32  ;;  %v267_v47 = vmul.f32 %v589_v0, %v228_v33  ;;  %v238_v13 = vld [vmem:[%s594_s21 + $0xb8] sm:$0xff]  ;;  %v239_v26 = vld [vmem:[%s594_s21 + $0xc0] sm:$0xff] }
  0x18   : > { %361 = vst [vmem:[%s622_s26 + $0x20] sm:$0xff] %v329_v35  ;;  %362 = vst [vmem:[%s622_s26 + $0x28] sm:$0xff] %v330_v36  ;;  %v301_v48 = vadd.f32 %v599_v1, %v262_v40  ;;  %v302_v49 = vadd.f32 %v599_v1, %v263_v41  ;;  %v303_v50 = vadd.f32 %v599_v1, %v264_v42  ;;  %v240_v27 = vld [vmem:[%s594_s21 + $0xc8] sm:$0xff]  ;;  %v241_v28 = vld [vmem:[%s594_s21 + $0xd0] sm:$0xff] }
  0x19   : > { %363 = vst [vmem:[%s622_s26 + $0x30] sm:$0xff] %v331_v39  ;;  %v268_v51 = vmul.f32 %v589_v0, %v229_v38  ;;  %364 = vst [vmem:[%s622_s26 + $0x38] sm:$0xff] %v332_v44  ;;  %v304_v52 = vadd.f32 %v599_v1, %v265_v45  ;;  %v305_v53 = vadd.f32 %v599_v1, %v266_v46  ;;  %v242_v33 = vld [vmem:[%s594_s21 + $0xd8] sm:$0xff]  ;;  %v243_v34 = vld [vmem:[%s594_s21 + $0xe0] sm:$0xff] }
  0x1a   : > { %v306_v54 = vadd.f32 %v599_v1, %v267_v47  ;;  %v269_v55 = vmul.f32 %v589_v0, %v230_v43  ;;  %v333_v59 = vmax.f32 %v301_v48, 0.0  ;;  %v334_v60 = vmax.f32 %v302_v49, 0.0  ;;  %v244_v35 = vld [vmem:[%s594_s21 + $0xe8] sm:$0xff]  ;;  %v245_v40 = vld [vmem:[%s594_s21 + $0xf0] sm:$0xff]  ;;  %v246_v45 = vld [vmem:[%s594_s21 + $0xf8] sm:$0xff] }
  0x1b   : > { %v335_v61 = vmax.f32 %v303_v50, 0.0  ;;  %v307_v62 = vadd.f32 %v599_v1, %v268_v51  ;;  %v336_v4 = vmax.f32 %v304_v52, 0.0  ;;  %v337_v5 = vmax.f32 %v305_v53, 0.0 }
  0x1c   : > { %v338_v6 = vmax.f32 %v306_v54, 0.0  ;;  %v308_v7 = vadd.f32 %v599_v1, %v269_v55  ;;  %365 = vst [vmem:[%s622_s26 + $0x40] sm:$0xff] %v333_v59  ;;  %366 = vst [vmem:[%s622_s26 + $0x48] sm:$0xff] %v334_v60  ;;  %v270_v10 = vmul.f32 %v589_v0, %v231_v56  ;;  %v271_v11 = vmul.f32 %v589_v0, %v232_v57 }
  0x1d   : > { %367 = vst [vmem:[%s622_s26 + $0x50] sm:$0xff] %v335_v61  ;;  %v339_v9 = vmax.f32 %v307_v62, 0.0  ;;  %v272_v12 = vmul.f32 %v589_v0, %v233_v58  ;;  %368 = vst [vmem:[%s622_s26 + $0x58] sm:$0xff] %v336_v4  ;;  %v273_v15 = vmul.f32 %v589_v0, %v234_v63  ;;  %v274_v16 = vmul.f32 %v589_v0, %v235_v2 }
  0x1e   : > { %369 = vst [vmem:[%s622_s26 + $0x60] sm:$0xff] %v337_v5  ;;  %370 = vst [vmem:[%s622_s26 + $0x68] sm:$0xff] %v338_v6  ;;  %v340_v14 = vmax.f32 %v308_v7, 0.0  ;;  %v275_v17 = vmul.f32 %v589_v0, %v236_v3  ;;  %v309_v18 = vadd.f32 %v599_v1, %v270_v10  ;;  %v310_v19 = vadd.f32 %v599_v1, %v271_v11 }
  0x1f   : > { %371 = vst [vmem:[%s622_s26 + $0x70] sm:$0xff] %v339_v9  ;;  %v311_v20 = vadd.f32 %v599_v1, %v272_v12  ;;  %v276_v21 = vmul.f32 %v589_v0, %v237_v8  ;;  %v312_v22 = vadd.f32 %v599_v1, %v273_v15  ;;  %v313_v23 = vadd.f32 %v599_v1, %v274_v16 }
  0x20   : > { %372 = vst [vmem:[%s622_s26 + $0x78] sm:$0xff] %v340_v14  ;;  %v314_v24 = vadd.f32 %v599_v1, %v275_v17  ;;  %v277_v25 = vmul.f32 %v589_v0, %v238_v13  ;;  %v341_v29 = vmax.f32 %v309_v18, 0.0  ;;  %v342_v30 = vmax.f32 %v310_v19, 0.0 }
  0x21   : > { %v343_v31 = vmax.f32 %v311_v20, 0.0  ;;  %v315_v32 = vadd.f32 %v599_v1, %v276_v21  ;;  %v344_v36 = vmax.f32 %v312_v22, 0.0  ;;  %v345_v37 = vmax.f32 %v313_v23, 0.0 }
  0x22   : > { %v346_v38 = vmax.f32 %v314_v24, 0.0  ;;  %v316_v39 = vadd.f32 %v599_v1, %v277_v25  ;;  %373 = vst [vmem:[%s622_s26 + $0x80] sm:$0xff] %v341_v29  ;;  %374 = vst [vmem:[%s622_s26 + $0x88] sm:$0xff] %v342_v30  ;;  %v278_v42 = vmul.f32 %v589_v0, %v239_v26  ;;  %v279_v43 = vmul.f32 %v589_v0, %v240_v27 }
  0x23   : > { %375 = vst [vmem:[%s622_s26 + $0x90] sm:$0xff] %v343_v31  ;;  %v347_v41 = vmax.f32 %v315_v32, 0.0  ;;  %v280_v44 = vmul.f32 %v589_v0, %v241_v28  ;;  %376 = vst [vmem:[%s622_s26 + $0x98] sm:$0xff] %v344_v36  ;;  %v281_v47 = vmul.f32 %v589_v0, %v242_v33  ;;  %v282_v48 = vmul.f32 %v589_v0, %v243_v34 }
  0x24   : > { %377 = vst [vmem:[%s622_s26 + $0xa0] sm:$0xff] %v345_v37  ;;  %378 = vst [vmem:[%s622_s26 + $0xa8] sm:$0xff] %v346_v38  ;;  %v348_v46 = vmax.f32 %v316_v39, 0.0  ;;  %v283_v49 = vmul.f32 %v589_v0, %v244_v35  ;;  %v317_v50 = vadd.f32 %v599_v1, %v278_v42  ;;  %v318_v51 = vadd.f32 %v599_v1, %v279_v43 }
  0x25   : > { %379 = vst [vmem:[%s622_s26 + $0xb0] sm:$0xff] %v347_v41  ;;  %v319_v52 = vadd.f32 %v599_v1, %v280_v44  ;;  %v284_v53 = vmul.f32 %v589_v0, %v245_v40  ;;  %v320_v54 = vadd.f32 %v599_v1, %v281_v47  ;;  %v321_v55 = vadd.f32 %v599_v1, %v282_v48 }
  0x26   : > { %380 = vst [vmem:[%s622_s26 + $0xb8] sm:$0xff] %v348_v46  ;;  %v322_v56 = vadd.f32 %v599_v1, %v283_v49  ;;  %v285_v57 = vmul.f32 %v589_v0, %v246_v45  ;;  %v349_v58 = vmax.f32 %v317_v50, 0.0  ;;  %v350_v59 = vmax.f32 %v318_v51, 0.0 }
  0x27   : > { %v351_v60 = vmax.f32 %v319_v52, 0.0  ;;  %v323_v61 = vadd.f32 %v599_v1, %v284_v53  ;;  %v352_v62 = vmax.f32 %v320_v54, 0.0  ;;  %v353_v63 = vmax.f32 %v321_v55, 0.0 }
  0x28   : > { %v354_v2 = vmax.f32 %v322_v56, 0.0  ;;  %v324_v3 = vadd.f32 %v599_v1, %v285_v57  ;;  %381 = vst [vmem:[%s622_s26 + $0xc0] sm:$0xff] %v349_v58  ;;  %382 = vst [vmem:[%s622_s26 + $0xc8] sm:$0xff] %v350_v59 }
  0x29   : > { %383 = vst [vmem:[%s622_s26 + $0xd0] sm:$0xff] %v351_v60  ;;  %v355_v4 = vmax.f32 %v323_v61, 0.0  ;;  %384 = vst [vmem:[%s622_s26 + $0xd8] sm:$0xff] %v352_v62 }
  0x2a   : > { %385 = vst [vmem:[%s622_s26 + $0xe0] sm:$0xff] %v353_v63  ;;  %386 = vst [vmem:[%s622_s26 + $0xe8] sm:$0xff] %v354_v2  ;;  %v356_v0 = vmax.f32 %v324_v3, 0.0 }
  0x2b   : > { %387 = vst [vmem:[%s622_s26 + $0xf0] sm:$0xff] %v355_v4 }
  0x2c   : > { %388 = vst [vmem:[%s622_s26 + $0xf8] sm:$0xff] %v356_v0 }
  0x2d PF: > { %s13_s14 = sadd.s32 1, %s546_s14   ;;  %s747_s12 = smov %s542_s13 }
  0x2e   : > { %p10_p5 = scmp.ge.s32.totalorder %s13_s14, 4   ;;  %s748_s13 = smov %s750_s15 }
  0x30   :  { %12 = sbr.rel (!%p10_p5) target bundleno = 2 (0x2), region = 62 }

// kernel: conv_block_forward.3
= control target key start
LH: loop header
LB: loop body
LE: loop exit
PB: predicated region body
PF: predicated region fallthrough
CT: control target
= control target key end

     0   :  { %s5189_s18 = smov 0   ;;  %s5191_s19 = smov 0   ;;  %s6793_s0 = inlined_call_operand.vmem [shape: f32[2,16,16,128], index: 0, kind: input, shape index: {}, may-alias: {0,1,2}]   ;;  %s6794_s1 = inlined_call_operand.vmem [shape: f32[2,16,16,128], index: 1, kind: input, shape index: {}, may-alias: {0,1,2}]   ;;  %s6795_s2 = inlined_call_operand.vmem [shape: f32[2,16,16,128], index: 2, kind: input, shape index: {}, may-alias: {0,1,2}]   ;;  %s6796_s3 = inlined_call_operand.vmem [shape: f32[9,128,128], index: 3, kind: input, shape index: {}]   ;;  %s6797_s4 = inlined_call_operand.vmem [shape: f32[2,16,16,128], index: 4, kind: output, shape index: {0}]   ;;  %s6798_s5 = inlined_call_operand.vmem [shape: f32[2,1,2,128], index: 5, kind: output, shape index: {1}]  }
   0x1   :  { %s5193_s20 = smov 0  }
   0x2 LB: > { %s28_s21 = sadd.s32 1, %s5153_s19  ;;  %p3721_p0 = scmp.ge.s32.totalorder %s5157_s20, 1  ;;  %s5157_s20 = sphi %s5193_s20, %s16_s20   ;;  %s5153_s19 = sphi %s5191_s19, %s6911_s19   ;;  %s5149_s18 = sphi %s5189_s18, %s6910_s18  }
   0x3   : > { %p30_p1 = scmp.ge.s32.totalorder %s28_s21, 2  ;;  %p282_p2 = scmp.lt.s32.totalorder %s5157_s20, 3 }
   0x5   : > { %s6913_s21 = smov (%p30_p1, %s28_s21), 0  ;;  %p283_p3 = pnand %p3721_p0, %p282_p2 }
   0x7   : > { %286 = sbr.rel (%p283_p3) target bundleno = 565 (0x235), region = 36 }
   0xc   : > { %v3748_v0 = vld [vmem:[%s6796_s3 + $0xf8] sm:$0xff]  ;;  %v3747_v1 = vld [vmem:[%s6796_s3 + $0xf0] sm:$0xff]  ;;  %p360_p4 = scmp.lt.s32.totalorder %s5149_s18, 1  ;;  %v3746_v2 = vld [vmem:[%s6796_s3 + $0xe8] sm:$0xff]  ;;  %vm436_vm0 = vcmask 1040384  }
   0xd   : > { %5021 = vmatprep.subr.mxu1 %v3748_v0  ;;  %4301 = vmatprep.subr.mxu0 %v3748_v0  ;;  %v3745_v3 = vld [vmem:[%s6796_s3 + $0xe0] sm:$0xff]  ;;  %v3744_v4 = vld [vmem:[%s6796_s3 + $0xd8] sm:$0xff]  ;;  %v3743_v13 = vld [vmem:[%s6796_s3 + $0xd0] sm:$0xff] }
   0xe   : > { %5037 = vmatpush3.msra.mxu1 %v3748_v0  ;;  %4302 = vmatpush3.msra.mxu0 %v3748_v0  ;;  %s6915_s18 = smov (!%p360_p4, %s5149_s18), 1  ;;  %v3742_v23 = vld [vmem:[%s6796_s3 + $0xc8] sm:$0xff]  ;;  %v3741_v34 = vld [vmem:[%s6796_s3 + $0xc0] sm:$0xff]  ;;  %v3740_v46 = vld [vmem:[%s6796_s3 + $0xb8] sm:$0xff] }
   0xf   : > { %5022 = vmatprep.subr.mxu1 %v3747_v1  ;;  %4303 = vmatprep.subr.mxu0 %v3747_v1  ;;  %s5222_s30 = sshll.u32 %s6915_s18, 8  ;;  %v3739_v57 = vld [vmem:[%s6796_s3 + $0xb0] sm:$0xff]  ;;  %vm5631_vm1 = vmneg %vm436_vm0 }
  0x10   : > { %5038 = vmatpush3.msra.mxu1 %v3747_v1  ;;  %4304 = vmatpush3.msra.mxu0 %v3747_v1  ;;  %s5231_s10 = scalar_lea.vmem %s6794_s1, %s5222_s30  ;;  %s368_s13 = scalar_lea.vmem %s6793_s0, %s5222_s30 }
  0x11   : > { %5023 = vmatprep.subr.mxu1 %v3746_v2  ;;  %4305 = vmatprep.subr.mxu0 %v3746_v2  ;;  %v462_v5 = vld [vmem:[%s5231_s10 + $0x70] sm:$0xff]  ;;  %v463_v6 = vld [vmem:[%s5231_s10 + $0x78] sm:$0xff]  ;;  %v464_v12 = vld [vmem:[%s5231_s10 + $0x80] sm:$0xff]  ;;  %s3866_s24 = sadd.s32 128, %s5222_s30  ;;  %s6661_s26 = scalar_lea.vmem %s6797_s4, %s5222_s30 }
  0x12   : > { %5039 = vmatpush3.msra.mxu1 %v3746_v2  ;;  %4306 = vmatpush3.msra.mxu0 %v3746_v2  ;;  %v3731_v7 = vld [vmem:[%s368_s13 + $0x70] sm:$0xff]  ;;  %v5239_v8 = vrot.slane %v462_v5, 7  ;;  %v534_v9 = vrot.slane %v463_v6, 7  ;;  %v3732_v10 = vld [vmem:[%s368_s13 + $0x78] sm:$0xff]  ;;  %v465_v15 = vld [vmem:[%s5231_s10 + $0x88] sm:$0xff]  ;;  %v5246_v16 = vrot.slane %v464_v12, 7  ;;  %s398_s29 = scalar_lea.vmem %s6795_s2, %s3866_s24 }
  0x13   : > { %5024 = vmatprep.subr.mxu1 %v3745_v3  ;;  %4307 = vmatprep.subr.mxu0 %v3745_v3  ;;  %v432_v11 = vmul.f32 0.0, %v3731_v7  ;;  %v433_v14 = vmul.f32 0.0, %v3732_v10  ;;  %v448_v17 = vld [vmem:[%s5231_s10] sm:$0xff]  ;;  %v449_v22 = vld [vmem:[%s5231_s10 + $0x8] sm:$0xff]  ;;  %v537_v25 = vrot.slane %v465_v15, 7  ;;  %v466_v28 = vld [vmem:[%s5231_s10 + $0x90] sm:$0xff] }
  0x14   : > { %5040 = vmatpush3.msra.mxu1 %v3745_v3  ;;  %4308 = vmatpush3.msra.mxu0 %v3745_v3  ;;  %v5251_v18 = vsel %vm436_vm0, %v5239_v8, %v534_v9  ;;  %v615_v19 = vsel %vm436_vm0, 0.0, %v5239_v8  ;;  %v631_v21 = vsel %vm436_vm0, %v534_v9, 0.0  ;;  %v616_v26 = vsel %vm436_vm0, 0.0, %v5246_v16  ;;  %v467_v31 = vld [vmem:[%s5231_s10 + $0x98] sm:$0xff]  ;;  %v450_v33 = vld [vmem:[%s5231_s10 + $0x10] sm:$0xff]  ;;  %v468_v44 = vld [vmem:[%s5231_s10 + $0xa0] sm:$0xff] }
  0x15   : > { %5025 = vmatprep.subr.mxu1 %v3744_v4  ;;  %4309 = vmatprep.subr.mxu0 %v3744_v4  ;;  %v5255_v20 = vrot.slane %v432_v11, 7  ;;  %662 = vst [vmem:[#allocation2 + $0xc0] sm:$0xff] %v615_v19  ;;  %663 = vst [vmem:[#allocation2 + $0xc8] sm:$0xff] %v5251_v18  ;;  %v438_v24 = vrot.slane %v433_v14, 7  ;;  %v5265_v27 = vrot.slane %v448_v17, 7  ;;  %v513_v30 = vrot.slane %v449_v22, 7 }
  0x16   : > { %5041 = vmatpush3.msra.mxu1 %v3744_v4  ;;  %4310 = vmatpush3.msra.mxu0 %v3744_v4  ;;  %664 = vst [vmem:[#allocation2 + $0xd0] sm:$0x3] %v631_v21  ;;  %665 = vst [vmem:[#allocation2 + $0xd8] sm:$0xff] %v616_v26  ;;  %v5271_v32 = vrot.slane %v466_v28, 7  ;;  %v5284_v37 = vsel %vm436_vm0, %v5246_v16, %v537_v25  ;;  %v451_v39 = vld [vmem:[%s5231_s10 + $0x18] sm:$0xff]  ;;  %v632_v41 = vsel %vm436_vm0, %v537_v25, 0.0 }
  0x17   : > { %5026 = vmatprep.subr.mxu1 %v3743_v13  ;;  %4311 = vmatprep.subr.mxu0 %v3743_v13  ;;  %v443_v29 = vsel %vm436_vm0, 0.0, %v5255_v20  ;;  %v5279_v35 = vsel %vm436_vm0, %v5255_v20, %v438_v24  ;;  %v444_v36 = vsel %vm436_vm0, %v438_v24, 0.0  ;;  %v608_v38 = vsel %vm436_vm0, 0.0, %v5265_v27  ;;  %666 = vst [vmem:[#allocation2 + $0xe0] sm:$0xff] %v5284_v37  ;;  %v469_v45 = vld [vmem:[%s5231_s10 + $0xa8] sm:$0xff]  ;;  %v452_v51 = vld [vmem:[%s5231_s10 + $0x20] sm:$0xff] }
  0x18   : > { %5042 = vmatpush3.msra.mxu1 %v3743_v13  ;;  %4312 = vmatpush3.msra.mxu0 %v3743_v13  ;;  %445 = vst [vmem:[#allocation2] sm:$0xff] %v443_v29  ;;  %446 = vst [vmem:[#allocation2 + $0x8] sm:$0xff] %v5279_v35  ;;  %v5293_v40 = vsel %vm436_vm0, %v5265_v27, %v513_v30  ;;  %v624_v42 = vsel %vm436_vm0, %v513_v30, 0.0  ;;  %v540_v43 = vrot.slane %v467_v31, 7  ;;  %v617_v47 = vsel %vm436_vm0, 0.0, %v5271_v32  ;;  %v453_v55 = vld [vmem:[%s5231_s10 + $0x28] sm:$0xff] }
  0x19   : > { %5027 = vmatprep.subr.mxu1 %v3742_v23  ;;  %4313 = vmatprep.subr.mxu0 %v3742_v23  ;;  %447 = vst [vmem:[#allocation2 + $0x10] sm:$0x3] %v444_v36  ;;  %641 = vst [vmem:[#allocation2 + $0x18] sm:$0xff] %v608_v38  ;;  %v5305_v48 = vrot.slane %v450_v33, 7  ;;  %v516_v49 = vrot.slane %v451_v39, 7  ;;  %v5307_v50 = vrot.slane %v468_v44, 7 }
  0x1a   : > { %5043 = vmatpush3.msra.mxu1 %v3742_v23  ;;  %4314 = vmatpush3.msra.mxu0 %v3742_v23  ;;  %642 = vst [vmem:[#allocation2 + $0x20] sm:$0xff] %v5293_v40  ;;  %667 = vst [vmem:[#allocation2 + $0xe8] sm:$0x3] %v632_v41  ;;  %v5312_v52 = vsel %vm436_vm0, %v5271_v32, %v540_v43  ;;  %v633_v53 = vsel %vm436_vm0, %v540_v43, 0.0  ;;  %v543_v54 = vrot.slane %v469_v45, 7  ;;  %v5316_v56 = vrot.slane %v452_v51, 7 }
  0x1b   : > { %643 = vst [vmem:[#allocation2 + $0x28] sm:$0x3] %v624_v42  ;;  %5028 = vmatprep.subr.mxu1 %v3741_v34  ;;  %4315 = vmatprep.subr.mxu0 %v3741_v34  ;;  %668 = vst [vmem:[#allocation2 + $0xf0] sm:$0xff] %v617_v47  ;;  %v5324_v58 = vsel %vm436_vm0, %v5305_v48, %v516_v49  ;;  %v609_v59 = vsel %vm436_vm0, 0.0, %v5305_v48  ;;  %v625_v60 = vsel %vm436_vm0, %v516_v49, 0.0  ;;  %v618_v61 = vsel %vm436_vm0, 0.0, %v5307_v50 }
  0x1c   : > { %5044 = vmatpush3.msra.mxu1 %v3741_v34  ;;  %4316 = vmatpush3.msra.mxu0 %v3741_v34  ;;  %669 = vst [vmem:[#allocation2 + $0xf8] sm:$0xff] %v5312_v52  ;;  %670 = vst [vmem:[#allocation2 + $0x100] sm:$0x3] %v633_v53  ;;  %v470_v62 = vld [vmem:[%s5231_s10 + $0xb0] sm:$0xff]  ;;  %v471_v63 = vld [vmem:[%s5231_s10 + $0xb8] sm:$0xff]  ;;  %v5336_v0 = vsel %vm436_vm0, %v5307_v50, %v543_v54  ;;  %v519_v1 = vrot.slane %v453_v55, 7 }
  0x1d   : > { %5029 = vmatprep.subr.mxu1 %v3740_v46  ;;  %4317 = vmatprep.subr.mxu0 %v3740_v46  ;;  %644 = vst [vmem:[#allocation2 + $0x30] sm:$0xff] %v609_v59  ;;  %645 = vst [vmem:[#allocation2 + $0x38] sm:$0xff] %v5324_v58  ;;  %v610_v2 = vsel %vm436_vm0, 0.0, %v5316_v56  ;;  %v634_v3 = vsel %vm436_vm0, %v543_v54, 0.0  ;;  %v3738_v4 = vld [vmem:[%s6796_s3 + $0xa8] sm:$0xff]  ;;  %v5345_v5 = vrot.slane %v470_v62, 7 }
  0x1e   : > { %646 = vst [vmem:[#allocation2 + $0x40] sm:$0x3] %v625_v60  ;;  %671 = vst [vmem:[#allocation2 + $0x108] sm:$0xff] %v618_v61  ;;  %5045 = vmatpush3.msra.mxu1 %v3740_v46  ;;  %4318 = vmatpush3.msra.mxu0 %v3740_v46  ;;  %v546_v6 = vrot.slane %v471_v63, 7  ;;  %v454_v7 = vld [vmem:[%s5231_s10 + $0x30] sm:$0xff]  ;;  %v455_v9 = vld [vmem:[%s5231_s10 + $0x38] sm:$0xff]  ;;  %v5351_v10 = vsel %vm436_vm0, %v5316_v56, %v519_v1 }
  0x1f   : > { %672 = vst [vmem:[#allocation2 + $0x110] sm:$0xff] %v5336_v0  ;;  %647 = vst [vmem:[#allocation2 + $0x48] sm:$0xff] %v610_v2  ;;  %5030 = vmatprep.subr.mxu1 %v3739_v57  ;;  %4319 = vmatprep.subr.mxu0 %v3739_v57  ;;  %v626_v11 = vsel %vm436_vm0, %v519_v1, 0.0  ;;  %v5354_v12 = vrot.slane %v454_v7, 7  ;;  %v522_v13 = vrot.slane %v455_v9, 7  ;;  %v472_v14 = vld [vmem:[%s5231_s10 + $0xc0] sm:$0xff] }
  0x20   : > { %673 = vst [vmem:[#allocation2 + $0x118] sm:$0x3] %v634_v3  ;;  %5046 = vmatpush3.msra.mxu1 %v3739_v57  ;;  %4320 = vmatpush3.msra.mxu0 %v3739_v57  ;;  %v3737_v15 = vld [vmem:[%s6796_s3 + $0xa0] sm:$0xff]  ;;  %648 = vst [vmem:[#allocation2 + $0x50] sm:$0xff] %v5351_v10  ;;  %v5363_v17 = vsel %vm436_vm0, %v5345_v5, %v546_v6  ;;  %v619_v19 = vsel %vm436_vm0, 0.0, %v5345_v5  ;;  %v635_v21 = vsel %vm436_vm0, %v546_v6, 0.0 }
  0x21   : > { %649 = vst [vmem:[#allocation2 + $0x58] sm:$0x3] %v626_v11  ;;  %v5368_v22 = vrot.slane %v472_v14, 7  ;;  %5031 = vmatprep.subr.mxu1 %v3738_v4  ;;  %4321 = vmatprep.subr.mxu0 %v3738_v4  ;;  %674 = vst [vmem:[#allocation2 + $0x120] sm:$0xff] %v619_v19  ;;  %v5373_v23 = vsel %vm436_vm0, %v5354_v12, %v522_v13  ;;  %v611_v24 = vsel %vm436_vm0, 0.0, %v5354_v12  ;;  %v627_v25 = vsel %vm436_vm0, %v522_v13, 0.0 }
  0x22   : > { %675 = vst [vmem:[#allocation2 + $0x128] sm:$0xff] %v5363_v17  ;;  %676 = vst [vmem:[#allocation2 + $0x130] sm:$0x3] %v635_v21  ;;  %5047 = vmatpush3.msra.mxu1 %v3738_v4  ;;  %4322 = vmatpush3.msra.mxu0 %v3738_v4  ;;  %v3736_v26 = vld [vmem:[%s6796_s3 + $0x98] sm:$0xff]  ;;  %v473_v28 = vld [vmem:[%s5231_s10 + $0xc8] sm:$0xff]  ;;  %s3730_s30 = sshll.u32 %s6915_s18, 1 }
  0x23   : > { %650 = vst [vmem:[#allocation2 + $0x60] sm:$0xff] %v611_v24  ;;  %651 = vst [vmem:[#allocation2 + $0x68] sm:$0xff] %v5373_v23  ;;  %v620_v29 = vsel %vm436_vm0, 0.0, %v5368_v22  ;;  %v456_v30 = vld [vmem:[%s5231_s10 + $0x40] sm:$0xff]  ;;  %5032 = vmatprep.subr.mxu1 %v3737_v15  ;;  %4323 = vmatprep.subr.mxu0 %v3737_v15  ;;  %v549_v31 = vrot.slane %v473_v28, 7  ;;  %v457_v33 = vld [vmem:[%s5231_s10 + $0x48] sm:$0xff] }
  0x24   : > { %652 = vst [vmem:[#allocation2 + $0x70] sm:$0x3] %v627_v25  ;;  %677 = vst [vmem:[#allocation2 + $0x138] sm:$0xff] %v620_v29  ;;  %v5387_v34 = vrot.slane %v456_v30, 7  ;;  %5048 = vmatpush3.msra.mxu1 %v3737_v15  ;;  %4324 = vmatpush3.msra.mxu0 %v3737_v15  ;;  %v3735_v36 = vld [vmem:[%s6796_s3 + $0x90] sm:$0xff]  ;;  %v525_v38 = vrot.slane %v457_v33, 7 }
  0x25   : > { %5033 = vmatprep.subr.mxu1 %v3736_v26  ;;  %4325 = vmatprep.subr.mxu0 %v3736_v26  ;;  %v5394_v39 = vsel %vm436_vm0, %v5368_v22, %v549_v31  ;;  %v636_v42 = vsel %vm436_vm0, %v549_v31, 0.0  ;;  %v3734_v43 = vld [vmem:[%s6796_s3 + $0x88] sm:$0xff]  ;;  %v474_v46 = vld [vmem:[%s5231_s10 + $0xd0] sm:$0xff]  ;;  %v475_v47 = vld [vmem:[%s5231_s10 + $0xd8] sm:$0xff] }
  0x26   : > { %v612_v41 = vsel %vm436_vm0, 0.0, %v5387_v34  ;;  %5049 = vmatpush3.msra.mxu1 %v3736_v26  ;;  %4326 = vmatpush3.msra.mxu0 %v3736_v26  ;;  %678 = vst [vmem:[#allocation2 + $0x140] sm:$0xff] %v5394_v39  ;;  %v5405_v44 = vsel %vm436_vm0, %v5387_v34, %v525_v38  ;;  %679 = vst [vmem:[#allocation2 + $0x148] sm:$0x3] %v636_v42  ;;  %v628_v45 = vsel %vm436_vm0, %v525_v38, 0.0  ;;  %v5411_v49 = vrot.slane %v474_v46, 7 }
  0x27   : > { %653 = vst [vmem:[#allocation2 + $0x78] sm:$0xff] %v612_v41  ;;  %5034 = vmatprep.subr.mxu1 %v3735_v36  ;;  %4327 = vmatprep.subr.mxu0 %v3735_v36  ;;  %654 = vst [vmem:[#allocation2 + $0x80] sm:$0xff] %v5405_v44  ;;  %v552_v51 = vrot.slane %v475_v47, 7  ;;  %v3733_v53 = vld [vmem:[%s6796_s3 + $0x80] sm:$0xff]  ;;  %v458_v54 = vld [vmem:[%s5231_s10 + $0x50] sm:$0xff] }
  0x28   : > { %655 = vst [vmem:[#allocation2 + $0x88] sm:$0x3] %v628_v45  ;;  %5050 = vmatpush3.msra.mxu1 %v3735_v36  ;;  %4328 = vmatpush3.msra.mxu0 %v3735_v36  ;;  %v772_v55 = vld [vmem:[#allocation2 + $0xc1] sm:$0xff]  ;;  %v621_v59 = vsel %vm436_vm0, 0.0, %v5411_v49  ;;  %v459_v60 = vld [vmem:[%s5231_s10 + $0x58] sm:$0xff]  ;;  %v5424_v61 = vrot.slane %v458_v54, 7 }
  0x29   : > { %5035 = vmatprep.subr.mxu1 %v3734_v43  ;;  %4329 = vmatprep.subr.mxu0 %v3734_v43  ;;  %v5419_v57 = vsel %vm436_vm0, %v5411_v49, %v552_v51  ;;  %v637_v62 = vsel %vm436_vm0, %v552_v51, 0.0  ;;  %v756_v63 = vld [vmem:[#allocation2 + $0x1] sm:$0xff]  ;;  %v755_v1 = vld [vmem:[%s6796_s3 + $0x78] sm:$0xff]  ;;  %680 = vst [vmem:[#allocation2 + $0x150] sm:$0xff] %v621_v59  ;;  %v528_v2 = vrot.slane %v459_v60, 7  ;;  %v773_v3 = vld [vmem:[#allocation2 + $0xc9] sm:$0xff] }
  0x2a   : > { %5051 = vmatpush3.msra.mxu1 %v3734_v43  ;;  %4330 = vmatpush3.msra.mxu0 %v3734_v43  ;;  %681 = vst [vmem:[#allocation2 + $0x158] sm:$0xff] %v5419_v57  ;;  %682 = vst [vmem:[#allocation2 + $0x160] sm:$0x3] %v637_v62  ;;  %v613_v4 = vsel %vm436_vm0, 0.0, %v5424_v61  ;;  %v476_v6 = vld [vmem:[%s5231_s10 + $0xe0] sm:$0xff]  ;;  %v477_v7 = vld [vmem:[%s5231_s10 + $0xe8] sm:$0xff] }
  0x2b   : > { %5036 = vmatprep.subr.mxu1 %v3733_v53  ;;  %4331 = vmatprep.subr.mxu0 %v3733_v53  ;;  %v757_v9 = vld [vmem:[#allocation2 + $0x9] sm:$0xff]  ;;  %v5437_v11 = vsel %vm436_vm0, %v5424_v61, %v528_v2  ;;  %656 = vst [vmem:[#allocation2 + $0x90] sm:$0xff] %v613_v4  ;;  %v629_v13 = vsel %vm436_vm0, %v528_v2, 0.0  ;;  %v5440_v14 = vrot.slane %v476_v6, 7  ;;  %v555_v15 = vrot.slane %v477_v7, 7  ;;  %v460_v19 = vld [vmem:[%s5231_s10 + $0x60] sm:$0xff] }
  0x2c   : > { %5052 = vmatpush3.msra.mxu1 %v3733_v53  ;;  %4357 = vmatprep.mubr.f32.mxu1 %v772_v55  ;;  %v461_v21 = vld [vmem:[%s5231_s10 + $0x68] sm:$0xff]  ;;  %v3764_v24 = vld [vmem:[%s6796_s3 + $0x178] sm:$0xff]  ;;  %v754_v25 = vld [vmem:[%s6796_s3 + $0x70] sm:$0xff]  ;;  %657 = vst [vmem:[#allocation2 + $0x98] sm:$0xff] %v5437_v11  ;;  %v5451_v26 = vrot.slane %v460_v19, 7 }
  0x2d   : > { %4332 = vmatpush3.msra.mxu0 %v3733_v53  ;;  %4333 = vmatprep.mubr.f32.mxu0 %v756_v63  ;;  %658 = vst [vmem:[#allocation2 + $0xa0] sm:$0x3] %v629_v13  ;;  %v531_v28 = vrot.slane %v461_v21, 7  ;;  %v774_v29 = vld [vmem:[#allocation2 + $0xd9] sm:$0xff]  ;;  %v5455_v30 = vsel %vm436_vm0, %v5440_v14, %v555_v15  ;;  %v622_v31 = vsel %vm436_vm0, 0.0, %v5440_v14  ;;  %v638_v33 = vsel %vm436_vm0, %v555_v15, 0.0 }
  0x2e   : > { %4358 = vmatmul.mubr.f32.vlgmr.msra.gmra.mxu1 %v773_v3  ;;  %4381 = vmatprep.subr.mxu1 %v755_v1  ;;  %v3763_v36 = vld [vmem:[%s6796_s3 + $0x170] sm:$0xff]  ;;  %683 = vst [vmem:[#allocation2 + $0x168] sm:$0xff] %v622_v31  ;;  %684 = vst [vmem:[#allocation2 + $0x170] sm:$0xff] %v5455_v30  ;;  %v614_v41 = vsel %vm436_vm0, 0.0, %v5451_v26  ;;  %v5471_v43 = vld [vmem:[#allocation2 + $0x19] sm:$0xff] }
  0x2f   : > { %4334 = vmatmul.mubr.f32.vlgmr.msra.gmra.mxu0 %v757_v9  ;;  %4382 = vmatpush3.msra.mxu1 %v755_v1  ;;  %v5466_v38 = vsel %vm436_vm0, %v5451_v26, %v531_v28  ;;  %685 = vst [vmem:[#allocation2 + $0x178] sm:$0x3] %v638_v33  ;;  %v630_v42 = vsel %vm436_vm0, %v531_v28, 0.0  ;;  %v775_v45 = vld [vmem:[#allocation2 + $0xe1] sm:$0xff]  ;;  %659 = vst [vmem:[#allocation2 + $0xa8] sm:$0xff] %v614_v41  ;;  %v776_v54 = vld [vmem:[#allocation2 + $0xf1] sm:$0xff] }
  0x30   : > { %4461 = vmatprep.subr.mxu0 %v3764_v24  ;;  %4383 = vmatprep.subr.mxu1 %v754_v25  ;;  %660 = vst [vmem:[#allocation2 + $0xb0] sm:$0xff] %v5466_v38  ;;  %661 = vst [vmem:[#allocation2 + $0xb8] sm:$0x3] %v630_v42  ;;  %v753_v46 = vld [vmem:[%s6796_s3 + $0x68] sm:$0xff]  ;;  %v752_v53 = vld [vmem:[%s6796_s3 + $0x60] sm:$0xff] }
  0x31   : > { %4462 = vmatpush3.msra.mxu0 %v3764_v24  ;;  %4360 = vmatprep.mubr.f32.mxu1 %v774_v29  ;;  %v5477_v47 = vld [vmem:[#allocation2 + $0x21] sm:$0xff]  ;;  %v5490_v59 = vld [vmem:[#allocation2 + $0x31] sm:$0xff]  ;;  %v777_v60 = vld [vmem:[#allocation2 + $0xf9] sm:$0xff] }
  0x32   : > { %4384 = vmatpush3.msra.mxu1 %v754_v25  ;;  %4463 = vmatprep.subr.mxu0 %v3763_v36  ;;  %v3762_v51 = vld [vmem:[%s6796_s3 + $0x168] sm:$0xff]  ;;  %v3761_v55 = vld [vmem:[%s6796_s3 + $0x160] sm:$0xff]  ;;  %v751_v62 = vld [vmem:[%s6796_s3 + $0x58] sm:$0xff] }
  0x33   : > { %4336 = vmatprep.mubr.f32.mxu0 %v5471_v43  ;;  %4361 = vmatmul.mubr.f32.gmra.mxu1 %v775_v45  ;;  %v5495_v63 = vld [vmem:[#allocation2 + $0x39] sm:$0xff]  ;;  %v750_v2 = vld [vmem:[%s6796_s3 + $0x50] sm:$0xff]  ;;  %v749_v9 = vld [vmem:[%s6796_s3 + $0x48] sm:$0xff] }
  0x34   : > { %4385 = vmatprep.subr.mxu1 %v753_v46  ;;  %4464 = vmatpush3.msra.mxu0 %v3763_v36  ;;  %v3760_v1 = vld [vmem:[%s6796_s3 + $0x158] sm:$0xff]  ;;  %v778_v3 = vld [vmem:[#allocation2 + $0x109] sm:$0xff]  ;;  %v748_v19 = vld [vmem:[%s6796_s3 + $0x40] sm:$0xff] }
  0x35   : > { %4337 = vmatmul.mubr.f32.gmra.mxu0 %v5477_v47  ;;  %4386 = vmatpush3.msra.mxu1 %v753_v46  ;;  %v3759_v4 = vld [vmem:[%s6796_s3 + $0x150] sm:$0xff]  ;;  %v3758_v15 = vld [vmem:[%s6796_s3 + $0x148] sm:$0xff]  ;;  %v3757_v24 = vld [vmem:[%s6796_s3 + $0x140] sm:$0xff] }
  0x36   : > { %4465 = vmatprep.subr.mxu0 %v3762_v51  ;;  %4387 = vmatprep.subr.mxu1 %v752_v53  ;;  %v5508_v6 = vld [vmem:[#allocation2 + $0x49] sm:$0xff]  ;;  %v779_v7 = vld [vmem:[#allocation2 + $0x111] sm:$0xff]  ;;  %v780_v21 = vld [vmem:[#allocation2 + $0x121] sm:$0xff] }
  0x37   : > { %4466 = vmatpush3.msra.mxu0 %v3762_v51  ;;  %4363 = vmatprep.mubr.f32.mxu1 %v776_v54  ;;  %v5513_v13 = vld [vmem:[#allocation2 + $0x51] sm:$0xff]  ;;  %v5526_v25 = vld [vmem:[#allocation2 + $0x61] sm:$0xff]  ;;  %v781_v28 = vld [vmem:[#allocation2 + $0x129] sm:$0xff] }
  0x38   : > { %4388 = vmatpush3.msra.mxu1 %v752_v53  ;;  %4467 = vmatprep.subr.mxu0 %v3761_v55  ;;  %v747_v29 = vld [vmem:[%s6796_s3 + $0x38] sm:$0xff]  ;;  %v5531_v31 = vld [vmem:[#allocation2 + $0x69] sm:$0xff]  ;;  %v5548_v46 = vld [vmem:[#allocation2 + $0x141] sm:$0xff] }
  0x39   : > { %4339 = vmatprep.mubr.f32.mxu0 %v5490_v59  ;;  %4364 = vmatmul.mubr.f32.gmra.mxu1 %v777_v60  ;;  %v3756_v33 = vld [vmem:[%s6796_s3 + $0x138] sm:$0xff]  ;;  %v746_v36 = vld [vmem:[%s6796_s3 + $0x30] sm:$0xff]  ;;  %v745_v51 = vld [vmem:[%s6796_s3 + $0x28] sm:$0xff] }
  0x3a   : > { %4389 = vmatprep.subr.mxu1 %v751_v62  ;;  %4468 = vmatpush3.msra.mxu0 %v3761_v55  ;;  %v5540_v41 = vld [vmem:[#allocation2 + $0x139] sm:$0xff]  ;;  %v3755_v42 = vld [vmem:[%s6796_s3 + $0x130] sm:$0xff]  ;;  %v5554_v53 = vld [vmem:[#allocation2 + $0x81] sm:$0xff] }
  0x3b   : > { %4340 = vmatmul.mubr.f32.gmra.mxu0 %v5495_v63  ;;  %4390 = vmatpush3.msra.mxu1 %v751_v62  ;;  %v5546_v45 = vld [vmem:[#allocation2 + $0x79] sm:$0xff]  ;;  %v3754_v54 = vld [vmem:[%s6796_s3 + $0x128] sm:$0xff]  ;;  %v5564_v60 = vld [vmem:[#allocation2 + $0x151] sm:$0xff] }
  0x3c   : > { %4469 = vmatprep.subr.mxu0 %v3760_v1  ;;  %4391 = vmatprep.subr.mxu1 %v750_v2  ;;  %v744_v55 = vld [vmem:[%s6796_s3 + $0x20] sm:$0xff] }
  0x3d   : > { %4470 = vmatpush3.msra.mxu0 %v3760_v1  ;;  %4366 = vmatprep.mubr.f32.mxu1 %v778_v3  ;;  %v3753_v62 = vld [vmem:[%s6796_s3 + $0x120] sm:$0xff]  ;;  %v5570_v1 = vld [vmem:[#allocation2 + $0x91] sm:$0xff] }
  0x3e   : > { %4392 = vmatpush3.msra.mxu1 %v750_v2  ;;  %4471 = vmatprep.subr.mxu0 %v3759_v4  ;;  %v5572_v2 = vld [vmem:[#allocation2 + $0x159] sm:$0xff] }
  0x3f   : > { %4342 = vmatprep.mubr.f32.mxu0 %v5508_v6  ;;  %4367 = vmatmul.mubr.f32.gmra.mxu1 %v779_v7  ;;  %v743_v3 = vld [vmem:[%s6796_s3 + $0x18] sm:$0xff] }
  0x40   : > { %4393 = vmatprep.subr.mxu1 %v749_v9  ;;  %4472 = vmatpush3.msra.mxu0 %v3759_v4  ;;  %v5578_v4 = vld [vmem:[#allocation2 + $0x99] sm:$0xff] }
  0x41   : > { %4343 = vmatmul.mubr.f32.gmra.mxu0 %v5513_v13  ;;  %4394 = vmatpush3.msra.mxu1 %v749_v9  ;;  %v3752_v7 = vld [vmem:[%s6796_s3 + $0x118] sm:$0xff]  ;;  %v742_v9 = vld [vmem:[%s6796_s3 + $0x10] sm:$0xff] }
  0x42   : > { %4473 = vmatprep.subr.mxu0 %v3758_v15  ;;  %4395 = vmatprep.subr.mxu1 %v748_v19 }
  0x43   : > { %4474 = vmatpush3.msra.mxu0 %v3758_v15  ;;  %4369 = vmatprep.mubr.f32.mxu1 %v780_v21  ;;  %v5588_v15 = vld [vmem:[#allocation2 + $0x169] sm:$0xff] }
  0x44   : > { %4396 = vmatpush3.msra.mxu1 %v748_v19  ;;  %4475 = vmatprep.subr.mxu0 %v3757_v24  ;;  %v3751_v19 = vld [vmem:[%s6796_s3 + $0x110] sm:$0xff] }
  0x45   : > { %4345 = vmatprep.mubr.f32.mxu0 %v5526_v25  ;;  %4370 = vmatmul.mubr.f32.gmra.mxu1 %v781_v28  ;;  %v5594_v21 = vld [vmem:[#allocation2 + $0xa9] sm:$0xff] }
  0x46   : > { %4397 = vmatprep.subr.mxu1 %v747_v29  ;;  %4476 = vmatpush3.msra.mxu0 %v3757_v24  ;;  %v5596_v24 = vld [vmem:[#allocation2 + $0x171] sm:$0xff]  ;;  %v741_v28 = vld [vmem:[%s6796_s3 + $0x8] sm:$0xff] }
  0x47   : > { %4346 = vmatmul.mubr.f32.gmra.mxu0 %v5531_v31  ;;  %4398 = vmatpush3.msra.mxu1 %v747_v29  ;;  %v5602_v29 = vld [vmem:[#allocation2 + $0xb1] sm:$0xff] }
  0x48   : > { %4477 = vmatprep.subr.mxu0 %v3756_v33  ;;  %4399 = vmatprep.subr.mxu1 %v746_v36 }
  0x49   : > { %4478 = vmatpush3.msra.mxu0 %v3756_v33  ;;  %4372 = vmatprep.mubr.f32.mxu1 %v5540_v41  ;;  %v3750_v33 = vld [vmem:[%s6796_s3 + $0x108] sm:$0xff] }
  0x4a   : > { %4400 = vmatpush3.msra.mxu1 %v746_v36  ;;  %4479 = vmatprep.subr.mxu0 %v3755_v42  ;;  %v740_v36 = vld [vmem:[%s6796_s3] sm:$0xff] }
  0x4b   : > { %4348 = vmatprep.mubr.f32.mxu0 %v5546_v45  ;;  %4373 = vmatmul.mubr.f32.gmra.mxu1 %v5548_v46 }
  0x4c   : > { %4401 = vmatprep.subr.mxu1 %v745_v51  ;;  %4480 = vmatpush3.msra.mxu0 %v3755_v42  ;;  %v478_v42 = vld [vmem:[%s5231_s10 + $0xf0] sm:$0xff] }
  0x4d   : > { %4349 = vmatmul.mubr.f32.gmra.mxu0 %v5554_v53  ;;  %4402 = vmatpush3.msra.mxu1 %v745_v51  ;;  %v479_v51 = vld [vmem:[%s5231_s10 + $0xf8] sm:$0xff] }
  0x4e   : > { %4481 = vmatprep.subr.mxu0 %v3754_v54  ;;  %4403 = vmatprep.subr.mxu1 %v744_v55 }
  0x4f   : > { %4482 = vmatpush3.msra.mxu0 %v3754_v54  ;;  %4375 = vmatprep.mubr.f32.mxu1 %v5564_v60  ;;  %v3749_v54 = vld [vmem:[%s6796_s3 + $0x100] sm:$0xff] }
  0x50   : > { %4404 = vmatpush3.msra.mxu1 %v744_v55  ;;  %4483 = vmatprep.subr.mxu0 %v3753_v62  ;;  %v5618_v55 = vrot.slane %v478_v42, 7  ;;  %v2789_v42 = vld [vmem:[#allocation2 + $0x51] sm:$0xff] }
  0x51   : > { %4351 = vmatprep.mubr.f32.mxu0 %v5570_v1  ;;  %4376 = vmatmul.mubr.f32.gmra.mxu1 %v5572_v2 }
  0x52   : > { %4405 = vmatprep.subr.mxu1 %v743_v3  ;;  %4484 = vmatpush3.msra.mxu0 %v3753_v62  ;;  %v558_v62 = vrot.slane %v479_v51, 7  ;;  %v5643_v51 = vld [vmem:[#allocation2 + $0x1a] sm:$0xff] }
  0x53   : > { %4352 = vmatmul.mubr.f32.gmra.mxu0 %v5578_v4  ;;  %4406 = vmatpush3.msra.mxu1 %v743_v3  ;;  %v1255_v3 = vld [vmem:[#allocation2 + $0x2] sm:$0xff] }
  0x54   : > { %4485 = vmatprep.subr.mxu0 %v3752_v7  ;;  %4407 = vmatprep.subr.mxu1 %v742_v9 }
  0x55   : > { %4486 = vmatpush3.msra.mxu0 %v3752_v7  ;;  %4378 = vmatprep.mubr.f32.mxu1 %v5588_v15  ;;  %v3780_v7 = vld [vmem:[%s6796_s3 + $0x1f8] sm:$0xff] }
  0x56   : > { %4408 = vmatpush3.msra.mxu1 %v742_v9  ;;  %4487 = vmatprep.subr.mxu0 %v3751_v19  ;;  %v623_v9 = vsel %vm436_vm0, 0.0, %v5618_v55 }
  0x57   : > { %4354 = vmatprep.mubr.f32.mxu0 %v5594_v21  ;;  %4379 = vmatmul.mubr.f32.gmra.mxu1 %v5596_v24  ;;  %686 = vst [vmem:[#allocation2 + $0x180] sm:$0xff] %v623_v9  ;;  %v3793_v9 = vld [vmem:[%s6796_s3 + $0x260] sm:$0xff] }
  0x58   : > { %4409 = vmatprep.subr.mxu1 %v741_v28  ;;  %4488 = vmatpush3.msra.mxu0 %v3751_v19  ;;  %v5627_v19 = vsel %vm436_vm0, %v5618_v55, %v558_v62 }
  0x59   : > { %4355 = vmatmul.mubr.f32.gmra.mxu0 %v5602_v29  ;;  %4410 = vmatpush3.msra.mxu1 %v741_v28  ;;  %v639_v28 = vsel %vm436_vm0, %v558_v62, 0.0  ;;  %687 = vst [vmem:[#allocation2 + $0x188] sm:$0xff] %v5627_v19  ;;  %v5659_v62 = vld [vmem:[#allocation2 + $0x32] sm:$0xff] }
  0x5a   : > { %4489 = vmatprep.subr.mxu0 %v3750_v33  ;;  %4411 = vmatprep.subr.mxu1 %v740_v36  ;;  %688 = vst [vmem:[#allocation2 + $0x190] sm:$0x3] %v639_v28  ;;  %v5691_v28 = vld [vmem:[#allocation2 + $0x62] sm:$0xff] }
  0x5b   : > { %4490 = vmatpush3.msra.mxu0 %v3750_v33  ;;  %4412 = vmatpush3.msra.mxu1 %v740_v36  ;;  %v1256_v33 = vld [vmem:[#allocation2 + $0xa] sm:$0xff]  ;;  %v3796_v36 = vld [vmem:[%s6796_s3 + $0x278] sm:$0xff] }
  0x5c   : > { %5090 = vmatprep.mubr.msk.f32.mxu1 %vm5631_vm1, %v5255_v20  ;;  %4491 = vmatprep.subr.mxu0 %v3749_v54  ;;  %v3779_v20 = vld [vmem:[%s6796_s3 + $0x1f0] sm:$0xff] }
  0x5d   : > { %4414 = vmatmul.mubr.f32.vlgmr.msra.gmra.mxu1 %v5279_v35  ;;  %4492 = vmatpush3.msra.mxu0 %v3749_v54  ;;  %v5651_v35 = vld [vmem:[#allocation2 + $0x22] sm:$0xff]  ;;  %v3795_v54 = vld [vmem:[%s6796_s3 + $0x270] sm:$0xff] }
  0x5e   : > { %4493 = vmatprep.mubr.f32.mxu0 %v1255_v3  ;;  %4541 = vmatprep.subr.mxu1 %v3780_v7  ;;  %v3794_v3 = vld [vmem:[%s6796_s3 + $0x268] sm:$0xff] }
  0x5f   : > { %4494 = vmatmul.mubr.f32.vlgmr.msra.gmra.mxu0 %v1256_v33  ;;  %4542 = vmatpush3.msra.mxu1 %v3780_v7  ;;  %v5675_v7 = vld [vmem:[#allocation2 + $0x4a] sm:$0xff]  ;;  %v3776_v33 = vld [vmem:[%s6796_s3 + $0x1d8] sm:$0xff] }
  0x60   : > { %4621 = vmatprep.subr.mxu0 %v3796_v36  ;;  %5092 = vmatprep.mubr.msk.f32.mxu1 %vm5631_vm1, %v5265_v27  ;;  %v3778_v27 = vld [vmem:[%s6796_s3 + $0x1e8] sm:$0xff] }
  0x61   : > { %4622 = vmatpush3.msra.mxu0 %v3796_v36  ;;  %4417 = vmatmul.mubr.f32.gmra.mxu1 %v5293_v40  ;;  %v5667_v40 = vld [vmem:[#allocation2 + $0x3a] sm:$0xff]  ;;  %v5699_v36 = vld [vmem:[#allocation2 + $0x6a] sm:$0xff] }
  0x62   : > { %4496 = vmatprep.mubr.f32.mxu0 %v5643_v51  ;;  %4543 = vmatprep.subr.mxu1 %v3779_v20 }
  0x63   : > { %4497 = vmatmul.mubr.f32.gmra.mxu0 %v5651_v35  ;;  %4544 = vmatpush3.msra.mxu1 %v3779_v20  ;;  %v3792_v20 = vld [vmem:[%s6796_s3 + $0x258] sm:$0xff] }
  0x64   : > { %4623 = vmatprep.subr.mxu0 %v3795_v54  ;;  %5094 = vmatprep.mubr.msk.f32.mxu1 %vm5631_vm1, %v5305_v48  ;;  %v3777_v48 = vld [vmem:[%s6796_s3 + $0x1e0] sm:$0xff] }
  0x65   : > { %4624 = vmatpush3.msra.mxu0 %v3795_v54  ;;  %4420 = vmatmul.mubr.f32.gmra.mxu1 %v5324_v58  ;;  %v5683_v58 = vld [vmem:[#allocation2 + $0x52] sm:$0xff]  ;;  %v5707_v54 = vld [vmem:[#allocation2 + $0x7a] sm:$0xff] }
  0x66   : > { %4499 = vmatprep.mubr.f32.mxu0 %v5659_v62  ;;  %4545 = vmatprep.subr.mxu1 %v3778_v27  ;;  %6811 = vst [vmem:[#allocation3_spill] sm:$0xff] %v5707_v54 }
  0x67   : > { %4500 = vmatmul.mubr.f32.gmra.mxu0 %v5667_v40  ;;  %4546 = vmatpush3.msra.mxu1 %v3778_v27  ;;  %v3775_v27 = vld [vmem:[%s6796_s3 + $0x1d0] sm:$0xff] }
  0x68   : > { %4625 = vmatprep.subr.mxu0 %v3794_v3  ;;  %5096 = vmatprep.mubr.msk.f32.mxu1 %vm5631_vm1, %v5316_v56 }
  0x69   : > { %4626 = vmatpush3.msra.mxu0 %v3794_v3  ;;  %4423 = vmatmul.mubr.f32.gmra.mxu1 %v5351_v10  ;;  %v5715_v3 = vld [vmem:[#allocation2 + $0x82] sm:$0xff] }
  0x6a   : > { %4502 = vmatprep.mubr.f32.mxu0 %v5675_v7  ;;  %4547 = vmatprep.subr.mxu1 %v3777_v48  ;;  %6812 = vst [vmem:[#allocation4_spill] sm:$0xff] %v5715_v3 }
  0x6b   : > { %4503 = vmatmul.mubr.f32.gmra.mxu0 %v5683_v58  ;;  %4548 = vmatpush3.msra.mxu1 %v3777_v48  ;;  %v3791_v48 = vld [vmem:[%s6796_s3 + $0x250] sm:$0xff] }
  0x6c   : > { %4627 = vmatprep.subr.mxu0 %v3793_v9  ;;  %5098 = vmatprep.mubr.msk.f32.mxu1 %vm5631_vm1, %v5354_v12 }
  0x6d   : > { %4628 = vmatpush3.msra.mxu0 %v3793_v9  ;;  %4426 = vmatmul.mubr.f32.gmra.mxu1 %v5373_v23  ;;  %v5723_v9 = vld [vmem:[#allocation2 + $0x92] sm:$0xff] }
  0x6e   : > { %4505 = vmatprep.mubr.f32.mxu0 %v5691_v28  ;;  %4549 = vmatprep.subr.mxu1 %v3776_v33  ;;  %6813 = vst [vmem:[#allocation5_spill] sm:$0xff] %v5723_v9 }
  0x6f   : > { %4506 = vmatmul.mubr.f32.gmra.mxu0 %v5699_v36  ;;  %4550 = vmatpush3.msra.mxu1 %v3776_v33  ;;  %v3774_v33 = vld [vmem:[%s6796_s3 + $0x1c8] sm:$0xff] }
  0x70   : > { %4629 = vmatprep.subr.mxu0 %v3792_v20  ;;  %5100 = vmatprep.mubr.msk.f32.mxu1 %vm5631_vm1, %v5387_v34 }
  0x71   : > { %4630 = vmatpush3.msra.mxu0 %v3792_v20  ;;  %4429 = vmatmul.mubr.f32.gmra.mxu1 %v5405_v44  ;;  %v5731_v20 = vld [vmem:[#allocation2 + $0x9a] sm:$0xff] }
  0x72   : > { %4508 = vmatprep.mubr.f32.mxu0 %v5707_v54  ;;  %4551 = vmatprep.subr.mxu1 %v3775_v27  ;;  %6814 = vst [vmem:[#allocation6_spill] sm:$0xff] %v5731_v20  ;;  %v3773_v54 = vld [vmem:[%s6796_s3 + $0x1c0] sm:$0xff] }
  0x73   : > { %4509 = vmatmul.mubr.f32.gmra.mxu0 %v5715_v3  ;;  %4552 = vmatpush3.msra.mxu1 %v3775_v27  ;;  %v3790_v27 = vld [vmem:[%s6796_s3 + $0x248] sm:$0xff] }
  0x74   : > { %4631 = vmatprep.subr.mxu0 %v3791_v48  ;;  %5102 = vmatprep.mubr.msk.f32.mxu1 %vm5631_vm1, %v5424_v61  ;;  %v5739_v3 = vld [vmem:[#allocation2 + $0xaa] sm:$0xff] }
  0x75   : > { %4632 = vmatpush3.msra.mxu0 %v3791_v48  ;;  %4432 = vmatmul.mubr.f32.gmra.mxu1 %v5437_v11  ;;  %v5747_v48 = vld [vmem:[#allocation2 + $0xb2] sm:$0xff] }
  0x76   : > { %4511 = vmatprep.mubr.f32.mxu0 %v5723_v9  ;;  %4553 = vmatprep.subr.mxu1 %v3774_v33  ;;  %6815 = vst [vmem:[#allocation7_spill] sm:$0xff] %v5747_v48  ;;  %v3772_v9 = vld [vmem:[%s6796_s3 + $0x1b8] sm:$0xff] }
  0x77   : > { %4512 = vmatmul.mubr.f32.gmra.mxu0 %v5731_v20  ;;  %4554 = vmatpush3.msra.mxu1 %v3774_v33  ;;  %v3789_v33 = vld [vmem:[%s6796_s3 + $0x240] sm:$0xff] }
  0x78   : > { %4633 = vmatprep.subr.mxu0 %v3790_v27  ;;  %5104 = vmatprep.mubr.msk.f32.mxu1 %vm5631_vm1, %v5451_v26  ;;  %v5755_v20 = vld [vmem:[#allocation2 + $0xc2] sm:$0xff] }
  0x79   : > { %4634 = vmatpush3.msra.mxu0 %v3790_v27  ;;  %4435 = vmatmul.mubr.f32.gmra.mxu1 %v5466_v38  ;;  %v5763_v27 = vld [vmem:[#allocation2 + $0xca] sm:$0xff] }
  0x7a   : > { %4514 = vmatprep.mubr.f32.mxu0 %v5739_v3  ;;  %4555 = vmatprep.subr.mxu1 %v3773_v54 }
  0x7b   : > { %4515 = vmatmul.mubr.f32.gmra.mxu0 %v5747_v48  ;;  %4556 = vmatpush3.msra.mxu1 %v3773_v54  ;;  %v3788_v54 = vld [vmem:[%s6796_s3 + $0x238] sm:$0xff] }
  0x7c   : > { %4635 = vmatprep.subr.mxu0 %v3789_v33  ;;  %5106 = vmatprep.mubr.msk.f32.mxu1 %vm5631_vm1, %v5239_v8  ;;  %v5771_v48 = vld [vmem:[#allocation2 + $0xda] sm:$0xff]  ;;  %v3771_v8 = vld [vmem:[%s6796_s3 + $0x1b0] sm:$0xff] }
  0x7d   : > { %4636 = vmatpush3.msra.mxu0 %v3789_v33  ;;  %4438 = vmatmul.mubr.f32.gmra.mxu1 %v5251_v18  ;;  %v5779_v18 = vld [vmem:[#allocation2 + $0xe2] sm:$0xff]  ;;  %v5787_v33 = vld [vmem:[#allocation2 + $0xf2] sm:$0xff] }
  0x7e   : > { %4517 = vmatprep.mubr.f32.mxu0 %v5755_v20  ;;  %4557 = vmatprep.subr.mxu1 %v3772_v9 }
  0x7f   : > { %4518 = vmatmul.mubr.f32.gmra.mxu0 %v5763_v27  ;;  %4558 = vmatpush3.msra.mxu1 %v3772_v9  ;;  %v3787_v9 = vld [vmem:[%s6796_s3 + $0x230] sm:$0xff] }
  0x80   : > { %4637 = vmatprep.subr.mxu0 %v3788_v54  ;;  %5108 = vmatprep.mubr.msk.f32.mxu1 %vm5631_vm1, %v5246_v16  ;;  %v3770_v16 = vld [vmem:[%s6796_s3 + $0x1a8] sm:$0xff] }
  0x81   : > { %4638 = vmatpush3.msra.mxu0 %v3788_v54  ;;  %4441 = vmatmul.mubr.f32.gmra.mxu1 %v5284_v37  ;;  %v5795_v37 = vld [vmem:[#allocation2 + $0xfa] sm:$0xff]  ;;  %v3786_v54 = vld [vmem:[%s6796_s3 + $0x228] sm:$0xff] }
  0x82   : > { %4520 = vmatprep.mubr.f32.mxu0 %v5771_v48  ;;  %4559 = vmatprep.subr.mxu1 %v3771_v8 }
  0x83   : > { %4521 = vmatmul.mubr.f32.gmra.mxu0 %v5779_v18  ;;  %4560 = vmatpush3.msra.mxu1 %v3771_v8  ;;  %v5803_v8 = vld [vmem:[#allocation2 + $0x10a] sm:$0xff] }
  0x84   : > { %4639 = vmatprep.subr.mxu0 %v3787_v9  ;;  %5110 = vmatprep.mubr.msk.f32.mxu1 %vm5631_vm1, %v5271_v32  ;;  %v3769_v32 = vld [vmem:[%s6796_s3 + $0x1a0] sm:$0xff] }
  0x85   : > { %4640 = vmatpush3.msra.mxu0 %v3787_v9  ;;  %4444 = vmatmul.mubr.f32.gmra.mxu1 %v5312_v52  ;;  %v5811_v52 = vld [vmem:[#allocation2 + $0x112] sm:$0xff]  ;;  %v3785_v9 = vld [vmem:[%s6796_s3 + $0x220] sm:$0xff] }
  0x86   : > { %4523 = vmatprep.mubr.f32.mxu0 %v5787_v33  ;;  %4561 = vmatprep.subr.mxu1 %v3770_v16 }
  0x87   : > { %4524 = vmatmul.mubr.f32.gmra.mxu0 %v5795_v37  ;;  %4562 = vmatpush3.msra.mxu1 %v3770_v16  ;;  %v5819_v16 = vld [vmem:[#allocation2 + $0x122] sm:$0xff] }
  0x88   : > { %4641 = vmatprep.subr.mxu0 %v3786_v54  ;;  %5112 = vmatprep.mubr.msk.f32.mxu1 %vm5631_vm1, %v5307_v50  ;;  %v3768_v50 = vld [vmem:[%s6796_s3 + $0x198] sm:$0xff] }
  0x89   : > { %4642 = vmatpush3.msra.mxu0 %v3786_v54  ;;  %4447 = vmatmul.mubr.f32.gmra.mxu1 %v5336_v0  ;;  %v5827_v0 = vld [vmem:[#allocation2 + $0x12a] sm:$0xff]  ;;  %v3784_v54 = vld [vmem:[%s6796_s3 + $0x218] sm:$0xff] }
  0x8a   : > { %4526 = vmatprep.mubr.f32.mxu0 %v5803_v8  ;;  %4563 = vmatprep.subr.mxu1 %v3769_v32  ;;  %6816 = vst [vmem:[#allocation8_spill] sm:$0xff] %v5827_v0 }
  0x8b   : > { %4527 = vmatmul.mubr.f32.gmra.mxu0 %v5811_v52  ;;  %4564 = vmatpush3.msra.mxu1 %v3769_v32  ;;  %v5835_v32 = vld [vmem:[#allocation2 + $0x13a] sm:$0xff] }
  0x8c   : > { %4643 = vmatprep.subr.mxu0 %v3785_v9  ;;  %5114 = vmatprep.mubr.msk.f32.mxu1 %vm5631_vm1, %v5345_v5  ;;  %6817 = vst [vmem:[#allocation9_spill] sm:$0xff] %v5835_v32  ;;  %v3767_v5 = vld [vmem:[%s6796_s3 + $0x190] sm:$0xff] }
  0x8d   : > { %4644 = vmatpush3.msra.mxu0 %v3785_v9  ;;  %4450 = vmatmul.mubr.f32.gmra.mxu1 %v5363_v17  ;;  %v5843_v17 = vld [vmem:[#allocation2 + $0x142] sm:$0xff]  ;;  %v3783_v9 = vld [vmem:[%s6796_s3 + $0x210] sm:$0xff] }
  0x8e   : > { %4529 = vmatprep.mubr.f32.mxu0 %v5819_v16  ;;  %4565 = vmatprep.subr.mxu1 %v3768_v50  ;;  %6818 = vst [vmem:[#allocation10_spill] sm:$0xff] %v5843_v17 }
  0x8f   : > { %4530 = vmatmul.mubr.f32.gmra.mxu0 %v5827_v0  ;;  %4566 = vmatpush3.msra.mxu1 %v3768_v50  ;;  %v5852_v50 = vld [vmem:[#allocation2 + $0x152] sm:$0xff] }
  0x90   : > { %4645 = vmatprep.subr.mxu0 %v3784_v54  ;;  %5116 = vmatprep.mubr.msk.f32.mxu1 %vm5631_vm1, %v5368_v22  ;;  %v3766_v22 = vld [vmem:[%s6796_s3 + $0x188] sm:$0xff] }
  0x91   : > { %4646 = vmatpush3.msra.mxu0 %v3784_v54  ;;  %4453 = vmatmul.mubr.f32.gmra.mxu1 %v5394_v39  ;;  %v5863_v39 = vld [vmem:[#allocation2 + $0x15a] sm:$0xff] }
  0x92   : > { %4532 = vmatprep.mubr.f32.mxu0 %v5835_v32  ;;  %4567 = vmatprep.subr.mxu1 %v3767_v5  ;;  %v689_v54 = vld [vmem:[%s398_s29] sm:$0xff] }
  0x93   : > { %4533 = vmatmul.mubr.f32.gmra.mxu0 %v5843_v17  ;;  %4568 = vmatpush3.msra.mxu1 %v3767_v5  ;;  %v3782_v5 = vld [vmem:[%s6796_s3 + $0x208] sm:$0xff]  ;;  %v692_v32 = vmul.f32 0.0, %v689_v54  ;;  %v5883_v54 = vld [vmem:[#allocation2 + $0x172] sm:$0xff] }
  0x94   : > { %4647 = vmatprep.subr.mxu0 %v3783_v9  ;;  %5118 = vmatprep.mubr.msk.f32.mxu1 %vm5631_vm1, %v5411_v49  ;;  %v690_v17 = vld [vmem:[%s398_s29 + $0x8] sm:$0xff]  ;;  %s421_s29 = scalar_lea.vmem %s6798_s5, %s3730_s30 }
  0x95   : > { %4648 = vmatpush3.msra.mxu0 %v3783_v9  ;;  %4456 = vmatmul.mubr.f32.gmra.mxu1 %v5419_v57  ;;  %v5870_v0 = vmul.f32 0.0, %v690_v17  ;;  %v5873_v49 = vld [vmem:[#allocation2 + $0x16a] sm:$0xff]  ;;  %v3765_v57 = vld [vmem:[%s6796_s3 + $0x180] sm:$0xff]  ;;  %v5878_v9 = vrot.slane %v692_v32, 7 }
  0x96   : > { %4535 = vmatprep.mubr.f32.mxu0 %v5852_v50  ;;  %4569 = vmatprep.subr.mxu1 %v3766_v22 }
  0x97   : > { %4536 = vmatmul.mubr.f32.gmra.mxu0 %v5863_v39  ;;  %4570 = vmatpush3.msra.mxu1 %v3766_v22  ;;  %v6807_v17 = vrot.slane %v5870_v0, 7  ;;  %v3781_v22 = vld [vmem:[%s6796_s3 + $0x200] sm:$0xff]  ;;  %v702_v32 = vsel %vm436_vm0, 0.0, %v5878_v9 }
  0x98   : > { %4649 = vmatprep.subr.mxu0 %v3782_v5  ;;  %5120 = vmatprep.mubr.msk.f32.mxu1 %vm5631_vm1, %v5440_v14  ;;  %705 = vst [vmem:[#allocation2 + $0x198] sm:$0xff] %v702_v32  ;;  %v5078_v32 = vld [vmem:[#allocation2 + $0x20] sm:$0xff] }
  0x99   : > { %4650 = vmatpush3.msra.mxu0 %v3782_v5  ;;  %4459 = vmatmul.mubr.f32.gmra.mxu1 %v5455_v30  ;;  %v5897_v14 = vsel %vm436_vm0, %v5878_v9, %v6807_v17  ;;  %v3812_v30 = vld [vmem:[%s6796_s3 + $0x2f8] sm:$0xff] }
  0x9a   : > { %4538 = vmatprep.mubr.f32.mxu0 %v5873_v49  ;;  %4571 = vmatprep.subr.mxu1 %v3765_v57  ;;  %6819 = vst [vmem:[#allocation11_spill] sm:$0xff] %v5897_v14  ;;  %706 = vst [vmem:[#allocation2 + $0x1a0] sm:$0xff] %v5897_v14  ;;  %v5077_v5 = vld [vmem:[#allocation2 + $0x18] sm:$0xff]  ;;  %v5079_v14 = vld [vmem:[#allocation2 + $0x30] sm:$0xff] }
  0x9b   : > { %4539 = vmatmul.mubr.f32.gmra.mxu0 %v5883_v54  ;;  %4572 = vmatpush3.msra.mxu1 %v3765_v57  ;;  %v3828_v17 = vld [vmem:[%s6796_s3 + $0x378] sm:$0xff]  ;;  %v3811_v57 = vld [vmem:[%s6796_s3 + $0x2f0] sm:$0xff] }
  0x9c   : > { %4651 = vmatprep.subr.mxu0 %v3781_v22  ;;  %4573 = vmatprep.mubr.f32.mxu1 %v5077_v5  ;;  %v3827_v5 = vld [vmem:[%s6796_s3 + $0x370] sm:$0xff] }
  0x9d   : > { %4652 = vmatpush3.msra.mxu0 %v3781_v22  ;;  %4574 = vmatmul.mubr.f32.vlgmr.msra.gmra.mxu1 %v5078_v32  ;;  %v5080_v22 = vld [vmem:[#allocation2 + $0x38] sm:$0xff]  ;;  %v3819_v32 = vld [vmem:[%s6796_s3 + $0x330] sm:$0xff] }
  0x9e   : > { %4653 = vmatprep.mubr.f32.mxu0 %v5471_v43  ;;  %4701 = vmatprep.subr.mxu1 %v3812_v30  ;;  %v3810_v43 = vld [vmem:[%s6796_s3 + $0x2e8] sm:$0xff] }
  0x9f   : > { %4654 = vmatmul.mubr.f32.vlgmr.msra.gmra.mxu0 %v5477_v47  ;;  %4702 = vmatpush3.msra.mxu1 %v3812_v30  ;;  %v3826_v47 = vld [vmem:[%s6796_s3 + $0x368] sm:$0xff]  ;;  %v6023_v30 = vld [vmem:[#allocation2 + $0xf9] sm:$0xff] }
  0xa0   : > { %4781 = vmatprep.subr.mxu0 %v3828_v17  ;;  %4576 = vmatprep.mubr.f32.mxu1 %v5079_v14  ;;  %v3803_v14 = vld [vmem:[%s6796_s3 + $0x2b0] sm:$0xff] }
  0xa1   : > { %4782 = vmatpush3.msra.mxu0 %v3828_v17  ;;  %4577 = vmatmul.mubr.f32.gmra.mxu1 %v5080_v22  ;;  %v6017_v17 = vld [vmem:[#allocation2 + $0xf1] sm:$0xff] }
  0xa2   : > { %4656 = vmatprep.mubr.f32.mxu0 %v5490_v59  ;;  %4703 = vmatprep.subr.mxu1 %v3811_v57  ;;  %v3809_v59 = vld [vmem:[%s6796_s3 + $0x2e0] sm:$0xff]  ;;  %v6032_v22 = vld [vmem:[#allocation2 + $0x110] sm:$0xff] }
  0xa3   : > { %4657 = vmatmul.mubr.f32.gmra.mxu0 %v5495_v63  ;;  %4704 = vmatpush3.msra.mxu1 %v3811_v57  ;;  %v5978_v63 = vld [vmem:[#allocation2 + $0xc8] sm:$0xff] }
  0xa4   : > { %4783 = vmatprep.subr.mxu0 %v3827_v5  ;;  %5122 = vmatprep.mubr.msk.f32.mxu1 %vm5631_vm1, %v5316_v56  ;;  %v3825_v56 = vld [vmem:[%s6796_s3 + $0x360] sm:$0xff]  ;;  %v6029_v57 = vld [vmem:[#allocation2 + $0x108] sm:$0xff] }
  0xa5   : > { %4784 = vmatpush3.msra.mxu0 %v3827_v5  ;;  %4580 = vmatmul.mubr.f32.gmra.mxu1 %v5351_v10  ;;  %v3808_v10 = vld [vmem:[%s6796_s3 + $0x2d8] sm:$0xff]  ;;  %v6035_v5 = vld [vmem:[#allocation2 + $0x109] sm:$0xff] }
  0xa6   : > { %4659 = vmatprep.mubr.f32.mxu0 %v5508_v6  ;;  %4705 = vmatprep.subr.mxu1 %v3810_v43  ;;  %v5981_v6 = vld [vmem:[#allocation2 + $0xc1] sm:$0xff] }
  0xa7   : > { %4660 = vmatmul.mubr.f32.gmra.mxu0 %v5513_v13  ;;  %4706 = vmatpush3.msra.mxu1 %v3810_v43  ;;  %v3821_v13 = vld [vmem:[%s6796_s3 + $0x340] sm:$0xff]  ;;  %v3802_v43 = vld [vmem:[%s6796_s3 + $0x2a8] sm:$0xff] }
  0xa8   : > { %4785 = vmatprep.subr.mxu0 %v3826_v47  ;;  %5124 = vmatprep.mubr.msk.f32.mxu1 %vm5631_vm1, %v5354_v12  ;;  %v3824_v12 = vld [vmem:[%s6796_s3 + $0x358] sm:$0xff] }
  0xa9   : > { %4786 = vmatpush3.msra.mxu0 %v3826_v47  ;;  %4583 = vmatmul.mubr.f32.gmra.mxu1 %v5373_v23  ;;  %v3807_v23 = vld [vmem:[%s6796_s3 + $0x2d0] sm:$0xff] }
  0xaa   : > { %4662 = vmatprep.mubr.f32.mxu0 %v5526_v25  ;;  %4707 = vmatprep.subr.mxu1 %v3809_v59  ;;  %v5993_v25 = vld [vmem:[#allocation2 + $0xd8] sm:$0xff] }
  0xab   : > { %4663 = vmatmul.mubr.f32.gmra.mxu0 %v5531_v31  ;;  %4708 = vmatpush3.msra.mxu1 %v3809_v59  ;;  %v5996_v31 = vld [vmem:[#allocation2 + $0xe0] sm:$0xff]  ;;  %v6041_v47 = vld [vmem:[#allocation2 + $0x111] sm:$0xff]  ;;  %v3818_v59 = vld [vmem:[%s6796_s3 + $0x328] sm:$0xff] }
  0xac   : > { %4787 = vmatprep.subr.mxu0 %v3825_v56  ;;  %5126 = vmatprep.mubr.msk.f32.mxu1 %vm5631_vm1, %v5387_v34  ;;  %v3823_v34 = vld [vmem:[%s6796_s3 + $0x350] sm:$0xff] }
  0xad   : > { %4788 = vmatpush3.msra.mxu0 %v3825_v56  ;;  %4586 = vmatmul.mubr.f32.gmra.mxu1 %v5405_v44  ;;  %v3806_v44 = vld [vmem:[%s6796_s3 + $0x2c8] sm:$0xff]  ;;  %v6047_v56 = vld [vmem:[#allocation2 + $0x120] sm:$0xff] }
  0xae   : > { %4665 = vmatprep.mubr.f32.mxu0 %v5546_v45  ;;  %4709 = vmatprep.subr.mxu1 %v3808_v10  ;;  %v5999_v45 = vld [vmem:[#allocation2 + $0xd9] sm:$0xff] }
  0xaf   : > { %4666 = vmatmul.mubr.f32.gmra.mxu0 %v5554_v53  ;;  %4710 = vmatpush3.msra.mxu1 %v3808_v10  ;;  %v3804_v53 = vld [vmem:[%s6796_s3 + $0x2b8] sm:$0xff]  ;;  %v6050_v10 = vld [vmem:[#allocation2 + $0x128] sm:$0xff] }
  0xb0   : > { %4789 = vmatprep.subr.mxu0 %v3824_v12  ;;  %5128 = vmatprep.mubr.msk.f32.mxu1 %vm5631_vm1, %v5424_v61  ;;  %v3822_v61 = vld [vmem:[%s6796_s3 + $0x348] sm:$0xff] }
  0xb1   : > { %4790 = vmatpush3.msra.mxu0 %v3824_v12  ;;  %4589 = vmatmul.mubr.f32.gmra.mxu1 %v5437_v11  ;;  %v5975_v11 = vld [vmem:[#allocation2 + $0xc0] sm:$0xff] }
  0xb2   : > { %4668 = vmatprep.mubr.f32.mxu0 %v5570_v1  ;;  %4711 = vmatprep.subr.mxu1 %v3807_v23  ;;  %v6005_v1 = vld [vmem:[#allocation2 + $0xe1] sm:$0xff] }
  0xb3   : > { %4669 = vmatmul.mubr.f32.gmra.mxu0 %v5578_v4  ;;  %4712 = vmatpush3.msra.mxu1 %v3807_v23  ;;  %v3820_v4 = vld [vmem:[%s6796_s3 + $0x338] sm:$0xff]  ;;  %v6053_v12 = vld [vmem:[#allocation2 + $0x121] sm:$0xff] }
  0xb4   : > { %4791 = vmatprep.subr.mxu0 %v3823_v34  ;;  %5130 = vmatprep.mubr.msk.f32.mxu1 %vm5631_vm1, %v5451_v26  ;;  %v3805_v26 = vld [vmem:[%s6796_s3 + $0x2c0] sm:$0xff] }
  0xb5   : > { %4792 = vmatpush3.msra.mxu0 %v3823_v34  ;;  %4592 = vmatmul.mubr.f32.gmra.mxu1 %v5466_v38  ;;  %v5987_v38 = vld [vmem:[#allocation2 + $0xc9] sm:$0xff]  ;;  %v3801_v23 = vld [vmem:[%s6796_s3 + $0x2a0] sm:$0xff] }
  0xb6   : > { %4671 = vmatprep.mubr.f32.mxu0 %v5594_v21  ;;  %4713 = vmatprep.subr.mxu1 %v3806_v44  ;;  %v6011_v21 = vld [vmem:[#allocation2 + $0xf0] sm:$0xff] }
  0xb7   : > { %4672 = vmatmul.mubr.f32.gmra.mxu0 %v5602_v29  ;;  %4714 = vmatpush3.msra.mxu1 %v3806_v44  ;;  %v6014_v29 = vld [vmem:[#allocation2 + $0xf8] sm:$0xff]  ;;  %v6059_v34 = vld [vmem:[#allocation2 + $0x129] sm:$0xff]  ;;  %v3817_v44 = vld [vmem:[%s6796_s3 + $0x320] sm:$0xff] }
  0xb8   : > { %4793 = vmatprep.subr.mxu0 %v3822_v61  ;;  %4594 = vmatprep.mubr.f32.mxu1 %v5975_v11 }
  0xb9   : > { %4794 = vmatpush3.msra.mxu0 %v3822_v61  ;;  %4595 = vmatmul.mubr.f32.gmra.mxu1 %v5978_v63  ;;  %v3800_v61 = vld [vmem:[%s6796_s3 + $0x298] sm:$0xff] }
  0xba   : > { %4674 = vmatprep.mubr.f32.mxu0 %v5981_v6  ;;  %4715 = vmatprep.subr.mxu1 %v3805_v26 }
  0xbb   : > { %4675 = vmatmul.mubr.f32.gmra.mxu0 %v5987_v38  ;;  %4716 = vmatpush3.msra.mxu1 %v3805_v26  ;;  %v5081_v26 = vld [vmem:[#allocation2 + $0x138] sm:$0xff] }
  0xbc   : > { %4795 = vmatprep.subr.mxu0 %v3821_v13  ;;  %4597 = vmatprep.mubr.f32.mxu1 %v5993_v25 }
  0xbd   : > { %4796 = vmatpush3.msra.mxu0 %v3821_v13  ;;  %4598 = vmatmul.mubr.f32.gmra.mxu1 %v5996_v31  ;;  %v5082_v13 = vld [vmem:[#allocation2 + $0x140] sm:$0xff] }
  0xbe   : > { %4677 = vmatprep.mubr.f32.mxu0 %v5999_v45  ;;  %4717 = vmatprep.subr.mxu1 %v3804_v53 }
  0xbf   : > { %4678 = vmatmul.mubr.f32.gmra.mxu0 %v6005_v1  ;;  %4718 = vmatpush3.msra.mxu1 %v3804_v53  ;;  %v3816_v53 = vld [vmem:[%s6796_s3 + $0x318] sm:$0xff] }
  0xc0   : > { %4797 = vmatprep.subr.mxu0 %v3820_v4  ;;  %4600 = vmatprep.mubr.f32.mxu1 %v6011_v21 }
  0xc1   : > { %4798 = vmatpush3.msra.mxu0 %v3820_v4  ;;  %4601 = vmatmul.mubr.f32.gmra.mxu1 %v6014_v29  ;;  %v3799_v4 = vld [vmem:[%s6796_s3 + $0x290] sm:$0xff] }
  0xc2   : > { %4680 = vmatprep.mubr.f32.mxu0 %v6017_v17  ;;  %4719 = vmatprep.subr.mxu1 %v3803_v14 }
  0xc3   : > { %4681 = vmatmul.mubr.f32.gmra.mxu0 %v6023_v30  ;;  %4720 = vmatpush3.msra.mxu1 %v3803_v14  ;;  %v5083_v14 = vld [vmem:[#allocation2 + $0x150] sm:$0xff] }
  0xc4   : > { %4799 = vmatprep.subr.mxu0 %v3819_v32  ;;  %4603 = vmatprep.mubr.f32.mxu1 %v6029_v57 }
  0xc5   : > { %4800 = vmatpush3.msra.mxu0 %v3819_v32  ;;  %4604 = vmatmul.mubr.f32.gmra.mxu1 %v6032_v22  ;;  %v5084_v32 = vld [vmem:[#allocation2 + $0x158] sm:$0xff] }
  0xc6   : > { %4683 = vmatprep.mubr.f32.mxu0 %v6035_v5  ;;  %4721 = vmatprep.subr.mxu1 %v3802_v43 }
  0xc7   : > { %4684 = vmatmul.mubr.f32.gmra.mxu0 %v6041_v47  ;;  %4722 = vmatpush3.msra.mxu1 %v3802_v43  ;;  %v3815_v43 = vld [vmem:[%s6796_s3 + $0x310] sm:$0xff] }
  0xc8   : > { %4801 = vmatprep.subr.mxu0 %v3818_v59  ;;  %4606 = vmatprep.mubr.f32.mxu1 %v6047_v56 }
  0xc9   : > { %4802 = vmatpush3.msra.mxu0 %v3818_v59  ;;  %4607 = vmatmul.mubr.f32.gmra.mxu1 %v6050_v10  ;;  %v3798_v59 = vld [vmem:[%s6796_s3 + $0x288] sm:$0xff] }
  0xca   : > { %4686 = vmatprep.mubr.f32.mxu0 %v6053_v12  ;;  %4723 = vmatprep.subr.mxu1 %v3801_v23 }
  0xcb   : > { %4687 = vmatmul.mubr.f32.gmra.mxu0 %v6059_v34  ;;  %4724 = vmatpush3.msra.mxu1 %v3801_v23  ;;  %v5085_v23 = vld [vmem:[#allocation2 + $0x168] sm:$0xff] }
  0xcc   : > { %4803 = vmatprep.subr.mxu0 %v3817_v44  ;;  %4609 = vmatprep.mubr.f32.mxu1 %v5081_v26  ;;  %v2481_v26 = vld [vmem:[#allocation2 + $0x38] sm:$0xff] }
  0xcd   : > { %4804 = vmatpush3.msra.mxu0 %v3817_v44  ;;  %4610 = vmatmul.mubr.f32.gmra.mxu1 %v5082_v13  ;;  %v5086_v44 = vld [vmem:[#allocation2 + $0x170] sm:$0xff]  ;;  %v2482_v13 = vld [vmem:[#allocation2 + $0x48] sm:$0xff] }
  0xce   : > { %4689 = vmatprep.mubr.f32.mxu0 %v5540_v41  ;;  %4725 = vmatprep.subr.mxu1 %v3800_v61  ;;  %v6820_v41 = vrot.slane %v5870_v0, 7  ;;  %v3797_v0 = vld [vmem:[%s6796_s3 + $0x280] sm:$0xff] }
  0xcf   : > { %4690 = vmatmul.mubr.f32.gmra.mxu0 %v5548_v46  ;;  %4726 = vmatpush3.msra.mxu1 %v3800_v61  ;;  %v6102_v61 = vld [vmem:[#allocation2 + $0x189] sm:$0xff] }
  0xd0   : > { %4805 = vmatprep.subr.mxu0 %v3816_v53  ;;  %4612 = vmatprep.mubr.f32.mxu1 %v5083_v14  ;;  %v703_v46 = vsel %vm436_vm0, %v6820_v41, 0.0  ;;  %v3842_v14 = vld [vmem:[%s6796_s3 + $0x3e8] sm:$0xff]  ;;  %v2488_v41 = vld [vmem:[#allocation2 + $0x90] sm:$0xff] }
  0xd1   : > { %4806 = vmatpush3.msra.mxu0 %v3816_v53  ;;  %4613 = vmatmul.mubr.f32.gmra.mxu1 %v5084_v32  ;;  %707 = vst [vmem:[#allocation2 + $0x1a8] sm:$0x3] %v703_v46  ;;  %v3843_v53 = vld [vmem:[%s6796_s3 + $0x3f0] sm:$0xff]  ;;  %v2486_v32 = vld [vmem:[#allocation2 + $0x78] sm:$0xff] }
  0xd2   : > { %4692 = vmatprep.mubr.f32.mxu0 %v5564_v60  ;;  %4727 = vmatprep.subr.mxu1 %v3799_v4  ;;  %v3814_v60 = vld [vmem:[%s6796_s3 + $0x308] sm:$0xff]  ;;  %v3840_v46 = vld [vmem:[%s6796_s3 + $0x3d8] sm:$0xff] }
  0xd3   : > { %4693 = vmatmul.mubr.f32.gmra.mxu0 %v5572_v2  ;;  %4728 = vmatpush3.msra.mxu1 %v3799_v4  ;;  %v6094_v2 = vld [vmem:[#allocation2 + $0x181] sm:$0xff] }
  0xd4   : > { %4807 = vmatprep.subr.mxu0 %v3815_v43  ;;  %4615 = vmatprep.mubr.f32.mxu1 %v5085_v23  ;;  %v2484_v4 = vld [vmem:[#allocation2 + $0x60] sm:$0xff]  ;;  %v6822_v23 = vld [vmem:[#allocation4_spill] sm:$0xff] }
  0xd5   : > { %4808 = vmatpush3.msra.mxu0 %v3815_v43  ;;  %4616 = vmatmul.mubr.f32.gmra.mxu1 %v5086_v44  ;;  %v3841_v43 = vld [vmem:[%s6796_s3 + $0x3e0] sm:$0xff] }
  0xd6   : > { %4695 = vmatprep.mubr.f32.mxu0 %v5588_v15  ;;  %4729 = vmatprep.subr.mxu1 %v3798_v59  ;;  %v3813_v15 = vld [vmem:[%s6796_s3 + $0x300] sm:$0xff] }
  0xd7   : > { %4696 = vmatmul.mubr.f32.gmra.mxu0 %v5596_v24  ;;  %4730 = vmatpush3.msra.mxu1 %v3798_v59  ;;  %v2480_v24 = vld [vmem:[#allocation2 + $0x30] sm:$0xff] }
  0xd8   : > { %4809 = vmatprep.subr.mxu0 %v3814_v60  ;;  %5132 = vmatprep.mubr.msk.f32.mxu1 %vm5631_vm1, %v5618_v55  ;;  %v3844_v55 = vld [vmem:[%s6796_s3 + $0x3f8] sm:$0xff]  ;;  %v6821_v59 = vld [vmem:[#allocation3_spill] sm:$0xff] }
  0xd9   : > { %4810 = vmatpush3.msra.mxu0 %v3814_v60  ;;  %4619 = vmatmul.mubr.f32.gmra.mxu1 %v5627_v19  ;;  %v3860_v19 = vld [vmem:[%s6796_s3 + $0x478] sm:$0xff]  ;;  %v2490_v60 = vld [vmem:[#allocation2 + $0xa8] sm:$0xff] }
  0xda   : > { %4698 = vmatprep.mubr.f32.mxu0 %v6094_v2  ;;  %4731 = vmatprep.subr.mxu1 %v3797_v0 }
  0xdb   : > { %4699 = vmatmul.mubr.f32.gmra.mxu0 %v6102_v61  ;;  %4732 = vmatpush3.msra.mxu1 %v3797_v0  ;;  %v3839_v0 = vld [vmem:[%s6796_s3 + $0x3d0] sm:$0xff] }
  0xdc   : > { %4811 = vmatprep.subr.mxu0 %v3813_v15  ;;  %4733 = vmatprep.mubr.f32.mxu1 %v5643_v51  ;;  %v2483_v51 = vld [vmem:[#allocation2 + $0x50] sm:$0xff] }
  0xdd   : > { %4812 = vmatpush3.msra.mxu0 %v3813_v15  ;;  %4734 = vmatmul.mubr.f32.vlgmr.msra.gmra.mxu1 %v5651_v35  ;;  %v3859_v35 = vld [vmem:[%s6796_s3 + $0x470] sm:$0xff] }
  0xde   : > { %4813 = vmatprep.mubr.f32.mxu0 %v2480_v24  ;;  %4861 = vmatprep.subr.mxu1 %v3844_v55  ;;  %v6823_v24 = vld [vmem:[#allocation5_spill] sm:$0xff] }
  0xdf   : > { %4814 = vmatmul.mubr.f32.vlgmr.msra.gmra.mxu0 %v2481_v26  ;;  %4862 = vmatpush3.msra.mxu1 %v3844_v55  ;;  %v2491_v55 = vld [vmem:[#allocation2 + $0xb0] sm:$0xff] }
  0xe0   : > { %4941 = vmatprep.subr.mxu0 %v3860_v19  ;;  %4736 = vmatprep.mubr.f32.mxu1 %v5659_v62  ;;  %v2485_v62 = vld [vmem:[#allocation2 + $0x68] sm:$0xff] }
  0xe1   : > { %4942 = vmatpush3.msra.mxu0 %v3860_v19  ;;  %4737 = vmatmul.mubr.f32.gmra.mxu1 %v5667_v40  ;;  %v3858_v40 = vld [vmem:[%s6796_s3 + $0x468] sm:$0xff] }
  0xe2   : > { %4816 = vmatprep.mubr.f32.mxu0 %v2482_v13  ;;  %4863 = vmatprep.subr.mxu1 %v3843_v53  ;;  %v6824_v19 = vld [vmem:[#allocation6_spill] sm:$0xff]  ;;  %v3855_v13 = vld [vmem:[%s6796_s3 + $0x450] sm:$0xff] }
  0xe3   : > { %4817 = vmatmul.mubr.f32.gmra.mxu0 %v2483_v51  ;;  %4864 = vmatpush3.msra.mxu1 %v3843_v53  ;;  %v3838_v51 = vld [vmem:[%s6796_s3 + $0x3c8] sm:$0xff] }
  0xe4   : > { %4943 = vmatprep.subr.mxu0 %v3859_v35  ;;  %4739 = vmatprep.mubr.f32.mxu1 %v5675_v7  ;;  %v2487_v7 = vld [vmem:[#allocation2 + $0x80] sm:$0xff] }
  0xe5   : > { %4944 = vmatpush3.msra.mxu0 %v3859_v35  ;;  %4740 = vmatmul.mubr.f32.gmra.mxu1 %v5683_v58  ;;  %v3857_v58 = vld [vmem:[%s6796_s3 + $0x460] sm:$0xff] }
  0xe6   : > { %4819 = vmatprep.mubr.f32.mxu0 %v2484_v4  ;;  %4865 = vmatprep.subr.mxu1 %v3842_v14  ;;  %v6825_v4 = vld [vmem:[#allocation7_spill] sm:$0xff] }
  0xe7   : > { %4820 = vmatmul.mubr.f32.gmra.mxu0 %v2485_v62  ;;  %4866 = vmatpush3.msra.mxu1 %v3842_v14  ;;  %v3854_v14 = vld [vmem:[%s6796_s3 + $0x448] sm:$0xff] }
  0xe8   : > { %4945 = vmatprep.subr.mxu0 %v3858_v40  ;;  %4742 = vmatprep.mubr.f32.mxu1 %v5691_v28  ;;  %v2489_v28 = vld [vmem:[#allocation2 + $0x98] sm:$0xff] }
  0xe9   : > { %4946 = vmatpush3.msra.mxu0 %v3858_v40  ;;  %4743 = vmatmul.mubr.f32.gmra.mxu1 %v5699_v36  ;;  %v3856_v36 = vld [vmem:[%s6796_s3 + $0x458] sm:$0xff] }
  0xea   : > { %4822 = vmatprep.mubr.f32.mxu0 %v2486_v32  ;;  %4867 = vmatprep.subr.mxu1 %v3841_v43 }
  0xeb   : > { %4823 = vmatmul.mubr.f32.gmra.mxu0 %v2487_v7  ;;  %4868 = vmatpush3.msra.mxu1 %v3841_v43 }
  0xec   : > { %4947 = vmatprep.subr.mxu0 %v3857_v58  ;;  %4745 = vmatprep.mubr.f32.mxu1 %v6821_v59  ;;  %v6826_v59 = vld [vmem:[#allocation8_spill] sm:$0xff] }
  0xed   : > { %4948 = vmatpush3.msra.mxu0 %v3857_v58  ;;  %4746 = vmatmul.mubr.f32.gmra.mxu1 %v6822_v23  ;;  %v3832_v23 = vld [vmem:[%s6796_s3 + $0x398] sm:$0xff] }
  0xee   : > { %4825 = vmatprep.mubr.f32.mxu0 %v2488_v41  ;;  %4869 = vmatprep.subr.mxu1 %v3840_v46  ;;  %v6150_v44 = vpop.f32.mrf.mxu1 }
  0xef   : > { %4826 = vmatmul.mubr.f32.gmra.mxu0 %v2489_v28  ;;  %4870 = vmatpush3.msra.mxu1 %v3840_v46  ;;  %v6155_v15 = vpop.f32.mrf.mxu0  ;;  %v2503_v46 = vld [vmem:[#allocation2 + $0x140] sm:$0xff]  ;;  %v2504_v28 = vld [vmem:[#allocation2 + $0x150] sm:$0xff] }
  0xf0   : > { %4949 = vmatprep.subr.mxu0 %v3856_v36  ;;  %4748 = vmatprep.mubr.f32.mxu1 %v6823_v24  ;;  %v6158_v26 = vpop.f32.mrf.mxu1  ;;  %v3848_v24 = vld [vmem:[%s6796_s3 + $0x418] sm:$0xff] }
  0xf1   : > { %4950 = vmatpush3.msra.mxu0 %v3856_v36  ;;  %4749 = vmatmul.mubr.f32.gmra.mxu1 %v6824_v19  ;;  %v6164_v53 = vpop.f32.mrf.mxu0  ;;  %v6827_v36 = vld [vmem:[#allocation9_spill] sm:$0xff] }
  0xf2   : > { %4828 = vmatprep.mubr.f32.mxu0 %v2490_v60  ;;  %4871 = vmatprep.subr.mxu1 %v3839_v0  ;;  %v2505_v60 = vld [vmem:[#allocation2 + $0x158] sm:$0xff] }
  0xf3   : > { %4829 = vmatmul.mubr.f32.gmra.mxu0 %v2491_v55  ;;  %4872 = vmatpush3.msra.mxu1 %v3839_v0  ;;  %v6169_v35 = vpop.f32.mrf.mxu1  ;;  %v6828_v0 = vld [vmem:[#allocation10_spill] sm:$0xff] }
  0xf4   : > { %4951 = vmatprep.subr.mxu0 %v3855_v13  ;;  %4751 = vmatprep.mubr.f32.mxu1 %v5739_v3  ;;  %v3837_v3 = vld [vmem:[%s6796_s3 + $0x3c0] sm:$0xff] }
  0xf5   : > { %4952 = vmatpush3.msra.mxu0 %v3855_v13  ;;  %4752 = vmatmul.mubr.f32.gmra.mxu1 %v6825_v4  ;;  %v6176_v62 = vpop.f32.mrf.mxu0  ;;  %v6178_v40 = vpop.f32.mrf.mxu1  ;;  %v2506_v13 = vld [vmem:[#allocation2 + $0x168] sm:$0xff] }
  0xf6   : > { %4831 = vmatprep.mubr.f32.mxu0 %v5975_v11  ;;  %4873 = vmatprep.subr.mxu1 %v3838_v51  ;;  %v3853_v11 = vld [vmem:[%s6796_s3 + $0x440] sm:$0xff] }
  0xf7   : > { %4832 = vmatmul.mubr.f32.gmra.mxu0 %v5978_v63  ;;  %4874 = vmatpush3.msra.mxu1 %v3838_v51  ;;  %v6185_v32 = vpop.f32.mrf.mxu0  ;;  %v3836_v63 = vld [vmem:[%s6796_s3 + $0x3b8] sm:$0xff]  ;;  %v3831_v51 = vld [vmem:[%s6796_s3 + $0x390] sm:$0xff] }
  0xf8   : > { %4953 = vmatprep.subr.mxu0 %v3854_v14  ;;  %4754 = vmatprep.mubr.f32.mxu1 %v5755_v20 }
  0xf9   : > { %4954 = vmatpush3.msra.mxu0 %v3854_v14  ;;  %4755 = vmatmul.mubr.f32.gmra.mxu1 %v5763_v27  ;;  %v6192_v43 = vpop.f32.mrf.mxu1  ;;  %v3852_v27 = vld [vmem:[%s6796_s3 + $0x438] sm:$0xff]  ;;  %v2507_v14 = vld [vmem:[#allocation2 + $0x170] sm:$0xff] }
  0xfa   : > { %4834 = vmatprep.mubr.f32.mxu0 %v5993_v25  ;;  %4875 = vmatprep.subr.mxu1 %v3837_v3 }
  0xfb   : > { %4835 = vmatmul.mubr.f32.gmra.mxu0 %v5996_v31  ;;  %4876 = vmatpush3.msra.mxu1 %v3837_v3  ;;  %v6199_v20 = vpop.f32.mrf.mxu0  ;;  %v6201_v7 = vpop.f32.mrf.mxu1  ;;  %v3835_v31 = vld [vmem:[%s6796_s3 + $0x3b0] sm:$0xff] }
  0xfc   : > { %4955 = vmatprep.subr.mxu0 %v3853_v11  ;;  %4757 = vmatprep.mubr.f32.mxu1 %v5771_v48  ;;  %v3847_v3 = vld [vmem:[%s6796_s3 + $0x410] sm:$0xff] }
  0xfd   : > { %4956 = vmatpush3.msra.mxu0 %v3853_v11  ;;  %4758 = vmatmul.mubr.f32.gmra.mxu1 %v5779_v18  ;;  %v6208_v25 = vpop.f32.mrf.mxu0  ;;  %v3851_v18 = vld [vmem:[%s6796_s3 + $0x430] sm:$0xff] }
  0xfe   : > { %4837 = vmatprep.mubr.f32.mxu0 %v6011_v21  ;;  %4877 = vmatprep.subr.mxu1 %v3836_v63 }
  0xff   : > { %4838 = vmatmul.mubr.f32.gmra.mxu0 %v6014_v29  ;;  %4878 = vmatpush3.msra.mxu1 %v3836_v63  ;;  %v6215_v48 = vpop.f32.mrf.mxu1  ;;  %v3830_v63 = vld [vmem:[%s6796_s3 + $0x388] sm:$0xff] }
 0x100   : > { %4957 = vmatprep.subr.mxu0 %v3852_v27  ;;  %4760 = vmatprep.mubr.f32.mxu1 %v5787_v33  ;;  %v3834_v33 = vld [vmem:[%s6796_s3 + $0x3a8] sm:$0xff] }
 0x101   : > { %4958 = vmatpush3.msra.mxu0 %v3852_v27  ;;  %4761 = vmatmul.mubr.f32.gmra.mxu1 %v5795_v37  ;;  %v6222_v21 = vpop.f32.mrf.mxu0  ;;  %v6224_v29 = vpop.f32.mrf.mxu1  ;;  %v3850_v37 = vld [vmem:[%s6796_s3 + $0x428] sm:$0xff] }
 0x102   : > { %4840 = vmatprep.mubr.f32.mxu0 %v6029_v57  ;;  %4879 = vmatprep.subr.mxu1 %v3835_v31 }
 0x103   : > { %4841 = vmatmul.mubr.f32.gmra.mxu0 %v6032_v22  ;;  %4880 = vmatpush3.msra.mxu1 %v3835_v31  ;;  %v6231_v58 = vpop.f32.mrf.mxu0  ;;  %v2502_v22 = vld [vmem:[#allocation2 + $0x138] sm:$0xff] }
 0x104   : > { %4959 = vmatprep.subr.mxu0 %v3851_v18  ;;  %4763 = vmatprep.mubr.f32.mxu1 %v5803_v8  ;;  %v3833_v8 = vld [vmem:[%s6796_s3 + $0x3a0] sm:$0xff] }
 0x105   : > { %4960 = vmatpush3.msra.mxu0 %v3851_v18  ;;  %4764 = vmatmul.mubr.f32.gmra.mxu1 %v5811_v52  ;;  %v6238_v57 = vpop.f32.mrf.mxu1  ;;  %v6296_v18 = vld [vmem:[#allocation2 + $0x182] sm:$0xff] }
 0x106   : > { %4843 = vmatprep.mubr.f32.mxu0 %v6047_v56  ;;  %4881 = vmatprep.subr.mxu1 %v3834_v33  ;;  %v3849_v56 = vld [vmem:[%s6796_s3 + $0x420] sm:$0xff] }
 0x107   : > { %4844 = vmatmul.mubr.f32.gmra.mxu0 %v6050_v10  ;;  %4882 = vmatpush3.msra.mxu1 %v3834_v33  ;;  %v6245_v41 = vpop.f32.mrf.mxu0  ;;  %v6247_v52 = vpop.f32.mrf.mxu1  ;;  %v5087_v33 = vld [vmem:[#allocation2 + $0x180] sm:$0xff] }
 0x108   : > { %4961 = vmatprep.subr.mxu0 %v3850_v37  ;;  %4766 = vmatprep.mubr.f32.mxu1 %v5819_v16 }
 0x109   : > { %4962 = vmatpush3.msra.mxu0 %v3850_v37  ;;  %4767 = vmatmul.mubr.f32.gmra.mxu1 %v6826_v59  ;;  %v6254_v10 = vpop.f32.mrf.mxu0  ;;  %v6298_v37 = vld [vmem:[#allocation2 + $0x18a] sm:$0xff]  ;;  %v3845_v59 = vld [vmem:[%s6796_s3 + $0x400] sm:$0xff] }
 0x10a   : > { %4846 = vmatprep.mubr.f32.mxu0 %v2502_v22  ;;  %4883 = vmatprep.subr.mxu1 %v3833_v8  ;;  %v5088_v22 = vld [vmem:[#allocation2 + $0x188] sm:$0xff] }
 0x10b   : > { %4847 = vmatmul.mubr.f32.gmra.mxu0 %v2503_v46  ;;  %4884 = vmatpush3.msra.mxu1 %v3833_v8  ;;  %v6259_v16 = vpop.f32.mrf.mxu1 }
 0x10c   : > { %4963 = vmatprep.subr.mxu0 %v3849_v56  ;;  %4769 = vmatprep.mubr.f32.mxu1 %v6827_v36 }
 0x10d   : > { %4964 = vmatpush3.msra.mxu0 %v3849_v56  ;;  %4770 = vmatmul.mubr.f32.gmra.mxu1 %v6828_v0  ;;  %v6266_v55 = vpop.f32.mrf.mxu0  ;;  %v6268_v19 = vpop.f32.mrf.mxu1  ;;  %v2786_v56 = vld [vmem:[#allocation2 + $0x31] sm:$0xff]  ;;  %v2788_v0 = vld [vmem:[#allocation2 + $0x49] sm:$0xff] }
 0x10e   : > { %4849 = vmatprep.mubr.f32.mxu0 %v2504_v28  ;;  %4885 = vmatprep.subr.mxu1 %v3832_v23  ;;  %v2787_v28 = vld [vmem:[#allocation2 + $0x39] sm:$0xff] }
 0x10f   : > { %4850 = vmatmul.mubr.f32.gmra.mxu0 %v2505_v60  ;;  %4886 = vmatpush3.msra.mxu1 %v3832_v23  ;;  %v6273_v4 = vpop.f32.mrf.mxu0  ;;  %v6829_v23 = vld [vmem:[#allocation11_spill] sm:$0xff] }
 0x110   : > { %4965 = vmatprep.subr.mxu0 %v3848_v24  ;;  %4772 = vmatprep.mubr.f32.mxu1 %v5852_v50  ;;  %v3092_v60 = vld [vmem:[#allocation2 + $0x32] sm:$0xff] }
 0x111   : > { %4966 = vmatpush3.msra.mxu0 %v3848_v24  ;;  %4773 = vmatmul.mubr.f32.gmra.mxu1 %v5863_v39  ;;  %v6280_v11 = vpop.f32.mrf.mxu1  ;;  %v3846_v39 = vld [vmem:[%s6796_s3 + $0x408] sm:$0xff]  ;;  %v3093_v24 = vld [vmem:[#allocation2 + $0x3a] sm:$0xff] }
 0x112   : > { %4852 = vmatprep.mubr.f32.mxu0 %v2506_v13  ;;  %4887 = vmatprep.subr.mxu1 %v3831_v51 }
 0x113   : > { %4853 = vmatmul.mubr.f32.gmra.mxu0 %v2507_v14  ;;  %4888 = vmatpush3.msra.mxu1 %v3831_v51  ;;  %v6285_v27 = vpop.f32.mrf.mxu0  ;;  %v6287_v50 = vpop.f32.mrf.mxu1  ;;  %v3094_v51 = vld [vmem:[#allocation2 + $0x4a] sm:$0xff] }
 0x114   : > { %4967 = vmatprep.subr.mxu0 %v3847_v3  ;;  %4775 = vmatprep.mubr.f32.mxu1 %v5873_v49 }
 0x115   : > { %4968 = vmatpush3.msra.mxu0 %v3847_v3  ;;  %4776 = vmatmul.mubr.f32.gmra.mxu1 %v5883_v54  ;;  %v6294_v31 = vpop.f32.mrf.mxu0  ;;  %v3829_v54 = vld [vmem:[%s6796_s3 + $0x380] sm:$0xff] }
 0x116   : > { %4855 = vmatprep.mubr.f32.mxu0 %v5087_v33  ;;  %4889 = vmatprep.subr.mxu1 %v3830_v63 }
 0x117   : > { %4856 = vmatmul.mubr.f32.gmra.mxu0 %v5088_v22  ;;  %4890 = vmatpush3.msra.mxu1 %v3830_v63  ;;  %v6300_v49 = vpop.f32.mrf.mxu1  ;;  %v2790_v63 = vld [vmem:[#allocation2 + $0x61] sm:$0xff]  ;;  %v3095_v22 = vld [vmem:[#allocation2 + $0x52] sm:$0xff] }
 0x118   : > { %4969 = vmatprep.subr.mxu0 %v3846_v39  ;;  %4778 = vmatprep.mubr.f32.mxu1 %v6296_v18 }
 0x119   : > { %4970 = vmatpush3.msra.mxu0 %v3846_v39  ;;  %4779 = vmatmul.mubr.f32.gmra.mxu1 %v6298_v37  ;;  %v6307_v8 = vpop.f32.mrf.mxu0  ;;  %v6309_v46 = vpop.f32.mrf.mxu1 }
 0x11a   : > { %5134 = vmatprep.mubr.msk.f32.mxu0 %vm5631_vm1, %v5878_v9  ;;  %4891 = vmatprep.subr.mxu1 %v3829_v54 }
 0x11b   : > { %4859 = vmatmul.mubr.f32.gmra.mxu0 %v6829_v23  ;;  %4892 = vmatpush3.msra.mxu1 %v3829_v54  ;;  %v6318_v36 = vpop.f32.mrf.mxu0  ;;  %v2791_v23 = vld [vmem:[#allocation2 + $0x69] sm:$0xff] }
 0x11c   : > { %4971 = vmatprep.subr.mxu0 %v3845_v59  ;;  %4893 = vmatprep.mubr.f32.mxu1 %v2786_v56  ;;  %v3096_v56 = vld [vmem:[#allocation2 + $0x62] sm:$0xff] }
 0x11d   : > { %4972 = vmatpush3.msra.mxu0 %v3845_v59  ;;  %v4415_v13 = vpop.f32.mrf.mxu1  ;;  %4894 = vmatmul.mubr.f32.vlgmr.msra.gmra.mxu1 %v2787_v28 }
 0x11e   : > { %v1102_v14 = vadd.f32 %v4415_v13, %v6155_v15  ;;  %4973 = vmatprep.mubr.f32.mxu0 %v3092_v60  ;;  %4896 = vmatprep.mubr.f32.mxu1 %v2788_v0 }
 0x11f   : > { %v4495_v9 = vpop.f32.mrf.mxu0  ;;  %4974 = vmatmul.mubr.f32.vlgmr.msra.gmra.mxu0 %v3093_v24  ;;  %v1096_v3 = vpop.f32.mrf.mxu1  ;;  %v2792_v24 = vld [vmem:[#allocation2 + $0x79] sm:$0xff] }
 0x120   : > { %v6321_v39 = vadd.f32 %v4495_v9, %v1102_v14  ;;  %v1097_v33 = vadd.f32 %v1096_v3, %v6164_v53  ;;  %4976 = vmatprep.mubr.f32.mxu0 %v3094_v51  ;;  %v3097_v51 = vld [vmem:[#allocation2 + $0x6a] sm:$0xff] }
 0x121   : > { %v1370_v54 = vpop.f32.mrf.mxu0  ;;  %v4418_v59 = vpop.f32.mrf.mxu1  ;;  %4897 = vmatmul.mubr.f32.gmra.mxu1 %v2789_v42  ;;  %v3098_v42 = vld [vmem:[#allocation2 + $0x7a] sm:$0xff] }
 0x122   : > { %v6324_v28 = vadd.f32 %v1370_v54, %v1097_v33  ;;  %v1112_v15 = vadd.f32 %v4418_v59, %v6176_v62  ;;  %4899 = vmatprep.mubr.f32.mxu1 %v2790_v63  ;;  %v2793_v63 = vld [vmem:[#allocation2 + $0x81] sm:$0xff]  ;;  %v2794_v54 = vld [vmem:[#allocation2 + $0x91] sm:$0xff] }
 0x123   : > { %v4498_v60 = vpop.f32.mrf.mxu0  ;;  %4977 = vmatmul.mubr.f32.gmra.mxu0 %v3095_v22  ;;  %v1106_v0 = vpop.f32.mrf.mxu1 }
 0x124   : > { %v6327_v13 = vadd.f32 %v4498_v60, %v1112_v15  ;;  %v1107_v53 = vadd.f32 %v1106_v0, %v6185_v32  ;;  %4979 = vmatprep.mubr.f32.mxu0 %v3096_v56  ;;  %v3099_v56 = vld [vmem:[#allocation2 + $0x82] sm:$0xff] }
 0x125   : > { %v1380_v14 = vpop.f32.mrf.mxu0  ;;  %v4421_v9 = vpop.f32.mrf.mxu1  ;;  %4900 = vmatmul.mubr.f32.gmra.mxu1 %v2791_v23  ;;  %v3100_v23 = vld [vmem:[#allocation2 + $0x92] sm:$0xff] }
 0x126   : > { %v6330_v3 = vadd.f32 %v1380_v14, %v1107_v53  ;;  %v1122_v62 = vadd.f32 %v4421_v9, %v6199_v20  ;;  %4902 = vmatprep.mubr.f32.mxu1 %v2792_v24  ;;  %v2795_v24 = vld [vmem:[#allocation2 + $0x99] sm:$0xff]  ;;  %v2796_v14 = vld [vmem:[#allocation2 + $0xa9] sm:$0xff] }
 0x127   : > { %v4501_v33 = vpop.f32.mrf.mxu0  ;;  %4980 = vmatmul.mubr.f32.gmra.mxu0 %v3097_v51  ;;  %v1116_v22 = vpop.f32.mrf.mxu1 }
 0x128   : > { %v6333_v59 = vadd.f32 %v4501_v33, %v1122_v62  ;;  %v1117_v32 = vadd.f32 %v1116_v22, %v6208_v25  ;;  %4982 = vmatprep.mubr.f32.mxu0 %v3098_v42  ;;  %v3101_v42 = vld [vmem:[#allocation2 + $0x9a] sm:$0xff] }
 0x129   : > { %v1390_v15 = vpop.f32.mrf.mxu0  ;;  %v4424_v60 = vpop.f32.mrf.mxu1  ;;  %4903 = vmatmul.mubr.f32.gmra.mxu1 %v2793_v63  ;;  %v3102_v63 = vld [vmem:[#allocation2 + $0xaa] sm:$0xff] }
 0x12a   : > { %v6336_v0 = vadd.f32 %v1390_v15, %v1117_v32  ;;  %v1132_v20 = vadd.f32 %v4424_v60, %v6222_v21  ;;  %4905 = vmatprep.mubr.f32.mxu1 %v2794_v54  ;;  %v2797_v54 = vld [vmem:[#allocation2 + $0xb1] sm:$0xff] }
 0x12b   : > { %v4504_v53 = vpop.f32.mrf.mxu0  ;;  %4983 = vmatmul.mubr.f32.gmra.mxu0 %v3099_v56  ;;  %v1126_v51 = vpop.f32.mrf.mxu1 }
 0x12c   : > { %v6339_v9 = vadd.f32 %v4504_v53, %v1132_v20  ;;  %v1127_v25 = vadd.f32 %v1126_v51, %v6231_v58  ;;  %4985 = vmatprep.mubr.f32.mxu0 %v3100_v23  ;;  %v3103_v58 = vld [vmem:[#allocation2 + $0xb2] sm:$0xff] }
 0x12d   : > { %v1400_v62 = vpop.f32.mrf.mxu0  ;;  %v4427_v33 = vpop.f32.mrf.mxu1  ;;  %4906 = vmatmul.mubr.f32.gmra.mxu1 %v2795_v24  ;;  %v3104_v24 = vld [vmem:[#allocation2 + $0xc2] sm:$0xff] }
 0x12e   : > { %v6342_v22 = vadd.f32 %v1400_v62, %v1127_v25  ;;  %v1142_v21 = vadd.f32 %v4427_v33, %v6245_v41  ;;  %4908 = vmatprep.mubr.f32.mxu1 %v2796_v14 }
 0x12f   : > { %v4507_v32 = vpop.f32.mrf.mxu0  ;;  %4986 = vmatmul.mubr.f32.gmra.mxu0 %v3101_v42  ;;  %v1136_v56 = vpop.f32.mrf.mxu1 }
 0x130   : > { %v6345_v15 = vadd.f32 %v4507_v32, %v1142_v21  ;;  %v1137_v60 = vadd.f32 %v1136_v56, %v6254_v10  ;;  %4988 = vmatprep.mubr.f32.mxu0 %v3102_v63  ;;  %v3105_v10 = vld [vmem:[#allocation2 + $0xca] sm:$0xff]  ;;  %v3106_v63 = vld [vmem:[#allocation2 + $0xda] sm:$0xff]  ;;  %v3107_v56 = vld [vmem:[#allocation2 + $0xe2] sm:$0xff] }
 0x131   : > { %v1410_v23 = vpop.f32.mrf.mxu0  ;;  %v4430_v20 = vpop.f32.mrf.mxu1  ;;  %4909 = vmatmul.mubr.f32.gmra.mxu1 %v2797_v54 }
 0x132   : > { %v6348_v53 = vadd.f32 %v1410_v23, %v1137_v60  ;;  %v1152_v51 = vadd.f32 %v4430_v20, %v6266_v55  ;;  %4911 = vmatprep.mubr.f32.mxu1 %v5981_v6 }
 0x133   : > { %v4510_v41 = vpop.f32.mrf.mxu0  ;;  %4989 = vmatmul.mubr.f32.gmra.mxu0 %v3103_v58  ;;  %v1146_v14 = vpop.f32.mrf.mxu1 }
 0x134   : > { %v6352_v25 = vadd.f32 %v4510_v41, %v1152_v51  ;;  %v1147_v42 = vadd.f32 %v1146_v14, %v6273_v4  ;;  %4991 = vmatprep.mubr.f32.mxu0 %v3104_v24  ;;  %v3109_v51 = vld [vmem:[#allocation2 + $0xfa] sm:$0xff] }
 0x135   : > { %v1420_v62 = vpop.f32.mrf.mxu0  ;;  %v4433_v33 = vpop.f32.mrf.mxu1  ;;  %4912 = vmatmul.mubr.f32.gmra.mxu1 %v5987_v38  ;;  %v3108_v38 = vld [vmem:[#allocation2 + $0xf2] sm:$0xff] }
 0x136   : > { %v6356_v21 = vadd.f32 %v1420_v62, %v1147_v42  ;;  %v1162_v55 = vadd.f32 %v4433_v33, %v6285_v27  ;;  %4914 = vmatprep.mubr.f32.mxu1 %v5999_v45  ;;  %v3111_v33 = vld [vmem:[#allocation2 + $0x112] sm:$0xff] }
 0x137   : > { %v4513_v6 = vpop.f32.mrf.mxu0  ;;  %4992 = vmatmul.mubr.f32.gmra.mxu0 %v3105_v10  ;;  %v1156_v54 = vpop.f32.mrf.mxu1 }
 0x138   : > { %v6360_v32 = vadd.f32 %v4513_v6, %v1162_v55  ;;  %v1157_v4 = vadd.f32 %v1156_v54, %v6294_v31  ;;  %4994 = vmatprep.mubr.f32.mxu0 %v3106_v63 }
 0x139   : > { %v1430_v60 = vpop.f32.mrf.mxu0  ;;  %v4436_v58 = vpop.f32.mrf.mxu1  ;;  %4915 = vmatmul.mubr.f32.gmra.mxu1 %v6005_v1  ;;  %v3110_v1 = vld [vmem:[#allocation2 + $0x10a] sm:$0xff] }
 0x13a   : > { %v6364_v23 = vadd.f32 %v1430_v60, %v1157_v4  ;;  %v1172_v27 = vadd.f32 %v4436_v58, %v6307_v8  ;;  %4917 = vmatprep.mubr.f32.mxu1 %v6017_v17  ;;  %v2808_v4 = vld [vmem:[#allocation2 + $0x139] sm:$0xff]  ;;  %v3113_v60 = vld [vmem:[#allocation2 + $0x12a] sm:$0xff] }
 0x13b   : > { %v4516_v45 = vpop.f32.mrf.mxu0  ;;  %4995 = vmatmul.mubr.f32.gmra.mxu0 %v3107_v56  ;;  %v1166_v20 = vpop.f32.mrf.mxu1 }
 0x13c   : > { %v6368_v24 = vadd.f32 %v4516_v45, %v1172_v27  ;;  %v1167_v31 = vadd.f32 %v1166_v20, %v6318_v36  ;;  %4997 = vmatprep.mubr.f32.mxu0 %v3108_v38 }
 0x13d   : > { %v1440_v41 = vpop.f32.mrf.mxu0  ;;  %v4439_v14 = vpop.f32.mrf.mxu1  ;;  %4918 = vmatmul.mubr.f32.gmra.mxu1 %v6023_v30  ;;  %v3112_v30 = vld [vmem:[#allocation2 + $0x122] sm:$0xff] }
 0x13e   : > { %v6372_v42 = vadd.f32 %v1440_v41, %v1167_v31  ;;  %v1182_v8 = vadd.f32 %v4439_v14, %v6150_v44  ;;  %4920 = vmatprep.mubr.f32.mxu1 %v6035_v5  ;;  %v2810_v31 = vld [vmem:[#allocation2 + $0x151] sm:$0xff]  ;;  %v3115_v41 = vld [vmem:[#allocation2 + $0x142] sm:$0xff] }
 0x13f   : > { %v4519_v17 = vpop.f32.mrf.mxu0  ;;  %4998 = vmatmul.mubr.f32.gmra.mxu0 %v3109_v51  ;;  %v1176_v10 = vpop.f32.mrf.mxu1 }
 0x140   : > { %v6376_v62 = vadd.f32 %v4519_v17, %v1182_v8  ;;  %v1177_v36 = vadd.f32 %v1176_v10, %v6158_v26  ;;  %5000 = vmatprep.mubr.f32.mxu0 %v3110_v1  ;;  %v2811_v17 = vld [vmem:[#allocation2 + $0x159] sm:$0xff] }
 0x141   : > { %v1450_v63 = vpop.f32.mrf.mxu0  ;;  %v4442_v55 = vpop.f32.mrf.mxu1  ;;  %4921 = vmatmul.mubr.f32.gmra.mxu1 %v6041_v47  ;;  %v3114_v47 = vld [vmem:[#allocation2 + $0x13a] sm:$0xff] }
 0x142   : > { %v6380_v6 = vadd.f32 %v1450_v63, %v1177_v36  ;;  %v1192_v44 = vadd.f32 %v4442_v55, %v6169_v35  ;;  %4923 = vmatprep.mubr.f32.mxu1 %v6053_v12  ;;  %v2809_v12 = vld [vmem:[#allocation2 + $0x141] sm:$0xff] }
 0x143   : > { %v4522_v5 = vpop.f32.mrf.mxu0  ;;  %5001 = vmatmul.mubr.f32.gmra.mxu0 %v3111_v33  ;;  %v1186_v54 = vpop.f32.mrf.mxu1  ;;  %v2812_v33 = vld [vmem:[#allocation2 + $0x169] sm:$0xff]  ;;  %v3117_v55 = vld [vmem:[#allocation2 + $0x15a] sm:$0xff] }
 0x144   : > { %v6384_v56 = vadd.f32 %v4522_v5, %v1192_v44  ;;  %v1187_v26 = vadd.f32 %v1186_v54, %v6178_v40  ;;  %5003 = vmatprep.mubr.f32.mxu0 %v3112_v30  ;;  %v3118_v5 = vld [vmem:[#allocation2 + $0x16a] sm:$0xff] }
 0x145   : > { %v1460_v58 = vpop.f32.mrf.mxu0  ;;  %v4445_v38 = vpop.f32.mrf.mxu1  ;;  %4924 = vmatmul.mubr.f32.gmra.mxu1 %v6059_v34  ;;  %v3116_v34 = vld [vmem:[#allocation2 + $0x152] sm:$0xff] }
 0x146   : > { %v6388_v27 = vadd.f32 %v1460_v58, %v1187_v26  ;;  %v1202_v35 = vadd.f32 %v4445_v38, %v6192_v43  ;;  %4926 = vmatprep.mubr.f32.mxu1 %v2808_v4  ;;  %v2813_v4 = vld [vmem:[#allocation2 + $0x171] sm:$0xff] }
 0x147   : > { %v4525_v45 = vpop.f32.mrf.mxu0  ;;  %5004 = vmatmul.mubr.f32.gmra.mxu0 %v3113_v60  ;;  %v1196_v20 = vpop.f32.mrf.mxu1 }
 0x148   : > { %v6391_v51 = vadd.f32 %v4525_v45, %v1202_v35  ;;  %v1197_v40 = vadd.f32 %v1196_v20, %v6201_v7  ;;  %5006 = vmatprep.mubr.f32.mxu0 %v3114_v47 }
 0x149   : > { %v1470_v14 = vpop.f32.mrf.mxu0  ;;  %v4448_v1 = vpop.f32.mrf.mxu1  ;;  %4927 = vmatmul.mubr.f32.gmra.mxu1 %v2809_v12 }
 0x14a   : > { %v6394_v8 = vadd.f32 %v1470_v14, %v1197_v40  ;;  %v1212_v43 = vadd.f32 %v4448_v1, %v6215_v48  ;;  %4929 = vmatprep.mubr.f32.mxu1 %v2810_v31  ;;  %v2816_v31 = vld [vmem:[#allocation2 + $0x199] sm:$0xff] }
 0x14b   : > { %v4528_v10 = vpop.f32.mrf.mxu0  ;;  %5007 = vmatmul.mubr.f32.gmra.mxu0 %v3115_v41  ;;  %v1206_v36 = vpop.f32.mrf.mxu1  ;;  %v3122_v1 = vld [vmem:[#allocation2 + $0x19a] sm:$0xff] }
 0x14c   : > { %v6397_v63 = vadd.f32 %v4528_v10, %v1212_v43  ;;  %v1207_v7 = vadd.f32 %v1206_v36, %v6224_v29  ;;  %5009 = vmatprep.mubr.f32.mxu0 %v3116_v34  ;;  %v3119_v29 = vld [vmem:[#allocation2 + $0x172] sm:$0xff] }
 0x14d   : > { %v1480_v30 = vpop.f32.mrf.mxu0  ;;  %v4451_v44 = vpop.f32.mrf.mxu1  ;;  %4930 = vmatmul.mubr.f32.gmra.mxu1 %v2811_v17 }
 0x14e   : > { %v6400_v54 = vadd.f32 %v1480_v30, %v1207_v7  ;;  %v1222_v48 = vadd.f32 %v4451_v44, %v6238_v57  ;;  %4932 = vmatprep.mubr.f32.mxu1 %v2812_v33 }
 0x14f   : > { %v4531_v26 = vpop.f32.mrf.mxu0  ;;  %5010 = vmatmul.mubr.f32.gmra.mxu0 %v3117_v55  ;;  %v1216_v60 = vpop.f32.mrf.mxu1 }
 0x150   : > { %v6403_v58 = vadd.f32 %v4531_v26, %v1222_v48  ;;  %v1217_v38 = vadd.f32 %v1216_v60, %v6247_v52  ;;  %5012 = vmatprep.mubr.f32.mxu0 %v3118_v5 }
 0x151   : > { %v1490_v47 = vpop.f32.mrf.mxu0  ;;  %v4454_v35 = vpop.f32.mrf.mxu1  ;;  %4933 = vmatmul.mubr.f32.gmra.mxu1 %v2813_v4 }
 0x152   : > { %v6406_v12 = vadd.f32 %v1490_v47, %v1217_v38  ;;  %v1232_v45 = vadd.f32 %v4454_v35, %v6259_v16  ;;  %4935 = vmatprep.mubr.f32.mxu1 %v6094_v2  ;;  %v2817_v2 = vld [vmem:[#allocation2 + $0x1a1] sm:$0xff] }
 0x153   : > { %v4534_v57 = vpop.f32.mrf.mxu0  ;;  %5013 = vmatmul.mubr.f32.gmra.mxu0 %v3119_v29  ;;  %v1226_v20 = vpop.f32.mrf.mxu1 }
 0x154   : > { %v6410_v40 = vadd.f32 %v4534_v57, %v1232_v45  ;;  %v1227_v41 = vadd.f32 %v1226_v20, %v6268_v19  ;;  %5015 = vmatprep.mubr.f32.mxu0 %v6296_v18  ;;  %v3123_v18 = vld [vmem:[#allocation2 + $0x1a2] sm:$0xff] }
 0x155   : > { %v1500_v52 = vpop.f32.mrf.mxu0  ;;  %v4457_v14 = vpop.f32.mrf.mxu1  ;;  %4936 = vmatmul.mubr.f32.gmra.mxu1 %v6102_v61 }
 0x156   : > { %v6415_v34 = vadd.f32 %v1500_v52, %v1227_v41  ;;  %v1242_v16 = vadd.f32 %v4457_v14, %v6280_v11  ;;  %4938 = vmatprep.mubr.f32.mxu1 %v2816_v31 }
 0x157   : > { %v4537_v43 = vpop.f32.mrf.mxu0  ;;  %5016 = vmatmul.mubr.f32.gmra.mxu0 %v6298_v37  ;;  %v1236_v17 = vpop.f32.mrf.mxu1 }
 0x158   : > { %v6419_v10 = vadd.f32 %v4537_v43, %v1242_v16  ;;  %v1237_v19 = vadd.f32 %v1236_v17, %v6287_v50  ;;  %5018 = vmatprep.mubr.f32.mxu0 %v3122_v1 }
 0x159   : > { %v1510_v36 = vpop.f32.mrf.mxu0  ;;  %v4460_v33 = vpop.f32.mrf.mxu1  ;;  %4939 = vmatmul.mubr.f32.gmra.mxu1 %v2817_v2 }
 0x15a   : > { %v6422_v61 = vadd.f32 %v1510_v36, %v1237_v19  ;;  %v1252_v7 = vadd.f32 %v4460_v33, %v6300_v49 }
 0x15b   : > { %v4540_v11 = vpop.f32.mrf.mxu0  ;;  %5019 = vmatmul.mubr.f32.gmra.mxu0 %v3123_v18  ;;  %v1246_v55 = vpop.f32.mrf.mxu1 }
 0x15c   : > { %v6425_v30 = vadd.f32 %v4540_v11, %v1252_v7  ;;  %v1247_v37 = vadd.f32 %v1246_v55, %v6309_v46 }
 0x15d   : > { %v1520_v44 = vpop.f32.mrf.mxu0  ;;  %v4575_v5 = vpop.f32.mrf.mxu1 }
 0x15e   : > { %v6428_v48 = vadd.f32 %v1520_v44, %v1247_v37  ;;  %v1836_v50 = vadd.f32 %v4575_v5, %v6321_v39 }
 0x15f   : > { %v4655_v4 = vpop.f32.mrf.mxu0  ;;  %v1676_v26 = vpop.f32.mrf.mxu1 }
 0x160   : > { %v6431_v60 = vadd.f32 %v4655_v4, %v1836_v50  ;;  %v1835_v38 = vadd.f32 %v1676_v26, %v6324_v28 }
 0x161   : > { %v1982_v49 = vpop.f32.mrf.mxu0  ;;  %v4578_v29 = vpop.f32.mrf.mxu1 }
 0x162   : > { %v6434_v47 = vadd.f32 %v1982_v49, %v1835_v38  ;;  %v1838_v35 = vadd.f32 %v4578_v29, %v6327_v13 }
 0x163   : > { %v4658_v45 = vpop.f32.mrf.mxu0  ;;  %v1686_v46 = vpop.f32.mrf.mxu1 }
 0x164   : > { %v6437_v57 = vadd.f32 %v4658_v45, %v1838_v35  ;;  %v1837_v20 = vadd.f32 %v1686_v46, %v6330_v3 }
 0x165   : > { %v1992_v31 = vpop.f32.mrf.mxu0  ;;  %v4581_v39 = vpop.f32.mrf.mxu1 }
 0x166   : > { %v6440_v41 = vadd.f32 %v1992_v31, %v1837_v20  ;;  %v1840_v52 = vadd.f32 %v4581_v39, %v6333_v59 }
 0x167   : > { %v4661_v14 = vpop.f32.mrf.mxu0  ;;  %v1696_v28 = vpop.f32.mrf.mxu1 }
 0x168   : > { %v6443_v1 = vadd.f32 %v4661_v14, %v1840_v52  ;;  %v1839_v16 = vadd.f32 %v1696_v28, %v6336_v0 }
 0x169   : > { %v2002_v2 = vpop.f32.mrf.mxu0  ;;  %v4584_v13 = vpop.f32.mrf.mxu1 }
 0x16a   : > { %v6446_v43 = vadd.f32 %v2002_v2, %v1839_v16  ;;  %v1842_v17 = vadd.f32 %v4584_v13, %v6339_v9 }
 0x16b   : > { %v4664_v19 = vpop.f32.mrf.mxu0  ;;  %v1706_v3 = vpop.f32.mrf.mxu1 }
 0x16c   : > { %v6449_v18 = vadd.f32 %v4664_v19, %v1842_v17  ;;  %v1841_v36 = vadd.f32 %v1706_v3, %v6342_v22 }
 0x16d   : > { %v2012_v33 = vpop.f32.mrf.mxu0  ;;  %v4587_v59 = vpop.f32.mrf.mxu1 }
 0x16e   : > { %v6452_v7 = vadd.f32 %v2012_v33, %v1841_v36  ;;  %v1844_v11 = vadd.f32 %v4587_v59, %v6345_v15 }
 0x16f   : > { %v4667_v55 = vpop.f32.mrf.mxu0  ;;  %v1716_v0 = vpop.f32.mrf.mxu1 }
 0x170   : > { %v6455_v37 = vadd.f32 %v4667_v55, %v1844_v11  ;;  %v1843_v44 = vadd.f32 %v1716_v0, %v6348_v53 }
 0x171   : > { %v2022_v5 = vpop.f32.mrf.mxu0  ;;  %v4590_v9 = vpop.f32.mrf.mxu1 }
 0x172   : > { %v6458_v50 = vadd.f32 %v2022_v5, %v1843_v44  ;;  %v1846_v4 = vadd.f32 %v4590_v9, %v6352_v25 }
 0x173   : > { %v4670_v26 = vpop.f32.mrf.mxu0  ;;  %v1726_v22 = vpop.f32.mrf.mxu1 }
 0x174   : > { %v6461_v38 = vadd.f32 %v4670_v26, %v1846_v4  ;;  %v1845_v49 = vadd.f32 %v1726_v22, %v6356_v21 }
 0x175   : > { %v2032_v29 = vpop.f32.mrf.mxu0  ;;  %v4593_v15 = vpop.f32.mrf.mxu1 }
 0x176   : > { %v6464_v35 = vadd.f32 %v2032_v29, %v1845_v49  ;;  %v1848_v45 = vadd.f32 %v4593_v15, %v6360_v32 }
 0x177   : > { %v4673_v46 = vpop.f32.mrf.mxu0  ;;  %v1736_v53 = vpop.f32.mrf.mxu1 }
 0x178   : > { %v6467_v20 = vadd.f32 %v4673_v46, %v1848_v45  ;;  %v1847_v31 = vadd.f32 %v1736_v53, %v6364_v23 }
 0x179   : > { %v2042_v39 = vpop.f32.mrf.mxu0  ;;  %v4596_v25 = vpop.f32.mrf.mxu1 }
 0x17a   : > { %v6470_v52 = vadd.f32 %v2042_v39, %v1847_v31  ;;  %v1850_v14 = vadd.f32 %v4596_v25, %v6368_v24 }
 0x17b   : > { %v4676_v28 = vpop.f32.mrf.mxu0  ;;  %v1746_v21 = vpop.f32.mrf.mxu1 }
 0x17c   : > { %v6473_v16 = vadd.f32 %v4676_v28, %v1850_v14  ;;  %v1849_v2 = vadd.f32 %v1746_v21, %v6372_v42 }
 0x17d   : > { %v2052_v13 = vpop.f32.mrf.mxu0  ;;  %v4599_v32 = vpop.f32.mrf.mxu1 }
 0x17e   : > { %v6476_v17 = vadd.f32 %v2052_v13, %v1849_v2  ;;  %v1852_v19 = vadd.f32 %v4599_v32, %v6376_v62 }
 0x17f   : > { %v4679_v3 = vpop.f32.mrf.mxu0  ;;  %v1756_v23 = vpop.f32.mrf.mxu1 }
 0x180   : > { %v6479_v36 = vadd.f32 %v4679_v3, %v1852_v19  ;;  %v1851_v33 = vadd.f32 %v1756_v23, %v6380_v6 }
 0x181   : > { %v2062_v59 = vpop.f32.mrf.mxu0  ;;  %v4602_v24 = vpop.f32.mrf.mxu1 }
 0x182   : > { %v6482_v11 = vadd.f32 %v2062_v59, %v1851_v33  ;;  %v1854_v55 = vadd.f32 %v4602_v24, %v6384_v56 }
 0x183   : > { %v4682_v0 = vpop.f32.mrf.mxu0  ;;  %v1766_v42 = vpop.f32.mrf.mxu1 }
 0x184   : > { %v6485_v44 = vadd.f32 %v4682_v0, %v1854_v55  ;;  %v1853_v5 = vadd.f32 %v1766_v42, %v6388_v27 }
 0x185   : > { %v2072_v9 = vpop.f32.mrf.mxu0  ;;  %v4605_v62 = vpop.f32.mrf.mxu1 }
 0x186   : > { %6830 = vst [vmem:[#allocation3_spill] sm:$0xff] %v6485_v44  ;;  %v6488_v4 = vadd.f32 %v2072_v9, %v1853_v5  ;;  %v1856_v26 = vadd.f32 %v4605_v62, %v6391_v51 }
 0x187   : > { %v4685_v22 = vpop.f32.mrf.mxu0  ;;  %v1776_v6 = vpop.f32.mrf.mxu1 }
 0x188   : > { %6831 = vst [vmem:[#allocation4_spill] sm:$0xff] %v6488_v4  ;;  %v6491_v49 = vadd.f32 %v4685_v22, %v1856_v26  ;;  %v1855_v29 = vadd.f32 %v1776_v6, %v6394_v8 }
 0x189   : > { %v2082_v15 = vpop.f32.mrf.mxu0  ;;  %v4608_v56 = vpop.f32.mrf.mxu1 }
 0x18a   : > { %6832 = vst [vmem:[#allocation5_spill] sm:$0xff] %v6491_v49  ;;  %v6494_v45 = vadd.f32 %v2082_v15, %v1855_v29  ;;  %v1858_v46 = vadd.f32 %v4608_v56, %v6397_v63 }
 0x18b   : > { %v4688_v53 = vpop.f32.mrf.mxu0  ;;  %v1786_v27 = vpop.f32.mrf.mxu1 }
 0x18c   : > { %6833 = vst [vmem:[#allocation6_spill] sm:$0xff] %v6494_v45  ;;  %v6497_v31 = vadd.f32 %v4688_v53, %v1858_v46  ;;  %v1857_v39 = vadd.f32 %v1786_v27, %v6400_v54 }
 0x18d   : > { %v2092_v25 = vpop.f32.mrf.mxu0  ;;  %v4611_v51 = vpop.f32.mrf.mxu1 }
 0x18e   : > { %6834 = vst [vmem:[#allocation7_spill] sm:$0xff] %v6497_v31  ;;  %v6500_v14 = vadd.f32 %v2092_v25, %v1857_v39  ;;  %v1860_v28 = vadd.f32 %v4611_v51, %v6403_v58 }
 0x18f   : > { %v4691_v21 = vpop.f32.mrf.mxu0  ;;  %v1796_v8 = vpop.f32.mrf.mxu1 }
 0x190   : > { %6835 = vst [vmem:[#allocation8_spill] sm:$0xff] %v6500_v14  ;;  %v6503_v2 = vadd.f32 %v4691_v21, %v1860_v28  ;;  %v1859_v13 = vadd.f32 %v1796_v8, %v6406_v12 }
 0x191   : > { %v2102_v32 = vpop.f32.mrf.mxu0  ;;  %v4614_v63 = vpop.f32.mrf.mxu1 }
 0x192   : > { %6836 = vst [vmem:[#allocation9_spill] sm:$0xff] %v6503_v2  ;;  %v6506_v19 = vadd.f32 %v2102_v32, %v1859_v13  ;;  %v1862_v3 = vadd.f32 %v4614_v63, %v6410_v40 }
 0x193   : > { %v4694_v23 = vpop.f32.mrf.mxu0  ;;  %v1806_v54 = vpop.f32.mrf.mxu1 }
 0x194   : > { %6837 = vst [vmem:[#allocation10_spill] sm:$0xff] %v6506_v19  ;;  %v6509_v33 = vadd.f32 %v4694_v23, %v1862_v3  ;;  %v1861_v59 = vadd.f32 %v1806_v54, %v6415_v34 }
 0x195   : > { %v2112_v24 = vpop.f32.mrf.mxu0  ;;  %v4617_v58 = vpop.f32.mrf.mxu1 }
 0x196   : > { %6838 = vst [vmem:[#allocation11_spill] sm:$0xff] %v6509_v33  ;;  %v6512_v55 = vadd.f32 %v2112_v24, %v1861_v59  ;;  %v1864_v0 = vadd.f32 %v4617_v58, %v6419_v10 }
 0x197   : > { %v4697_v42 = vpop.f32.mrf.mxu0  ;;  %v1816_v12 = vpop.f32.mrf.mxu1 }
 0x198   : > { %6839 = vst [vmem:[#allocation12_spill] sm:$0xff] %v6512_v55  ;;  %v6515_v5 = vadd.f32 %v4697_v42, %v1864_v0  ;;  %v1863_v9 = vadd.f32 %v1816_v12, %v6422_v61 }
 0x199   : > { %v2122_v62 = vpop.f32.mrf.mxu0  ;;  %v4620_v40 = vpop.f32.mrf.mxu1 }
 0x19a   : > { %6840 = vst [vmem:[#allocation13_spill] sm:$0xff] %v6515_v5  ;;  %v6518_v26 = vadd.f32 %v2122_v62, %v1863_v9  ;;  %v1866_v22 = vadd.f32 %v4620_v40, %v6425_v30 }
 0x19b   : > { %v4700_v6 = vpop.f32.mrf.mxu0  ;;  %v1826_v34 = vpop.f32.mrf.mxu1 }
 0x19c   : > { %6841 = vst [vmem:[#allocation14_spill] sm:$0xff] %v6518_v26  ;;  %v6521_v29 = vadd.f32 %v4700_v6, %v1866_v22  ;;  %v1865_v15 = vadd.f32 %v1826_v34, %v6428_v48 }
 0x19d   : > { %v2132_v56 = vpop.f32.mrf.mxu0  ;;  %v4735_v10 = vpop.f32.mrf.mxu1 }
 0x19e   : > { %6842 = vst [vmem:[#allocation15_spill] sm:$0xff] %v6521_v29  ;;  %v6524_v46 = vadd.f32 %v2132_v56, %v1865_v15 }
 0x19f   : > { %v6526_v53 = vpop.f32.mrf.mxu0  ;;  %v2288_v27 = vpop.f32.mrf.mxu1 }
 0x1a0   : > { %6843 = vst [vmem:[#allocation16_spill] sm:$0xff] %v6524_v46 }
 0x1a1   : > { %v6528_v61 = vpop.f32.mrf.mxu0  ;;  %v4738_v39 = vpop.f32.mrf.mxu1 }
 0x1a3   : > { %v6530_v25 = vpop.f32.mrf.mxu0  ;;  %v6532_v51 = vpop.f32.mrf.mxu1 }
 0x1a5   : > { %v6534_v30 = vpop.f32.mrf.mxu0  ;;  %v6536_v28 = vpop.f32.mrf.mxu1 }
 0x1a7   : > { %v6538_v21 = vpop.f32.mrf.mxu0  ;;  %v6540_v48 = vpop.f32.mrf.mxu1 }
 0x1a9   : > { %v6542_v8 = vpop.f32.mrf.mxu0  ;;  %v6544_v13 = vpop.f32.mrf.mxu1 }
 0x1ab   : > { %v6546_v32 = vpop.f32.mrf.mxu0  ;;  %v6548_v63 = vpop.f32.mrf.mxu1 }
 0x1ad   : > { %v6550_v3 = vpop.f32.mrf.mxu0  ;;  %v6552_v23 = vpop.f32.mrf.mxu1 }
 0x1af   : > { %v6554_v54 = vpop.f32.mrf.mxu0  ;;  %v6556_v59 = vpop.f32.mrf.mxu1 }
 0x1b1   : > { %v6558_v24 = vpop.f32.mrf.mxu0  ;;  %v6560_v58 = vpop.f32.mrf.mxu1 }
 0x1b3   : > { %v6562_v0 = vpop.f32.mrf.mxu0  ;;  %v6564_v42 = vpop.f32.mrf.mxu1 }
 0x1b5   : > { %v6566_v12 = vpop.f32.mrf.mxu0  ;;  %v6568_v9 = vpop.f32.mrf.mxu1 }
 0x1b7   : > { %v6570_v62 = vpop.f32.mrf.mxu0  ;;  %v6572_v40 = vpop.f32.mrf.mxu1 }
 0x1b9   : > { %v6574_v22 = vpop.f32.mrf.mxu0  ;;  %v6576_v6 = vpop.f32.mrf.mxu1 }
 0x1bb   : > { %v6578_v34 = vpop.f32.mrf.mxu0  ;;  %v6580_v15 = vpop.f32.mrf.mxu1 }
 0x1bd   : > { %v6582_v56 = vpop.f32.mrf.mxu0  ;;  %v6584_v46 = vpop.f32.mrf.mxu1 }
 0x1bf   : > { %v6586_v29 = vpop.f32.mrf.mxu0  ;;  %v6588_v26 = vpop.f32.mrf.mxu1 }
 0x1c1   : > { %v6590_v5 = vpop.f32.mrf.mxu0  ;;  %v6592_v55 = vpop.f32.mrf.mxu1 }
 0x1c2   : > { %6844 = vst [vmem:[#allocation17_spill] sm:$0xff] %v6590_v5  ;;  %6845 = vst [vmem:[#allocation18_spill] sm:$0xff] %v6592_v55 }
 0x1c3   : > { %v6594_v33 = vpop.f32.mrf.mxu0  ;;  %v6596_v19 = vpop.f32.mrf.mxu1 }
 0x1c4   : > { %6846 = vst [vmem:[#allocation19_spill] sm:$0xff] %v6594_v33  ;;  %6847 = vst [vmem:[#allocation20_spill] sm:$0xff] %v6596_v19 }
 0x1c5   : > { %v6598_v2 = vpop.f32.mrf.mxu0  ;;  %v6600_v14 = vpop.f32.mrf.mxu1 }
 0x1c6   : > { %6848 = vst [vmem:[#allocation21_spill] sm:$0xff] %v6598_v2  ;;  %6849 = vst [vmem:[#allocation22_spill] sm:$0xff] %v6600_v14 }
 0x1c7   : > { %v6602_v31 = vpop.f32.mrf.mxu0  ;;  %v6604_v45 = vpop.f32.mrf.mxu1 }
 0x1c8   : > { %6850 = vst [vmem:[#allocation23_spill] sm:$0xff] %v6602_v31  ;;  %6851 = vst [vmem:[#allocation24_spill] sm:$0xff] %v6604_v45 }
 0x1c9   : > { %v6606_v49 = vpop.f32.mrf.mxu0  ;;  %v6608_v4 = vpop.f32.mrf.mxu1 }
 0x1ca   : > { %6852 = vst [vmem:[#allocation25_spill] sm:$0xff] %v6606_v49  ;;  %6853 = vst [vmem:[#allocation26_spill] sm:$0xff] %v6608_v4 }
 0x1cb   : > { %v6610_v44 = vpop.f32.mrf.mxu0  ;;  %v6612_v5 = vpop.f32.mrf.mxu1 }
 0x1cc   : > { %6854 = vst [vmem:[#allocation27_spill] sm:$0xff] %v6610_v44  ;;  %6855 = vst [vmem:[#allocation28_spill] sm:$0xff] %v6612_v5 }
 0x1cd   : > { %v6614_v55 = vpop.f32.mrf.mxu0  ;;  %v6616_v33 = vpop.f32.mrf.mxu1 }
 0x1ce   : > { %6856 = vst [vmem:[#allocation29_spill] sm:$0xff] %v6614_v55  ;;  %6857 = vst [vmem:[#allocation30_spill] sm:$0xff] %v6616_v33 }
 0x1cf   : > { %v6618_v19 = vpop.f32.mrf.mxu0  ;;  %v6620_v2 = vpop.f32.mrf.mxu1 }
 0x1d0   : > { %6858 = vst [vmem:[#allocation31_spill] sm:$0xff] %v6618_v19  ;;  %6859 = vst [vmem:[#allocation32_spill] sm:$0xff] %v6620_v2  ;;  %v2448_v19 = vadd.f32 %v4735_v10, %v6431_v60  ;;  %v2449_v60 = vadd.f32 %v6532_v51, %v6440_v41 }
 0x1d1   : > { %v6622_v14 = vpop.f32.mrf.mxu0  ;;  %v6624_v31 = vpop.f32.mrf.mxu1 }
 0x1d2   : > { %6860 = vst [vmem:[#allocation33_spill] sm:$0xff] %v6622_v14  ;;  %6861 = vst [vmem:[#allocation34_spill] sm:$0xff] %v6624_v31  ;;  %v2447_v31 = vadd.f32 %v2288_v27, %v6434_v47  ;;  %v2452_v47 = vadd.f32 %v6536_v28, %v6443_v1  ;;  %v2756_v41 = vadd.f32 %v6534_v30, %v2449_v60 }
 0x1d3   : > { %v6626_v45 = vpop.f32.mrf.mxu0  ;;  %v6628_v49 = vpop.f32.mrf.mxu1  ;;  %v2451_v1 = vadd.f32 %v6540_v48, %v6446_v43  ;;  %v2454_v30 = vadd.f32 %v6544_v13, %v6449_v18  ;;  %v2453_v43 = vadd.f32 %v6548_v63, %v6452_v7 }
 0x1d4   : > { %6862 = vst [vmem:[#allocation35_spill] sm:$0xff] %v6626_v45  ;;  %6863 = vst [vmem:[#allocation36_spill] sm:$0xff] %v6628_v49  ;;  %v2759_v51 = vadd.f32 %v6538_v21, %v2452_v47 }
 0x1d5   : > { %v6630_v4 = vpop.f32.mrf.mxu0  ;;  %v6632_v44 = vpop.f32.mrf.mxu1  ;;  %v2761_v7 = vadd.f32 %v6546_v32, %v2454_v30 }
 0x1d6   : > { %6864 = vst [vmem:[#allocation37_spill] sm:$0xff] %v6630_v4  ;;  %6865 = vst [vmem:[#allocation38_spill] sm:$0xff] %v6632_v44  ;;  %v2755_v4 = vadd.f32 %v6526_v53, %v2448_v19  ;;  %v2450_v44 = vadd.f32 %v4738_v39, %v6437_v57 }
 0x1d7   : > { %v6634_v5 = vpop.f32.mrf.mxu0  ;;  %v6636_v55 = vpop.f32.mrf.mxu1 }
 0x1d8   : > { %6866 = vst [vmem:[#allocation39_spill] sm:$0xff] %v6634_v5  ;;  %6867 = vst [vmem:[#allocation40_spill] sm:$0xff] %v6636_v55  ;;  %v2754_v55 = vadd.f32 %v6528_v61, %v2447_v31  ;;  %v2757_v53 = vadd.f32 %v6530_v25, %v2450_v44 }
 0x1d9   : > { %v6639_v2 = vpop.f32.mrf.mxu0  ;;  %v6641_v14 = vpop.f32.mrf.mxu1 }
 0x1db   : > { %v6644_v45 = vpop.f32.mrf.mxu0  ;;  %v6646_v49 = vpop.f32.mrf.mxu1 }
 0x1dc   : > { %6868 = vst [vmem:[#allocation41_spill] sm:$0xff] %v6644_v45 }
 0x1dd   : > { %v6650_v5 = vpop.f32.mrf.mxu0  ;;  %v4895_v33 = vpop.f32.mrf.mxu1 }
 0x1de   : > { %6869 = vst [vmem:[#allocation42_spill] sm:$0xff] %v6650_v5  ;;  %v3061_v10 = vadd.f32 %v4895_v33, %v2755_v4 }
 0x1df   : > { %v4975_v19 = vpop.f32.mrf.mxu0  ;;  %v2901_v57 = vpop.f32.mrf.mxu1 }
 0x1e0   : > { %v3367_v27 = vadd.f32 %v4975_v19, %v3061_v10  ;;  %v3060_v31 = vadd.f32 %v2901_v57, %v2754_v55  ;;  %v2758_v19 = vadd.f32 %v6542_v8, %v2451_v1  ;;  %v2760_v8 = vadd.f32 %v6550_v3, %v2453_v43 }
 0x1e1   : > { %v3207_v61 = vpop.f32.mrf.mxu0  ;;  %v4898_v39 = vpop.f32.mrf.mxu1 }
 0x1e2   : > { %3399 = vst [vmem:[%s6661_s26 + $0x8] sm:$0xff] %v3367_v27  ;;  %v3366_v4 = vadd.f32 %v3207_v61, %v3060_v31  ;;  %v3063_v33 = vadd.f32 %v4898_v39, %v2757_v53  ;;  %v3468_v28 = vmul.f32 %v3367_v27, %v3367_v27  ;;  %v2456_v53 = vadd.f32 %v6552_v23, %v6455_v37 }
 0x1e3   : > { %v4978_v5 = vpop.f32.mrf.mxu0  ;;  %v2911_v45 = vpop.f32.mrf.mxu1  ;;  %v2455_v23 = vadd.f32 %v6556_v59, %v6458_v50 }
 0x1e4   : > { %3398 = vst [vmem:[%s6661_s26] sm:$0xff] %v3366_v4  ;;  %v3430_v44 = vadd.f32 %v3367_v27, %v3366_v4  ;;  %v3467_v55 = vmul.f32 %v3366_v4, %v3366_v4  ;;  %v3369_v25 = vadd.f32 %v4978_v5, %v3063_v33  ;;  %v3062_v10 = vadd.f32 %v2911_v45, %v2756_v41 }
 0x1e5   : > { %v3217_v48 = vpop.f32.mrf.mxu0  ;;  %v4901_v60 = vpop.f32.mrf.mxu1  ;;  %v2763_v37 = vadd.f32 %v6554_v54, %v2456_v53  ;;  %v2458_v33 = vadd.f32 %v6560_v58, %v6461_v38 }
 0x1e6   : > { %v3499_v21 = vadd.f32 %v3468_v28, %v3467_v55  ;;  %3401 = vst [vmem:[%s6661_s26 + $0x18] sm:$0xff] %v3369_v25  ;;  %v3368_v47 = vadd.f32 %v3217_v48, %v3062_v10  ;;  %v3065_v57 = vadd.f32 %v4901_v60, %v2759_v51  ;;  %v3470_v39 = vmul.f32 %v3369_v25, %v3369_v25 }
 0x1e7   : > { %v4981_v5 = vpop.f32.mrf.mxu0  ;;  %v2921_v45 = vpop.f32.mrf.mxu1  ;;  %v2762_v60 = vadd.f32 %v6558_v24, %v2455_v23 }
 0x1e8   : > { %3400 = vst [vmem:[%s6661_s26 + $0x10] sm:$0xff] %v3368_v47  ;;  %v3431_v27 = vadd.f32 %v3430_v44, %v3368_v47  ;;  %v3469_v18 = vmul.f32 %v3368_v47, %v3368_v47  ;;  %v3371_v13 = vadd.f32 %v4981_v5, %v3065_v57  ;;  %v3064_v31 = vadd.f32 %v2921_v45, %v2758_v19 }
 0x1e9   : > { %v3227_v63 = vpop.f32.mrf.mxu0  ;;  %v4904_v61 = vpop.f32.mrf.mxu1  ;;  %v2765_v19 = vadd.f32 %v6562_v0, %v2458_v33 }
 0x1ea   : > { %v3500_v41 = vadd.f32 %v3499_v21, %v3469_v18  ;;  %3403 = vst [vmem:[%s6661_s26 + $0x28] sm:$0xff] %v3371_v13  ;;  %v3370_v1 = vadd.f32 %v3227_v63, %v3064_v31  ;;  %v3432_v4 = vadd.f32 %v3431_v27, %v3369_v25  ;;  %v3067_v51 = vadd.f32 %v4904_v61, %v2761_v7 }
 0x1eb   : > { %v4984_v28 = vpop.f32.mrf.mxu0  ;;  %v2931_v32 = vpop.f32.mrf.mxu1  ;;  %v2457_v25 = vadd.f32 %v6564_v42, %v6464_v35  ;;  %v3472_v54 = vmul.f32 %v3371_v13, %v3371_v13  ;;  %v2460_v21 = vadd.f32 %v6568_v9, %v6467_v20  ;;  %v2459_v27 = vadd.f32 %v6572_v40, %v6470_v52 }
 0x1ec   : > { %3402 = vst [vmem:[%s6661_s26 + $0x20] sm:$0xff] %v3370_v1  ;;  %v3433_v3 = vadd.f32 %v3432_v4, %v3370_v1  ;;  %v3471_v44 = vmul.f32 %v3370_v1, %v3370_v1  ;;  %v3501_v55 = vadd.f32 %v3500_v41, %v3470_v39  ;;  %v3066_v10 = vadd.f32 %v2931_v32, %v2760_v8 }
 0x1ed   : > { %v3373_v30 = vadd.f32 %v4984_v28, %v3067_v51  ;;  %v3237_v43 = vpop.f32.mrf.mxu0  ;;  %v4907_v50 = vpop.f32.mrf.mxu1  ;;  %v2764_v45 = vadd.f32 %v6566_v12, %v2457_v25  ;;  %v2767_v7 = vadd.f32 %v6570_v62, %v2460_v21  ;;  %v2462_v12 = vadd.f32 %v6576_v6, %v6473_v16  ;;  %v6871_v21 = vld [vmem:[#allocation18_spill] sm:$0xff] }
 0x1ee   : > { %v3502_v59 = vadd.f32 %v3501_v55, %v3471_v44  ;;  %v3372_v48 = vadd.f32 %v3237_v43, %v3066_v10  ;;  %v3434_v38 = vadd.f32 %v3433_v3, %v3371_v13  ;;  %v3069_v58 = vadd.f32 %v4907_v50, %v2763_v37 }
 0x1ef   : > { %3405 = vst [vmem:[%s6661_s26 + $0x38] sm:$0xff] %v3373_v30  ;;  %v4987_v47 = vpop.f32.mrf.mxu0  ;;  %v2941_v57 = vpop.f32.mrf.mxu1  ;;  %v3474_v13 = vmul.f32 %v3373_v30, %v3373_v30  ;;  %v2766_v23 = vadd.f32 %v6574_v22, %v2459_v27  ;;  %v2461_v62 = vadd.f32 %v6580_v15, %v6476_v17  ;;  %v2464_v16 = vadd.f32 %v6584_v46, %v6479_v36  ;;  %v6874_v27 = vld [vmem:[#allocation20_spill] sm:$0xff] }
 0x1f0   : > { %3404 = vst [vmem:[%s6661_s26 + $0x30] sm:$0xff] %v3372_v48  ;;  %v3435_v35 = vadd.f32 %v3434_v38, %v3372_v48  ;;  %v3473_v42 = vmul.f32 %v3372_v48, %v3372_v48  ;;  %v3503_v53 = vadd.f32 %v3502_v59, %v3472_v54  ;;  %v3375_v5 = vadd.f32 %v4987_v47, %v3069_v58 }
 0x1f1   : > { %v3068_v24 = vadd.f32 %v2941_v57, %v2762_v60  ;;  %v3247_v0 = vpop.f32.mrf.mxu0  ;;  %v4910_v18 = vpop.f32.mrf.mxu1  ;;  %v2769_v55 = vadd.f32 %v6578_v34, %v2462_v12  ;;  %v2768_v43 = vadd.f32 %v6582_v56, %v2461_v62  ;;  %v2463_v36 = vadd.f32 %v6588_v26, %v6482_v11  ;;  %v6877_v12 = vld [vmem:[#allocation19_spill] sm:$0xff]  ;;  %v6878_v62 = vld [vmem:[#allocation21_spill] sm:$0xff] }
 0x1f2   : > { %v3504_v20 = vadd.f32 %v3503_v53, %v3473_v42  ;;  %3407 = vst [vmem:[%s6661_s26 + $0x48] sm:$0xff] %v3375_v5  ;;  %v3436_v9 = vadd.f32 %v3435_v35, %v3373_v30  ;;  %v3071_v31 = vadd.f32 %v4910_v18, %v2765_v19  ;;  %v3476_v6 = vmul.f32 %v3375_v5, %v3375_v5  ;;  %v6870_v19 = vld [vmem:[#allocation3_spill] sm:$0xff] }
 0x1f3   : > { %v3374_v8 = vadd.f32 %v3247_v0, %v3068_v24  ;;  %v4990_v63 = vpop.f32.mrf.mxu0  ;;  %v2951_v61 = vpop.f32.mrf.mxu1  ;;  %v2771_v59 = vadd.f32 %v6586_v29, %v2464_v16  ;;  %v2466_v47 = vadd.f32 %v6871_v21, %v6870_v19  ;;  %v6880_v16 = vld [vmem:[#allocation24_spill] sm:$0xff] }
 0x1f4   : > { %v3505_v39 = vadd.f32 %v3504_v20, %v3474_v13  ;;  %v3377_v52 = vadd.f32 %v4990_v63, %v3071_v31  ;;  %v3070_v40 = vadd.f32 %v2951_v61, %v2764_v45  ;;  %v6873_v45 = vld [vmem:[#allocation4_spill] sm:$0xff]  ;;  %v6875_v13 = vld [vmem:[#allocation5_spill] sm:$0xff]  ;;  %v6876_v20 = vld [vmem:[#allocation22_spill] sm:$0xff] }
 0x1f5   : > { %3406 = vst [vmem:[%s6661_s26 + $0x40] sm:$0xff] %v3374_v8  ;;  %v3437_v41 = vadd.f32 %v3436_v9, %v3374_v8  ;;  %v3475_v1 = vmul.f32 %v3374_v8, %v3374_v8  ;;  %v3257_v4 = vpop.f32.mrf.mxu0  ;;  %v4913_v37 = vpop.f32.mrf.mxu1  ;;  %v2465_v24 = vadd.f32 %v6874_v27, %v6873_v45  ;;  %v2468_v9 = vadd.f32 %v6876_v20, %v6875_v13  ;;  %v6886_v19 = vld [vmem:[#allocation28_spill] sm:$0xff]  ;;  %v6889_v45 = vld [vmem:[#allocation27_spill] sm:$0xff] }
 0x1f6   : > { %3409 = vst [vmem:[%s6661_s26 + $0x58] sm:$0xff] %v3377_v52  ;;  %v3376_v33 = vadd.f32 %v3257_v4, %v3070_v40  ;;  %v3073_v51 = vadd.f32 %v4913_v37, %v2767_v7  ;;  %v3478_v34 = vmul.f32 %v3377_v52, %v3377_v52 }
 0x1f7   : > { %v3506_v28 = vadd.f32 %v3505_v39, %v3475_v1  ;;  %v3438_v32 = vadd.f32 %v3437_v41, %v3375_v5  ;;  %v4993_v3 = vpop.f32.mrf.mxu0  ;;  %v2961_v44 = vpop.f32.mrf.mxu1  ;;  %v6872_v5 = vld [vmem:[#allocation17_spill] sm:$0xff]  ;;  %v2773_v39 = vadd.f32 %v6877_v12, %v2466_v47 }
 0x1f8   : > { %3408 = vst [vmem:[%s6661_s26 + $0x50] sm:$0xff] %v3376_v33  ;;  %v3477_v10 = vmul.f32 %v3376_v33, %v3376_v33  ;;  %v3379_v22 = vadd.f32 %v4993_v3, %v3073_v51  ;;  %v3072_v25 = vadd.f32 %v2961_v44, %v2766_v23  ;;  %v2770_v29 = vadd.f32 %v6872_v5, %v2463_v36  ;;  %v6879_v51 = vld [vmem:[#allocation6_spill] sm:$0xff]  ;;  %v6881_v3 = vld [vmem:[#allocation23_spill] sm:$0xff] }
 0x1f9   : > { %v3439_v54 = vadd.f32 %v3438_v32, %v3376_v33  ;;  %v3507_v17 = vadd.f32 %v3506_v28, %v3476_v6  ;;  %v3267_v15 = vpop.f32.mrf.mxu0  ;;  %v4916_v30 = vpop.f32.mrf.mxu1  ;;  %v2772_v33 = vadd.f32 %v6878_v62, %v2465_v24  ;;  %v2467_v6 = vadd.f32 %v6880_v16, %v6879_v51  ;;  %v6895_v51 = vld [vmem:[#allocation34_spill] sm:$0xff] }
 0x1fa   : > { %3411 = vst [vmem:[%s6661_s26 + $0x68] sm:$0xff] %v3379_v22  ;;  %v3378_v46 = vadd.f32 %v3267_v15, %v3072_v25  ;;  %v3075_v50 = vadd.f32 %v4916_v30, %v2769_v55  ;;  %v3480_v31 = vmul.f32 %v3379_v22, %v3379_v22  ;;  %v2775_v44 = vadd.f32 %v6881_v3, %v2468_v9  ;;  %v6883_v15 = vld [vmem:[#allocation26_spill] sm:$0xff] }
 0x1fb   : > { %v3508_v48 = vadd.f32 %v3507_v17, %v3477_v10  ;;  %v3440_v38 = vadd.f32 %v3439_v54, %v3377_v52  ;;  %v4996_v58 = vpop.f32.mrf.mxu0  ;;  %v2971_v60 = vpop.f32.mrf.mxu1  ;;  %v6882_v17 = vld [vmem:[#allocation7_spill] sm:$0xff] }
 0x1fc   : > { %3410 = vst [vmem:[%s6661_s26 + $0x60] sm:$0xff] %v3378_v46  ;;  %v3479_v57 = vmul.f32 %v3378_v46, %v3378_v46  ;;  %v3381_v56 = vadd.f32 %v4996_v58, %v3075_v50  ;;  %v3074_v35 = vadd.f32 %v2971_v60, %v2768_v43  ;;  %v2470_v30 = vadd.f32 %v6883_v15, %v6882_v17  ;;  %v6885_v60 = vld [vmem:[#allocation8_spill] sm:$0xff] }
 0x1fd   : > { %v3441_v42 = vadd.f32 %v3440_v38, %v3378_v46  ;;  %v3509_v11 = vadd.f32 %v3508_v48, %v3478_v34  ;;  %v3277_v26 = vpop.f32.mrf.mxu0  ;;  %v4919_v53 = vpop.f32.mrf.mxu1  ;;  %v6884_v38 = vld [vmem:[#allocation25_spill] sm:$0xff]  ;;  %v2469_v21 = vadd.f32 %v6886_v19, %v6885_v60  ;;  %v6898_v17 = vld [vmem:[#allocation36_spill] sm:$0xff]  ;;  %v6901_v60 = vld [vmem:[#allocation35_spill] sm:$0xff] }
 0x1fe   : > { %3413 = vst [vmem:[%s6661_s26 + $0x78] sm:$0xff] %v3381_v56  ;;  %v3380_v0 = vadd.f32 %v3277_v26, %v3074_v35  ;;  %v3077_v18 = vadd.f32 %v4919_v53, %v2771_v59  ;;  %v3482_v55 = vmul.f32 %v3381_v56, %v3381_v56  ;;  %v2774_v58 = vadd.f32 %v6884_v38, %v2467_v6  ;;  %v6888_v35 = vld [vmem:[#allocation30_spill] sm:$0xff] }
 0x1ff   : > { %v3510_v7 = vadd.f32 %v3509_v11, %v3479_v57  ;;  %v3442_v8 = vadd.f32 %v3441_v42, %v3379_v22  ;;  %v4999_v63 = vpop.f32.mrf.mxu0  ;;  %v2981_v61 = vpop.f32.mrf.mxu1  ;;  %v2777_v27 = vadd.f32 %v6889_v45, %v2470_v30 }
 0x200   : > { %3412 = vst [vmem:[%s6661_s26 + $0x70] sm:$0xff] %v3380_v0  ;;  %v3481_v52 = vmul.f32 %v3380_v0, %v3380_v0  ;;  %v3383_v40 = vadd.f32 %v4999_v63, %v3077_v18  ;;  %v3076_v41 = vadd.f32 %v2981_v61, %v2770_v29  ;;  %v6891_v63 = vld [vmem:[#allocation10_spill] sm:$0xff]  ;;  %v6892_v61 = vld [vmem:[#allocation32_spill] sm:$0xff] }
 0x201   : > { %v3443_v1 = vadd.f32 %v3442_v8, %v3380_v0  ;;  %v3511_v4 = vadd.f32 %v3510_v7, %v3480_v31  ;;  %v3287_v37 = vpop.f32.mrf.mxu0  ;;  %v4922_v23 = vpop.f32.mrf.mxu1  ;;  %v6890_v7 = vld [vmem:[#allocation29_spill] sm:$0xff]  ;;  %v2471_v12 = vadd.f32 %v6892_v61, %v6891_v63 }
 0x202   : > { %3415 = vst [vmem:[%s6661_s26 + $0x88] sm:$0xff] %v3383_v40  ;;  %v3382_v28 = vadd.f32 %v3287_v37, %v3076_v41  ;;  %v3079_v32 = vadd.f32 %v4922_v23, %v2773_v39  ;;  %v3484_v11 = vmul.f32 %v3383_v40, %v3383_v40  ;;  %v2776_v8 = vadd.f32 %v6890_v7, %v2469_v21 }
 0x203   : > { %v3512_v10 = vadd.f32 %v3511_v4, %v3481_v52  ;;  %v3444_v22 = vadd.f32 %v3443_v1, %v3381_v56  ;;  %v5002_v25 = vpop.f32.mrf.mxu0  ;;  %v2991_v54 = vpop.f32.mrf.mxu1  ;;  %v6887_v56 = vld [vmem:[#allocation9_spill] sm:$0xff] }
 0x204   : > { %3414 = vst [vmem:[%s6661_s26 + $0x80] sm:$0xff] %v3382_v28  ;;  %v3483_v43 = vmul.f32 %v3382_v28, %v3382_v28  ;;  %v3385_v36 = vadd.f32 %v5002_v25, %v3079_v32  ;;  %v3078_v46 = vadd.f32 %v2991_v54, %v2772_v33  ;;  %v2472_v42 = vadd.f32 %v6888_v35, %v6887_v56  ;;  %v6894_v33 = vld [vmem:[#allocation11_spill] sm:$0xff]  ;;  %v6897_v54 = vld [vmem:[#allocation12_spill] sm:$0xff] }
 0x205   : > { %v3445_v50 = vadd.f32 %v3444_v22, %v3382_v28  ;;  %v3513_v59 = vadd.f32 %v3512_v10, %v3482_v55  ;;  %v3297_v34 = vpop.f32.mrf.mxu0  ;;  %v4925_v48 = vpop.f32.mrf.mxu1  ;;  %v2474_v16 = vadd.f32 %v6895_v51, %v6894_v33  ;;  %v6896_v22 = vld [vmem:[#allocation33_spill] sm:$0xff]  ;;  %v2473_v15 = vadd.f32 %v6898_v17, %v6897_v54  ;;  %v6909_v54 = vld [vmem:[#allocation42_spill] sm:$0xff] }
 0x206   : > { %3417 = vst [vmem:[%s6661_s26 + $0x98] sm:$0xff] %v3385_v36  ;;  %v3384_v47 = vadd.f32 %v3297_v34, %v3078_v46  ;;  %v3081_v57 = vadd.f32 %v4925_v48, %v2775_v44  ;;  %v3486_v1 = vmul.f32 %v3385_v36, %v3385_v36  ;;  %v2778_v25 = vadd.f32 %v6896_v22, %v2471_v12  ;;  %v6900_v46 = vld [vmem:[#allocation38_spill] sm:$0xff] }
 0x207   : > { %v3514_v26 = vadd.f32 %v3513_v59, %v3483_v43  ;;  %v3446_v53 = vadd.f32 %v3445_v50, %v3383_v40  ;;  %v5005_v5 = vpop.f32.mrf.mxu0  ;;  %v3001_v29 = vpop.f32.mrf.mxu1  ;;  %v6893_v40 = vld [vmem:[#allocation31_spill] sm:$0xff]  ;;  %v2781_v19 = vadd.f32 %v6901_v60, %v2474_v16 }
 0x208   : > { %3416 = vst [vmem:[%s6661_s26 + $0x90] sm:$0xff] %v3384_v47  ;;  %v3485_v24 = vmul.f32 %v3384_v47, %v3384_v47  ;;  %v3387_v0 = vadd.f32 %v5005_v5, %v3081_v57  ;;  %v3080_v18 = vadd.f32 %v3001_v29, %v2774_v58  ;;  %v2779_v41 = vadd.f32 %v6893_v40, %v2472_v42  ;;  %v6903_v5 = vld [vmem:[#allocation14_spill] sm:$0xff]  ;;  %v6904_v29 = vld [vmem:[#allocation40_spill] sm:$0xff] }
 0x209   : > { %v3447_v13 = vadd.f32 %v3446_v53, %v3384_v47  ;;  %v3515_v20 = vadd.f32 %v3514_v26, %v3484_v11  ;;  %v3307_v9 = vpop.f32.mrf.mxu0  ;;  %v4928_v31 = vpop.f32.mrf.mxu1  ;;  %v6902_v26 = vld [vmem:[#allocation37_spill] sm:$0xff]  ;;  %v2475_v45 = vadd.f32 %v6904_v29, %v6903_v5 }
 0x20a   : > { %3419 = vst [vmem:[%s6661_s26 + $0xa8] sm:$0xff] %v3387_v0  ;;  %v3386_v39 = vadd.f32 %v3307_v9, %v3080_v18  ;;  %v3083_v52 = vadd.f32 %v4928_v31, %v2777_v27  ;;  %v3488_v59 = vmul.f32 %v3387_v0, %v3387_v0  ;;  %v2780_v53 = vadd.f32 %v6902_v26, %v2473_v15 }
 0x20b   : > { %v3516_v4 = vadd.f32 %v3515_v20, %v3485_v24  ;;  %v3448_v37 = vadd.f32 %v3447_v13, %v3385_v36  ;;  %v5008_v23 = vpop.f32.mrf.mxu0  ;;  %v3011_v62 = vpop.f32.mrf.mxu1  ;;  %v6899_v36 = vld [vmem:[#allocation13_spill] sm:$0xff] }
 0x20c   : > { %3418 = vst [vmem:[%s6661_s26 + $0xa0] sm:$0xff] %v3386_v39  ;;  %v3487_v6 = vmul.f32 %v3386_v39, %v3386_v39  ;;  %v3389_v28 = vadd.f32 %v5008_v23, %v3083_v52  ;;  %v3082_v32 = vadd.f32 %v3011_v62, %v2776_v8  ;;  %v2476_v50 = vadd.f32 %v6900_v46, %v6899_v36  ;;  %v6906_v8 = vld [vmem:[#allocation15_spill] sm:$0xff] }
 0x20d   : > { %v3449_v3 = vadd.f32 %v3448_v37, %v3386_v39  ;;  %v3517_v44 = vadd.f32 %v3516_v4, %v3486_v1  ;;  %v3317_v55 = vpop.f32.mrf.mxu0  ;;  %v4931_v10 = vpop.f32.mrf.mxu1  ;;  %v2478_v63 = vadd.f32 %v6641_v14, %v6906_v8  ;;  %v2782_v4 = vadd.f32 %v6639_v2, %v2475_v45  ;;  %v6907_v37 = vld [vmem:[#allocation16_spill] sm:$0xff] }
 0x20e   : > { %3421 = vst [vmem:[%s6661_s26 + $0xb8] sm:$0xff] %v3389_v28  ;;  %v3388_v30 = vadd.f32 %v3317_v55, %v3082_v32  ;;  %v3085_v43 = vadd.f32 %v4931_v10, %v2779_v41  ;;  %v3490_v13 = vmul.f32 %v3389_v28, %v3389_v28  ;;  %v2477_v23 = vadd.f32 %v6646_v49, %v6907_v37  ;;  %v6908_v32 = vld [vmem:[#allocation41_spill] sm:$0xff] }
 0x20f   : > { %v3518_v34 = vadd.f32 %v3517_v44, %v3487_v6  ;;  %v3450_v48 = vadd.f32 %v3449_v3, %v3387_v0  ;;  %v5011_v38 = vpop.f32.mrf.mxu0  ;;  %v3021_v58 = vpop.f32.mrf.mxu1  ;;  %v6905_v0 = vld [vmem:[#allocation39_spill] sm:$0xff]  ;;  %v2785_v3 = vadd.f32 %v6908_v32, %v2478_v63 }
 0x210   : > { %3420 = vst [vmem:[%s6661_s26 + $0xb0] sm:$0xff] %v3388_v30  ;;  %v3489_v21 = vmul.f32 %v3388_v30, %v3388_v30  ;;  %v3391_v47 = vadd.f32 %v5011_v38, %v3085_v43  ;;  %v3084_v57 = vadd.f32 %v3021_v58, %v2778_v25  ;;  %v2783_v18 = vadd.f32 %v6905_v0, %v2476_v50 }
 0x211   : > { %v3451_v56 = vadd.f32 %v3450_v48, %v3388_v30  ;;  %v3519_v35 = vadd.f32 %v3518_v34, %v3488_v59  ;;  %v3327_v42 = vpop.f32.mrf.mxu0  ;;  %v4934_v11 = vpop.f32.mrf.mxu1  ;;  %v2784_v17 = vadd.f32 %v6909_v54, %v2477_v23 }
 0x212   : > { %3423 = vst [vmem:[%s6661_s26 + $0xc8] sm:$0xff] %v3391_v47  ;;  %v3390_v27 = vadd.f32 %v3327_v42, %v3084_v57  ;;  %v3087_v24 = vadd.f32 %v4934_v11, %v2781_v19  ;;  %v3492_v51 = vmul.f32 %v3391_v47, %v3391_v47 }
 0x213   : > { %v3520_v20 = vadd.f32 %v3519_v35, %v3489_v21  ;;  %v3452_v9 = vadd.f32 %v3451_v56, %v3389_v28  ;;  %v5014_v31 = vpop.f32.mrf.mxu0  ;;  %v3031_v7 = vpop.f32.mrf.mxu1 }
 0x214   : > { %3422 = vst [vmem:[%s6661_s26 + $0xc0] sm:$0xff] %v3390_v27  ;;  %v3491_v61 = vmul.f32 %v3390_v27, %v3390_v27  ;;  %v3393_v12 = vadd.f32 %v5014_v31, %v3087_v24  ;;  %v3086_v39 = vadd.f32 %v3031_v7, %v2780_v53 }
 0x215   : > { %v3453_v52 = vadd.f32 %v3452_v9, %v3390_v27  ;;  %v3521_v40 = vadd.f32 %v3520_v20, %v3490_v13  ;;  %v3337_v41 = vpop.f32.mrf.mxu0  ;;  %v4937_v1 = vpop.f32.mrf.mxu1 }
 0x216   : > { %3425 = vst [vmem:[%s6661_s26 + $0xd8] sm:$0xff] %v3393_v12  ;;  %v3392_v62 = vadd.f32 %v3337_v41, %v3086_v39  ;;  %v3089_v33 = vadd.f32 %v4937_v1, %v2783_v18  ;;  %v3494_v43 = vmul.f32 %v3393_v12, %v3393_v12 }
 0x217   : > { %v3522_v14 = vadd.f32 %v3521_v40, %v3491_v61  ;;  %v3454_v16 = vadd.f32 %v3453_v52, %v3391_v47  ;;  %v5017_v6 = vpop.f32.mrf.mxu0  ;;  %v3041_v28 = vpop.f32.mrf.mxu1 }
 0x218   : > { %3424 = vst [vmem:[%s6661_s26 + $0xd0] sm:$0xff] %v3392_v62  ;;  %v3493_v44 = vmul.f32 %v3392_v62, %v3392_v62  ;;  %v3395_v55 = vadd.f32 %v5017_v6, %v3089_v33  ;;  %v3088_v10 = vadd.f32 %v3041_v28, %v2782_v4 }
 0x219   : > { %v3455_v2 = vadd.f32 %v3454_v16, %v3392_v62  ;;  %v3523_v22 = vadd.f32 %v3522_v14, %v3492_v51  ;;  %v3347_v25 = vpop.f32.mrf.mxu0  ;;  %v4940_v49 = vpop.f32.mrf.mxu1 }
 0x21a   : > { %3427 = vst [vmem:[%s6661_s26 + $0xe8] sm:$0xff] %v3395_v55  ;;  %v3394_v15 = vadd.f32 %v3347_v25, %v3088_v10  ;;  %v3091_v30 = vadd.f32 %v4940_v49, %v2785_v3  ;;  %v3496_v47 = vmul.f32 %v3395_v55, %v3395_v55 }
 0x21b   : > { %v3524_v36 = vadd.f32 %v3523_v22, %v3493_v44  ;;  %v3456_v46 = vadd.f32 %v3455_v2, %v3393_v12  ;;  %v5020_v50 = vpop.f32.mrf.mxu0  ;;  %v3051_v59 = vpop.f32.mrf.mxu1 }
 0x21c   : > { %3426 = vst [vmem:[%s6661_s26 + $0xe0] sm:$0xff] %v3394_v15  ;;  %v3495_v34 = vmul.f32 %v3394_v15, %v3394_v15  ;;  %v3397_v48 = vadd.f32 %v5020_v50, %v3091_v30  ;;  %v3090_v38 = vadd.f32 %v3051_v59, %v2784_v17 }
 0x21d   : > { %v3457_v58 = vadd.f32 %v3456_v46, %v3394_v15  ;;  %v3525_v60 = vadd.f32 %v3524_v36, %v3494_v43  ;;  %v3357_v19 = vpop.f32.mrf.mxu0 }
 0x21e   : > { %3429 = vst [vmem:[%s6661_s26 + $0xf8] sm:$0xff] %v3397_v48  ;;  %v3396_v21 = vadd.f32 %v3357_v19, %v3090_v38  ;;  %v3498_v26 = vmul.f32 %v3397_v48, %v3397_v48 }
 0x21f   : > { %v3526_v57 = vadd.f32 %v3525_v60, %v3495_v34  ;;  %v3458_v56 = vadd.f32 %v3457_v58, %v3395_v55 }
 0x220   : > { %3428 = vst [vmem:[%s6661_s26 + $0xf0] sm:$0xff] %v3396_v21  ;;  %v3497_v35 = vmul.f32 %v3396_v21, %v3396_v21 }
 0x221   : > { %v3459_v42 = vadd.f32 %v3458_v56, %v3396_v21  ;;  %v3527_v11 = vadd.f32 %v3526_v57, %v3496_v47 }
 0x223   : > { %v3460_v53 = vadd.f32 %v3459_v42, %v3397_v48  ;;  %v3528_v5 = vadd.f32 %v3527_v11, %v3497_v35 }
 0x225   : > { %v3461_v29 = vrot.slane %v3460_v53, 4  ;;  %v3529_v45 = vadd.f32 %v3528_v5, %v3498_v26 }
 0x227   : > { %v3462_v27 = vadd.f32 %v3461_v29, %v3460_v53  ;;  %v3530_v24 = vrot.slane %v3529_v45, 4 }
 0x229   : > { %v3463_v0 = vrot.slane %v3462_v27, 2  ;;  %v3531_v18 = vadd.f32 %v3530_v24, %v3529_v45 }
 0x22b   : > { %v3464_v13 = vadd.f32 %v3463_v0, %v3462_v27  ;;  %v3532_v20 = vrot.slane %v3531_v18, 2 }
 0x22d   : > { %v3465_v9 = vrot.slane %v3464_v13, 1  ;;  %v3533_v31 = vadd.f32 %v3532_v20, %v3531_v18 }
 0x22f   : > { %v3534_v7 = vrot.slane %v3533_v31, 1  ;;  %v3466_v8 = vadd.f32 %v3465_v9, %v3464_v13 }
 0x231   : > { %v3535_v63 = vadd.f32 %v3534_v7, %v3533_v31 }
 0x233   : > { %v3536_v61 = vsel %vm436_vm0, %v3466_v8, %v3535_v63 }
 0x234   : > { %3537 = vst [vmem:[%s421_s29] sm:$0x3] %v3536_v61 }
 0x235 PF: > { %s16_s20 = sadd.s32 1, %s5157_s20   ;;  %s6910_s18 = smov %s5153_s19 }
 0x236   : > { %p13_p5 = scmp.ge.s32.totalorder %s16_s20, 4   ;;  %s6911_s19 = smov %s6913_s21 }
 0x238   :  { %15 = sbr.rel (!%p13_p5) target bundleno = 2 (0x2), region = 96 }

// kernel: conv_block_forward.4
= control target key start
LH: loop header
LB: loop body
LE: loop exit
PB: predicated region body
PF: predicated region fallthrough
CT: control target
= control target key end

     0   :  { %s5401_s24 = smov 0   ;;  %s5403_s25 = smov 0   ;;  %s7049_s0 = inlined_call_operand.vmem [shape: f32[2,16,16,128], index: 0, kind: input, shape index: {}, may-alias: {0,1,2}]   ;;  %s7050_s1 = inlined_call_operand.vmem [shape: f32[2,16,16,128], index: 1, kind: input, shape index: {}, may-alias: {0,1,2}]   ;;  %s7051_s2 = inlined_call_operand.vmem [shape: f32[2,16,16,128], index: 2, kind: input, shape index: {}, may-alias: {0,1,2}]   ;;  %s7052_s3 = inlined_call_operand.vmem [shape: f32[9,128,128], index: 3, kind: input, shape index: {}]   ;;  %s7053_s4 = inlined_call_operand.vmem [shape: f32[1,128], index: 4, kind: input, shape index: {}]   ;;  %s7054_s5 = inlined_call_operand.vmem [shape: f32[1,128], index: 5, kind: input, shape index: {}]   ;;  %s7055_s6 = inlined_call_operand.vmem [shape: f32[2,16,16,128], index: 6, kind: output, shape index: {0}]   ;;  %s7056_s7 = inlined_call_operand.vmem [shape: f32[2,1,2,128], index: 7, kind: output, shape index: {1}]  }
   0x1   :  { %s5405_s26 = smov 0  }
   0x2 LB: > { %s30_s27 = sadd.s32 1, %s5355_s25  ;;  %p3925_p0 = scmp.ge.s32.totalorder %s5359_s26, 1  ;;  %s5359_s26 = sphi %s5405_s26, %s18_s26   ;;  %s5355_s25 = sphi %s5403_s25, %s7166_s25   ;;  %s5351_s24 = sphi %s5401_s24, %s7165_s24  }
   0x3   : > { %p32_p1 = scmp.ge.s32.totalorder %s30_s27, 2  ;;  %p332_p2 = scmp.lt.s32.totalorder %s5359_s26, 3 }
   0x5   : > { %s7168_s27 = smov (%p32_p1, %s30_s27), 0  ;;  %p333_p3 = pnand %p3925_p0, %p332_p2 }
   0x7   : > { %336 = sbr.rel (%p333_p3) target bundleno = 565 (0x235), region = 44 }
   0xc   : > { %v3958_v0 = vld [vmem:[%s7052_s3 + $0xf8] sm:$0xff]  ;;  %v3957_v1 = vld [vmem:[%s7052_s3 + $0xf0] sm:$0xff]  ;;  %p414_p4 = scmp.lt.s32.totalorder %s5351_s24, 1  ;;  %v3956_v2 = vld [vmem:[%s7052_s3 + $0xe8] sm:$0xff]  ;;  %vm510_vm0 = vcmask 1040384  }
   0xd   : > { %5231 = vmatprep.subr.mxu1 %v3958_v0  ;;  %4511 = vmatprep.subr.mxu0 %v3958_v0  ;;  %v3955_v3 = vld [vmem:[%s7052_s3 + $0xe0] sm:$0xff]  ;;  %v3954_v4 = vld [vmem:[%s7052_s3 + $0xd8] sm:$0xff]  ;;  %v3953_v14 = vld [vmem:[%s7052_s3 + $0xd0] sm:$0xff] }
   0xe   : > { %5247 = vmatpush3.msra.mxu1 %v3958_v0  ;;  %4512 = vmatpush3.msra.mxu0 %v3958_v0  ;;  %s7170_s24 = smov (!%p414_p4, %s5351_s24), 1  ;;  %v5448_v5 = vld [vmem:[%s7053_s4] ss:$0 sm:$0xff]  ;;  %v3952_v23 = vld [vmem:[%s7052_s3 + $0xc8] sm:$0xff]  ;;  %v3950_v40 = vld [vmem:[%s7052_s3 + $0xb8] sm:$0xff] }
   0xf   : > { %5232 = vmatprep.subr.mxu1 %v3957_v1  ;;  %4513 = vmatprep.subr.mxu0 %v3957_v1  ;;  %s5434_s13 = sshll.u32 %s7170_s24, 8  ;;  %v5453_v6 = vld [vmem:[%s7054_s5] ss:$0 sm:$0xff]  ;;  %v3949_v51 = vld [vmem:[%s7052_s3 + $0xb0] sm:$0xff]  ;;  %v3948_v62 = vld [vmem:[%s7052_s3 + $0xa8] sm:$0xff] }
  0x10   : > { %5248 = vmatpush3.msra.mxu1 %v3957_v1  ;;  %4514 = vmatpush3.msra.mxu0 %v3957_v1  ;;  %s5443_s18 = scalar_lea.vmem %s7050_s1, %s5434_s13  ;;  %s422_s29 = scalar_lea.vmem %s7049_s0, %s5434_s13  ;;  %v3951_v31 = vld [vmem:[%s7052_s3 + $0xc0] sm:$0xff]  ;;  %vm5878_vm1 = vmneg %vm510_vm0 }
  0x11   : > { %5233 = vmatprep.subr.mxu1 %v3956_v2  ;;  %4515 = vmatprep.subr.mxu0 %v3956_v2  ;;  %v536_v7 = vld [vmem:[%s5443_s18 + $0x70] sm:$0xff]  ;;  %v537_v8 = vld [vmem:[%s5443_s18 + $0x78] sm:$0xff]  ;;  %v538_v16 = vld [vmem:[%s5443_s18 + $0x80] sm:$0xff]  ;;  %s4076_s23 = sadd.s32 128, %s5434_s13  ;;  %s6917_s12 = scalar_lea.vmem %s7055_s6, %s5434_s13 }
  0x12   : > { %5249 = vmatpush3.msra.mxu1 %v3956_v2  ;;  %4516 = vmatpush3.msra.mxu0 %v3956_v2  ;;  %v3935_v9 = vld [vmem:[%s422_s29 + $0x70] sm:$0xff]  ;;  %v575_v10 = vmul.f32 %v5448_v5, %v536_v7  ;;  %v576_v11 = vmul.f32 %v5448_v5, %v537_v8  ;;  %v3936_v12 = vld [vmem:[%s422_s29 + $0x78] sm:$0xff]  ;;  %v539_v17 = vld [vmem:[%s5443_s18 + $0x88] sm:$0xff]  ;;  %v577_v25 = vmul.f32 %v5448_v5, %v538_v16  ;;  %s452_s9 = scalar_lea.vmem %s7051_s2, %s4076_s23  ;;  %s3934_s13 = sshll.u32 %s7170_s24, 1 }
  0x13   : > { %5234 = vmatprep.subr.mxu1 %v3955_v3  ;;  %4517 = vmatprep.subr.mxu0 %v3955_v3  ;;  %v492_v13 = vmul.f32 %v5448_v5, %v3935_v9  ;;  %v493_v15 = vmul.f32 %v5448_v5, %v3936_v12  ;;  %v522_v21 = vld [vmem:[%s5443_s18] sm:$0xff]  ;;  %v523_v22 = vld [vmem:[%s5443_s18 + $0x8] sm:$0xff]  ;;  %v578_v26 = vmul.f32 %v5448_v5, %v539_v17  ;;  %v540_v45 = vld [vmem:[%s5443_s18 + $0x90] sm:$0xff]  ;;  %s475_s15 = scalar_lea.vmem %s7056_s7, %s3934_s13 }
  0x14   : > { %5250 = vmatpush3.msra.mxu1 %v3955_v3  ;;  %4518 = vmatpush3.msra.mxu0 %v3955_v3  ;;  %v614_v18 = vadd.f32 %v5453_v6, %v575_v10  ;;  %v615_v19 = vadd.f32 %v5453_v6, %v576_v11  ;;  %v561_v30 = vmul.f32 %v5448_v5, %v522_v21  ;;  %v541_v46 = vld [vmem:[%s5443_s18 + $0x98] sm:$0xff]  ;;  %v524_v60 = vld [vmem:[%s5443_s18 + $0x10] sm:$0xff]  ;;  %v3947_v3 = vld [vmem:[%s7052_s3 + $0xa0] sm:$0xff] }
  0x15   : > { %5235 = vmatprep.subr.mxu1 %v3954_v4  ;;  %4519 = vmatprep.subr.mxu0 %v3954_v4  ;;  %v501_v20 = vadd.f32 %v5453_v6, %v492_v13  ;;  %v502_v24 = vadd.f32 %v5453_v6, %v493_v15  ;;  %v616_v33 = vadd.f32 %v5453_v6, %v577_v25  ;;  %v525_v61 = vld [vmem:[%s5443_s18 + $0x18] sm:$0xff]  ;;  %v542_v10 = vld [vmem:[%s5443_s18 + $0xa0] sm:$0xff]  ;;  %v527_v16 = vld [vmem:[%s5443_s18 + $0x28] sm:$0xff] }
  0x16   : > { %5251 = vmatpush3.msra.mxu1 %v3954_v4  ;;  %4520 = vmatpush3.msra.mxu0 %v3954_v4  ;;  %v646_v27 = vmax.f32 %v614_v18, 0.0  ;;  %v647_v28 = vmax.f32 %v615_v19, 0.0  ;;  %v617_v34 = vadd.f32 %v5453_v6, %v578_v26  ;;  %v562_v35 = vmul.f32 %v5448_v5, %v523_v22  ;;  %v526_v15 = vld [vmem:[%s5443_s18 + $0x20] sm:$0xff]  ;;  %v3946_v21 = vld [vmem:[%s7052_s3 + $0x98] sm:$0xff] }
  0x17   : > { %5236 = vmatprep.subr.mxu1 %v3953_v14  ;;  %4521 = vmatprep.subr.mxu0 %v3953_v14  ;;  %v503_v29 = vmax.f32 %v501_v20, 0.0  ;;  %v504_v32 = vmax.f32 %v502_v24, 0.0  ;;  %v600_v39 = vadd.f32 %v5453_v6, %v561_v30  ;;  %v648_v42 = vmax.f32 %v616_v33, 0.0  ;;  %v3945_v30 = vld [vmem:[%s7052_s3 + $0x90] sm:$0xff] }
  0x18   : > { %5252 = vmatpush3.msra.mxu1 %v3953_v14  ;;  %4522 = vmatpush3.msra.mxu0 %v3953_v14  ;;  %v717_v36 = vrot.slane %v646_v27, 7  ;;  %v718_v37 = vrot.slane %v647_v28, 7  ;;  %v649_v43 = vmax.f32 %v617_v34, 0.0  ;;  %v601_v44 = vadd.f32 %v5453_v6, %v562_v35  ;;  %v543_v14 = vld [vmem:[%s5443_s18 + $0xa8] sm:$0xff] }
  0x19   : > { %5237 = vmatprep.subr.mxu1 %v3952_v23  ;;  %4523 = vmatprep.subr.mxu0 %v3952_v23  ;;  %v506_v38 = vmul.f32 0.0, %v503_v29  ;;  %v507_v41 = vmul.f32 0.0, %v504_v32  ;;  %v720_v53 = vrot.slane %v648_v42, 7  ;;  %v632_v55 = vmax.f32 %v600_v39, 0.0  ;;  %v544_v39 = vld [vmem:[%s5443_s18 + $0xb0] sm:$0xff] }
  0x1a   : > { %5253 = vmatpush3.msra.mxu1 %v3952_v23  ;;  %4524 = vmatpush3.msra.mxu0 %v3952_v23  ;;  %v719_v47 = vsel %vm510_vm0, %v717_v36, %v718_v37  ;;  %v799_v48 = vsel %vm510_vm0, 0.0, %v717_v36  ;;  %v815_v50 = vsel %vm510_vm0, %v718_v37, 0.0  ;;  %v721_v54 = vrot.slane %v649_v43, 7 }
  0x1b   : > { %5238 = vmatprep.subr.mxu1 %v3951_v31  ;;  %4525 = vmatprep.subr.mxu0 %v3951_v31  ;;  %v5497_v49 = vrot.slane %v506_v38, 7  ;;  %846 = vst [vmem:[#allocation2 + $0xc0] sm:$0xff] %v799_v48  ;;  %847 = vst [vmem:[#allocation2 + $0xc8] sm:$0xff] %v719_v47  ;;  %v512_v52 = vrot.slane %v507_v41, 7  ;;  %v633_v57 = vmax.f32 %v601_v44, 0.0  ;;  %v579_v58 = vmul.f32 %v5448_v5, %v540_v45 }
  0x1c   : > { %5254 = vmatpush3.msra.mxu1 %v3951_v31  ;;  %4526 = vmatpush3.msra.mxu0 %v3951_v31  ;;  %848 = vst [vmem:[#allocation2 + $0xd0] sm:$0x3] %v815_v50  ;;  %v580_v59 = vmul.f32 %v5448_v5, %v541_v46  ;;  %v722_v1 = vsel %vm510_vm0, %v720_v53, %v721_v54  ;;  %v800_v2 = vsel %vm510_vm0, 0.0, %v720_v53  ;;  %v5523_v4 = vrot.slane %v632_v55, 7  ;;  %v545_v50 = vld [vmem:[%s5443_s18 + $0xb8] sm:$0xff] }
  0x1d   : > { %5239 = vmatprep.subr.mxu1 %v3950_v40  ;;  %4527 = vmatprep.subr.mxu0 %v3950_v40  ;;  %v517_v56 = vsel %vm510_vm0, 0.0, %v5497_v49  ;;  %v5514_v63 = vsel %vm510_vm0, %v5497_v49, %v512_v52  ;;  %v518_v0 = vsel %vm510_vm0, %v512_v52, 0.0  ;;  %849 = vst [vmem:[#allocation2 + $0xd8] sm:$0xff] %v800_v2  ;;  %850 = vst [vmem:[#allocation2 + $0xe0] sm:$0xff] %v722_v1  ;;  %v697_v7 = vrot.slane %v633_v57, 7  ;;  %v3943_v52 = vld [vmem:[%s7052_s3 + $0x80] sm:$0xff] }
  0x1e   : > { %5255 = vmatpush3.msra.mxu1 %v3950_v40  ;;  %4528 = vmatpush3.msra.mxu0 %v3950_v40  ;;  %519 = vst [vmem:[#allocation2] sm:$0xff] %v517_v56  ;;  %520 = vst [vmem:[#allocation2 + $0x8] sm:$0xff] %v5514_v63  ;;  %v816_v8 = vsel %vm510_vm0, %v721_v54, 0.0  ;;  %v618_v9 = vadd.f32 %v5453_v6, %v579_v58  ;;  %v619_v11 = vadd.f32 %v5453_v6, %v580_v59  ;;  %v3944_v40 = vld [vmem:[%s7052_s3 + $0x88] sm:$0xff]  ;;  %v959_v58 = vld [vmem:[%s7052_s3 + $0x78] sm:$0xff] }
  0x1f   : > { %5240 = vmatprep.subr.mxu1 %v3949_v51  ;;  %4529 = vmatprep.subr.mxu0 %v3949_v51  ;;  %521 = vst [vmem:[#allocation2 + $0x10] sm:$0x3] %v518_v0  ;;  %851 = vst [vmem:[#allocation2 + $0xe8] sm:$0x3] %v816_v8  ;;  %v563_v12 = vmul.f32 %v5448_v5, %v524_v60  ;;  %v564_v13 = vmul.f32 %v5448_v5, %v525_v61  ;;  %v792_v18 = vsel %vm510_vm0, 0.0, %v5523_v4  ;;  %v546_v8 = vld [vmem:[%s5443_s18 + $0xc0] sm:$0xff] }
  0x20   : > { %5256 = vmatpush3.msra.mxu1 %v3949_v51  ;;  %4530 = vmatpush3.msra.mxu0 %v3949_v51  ;;  %v5536_v17 = vsel %vm510_vm0, %v5523_v4, %v697_v7  ;;  %v808_v19 = vsel %vm510_vm0, %v697_v7, 0.0  ;;  %v650_v20 = vmax.f32 %v618_v9, 0.0  ;;  %825 = vst [vmem:[#allocation2 + $0x18] sm:$0xff] %v792_v18  ;;  %v651_v22 = vmax.f32 %v619_v11, 0.0  ;;  %v528_v51 = vld [vmem:[%s5443_s18 + $0x30] sm:$0xff] }
  0x21   : > { %5241 = vmatprep.subr.mxu1 %v3948_v62  ;;  %4531 = vmatprep.subr.mxu0 %v3948_v62  ;;  %826 = vst [vmem:[#allocation2 + $0x20] sm:$0xff] %v5536_v17  ;;  %827 = vst [vmem:[#allocation2 + $0x28] sm:$0x3] %v808_v19  ;;  %v602_v23 = vadd.f32 %v5453_v6, %v563_v12  ;;  %v603_v24 = vadd.f32 %v5453_v6, %v564_v13 }
  0x22   : > { %5257 = vmatpush3.msra.mxu1 %v3948_v62  ;;  %4532 = vmatpush3.msra.mxu0 %v3948_v62  ;;  %v581_v25 = vmul.f32 %v5448_v5, %v542_v10  ;;  %v5548_v26 = vrot.slane %v650_v20, 7  ;;  %v582_v27 = vmul.f32 %v5448_v5, %v543_v14  ;;  %v565_v28 = vmul.f32 %v5448_v5, %v526_v15  ;;  %v976_v57 = vld [vmem:[#allocation2 + $0xc1] sm:$0xff] }
  0x23   : > { %5242 = vmatprep.subr.mxu1 %v3947_v3  ;;  %4533 = vmatprep.subr.mxu0 %v3947_v3  ;;  %v566_v29 = vmul.f32 %v5448_v5, %v527_v16  ;;  %v724_v31 = vrot.slane %v651_v22, 7  ;;  %v634_v32 = vmax.f32 %v602_v23, 0.0  ;;  %v635_v33 = vmax.f32 %v603_v24, 0.0  ;;  %v977_v9 = vld [vmem:[#allocation2 + $0xc9] sm:$0xff]  ;;  %v530_v15 = vld [vmem:[%s5443_s18 + $0x40] sm:$0xff]  ;;  %v3974_v23 = vld [vmem:[%s7052_s3 + $0x178] sm:$0xff] }
  0x24   : > { %5258 = vmatpush3.msra.mxu1 %v3947_v3  ;;  %4534 = vmatpush3.msra.mxu0 %v3947_v3  ;;  %v620_v34 = vadd.f32 %v5453_v6, %v581_v25  ;;  %v801_v35 = vsel %vm510_vm0, 0.0, %v5548_v26  ;;  %v621_v36 = vadd.f32 %v5453_v6, %v582_v27  ;;  %v604_v37 = vadd.f32 %v5453_v6, %v565_v28  ;;  %v529_v3 = vld [vmem:[%s5443_s18 + $0x38] sm:$0xff]  ;;  %v547_v14 = vld [vmem:[%s5443_s18 + $0xc8] sm:$0xff]  ;;  %v958_v24 = vld [vmem:[%s7052_s3 + $0x70] sm:$0xff] }
  0x25   : > { %5243 = vmatprep.subr.mxu1 %v3946_v21  ;;  %4535 = vmatprep.subr.mxu0 %v3946_v21  ;;  %v605_v38 = vadd.f32 %v5453_v6, %v566_v29  ;;  %v5568_v41 = vsel %vm510_vm0, %v5548_v26, %v724_v31  ;;  %852 = vst [vmem:[#allocation2 + $0xf0] sm:$0xff] %v801_v35  ;;  %v5570_v42 = vrot.slane %v634_v32, 7  ;;  %v700_v43 = vrot.slane %v635_v33, 7  ;;  %v960_v0 = vld [vmem:[#allocation2 + $0x1] sm:$0xff]  ;;  %v978_v29 = vld [vmem:[#allocation2 + $0xd9] sm:$0xff] }
  0x26   : > { %5259 = vmatpush3.msra.mxu1 %v3946_v21  ;;  %4536 = vmatpush3.msra.mxu0 %v3946_v21  ;;  %v817_v44 = vsel %vm510_vm0, %v724_v31, 0.0  ;;  %853 = vst [vmem:[#allocation2 + $0xf8] sm:$0xff] %v5568_v41  ;;  %v652_v45 = vmax.f32 %v620_v34, 0.0  ;;  %v653_v46 = vmax.f32 %v621_v36, 0.0  ;;  %v636_v47 = vmax.f32 %v604_v37, 0.0  ;;  %v961_v16 = vld [vmem:[#allocation2 + $0x9] sm:$0xff] }
  0x27   : > { %5244 = vmatprep.subr.mxu1 %v3945_v30  ;;  %4537 = vmatprep.subr.mxu0 %v3945_v30  ;;  %854 = vst [vmem:[#allocation2 + $0x100] sm:$0x3] %v817_v44  ;;  %v637_v48 = vmax.f32 %v605_v38, 0.0  ;;  %v5581_v53 = vsel %vm510_vm0, %v5570_v42, %v700_v43  ;;  %v793_v54 = vsel %vm510_vm0, 0.0, %v5570_v42  ;;  %v809_v55 = vsel %vm510_vm0, %v700_v43, 0.0  ;;  %v531_v22 = vld [vmem:[%s5443_s18 + $0x48] sm:$0xff] }
  0x28   : > { %5260 = vmatpush3.msra.mxu1 %v3945_v30  ;;  %4538 = vmatpush3.msra.mxu0 %v3945_v30  ;;  %v583_v56 = vmul.f32 %v5448_v5, %v544_v39  ;;  %828 = vst [vmem:[#allocation2 + $0x30] sm:$0xff] %v793_v54  ;;  %829 = vst [vmem:[#allocation2 + $0x38] sm:$0xff] %v5581_v53  ;;  %v5591_v59 = vrot.slane %v652_v45, 7  ;;  %v727_v60 = vrot.slane %v653_v46, 7  ;;  %v5593_v61 = vrot.slane %v636_v47, 7  ;;  %v3973_v34 = vld [vmem:[%s7052_s3 + $0x170] sm:$0xff] }
  0x29   : > { %5245 = vmatprep.subr.mxu1 %v3944_v40  ;;  %4539 = vmatprep.subr.mxu0 %v3944_v40  ;;  %830 = vst [vmem:[#allocation2 + $0x40] sm:$0x3] %v809_v55  ;;  %v703_v62 = vrot.slane %v637_v48, 7  ;;  %v584_v1 = vmul.f32 %v5448_v5, %v545_v50  ;;  %v567_v7 = vmul.f32 %v5448_v5, %v528_v51  ;;  %v962_v39 = vld [vmem:[#allocation2 + $0x19] sm:$0xff]  ;;  %v957_v47 = vld [vmem:[%s7052_s3 + $0x68] sm:$0xff]  ;;  %v548_v54 = vld [vmem:[%s5443_s18 + $0xd0] sm:$0xff] }
  0x2a   : > { %5261 = vmatpush3.msra.mxu1 %v3944_v40  ;;  %4540 = vmatpush3.msra.mxu0 %v3944_v40  ;;  %v622_v2 = vadd.f32 %v5453_v6, %v583_v56  ;;  %v5602_v10 = vsel %vm510_vm0, %v5591_v59, %v727_v60  ;;  %v802_v11 = vsel %vm510_vm0, 0.0, %v5591_v59  ;;  %v794_v13 = vsel %vm510_vm0, 0.0, %v5593_v61  ;;  %v979_v40 = vld [vmem:[#allocation2 + $0xe1] sm:$0xff]  ;;  %v549_v55 = vld [vmem:[%s5443_s18 + $0xd8] sm:$0xff] }
  0x2b   : > { %5246 = vmatprep.subr.mxu1 %v3943_v52  ;;  %4541 = vmatprep.subr.mxu0 %v3943_v52  ;;  %v5608_v12 = vsel %vm510_vm0, %v5593_v61, %v703_v62  ;;  %855 = vst [vmem:[#allocation2 + $0x108] sm:$0xff] %v802_v11  ;;  %856 = vst [vmem:[#allocation2 + $0x110] sm:$0xff] %v5602_v10  ;;  %v818_v18 = vsel %vm510_vm0, %v727_v60, 0.0  ;;  %v810_v19 = vsel %vm510_vm0, %v703_v62, 0.0  ;;  %v963_v56 = vld [vmem:[#allocation2 + $0x21] sm:$0xff] }
  0x2c   : > { %5262 = vmatpush3.msra.mxu1 %v3943_v52  ;;  %4567 = vmatprep.mubr.f32.mxu1 %v976_v57  ;;  %831 = vst [vmem:[#allocation2 + $0x48] sm:$0xff] %v794_v13  ;;  %832 = vst [vmem:[#allocation2 + $0x50] sm:$0xff] %v5608_v12  ;;  %v623_v20 = vadd.f32 %v5453_v6, %v584_v1  ;;  %v654_v21 = vmax.f32 %v622_v2, 0.0  ;;  %v568_v25 = vmul.f32 %v5448_v5, %v529_v3  ;;  %v3972_v57 = vld [vmem:[%s7052_s3 + $0x168] sm:$0xff]  ;;  %v956_v1 = vld [vmem:[%s7052_s3 + $0x60] sm:$0xff] }
  0x2d   : > { %4542 = vmatpush3.msra.mxu0 %v3943_v52  ;;  %4543 = vmatprep.mubr.f32.mxu0 %v960_v0  ;;  %857 = vst [vmem:[#allocation2 + $0x118] sm:$0x3] %v818_v18  ;;  %833 = vst [vmem:[#allocation2 + $0x58] sm:$0x3] %v810_v19  ;;  %v606_v27 = vadd.f32 %v5453_v6, %v567_v7  ;;  %v585_v28 = vmul.f32 %v5448_v5, %v546_v8  ;;  %v5665_v2 = vld [vmem:[%s7052_s3 + $0x160] sm:$0xff]  ;;  %v980_v11 = vld [vmem:[#allocation2 + $0xf1] sm:$0xff] }
  0x2e   : > { %4568 = vmatmul.mubr.f32.vlgmr.msra.gmra.mxu1 %v977_v9  ;;  %4591 = vmatprep.subr.mxu1 %v959_v58  ;;  %v655_v30 = vmax.f32 %v623_v20, 0.0  ;;  %v5629_v31 = vrot.slane %v654_v21, 7  ;;  %v586_v32 = vmul.f32 %v5448_v5, %v547_v14  ;;  %v569_v33 = vmul.f32 %v5448_v5, %v530_v15  ;;  %v532_v18 = vld [vmem:[%s5443_s18 + $0x50] sm:$0xff]  ;;  %v533_v19 = vld [vmem:[%s5443_s18 + $0x58] sm:$0xff] }
  0x2f   : > { %4544 = vmatmul.mubr.f32.vlgmr.msra.gmra.mxu0 %v961_v16  ;;  %4592 = vmatpush3.msra.mxu1 %v959_v58  ;;  %v607_v35 = vadd.f32 %v5453_v6, %v568_v25  ;;  %v638_v36 = vmax.f32 %v606_v27, 0.0  ;;  %v624_v37 = vadd.f32 %v5453_v6, %v585_v28  ;;  %v570_v38 = vmul.f32 %v5448_v5, %v531_v22  ;;  %v551_v25 = vld [vmem:[%s5443_s18 + $0xe8] sm:$0xff]  ;;  %v534_v27 = vld [vmem:[%s5443_s18 + $0x60] sm:$0xff]  ;;  %v964_v28 = vld [vmem:[#allocation2 + $0x31] sm:$0xff] }
  0x30   : > { %4671 = vmatprep.subr.mxu0 %v3974_v23  ;;  %4593 = vmatprep.subr.mxu1 %v958_v24  ;;  %v730_v43 = vrot.slane %v655_v30, 7  ;;  %v803_v44 = vsel %vm510_vm0, 0.0, %v5629_v31  ;;  %v625_v45 = vadd.f32 %v5453_v6, %v586_v32  ;;  %v608_v46 = vadd.f32 %v5453_v6, %v569_v33 }
  0x31   : > { %4672 = vmatpush3.msra.mxu0 %v3974_v23  ;;  %4570 = vmatprep.mubr.f32.mxu1 %v978_v29  ;;  %858 = vst [vmem:[#allocation2 + $0x120] sm:$0xff] %v803_v44  ;;  %v639_v48 = vmax.f32 %v607_v35, 0.0  ;;  %v5646_v50 = vrot.slane %v638_v36, 7  ;;  %v656_v51 = vmax.f32 %v624_v37, 0.0  ;;  %v609_v52 = vadd.f32 %v5453_v6, %v570_v38  ;;  %v981_v29 = vld [vmem:[#allocation2 + $0xf9] sm:$0xff]  ;;  %v535_v35 = vld [vmem:[%s5443_s18 + $0x68] sm:$0xff] }
  0x32   : > { %4594 = vmatpush3.msra.mxu1 %v958_v24  ;;  %4673 = vmatprep.subr.mxu0 %v3973_v34  ;;  %v5656_v58 = vsel %vm510_vm0, %v5629_v31, %v730_v43  ;;  %v819_v60 = vsel %vm510_vm0, %v730_v43, 0.0  ;;  %v657_v62 = vmax.f32 %v625_v45, 0.0  ;;  %v640_v0 = vmax.f32 %v608_v46, 0.0  ;;  %v550_v24 = vld [vmem:[%s5443_s18 + $0xe0] sm:$0xff]  ;;  %v955_v36 = vld [vmem:[%s7052_s3 + $0x58] sm:$0xff] }
  0x33   : > { %4546 = vmatprep.mubr.f32.mxu0 %v962_v39  ;;  %4571 = vmatmul.mubr.f32.gmra.mxu1 %v979_v40  ;;  %859 = vst [vmem:[#allocation2 + $0x128] sm:$0xff] %v5656_v58  ;;  %v706_v3 = vrot.slane %v639_v48, 7  ;;  %v795_v7 = vsel %vm510_vm0, 0.0, %v5646_v50  ;;  %860 = vst [vmem:[#allocation2 + $0x130] sm:$0x3] %v819_v60  ;;  %v5670_v8 = vrot.slane %v656_v51, 7  ;;  %v587_v15 = vmul.f32 %v5448_v5, %v548_v54 }
  0x34   : > { %v641_v9 = vmax.f32 %v609_v52, 0.0  ;;  %4595 = vmatprep.subr.mxu1 %v957_v47  ;;  %4674 = vmatpush3.msra.mxu0 %v3973_v34  ;;  %834 = vst [vmem:[#allocation2 + $0x60] sm:$0xff] %v795_v7  ;;  %v733_v13 = vrot.slane %v657_v62, 7  ;;  %v5672_v14 = vrot.slane %v640_v0, 7  ;;  %v588_v16 = vmul.f32 %v5448_v5, %v549_v55  ;;  %v965_v43 = vld [vmem:[#allocation2 + $0x39] sm:$0xff]  ;;  %v954_v51 = vld [vmem:[%s7052_s3 + $0x50] sm:$0xff] }
  0x35   : > { %4547 = vmatmul.mubr.f32.gmra.mxu0 %v963_v56  ;;  %4596 = vmatpush3.msra.mxu1 %v957_v47  ;;  %v5680_v20 = vsel %vm510_vm0, %v5646_v50, %v706_v3  ;;  %v811_v21 = vsel %vm510_vm0, %v706_v3, 0.0  ;;  %v804_v22 = vsel %vm510_vm0, 0.0, %v5670_v8  ;;  %v626_v34 = vadd.f32 %v5453_v6, %v587_v15  ;;  %v3970_v48 = vld [vmem:[%s7052_s3 + $0x158] sm:$0xff]  ;;  %v3969_v3 = vld [vmem:[%s7052_s3 + $0x150] sm:$0xff] }
  0x36   : > { %v709_v23 = vrot.slane %v641_v9, 7  ;;  %4675 = vmatprep.subr.mxu0 %v3972_v57  ;;  %4597 = vmatprep.subr.mxu1 %v956_v1  ;;  %835 = vst [vmem:[#allocation2 + $0x68] sm:$0xff] %v5680_v20  ;;  %836 = vst [vmem:[#allocation2 + $0x70] sm:$0x3] %v811_v21  ;;  %v5691_v30 = vsel %vm510_vm0, %v5670_v8, %v733_v13  ;;  %v796_v32 = vsel %vm510_vm0, 0.0, %v5672_v14  ;;  %v820_v33 = vsel %vm510_vm0, %v733_v13, 0.0 }
  0x37   : > { %861 = vst [vmem:[#allocation2 + $0x138] sm:$0xff] %v804_v22  ;;  %4676 = vmatpush3.msra.mxu0 %v3972_v57  ;;  %4573 = vmatprep.mubr.f32.mxu1 %v980_v11  ;;  %862 = vst [vmem:[#allocation2 + $0x140] sm:$0xff] %v5691_v30  ;;  %v627_v39 = vadd.f32 %v5453_v6, %v588_v16  ;;  %v571_v40 = vmul.f32 %v5448_v5, %v532_v18  ;;  %v658_v44 = vmax.f32 %v626_v34, 0.0  ;;  %v982_v57 = vld [vmem:[#allocation2 + $0x109] sm:$0xff]  ;;  %v983_v15 = vld [vmem:[#allocation2 + $0x111] sm:$0xff] }
  0x38   : > { %v5704_v37 = vsel %vm510_vm0, %v5672_v14, %v709_v23  ;;  %837 = vst [vmem:[#allocation2 + $0x78] sm:$0xff] %v796_v32  ;;  %863 = vst [vmem:[#allocation2 + $0x148] sm:$0x3] %v820_v33  ;;  %v812_v38 = vsel %vm510_vm0, %v709_v23, 0.0  ;;  %4598 = vmatpush3.msra.mxu1 %v956_v1  ;;  %4677 = vmatprep.subr.mxu0 %v5665_v2  ;;  %v572_v45 = vmul.f32 %v5448_v5, %v533_v19  ;;  %v5734_v13 = vld [vmem:[#allocation2 + $0x49] sm:$0xff] }
  0x39   : > { %838 = vst [vmem:[#allocation2 + $0x80] sm:$0xff] %v5704_v37  ;;  %839 = vst [vmem:[#allocation2 + $0x88] sm:$0x3] %v812_v38  ;;  %v589_v46 = vmul.f32 %v5448_v5, %v550_v24  ;;  %v590_v47 = vmul.f32 %v5448_v5, %v551_v25  ;;  %4549 = vmatprep.mubr.f32.mxu0 %v964_v28  ;;  %4574 = vmatmul.mubr.f32.gmra.mxu1 %v981_v29  ;;  %v659_v52 = vmax.f32 %v627_v39, 0.0  ;;  %v953_v22 = vld [vmem:[%s7052_s3 + $0x48] sm:$0xff]  ;;  %v5748_v28 = vld [vmem:[#allocation2 + $0x51] sm:$0xff] }
  0x3a   : > { %v610_v54 = vadd.f32 %v5453_v6, %v571_v40  ;;  %v573_v55 = vmul.f32 %v5448_v5, %v534_v27  ;;  %v574_v56 = vmul.f32 %v5448_v5, %v535_v35  ;;  %4599 = vmatprep.subr.mxu1 %v955_v36  ;;  %4678 = vmatpush3.msra.mxu0 %v5665_v2  ;;  %v5724_v60 = vrot.slane %v658_v44, 7  ;;  %v3968_v35 = vld [vmem:[%s7052_s3 + $0x148] sm:$0xff] }
  0x3b   : > { %v611_v62 = vadd.f32 %v5453_v6, %v572_v45  ;;  %v628_v0 = vadd.f32 %v5453_v6, %v589_v46  ;;  %v629_v1 = vadd.f32 %v5453_v6, %v590_v47  ;;  %4550 = vmatmul.mubr.f32.gmra.mxu0 %v965_v43  ;;  %4600 = vmatpush3.msra.mxu1 %v955_v36  ;;  %v736_v7 = vrot.slane %v659_v52, 7  ;;  %v952_v36 = vld [vmem:[%s7052_s3 + $0x40] sm:$0xff] }
  0x3c   : > { %v642_v9 = vmax.f32 %v610_v54, 0.0  ;;  %v612_v11 = vadd.f32 %v5453_v6, %v573_v55  ;;  %v613_v2 = vadd.f32 %v5453_v6, %v574_v56  ;;  %4679 = vmatprep.subr.mxu0 %v3970_v48  ;;  %4601 = vmatprep.subr.mxu1 %v954_v51  ;;  %v805_v16 = vsel %vm510_vm0, 0.0, %v5724_v60  ;;  %v984_v40 = vld [vmem:[#allocation2 + $0x121] sm:$0xff]  ;;  %v985_v55 = vld [vmem:[#allocation2 + $0x129] sm:$0xff]  ;;  %v951_v56 = vld [vmem:[%s7052_s3 + $0x38] sm:$0xff] }
  0x3d   : > { %v643_v18 = vmax.f32 %v611_v62, 0.0  ;;  %v660_v19 = vmax.f32 %v628_v0, 0.0  ;;  %v661_v21 = vmax.f32 %v629_v1, 0.0  ;;  %4680 = vmatpush3.msra.mxu0 %v3970_v48  ;;  %4576 = vmatprep.mubr.f32.mxu1 %v982_v57  ;;  %v5743_v23 = vsel %vm510_vm0, %v5724_v60, %v736_v7  ;;  %864 = vst [vmem:[#allocation2 + $0x150] sm:$0xff] %v805_v16  ;;  %v3967_v47 = vld [vmem:[%s7052_s3 + $0x140] sm:$0xff]  ;;  %v5794_v0 = vld [vmem:[#allocation2 + $0x69] sm:$0xff] }
  0x3e   : > { %v5745_v24 = vrot.slane %v642_v9, 7  ;;  %v821_v25 = vsel %vm510_vm0, %v736_v7, 0.0  ;;  %v644_v27 = vmax.f32 %v612_v11, 0.0  ;;  %4602 = vmatpush3.msra.mxu1 %v954_v51  ;;  %4681 = vmatprep.subr.mxu0 %v3969_v3  ;;  %865 = vst [vmem:[#allocation2 + $0x158] sm:$0xff] %v5743_v23  ;;  %v645_v34 = vmax.f32 %v613_v2, 0.0  ;;  %v5784_v54 = vld [vmem:[#allocation2 + $0x61] sm:$0xff] }
  0x3f   : > { %v712_v29 = vrot.slane %v643_v18, 7  ;;  %866 = vst [vmem:[#allocation2 + $0x160] sm:$0x3] %v821_v25  ;;  %v5751_v32 = vrot.slane %v660_v19, 7  ;;  %v739_v33 = vrot.slane %v661_v21, 7  ;;  %4552 = vmatprep.mubr.f32.mxu0 %v5734_v13  ;;  %4577 = vmatmul.mubr.f32.gmra.mxu1 %v983_v15  ;;  %v3966_v1 = vld [vmem:[%s7052_s3 + $0x138] sm:$0xff] }
  0x40   : > { %v797_v38 = vsel %vm510_vm0, 0.0, %v5745_v24  ;;  %v5762_v39 = vrot.slane %v644_v27, 7  ;;  %4603 = vmatprep.subr.mxu1 %v953_v22  ;;  %4682 = vmatpush3.msra.mxu0 %v3969_v3  ;;  %v715_v48 = vrot.slane %v645_v34, 7  ;;  %v950_v3 = vld [vmem:[%s7052_s3 + $0x30] sm:$0xff]  ;;  %v986_v7 = vld [vmem:[#allocation2 + $0x139] sm:$0xff]  ;;  %v987_v2 = vld [vmem:[#allocation2 + $0x141] sm:$0xff] }
  0x41   : > { %v5766_v43 = vsel %vm510_vm0, %v5745_v24, %v712_v29  ;;  %840 = vst [vmem:[#allocation2 + $0x90] sm:$0xff] %v797_v38  ;;  %v813_v44 = vsel %vm510_vm0, %v712_v29, 0.0  ;;  %v5771_v45 = vsel %vm510_vm0, %v5751_v32, %v739_v33  ;;  %v806_v46 = vsel %vm510_vm0, 0.0, %v5751_v32  ;;  %4553 = vmatmul.mubr.f32.gmra.mxu0 %v5748_v28  ;;  %4604 = vmatpush3.msra.mxu1 %v953_v22  ;;  %v3965_v9 = vld [vmem:[%s7052_s3 + $0x130] sm:$0xff]  ;;  %v5808_v11 = vld [vmem:[#allocation2 + $0x79] sm:$0xff]  ;;  %v949_v15 = vld [vmem:[%s7052_s3 + $0x28] sm:$0xff] }
  0x42   : > { %841 = vst [vmem:[#allocation2 + $0x98] sm:$0xff] %v5766_v43  ;;  %842 = vst [vmem:[#allocation2 + $0xa0] sm:$0x3] %v813_v44  ;;  %v798_v51 = vsel %vm510_vm0, 0.0, %v5762_v39  ;;  %v822_v52 = vsel %vm510_vm0, %v739_v33, 0.0  ;;  %4683 = vmatprep.subr.mxu0 %v3968_v35  ;;  %4605 = vmatprep.subr.mxu1 %v952_v36  ;;  %v5791_v57 = vsel %vm510_vm0, %v5762_v39, %v715_v48  ;;  %v814_v62 = vsel %vm510_vm0, %v715_v48, 0.0 }
  0x43   : > { %867 = vst [vmem:[#allocation2 + $0x168] sm:$0xff] %v806_v46  ;;  %868 = vst [vmem:[#allocation2 + $0x170] sm:$0xff] %v5771_v45  ;;  %4684 = vmatpush3.msra.mxu0 %v3968_v35  ;;  %4579 = vmatprep.mubr.f32.mxu1 %v984_v40  ;;  %v5813_v16 = vld [vmem:[#allocation2 + $0x81] sm:$0xff]  ;;  %v947_v29 = vld [vmem:[%s7052_s3 + $0x18] sm:$0xff] }
  0x44   : > { %843 = vst [vmem:[#allocation2 + $0xa8] sm:$0xff] %v798_v51  ;;  %869 = vst [vmem:[#allocation2 + $0x178] sm:$0x3] %v822_v52  ;;  %4606 = vmatpush3.msra.mxu1 %v952_v36  ;;  %4685 = vmatprep.subr.mxu0 %v3967_v47  ;;  %v3964_v18 = vld [vmem:[%s7052_s3 + $0x128] sm:$0xff]  ;;  %v948_v19 = vld [vmem:[%s7052_s3 + $0x20] sm:$0xff] }
  0x45   : > { %844 = vst [vmem:[#allocation2 + $0xb0] sm:$0xff] %v5791_v57  ;;  %845 = vst [vmem:[#allocation2 + $0xb8] sm:$0x3] %v814_v62  ;;  %4555 = vmatprep.mubr.f32.mxu0 %v5784_v54  ;;  %4580 = vmatmul.mubr.f32.gmra.mxu1 %v985_v55  ;;  %v5822_v21 = vld [vmem:[#allocation2 + $0x151] sm:$0xff]  ;;  %v3963_v22 = vld [vmem:[%s7052_s3 + $0x120] sm:$0xff] }
  0x46   : > { %4607 = vmatprep.subr.mxu1 %v951_v56  ;;  %4686 = vmatpush3.msra.mxu0 %v3967_v47  ;;  %v5830_v27 = vld [vmem:[#allocation2 + $0x159] sm:$0xff]  ;;  %v946_v35 = vld [vmem:[%s7052_s3 + $0x10] sm:$0xff]  ;;  %v945_v46 = vld [vmem:[%s7052_s3 + $0x8] sm:$0xff] }
  0x47   : > { %4556 = vmatmul.mubr.f32.gmra.mxu0 %v5794_v0  ;;  %4608 = vmatpush3.msra.mxu1 %v951_v56  ;;  %v3962_v34 = vld [vmem:[%s7052_s3 + $0x118] sm:$0xff]  ;;  %v3961_v38 = vld [vmem:[%s7052_s3 + $0x110] sm:$0xff]  ;;  %v3960_v48 = vld [vmem:[%s7052_s3 + $0x108] sm:$0xff] }
  0x48   : > { %4687 = vmatprep.subr.mxu0 %v3966_v1  ;;  %4609 = vmatprep.subr.mxu1 %v950_v3  ;;  %v944_v51 = vld [vmem:[%s7052_s3] sm:$0xff]  ;;  %v3990_v56 = vld [vmem:[%s7052_s3 + $0x1f8] sm:$0xff] }
  0x49   : > { %4688 = vmatpush3.msra.mxu0 %v3966_v1  ;;  %4582 = vmatprep.mubr.f32.mxu1 %v986_v7  ;;  %v5828_v25 = vld [vmem:[#allocation2 + $0x91] sm:$0xff]  ;;  %v5836_v33 = vld [vmem:[#allocation2 + $0x99] sm:$0xff]  ;;  %v1459_v55 = vld [vmem:[#allocation2 + $0x2] sm:$0xff] }
  0x4a   : > { %4610 = vmatpush3.msra.mxu1 %v950_v3  ;;  %4689 = vmatprep.subr.mxu0 %v3965_v9  ;;  %v5846_v36 = vld [vmem:[#allocation2 + $0x169] sm:$0xff]  ;;  %v3959_v52 = vld [vmem:[%s7052_s3 + $0x100] sm:$0xff]  ;;  %v4006_v3 = vld [vmem:[%s7052_s3 + $0x278] sm:$0xff] }
  0x4b   : > { %4558 = vmatprep.mubr.f32.mxu0 %v5808_v11  ;;  %4583 = vmatmul.mubr.f32.gmra.mxu1 %v987_v2  ;;  %v5854_v44 = vld [vmem:[#allocation2 + $0x171] sm:$0xff]  ;;  %v5891_v2 = vld [vmem:[#allocation2 + $0x1a] sm:$0xff] }
  0x4c   : > { %4611 = vmatprep.subr.mxu1 %v949_v15  ;;  %4690 = vmatpush3.msra.mxu0 %v3965_v9  ;;  %v5852_v40 = vld [vmem:[#allocation2 + $0xa9] sm:$0xff]  ;;  %v5860_v47 = vld [vmem:[#allocation2 + $0xb1] sm:$0xff] }
  0x4d   : > { %4559 = vmatmul.mubr.f32.gmra.mxu0 %v5813_v16  ;;  %4612 = vmatpush3.msra.mxu1 %v949_v15  ;;  %v1460_v1 = vld [vmem:[#allocation2 + $0xa] sm:$0xff]  ;;  %v553_v9 = vld [vmem:[%s5443_s18 + $0xf8] sm:$0xff] }
  0x4e   : > { %4691 = vmatprep.subr.mxu0 %v3964_v18  ;;  %4613 = vmatprep.subr.mxu1 %v948_v19  ;;  %v552_v7 = vld [vmem:[%s5443_s18 + $0xf0] sm:$0xff] }
  0x4f   : > { %4692 = vmatpush3.msra.mxu0 %v3964_v18  ;;  %4585 = vmatprep.mubr.f32.mxu1 %v5822_v21  ;;  %v591_v15 = vmul.f32 %v5448_v5, %v552_v7  ;;  %v5901_v18 = vld [vmem:[#allocation2 + $0x22] sm:$0xff]  ;;  %v5969_v7 = vld [vmem:[#allocation2 + $0x7a] sm:$0xff] }
  0x50   : > { %4614 = vmatpush3.msra.mxu1 %v948_v19  ;;  %4693 = vmatprep.subr.mxu0 %v3963_v22  ;;  %v4005_v19 = vld [vmem:[%s7052_s3 + $0x270] sm:$0xff] }
  0x51   : > { %4561 = vmatprep.mubr.f32.mxu0 %v5828_v25  ;;  %4586 = vmatmul.mubr.f32.gmra.mxu1 %v5830_v27 }
  0x52   : > { %4615 = vmatprep.subr.mxu1 %v947_v29  ;;  %4694 = vmatpush3.msra.mxu0 %v3963_v22  ;;  %v630_v22 = vadd.f32 %v5453_v6, %v591_v15  ;;  %v4001_v15 = vld [vmem:[%s7052_s3 + $0x250] sm:$0xff] }
  0x53   : > { %4562 = vmatmul.mubr.f32.gmra.mxu0 %v5836_v33  ;;  %4616 = vmatpush3.msra.mxu1 %v947_v29 }
  0x54   : > { %4695 = vmatprep.subr.mxu0 %v3962_v34  ;;  %4617 = vmatprep.subr.mxu1 %v946_v35 }
  0x55   : > { %4696 = vmatpush3.msra.mxu0 %v3962_v34  ;;  %4588 = vmatprep.mubr.f32.mxu1 %v5846_v36 }
  0x56   : > { %4618 = vmatpush3.msra.mxu1 %v946_v35  ;;  %4697 = vmatprep.subr.mxu0 %v3961_v38  ;;  %v4004_v35 = vld [vmem:[%s7052_s3 + $0x268] sm:$0xff] }
  0x57   : > { %4564 = vmatprep.mubr.f32.mxu0 %v5852_v40  ;;  %4589 = vmatmul.mubr.f32.gmra.mxu1 %v5854_v44 }
  0x58   : > { %4619 = vmatprep.subr.mxu1 %v945_v46  ;;  %4698 = vmatpush3.msra.mxu0 %v3961_v38 }
  0x59   : > { %4565 = vmatmul.mubr.f32.gmra.mxu0 %v5860_v47  ;;  %4620 = vmatpush3.msra.mxu1 %v945_v46 }
  0x5a   : > { %4699 = vmatprep.subr.mxu0 %v3960_v48  ;;  %4621 = vmatprep.subr.mxu1 %v944_v51 }
  0x5b   : > { %4700 = vmatpush3.msra.mxu0 %v3960_v48  ;;  %4622 = vmatpush3.msra.mxu1 %v944_v51  ;;  %v5929_v48 = vld [vmem:[#allocation2 + $0x4a] sm:$0xff] }
  0x5c   : > { %5296 = vmatprep.mubr.msk.f32.mxu1 %vm5878_vm1, %v5497_v49  ;;  %4701 = vmatprep.subr.mxu0 %v3959_v52  ;;  %v3989_v49 = vld [vmem:[%s7052_s3 + $0x1f0] sm:$0xff] }
  0x5d   : > { %4624 = vmatmul.mubr.f32.vlgmr.msra.gmra.mxu1 %v5514_v63  ;;  %4702 = vmatpush3.msra.mxu0 %v3959_v52  ;;  %v592_v63 = vmul.f32 %v5448_v5, %v553_v9  ;;  %v5911_v5 = vld [vmem:[#allocation2 + $0x32] sm:$0xff] }
  0x5e   : > { %4703 = vmatprep.mubr.f32.mxu0 %v1459_v55  ;;  %4751 = vmatprep.subr.mxu1 %v3990_v56  ;;  %v5944_v55 = vld [vmem:[#allocation2 + $0x52] sm:$0xff] }
  0x5f   : > { %4704 = vmatmul.mubr.f32.vlgmr.msra.gmra.mxu0 %v1460_v1  ;;  %4752 = vmatpush3.msra.mxu1 %v3990_v56  ;;  %v631_v29 = vadd.f32 %v5453_v6, %v592_v63  ;;  %v5919_v6 = vld [vmem:[#allocation2 + $0x3a] sm:$0xff]  ;;  %v3985_v9 = vld [vmem:[%s7052_s3 + $0x1d0] sm:$0xff] }
  0x60   : > { %4831 = vmatprep.subr.mxu0 %v4006_v3  ;;  %5298 = vmatprep.mubr.msk.f32.mxu1 %vm5878_vm1, %v5523_v4  ;;  %v3988_v4 = vld [vmem:[%s7052_s3 + $0x1e8] sm:$0xff]  ;;  %v4003_v56 = vld [vmem:[%s7052_s3 + $0x260] sm:$0xff]  ;;  %v3986_v1 = vld [vmem:[%s7052_s3 + $0x1d8] sm:$0xff] }
  0x61   : > { %4832 = vmatpush3.msra.mxu0 %v4006_v3  ;;  %4627 = vmatmul.mubr.f32.gmra.mxu1 %v5536_v17  ;;  %v662_v17 = vmax.f32 %v630_v22, 0.0  ;;  %v663_v34 = vmax.f32 %v631_v29, 0.0  ;;  %v4002_v3 = vld [vmem:[%s7052_s3 + $0x258] sm:$0xff]  ;;  %v4000_v29 = vld [vmem:[%s7052_s3 + $0x248] sm:$0xff] }
  0x62   : > { %4706 = vmatprep.mubr.f32.mxu0 %v5891_v2  ;;  %4753 = vmatprep.subr.mxu1 %v3989_v49  ;;  %v5985_v63 = vld [vmem:[#allocation2 + $0x92] sm:$0xff]  ;;  %v5993_v22 = vld [vmem:[#allocation2 + $0x9a] sm:$0xff] }
  0x63   : > { %4707 = vmatmul.mubr.f32.gmra.mxu0 %v5901_v18  ;;  %4754 = vmatpush3.msra.mxu1 %v3989_v49  ;;  %v5925_v38 = vrot.slane %v662_v17, 7  ;;  %v742_v46 = vrot.slane %v663_v34, 7  ;;  %v5977_v49 = vld [vmem:[#allocation2 + $0x82] sm:$0xff]  ;;  %v6009_v34 = vld [vmem:[#allocation2 + $0xb2] sm:$0xff] }
  0x64   : > { %4833 = vmatprep.subr.mxu0 %v4005_v19  ;;  %5300 = vmatprep.mubr.msk.f32.mxu1 %vm5878_vm1, %v5570_v42  ;;  %v3987_v42 = vld [vmem:[%s7052_s3 + $0x1e0] sm:$0xff] }
  0x65   : > { %4834 = vmatpush3.msra.mxu0 %v4005_v19  ;;  %4630 = vmatmul.mubr.f32.gmra.mxu1 %v5581_v53  ;;  %v807_v53 = vsel %vm510_vm0, 0.0, %v5925_v38  ;;  %v5938_v51 = vsel %vm510_vm0, %v5925_v38, %v742_v46  ;;  %v823_v52 = vsel %vm510_vm0, %v742_v46, 0.0  ;;  %v3984_v19 = vld [vmem:[%s7052_s3 + $0x1c8] sm:$0xff]  ;;  %v3983_v17 = vld [vmem:[%s7052_s3 + $0x1c0] sm:$0xff] }
  0x66   : > { %4709 = vmatprep.mubr.f32.mxu0 %v5911_v5  ;;  %4755 = vmatprep.subr.mxu1 %v3988_v4  ;;  %870 = vst [vmem:[#allocation2 + $0x180] sm:$0xff] %v807_v53  ;;  %871 = vst [vmem:[#allocation2 + $0x188] sm:$0xff] %v5938_v51  ;;  %v6015_v46 = vld [vmem:[#allocation2 + $0xc0] sm:$0xff] }
  0x67   : > { %4710 = vmatmul.mubr.f32.gmra.mxu0 %v5919_v6  ;;  %4756 = vmatpush3.msra.mxu1 %v3988_v4  ;;  %872 = vst [vmem:[#allocation2 + $0x190] sm:$0x3] %v823_v52  ;;  %v6001_v4 = vld [vmem:[#allocation2 + $0xaa] sm:$0xff]  ;;  %v6021_v53 = vld [vmem:[#allocation2 + $0xc2] sm:$0xff]  ;;  %v3982_v52 = vld [vmem:[%s7052_s3 + $0x1b8] sm:$0xff] }
  0x68   : > { %4835 = vmatprep.subr.mxu0 %v4004_v35  ;;  %5302 = vmatprep.mubr.msk.f32.mxu1 %vm5878_vm1, %v5593_v61  ;;  %v5953_v61 = vld [vmem:[#allocation2 + $0x62] sm:$0xff] }
  0x69   : > { %4836 = vmatpush3.msra.mxu0 %v4004_v35  ;;  %4633 = vmatmul.mubr.f32.gmra.mxu1 %v5608_v12  ;;  %v5961_v12 = vld [vmem:[#allocation2 + $0x6a] sm:$0xff]  ;;  %v3999_v35 = vld [vmem:[%s7052_s3 + $0x240] sm:$0xff] }
  0x6a   : > { %4712 = vmatprep.mubr.f32.mxu0 %v5929_v48  ;;  %4757 = vmatprep.subr.mxu1 %v3987_v42 }
  0x6b   : > { %4713 = vmatmul.mubr.f32.gmra.mxu0 %v5944_v55  ;;  %4758 = vmatpush3.msra.mxu1 %v3987_v42  ;;  %v6018_v42 = vld [vmem:[#allocation2 + $0xc8] sm:$0xff] }
  0x6c   : > { %4837 = vmatprep.subr.mxu0 %v4003_v56  ;;  %5304 = vmatprep.mubr.msk.f32.mxu1 %vm5878_vm1, %v5646_v50 }
  0x6d   : > { %4838 = vmatpush3.msra.mxu0 %v4003_v56  ;;  %4636 = vmatmul.mubr.f32.gmra.mxu1 %v5680_v20  ;;  %v6027_v56 = vld [vmem:[#allocation2 + $0xca] sm:$0xff] }
  0x6e   : > { %4715 = vmatprep.mubr.f32.mxu0 %v5953_v61  ;;  %4759 = vmatprep.subr.mxu1 %v3986_v1 }
  0x6f   : > { %4716 = vmatmul.mubr.f32.gmra.mxu0 %v5961_v12  ;;  %4760 = vmatpush3.msra.mxu1 %v3986_v1  ;;  %v3998_v1 = vld [vmem:[%s7052_s3 + $0x238] sm:$0xff] }
  0x70   : > { %4839 = vmatprep.subr.mxu0 %v4002_v3  ;;  %5306 = vmatprep.mubr.msk.f32.mxu1 %vm5878_vm1, %v5672_v14 }
  0x71   : > { %4840 = vmatpush3.msra.mxu0 %v4002_v3  ;;  %4639 = vmatmul.mubr.f32.gmra.mxu1 %v5704_v37  ;;  %v6035_v3 = vld [vmem:[#allocation2 + $0xda] sm:$0xff] }
  0x72   : > { %4718 = vmatprep.mubr.f32.mxu0 %v5969_v7  ;;  %4761 = vmatprep.subr.mxu1 %v3985_v9 }
  0x73   : > { %4719 = vmatmul.mubr.f32.gmra.mxu0 %v5977_v49  ;;  %4762 = vmatpush3.msra.mxu1 %v3985_v9  ;;  %v3981_v9 = vld [vmem:[%s7052_s3 + $0x1b0] sm:$0xff] }
  0x74   : > { %4841 = vmatprep.subr.mxu0 %v4001_v15  ;;  %5308 = vmatprep.mubr.msk.f32.mxu1 %vm5878_vm1, %v5745_v24 }
  0x75   : > { %4842 = vmatpush3.msra.mxu0 %v4001_v15  ;;  %4642 = vmatmul.mubr.f32.gmra.mxu1 %v5766_v43  ;;  %v5287_v15 = vld [vmem:[#allocation2 + $0xd8] sm:$0xff] }
  0x76   : > { %4721 = vmatprep.mubr.f32.mxu0 %v5985_v63  ;;  %4763 = vmatprep.subr.mxu1 %v3984_v19 }
  0x77   : > { %4722 = vmatmul.mubr.f32.gmra.mxu0 %v5993_v22  ;;  %4764 = vmatpush3.msra.mxu1 %v3984_v19  ;;  %v6040_v19 = vld [vmem:[#allocation2 + $0xe2] sm:$0xff] }
  0x78   : > { %4843 = vmatprep.subr.mxu0 %v4000_v29  ;;  %5310 = vmatprep.mubr.msk.f32.mxu1 %vm5878_vm1, %v5762_v39 }
  0x79   : > { %4844 = vmatpush3.msra.mxu0 %v4000_v29  ;;  %4645 = vmatmul.mubr.f32.gmra.mxu1 %v5791_v57  ;;  %v5288_v29 = vld [vmem:[#allocation2 + $0xe0] sm:$0xff] }
  0x7a   : > { %4724 = vmatprep.mubr.f32.mxu0 %v6001_v4  ;;  %4765 = vmatprep.subr.mxu1 %v3983_v17 }
  0x7b   : > { %4725 = vmatmul.mubr.f32.gmra.mxu0 %v6009_v34  ;;  %4766 = vmatpush3.msra.mxu1 %v3983_v17  ;;  %v3997_v17 = vld [vmem:[%s7052_s3 + $0x230] sm:$0xff] }
  0x7c   : > { %4845 = vmatprep.subr.mxu0 %v3999_v35  ;;  %4647 = vmatprep.mubr.f32.mxu1 %v6015_v46 }
  0x7d   : > { %4846 = vmatpush3.msra.mxu0 %v3999_v35  ;;  %4648 = vmatmul.mubr.f32.gmra.mxu1 %v6018_v42  ;;  %v6047_v35 = vld [vmem:[#allocation2 + $0xf2] sm:$0xff] }
  0x7e   : > { %4727 = vmatprep.mubr.f32.mxu0 %v6021_v53  ;;  %4767 = vmatprep.subr.mxu1 %v3982_v52 }
  0x7f   : > { %4728 = vmatmul.mubr.f32.gmra.mxu0 %v6027_v56  ;;  %4768 = vmatpush3.msra.mxu1 %v3982_v52  ;;  %v3980_v52 = vld [vmem:[%s7052_s3 + $0x1a8] sm:$0xff] }
  0x80   : > { %4847 = vmatprep.subr.mxu0 %v3998_v1  ;;  %4650 = vmatprep.mubr.f32.mxu1 %v5287_v15  ;;  %v6063_v15 = vld [vmem:[#allocation2 + $0x10a] sm:$0xff] }
  0x81   : > { %4848 = vmatpush3.msra.mxu0 %v3998_v1  ;;  %4651 = vmatmul.mubr.f32.gmra.mxu1 %v5288_v29  ;;  %v6055_v1 = vld [vmem:[#allocation2 + $0xfa] sm:$0xff]  ;;  %7069 = vst [vmem:[#allocation4_spill] sm:$0xff] %v6063_v15 }
  0x82   : > { %4730 = vmatprep.mubr.f32.mxu0 %v6035_v3  ;;  %4769 = vmatprep.subr.mxu1 %v3981_v9  ;;  %7068 = vst [vmem:[#allocation3_spill] sm:$0xff] %v6055_v1  ;;  %v3995_v29 = vld [vmem:[%s7052_s3 + $0x220] sm:$0xff] }
  0x83   : > { %4731 = vmatmul.mubr.f32.gmra.mxu0 %v6040_v19  ;;  %4770 = vmatpush3.msra.mxu1 %v3981_v9  ;;  %v3996_v9 = vld [vmem:[%s7052_s3 + $0x228] sm:$0xff] }
  0x84   : > { %4849 = vmatprep.subr.mxu0 %v3997_v17  ;;  %5312 = vmatprep.mubr.msk.f32.mxu1 %vm5878_vm1, %v5548_v26  ;;  %v3979_v26 = vld [vmem:[%s7052_s3 + $0x1a0] sm:$0xff] }
  0x85   : > { %4850 = vmatpush3.msra.mxu0 %v3997_v17  ;;  %4654 = vmatmul.mubr.f32.gmra.mxu1 %v5568_v41  ;;  %v6071_v41 = vld [vmem:[#allocation2 + $0x112] sm:$0xff]  ;;  %v6079_v17 = vld [vmem:[#allocation2 + $0x122] sm:$0xff] }
  0x86   : > { %4733 = vmatprep.mubr.f32.mxu0 %v6047_v35  ;;  %4771 = vmatprep.subr.mxu1 %v3980_v52  ;;  %7070 = vst [vmem:[#allocation5_spill] sm:$0xff] %v6071_v41  ;;  %7071 = vst [vmem:[#allocation6_spill] sm:$0xff] %v6079_v17 }
  0x87   : > { %4734 = vmatmul.mubr.f32.gmra.mxu0 %v6055_v1  ;;  %4772 = vmatpush3.msra.mxu1 %v3980_v52  ;;  %v3994_v52 = vld [vmem:[%s7052_s3 + $0x218] sm:$0xff] }
  0x88   : > { %4851 = vmatprep.subr.mxu0 %v3996_v9  ;;  %5314 = vmatprep.mubr.msk.f32.mxu1 %vm5878_vm1, %v5591_v59  ;;  %v3978_v59 = vld [vmem:[%s7052_s3 + $0x198] sm:$0xff] }
  0x89   : > { %4852 = vmatpush3.msra.mxu0 %v3996_v9  ;;  %4657 = vmatmul.mubr.f32.gmra.mxu1 %v5602_v10  ;;  %v6087_v10 = vld [vmem:[#allocation2 + $0x12a] sm:$0xff]  ;;  %v6098_v9 = vld [vmem:[#allocation2 + $0x13a] sm:$0xff] }
  0x8a   : > { %4736 = vmatprep.mubr.f32.mxu0 %v6063_v15  ;;  %4773 = vmatprep.subr.mxu1 %v3979_v26  ;;  %7072 = vst [vmem:[#allocation7_spill] sm:$0xff] %v6087_v10 }
  0x8b   : > { %4737 = vmatmul.mubr.f32.gmra.mxu0 %v6071_v41  ;;  %4774 = vmatpush3.msra.mxu1 %v3979_v26  ;;  %v874_v26 = vld [vmem:[%s452_s9 + $0x8] sm:$0xff] }
  0x8c   : > { %4853 = vmatprep.subr.mxu0 %v3995_v29  ;;  %5316 = vmatprep.mubr.msk.f32.mxu1 %vm5878_vm1, %v5629_v31  ;;  %v873_v31 = vld [vmem:[%s452_s9] sm:$0xff] }
  0x8d   : > { %4854 = vmatpush3.msra.mxu0 %v3995_v29  ;;  %4660 = vmatmul.mubr.f32.gmra.mxu1 %v5656_v58  ;;  %v3977_v58 = vld [vmem:[%s7052_s3 + $0x190] sm:$0xff]  ;;  %v3941_v29 = vld [vmem:[%s7053_s4] ss:$0 sm:$0xff] }
  0x8e   : > { %4739 = vmatprep.mubr.f32.mxu0 %v6079_v17  ;;  %4775 = vmatprep.subr.mxu1 %v3978_v59  ;;  %v6110_v17 = vld [vmem:[#allocation2 + $0x142] sm:$0xff]  ;;  %v882_v41 = vmul.f32 %v3941_v29, %v873_v31  ;;  %v883_v15 = vmul.f32 %v3941_v29, %v874_v26  ;;  %v6121_v31 = vld [vmem:[#allocation2 + $0x152] sm:$0xff] }
  0x8f   : > { %4740 = vmatmul.mubr.f32.gmra.mxu0 %v6087_v10  ;;  %4776 = vmatpush3.msra.mxu1 %v3978_v59  ;;  %v3942_v59 = vld [vmem:[%s7054_s5] ss:$0 sm:$0xff]  ;;  %v3993_v10 = vld [vmem:[%s7052_s3 + $0x210] sm:$0xff] }
  0x90   : > { %4855 = vmatprep.subr.mxu0 %v3994_v52  ;;  %5318 = vmatprep.mubr.msk.f32.mxu1 %vm5878_vm1, %v5670_v8  ;;  %v891_v1 = vadd.f32 %v3942_v59, %v882_v41  ;;  %v892_v8 = vadd.f32 %v3942_v59, %v883_v15  ;;  %v3992_v15 = vld [vmem:[%s7052_s3 + $0x208] sm:$0xff] }
  0x91   : > { %4856 = vmatpush3.msra.mxu0 %v3994_v52  ;;  %4663 = vmatmul.mubr.f32.gmra.mxu1 %v5691_v30  ;;  %v3976_v52 = vld [vmem:[%s7052_s3 + $0x188] sm:$0xff]  ;;  %v6129_v30 = vld [vmem:[#allocation2 + $0x15a] sm:$0xff] }
  0x92   : > { %4742 = vmatprep.mubr.f32.mxu0 %v6098_v9  ;;  %4777 = vmatprep.subr.mxu1 %v3977_v58  ;;  %7073 = vst [vmem:[#allocation8_spill] sm:$0xff] %v6129_v30  ;;  %v893_v26 = vmax.f32 %v891_v1, 0.0  ;;  %v894_v29 = vmax.f32 %v892_v8, 0.0  ;;  %v3975_v1 = vld [vmem:[%s7052_s3 + $0x180] sm:$0xff] }
  0x93   : > { %4743 = vmatmul.mubr.f32.gmra.mxu0 %v6110_v17  ;;  %4778 = vmatpush3.msra.mxu1 %v3977_v58  ;;  %v3991_v8 = vld [vmem:[%s7052_s3 + $0x200] sm:$0xff] }
  0x94   : > { %4857 = vmatprep.subr.mxu0 %v3993_v10  ;;  %5320 = vmatprep.mubr.msk.f32.mxu1 %vm5878_vm1, %v5724_v60  ;;  %v896_v41 = vmul.f32 0.0, %v893_v26  ;;  %v6136_v58 = vmul.f32 0.0, %v894_v29  ;;  %v6139_v60 = vld [vmem:[#allocation2 + $0x16a] sm:$0xff]  ;;  %v1766_v26 = vld [vmem:[#allocation2 + $0x20] sm:$0xff] }
  0x95   : > { %4858 = vmatpush3.msra.mxu0 %v3993_v10  ;;  %4666 = vmatmul.mubr.f32.gmra.mxu1 %v5743_v23  ;;  %7074 = vst [vmem:[#allocation9_spill] sm:$0xff] %v6139_v60  ;;  %v6147_v23 = vld [vmem:[#allocation2 + $0x172] sm:$0xff] }
  0x96   : > { %4745 = vmatprep.mubr.f32.mxu0 %v6121_v31  ;;  %4779 = vmatprep.subr.mxu1 %v3976_v52  ;;  %v6149_v10 = vrot.slane %v896_v41, 7  ;;  %v7064_v59 = vrot.slane %v6136_v58, 7 }
  0x97   : > { %4746 = vmatmul.mubr.f32.gmra.mxu0 %v6129_v30  ;;  %4780 = vmatpush3.msra.mxu1 %v3976_v52  ;;  %v1765_v52 = vld [vmem:[#allocation2 + $0x18] sm:$0xff] }
  0x98   : > { %4859 = vmatprep.subr.mxu0 %v3992_v15  ;;  %5322 = vmatprep.mubr.msk.f32.mxu1 %vm5878_vm1, %v5751_v32  ;;  %7075 = vst [vmem:[#allocation10_spill] sm:$0xff] %v6149_v10  ;;  %v906_v29 = vsel %vm510_vm0, 0.0, %v6149_v10  ;;  %v6163_v41 = vsel %vm510_vm0, %v6149_v10, %v7064_v59  ;;  %v4022_v30 = vld [vmem:[%s7052_s3 + $0x2f8] sm:$0xff]  ;;  %v6173_v10 = vld [vmem:[#allocation2 + $0x30] sm:$0xff] }
  0x99   : > { %4860 = vmatpush3.msra.mxu0 %v3992_v15  ;;  %4669 = vmatmul.mubr.f32.gmra.mxu1 %v5771_v45  ;;  %v2071_v15 = vld [vmem:[#allocation2 + $0x19] sm:$0xff]  ;;  %909 = vst [vmem:[#allocation2 + $0x198] sm:$0xff] %v906_v29  ;;  %910 = vst [vmem:[#allocation2 + $0x1a0] sm:$0xff] %v6163_v41  ;;  %v6177_v29 = vld [vmem:[#allocation2 + $0x31] sm:$0xff] }
  0x9a   : > { %4748 = vmatprep.mubr.f32.mxu0 %v6139_v60  ;;  %4781 = vmatprep.subr.mxu1 %v3975_v1  ;;  %v2072_v60 = vld [vmem:[#allocation2 + $0x21] sm:$0xff]  ;;  %v4038_v59 = vld [vmem:[%s7052_s3 + $0x378] sm:$0xff] }
  0x9b   : > { %4749 = vmatmul.mubr.f32.gmra.mxu0 %v6147_v23  ;;  %4782 = vmatpush3.msra.mxu1 %v3975_v1  ;;  %v6175_v1 = vld [vmem:[#allocation2 + $0x38] sm:$0xff] }
  0x9c   : > { %4861 = vmatprep.subr.mxu0 %v3991_v8  ;;  %4783 = vmatprep.mubr.f32.mxu1 %v1765_v52  ;;  %v4021_v52 = vld [vmem:[%s7052_s3 + $0x2f0] sm:$0xff] }
  0x9d   : > { %4862 = vmatpush3.msra.mxu0 %v3991_v8  ;;  %4784 = vmatmul.mubr.f32.vlgmr.msra.gmra.mxu1 %v1766_v26  ;;  %v6183_v8 = vld [vmem:[#allocation2 + $0x39] sm:$0xff]  ;;  %v4037_v26 = vld [vmem:[%s7052_s3 + $0x370] sm:$0xff] }
  0x9e   : > { %4863 = vmatprep.mubr.f32.mxu0 %v2071_v15  ;;  %4911 = vmatprep.subr.mxu1 %v4022_v30  ;;  %v4036_v15 = vld [vmem:[%s7052_s3 + $0x368] sm:$0xff] }
  0x9f   : > { %4864 = vmatmul.mubr.f32.vlgmr.msra.gmra.mxu0 %v2072_v60  ;;  %4912 = vmatpush3.msra.mxu1 %v4022_v30  ;;  %v4020_v30 = vld [vmem:[%s7052_s3 + $0x2e8] sm:$0xff] }
  0xa0   : > { %4991 = vmatprep.subr.mxu0 %v4038_v59  ;;  %4786 = vmatprep.mubr.f32.mxu1 %v6173_v10  ;;  %v5289_v60 = vld [vmem:[#allocation2 + $0x48] sm:$0xff] }
  0xa1   : > { %4992 = vmatpush3.msra.mxu0 %v4038_v59  ;;  %4787 = vmatmul.mubr.f32.gmra.mxu1 %v6175_v1  ;;  %v5290_v59 = vld [vmem:[#allocation2 + $0x50] sm:$0xff] }
  0xa2   : > { %4866 = vmatprep.mubr.f32.mxu0 %v6177_v29  ;;  %4913 = vmatprep.subr.mxu1 %v4021_v52 }
  0xa3   : > { %4867 = vmatmul.mubr.f32.gmra.mxu0 %v6183_v8  ;;  %4914 = vmatpush3.msra.mxu1 %v4021_v52  ;;  %v4019_v52 = vld [vmem:[%s7052_s3 + $0x2e0] sm:$0xff] }
  0xa4   : > { %4993 = vmatprep.subr.mxu0 %v4037_v26  ;;  %4789 = vmatprep.mubr.f32.mxu1 %v5289_v60  ;;  %v4013_v60 = vld [vmem:[%s7052_s3 + $0x2b0] sm:$0xff] }
  0xa5   : > { %4994 = vmatpush3.msra.mxu0 %v4037_v26  ;;  %4790 = vmatmul.mubr.f32.gmra.mxu1 %v5290_v59  ;;  %v6280_v26 = vld [vmem:[#allocation2 + $0xf8] sm:$0xff] }
  0xa6   : > { %4869 = vmatprep.mubr.f32.mxu0 %v5734_v13  ;;  %4915 = vmatprep.subr.mxu1 %v4020_v30  ;;  %v4035_v13 = vld [vmem:[%s7052_s3 + $0x360] sm:$0xff] }
  0xa7   : > { %4870 = vmatmul.mubr.f32.gmra.mxu0 %v5748_v28  ;;  %4916 = vmatpush3.msra.mxu1 %v4020_v30  ;;  %v4018_v28 = vld [vmem:[%s7052_s3 + $0x2d8] sm:$0xff] }
  0xa8   : > { %4995 = vmatprep.subr.mxu0 %v4036_v15  ;;  %5324 = vmatprep.mubr.msk.f32.mxu1 %vm5878_vm1, %v5646_v50  ;;  %v4034_v50 = vld [vmem:[%s7052_s3 + $0x358] sm:$0xff] }
  0xa9   : > { %4996 = vmatpush3.msra.mxu0 %v4036_v15  ;;  %4793 = vmatmul.mubr.f32.gmra.mxu1 %v5680_v20  ;;  %v4017_v20 = vld [vmem:[%s7052_s3 + $0x2d0] sm:$0xff]  ;;  %v2090_v59 = vld [vmem:[#allocation2 + $0xf9] sm:$0xff] }
  0xaa   : > { %4872 = vmatprep.mubr.f32.mxu0 %v5784_v54  ;;  %4917 = vmatprep.subr.mxu1 %v4019_v52  ;;  %v4015_v54 = vld [vmem:[%s7052_s3 + $0x2c0] sm:$0xff]  ;;  %v2089_v30 = vld [vmem:[#allocation2 + $0xf1] sm:$0xff] }
  0xab   : > { %4873 = vmatmul.mubr.f32.gmra.mxu0 %v5794_v0  ;;  %4918 = vmatpush3.msra.mxu1 %v4019_v52  ;;  %v6259_v0 = vld [vmem:[#allocation2 + $0xd8] sm:$0xff]  ;;  %v4029_v15 = vld [vmem:[%s7052_s3 + $0x330] sm:$0xff]  ;;  %v6291_v52 = vld [vmem:[#allocation2 + $0x108] sm:$0xff] }
  0xac   : > { %4997 = vmatprep.subr.mxu0 %v4035_v13  ;;  %5326 = vmatprep.mubr.msk.f32.mxu1 %vm5878_vm1, %v5672_v14  ;;  %v4033_v14 = vld [vmem:[%s7052_s3 + $0x350] sm:$0xff] }
  0xad   : > { %4998 = vmatpush3.msra.mxu0 %v4035_v13  ;;  %4796 = vmatmul.mubr.f32.gmra.mxu1 %v5704_v37  ;;  %v4016_v37 = vld [vmem:[%s7052_s3 + $0x2c8] sm:$0xff]  ;;  %v6293_v13 = vld [vmem:[#allocation2 + $0x110] sm:$0xff] }
  0xae   : > { %4875 = vmatprep.mubr.f32.mxu0 %v5808_v11  ;;  %4919 = vmatprep.subr.mxu1 %v4018_v28  ;;  %v6262_v11 = vld [vmem:[#allocation2 + $0xe0] sm:$0xff] }
  0xaf   : > { %4876 = vmatmul.mubr.f32.gmra.mxu0 %v5813_v16  ;;  %4920 = vmatpush3.msra.mxu1 %v4018_v28  ;;  %v6265_v16 = vld [vmem:[#allocation2 + $0xd9] sm:$0xff]  ;;  %v2091_v28 = vld [vmem:[#allocation2 + $0x109] sm:$0xff] }
  0xb0   : > { %4999 = vmatprep.subr.mxu0 %v4034_v50  ;;  %5328 = vmatprep.mubr.msk.f32.mxu1 %vm5878_vm1, %v5745_v24  ;;  %v4032_v24 = vld [vmem:[%s7052_s3 + $0x348] sm:$0xff] }
  0xb1   : > { %5000 = vmatpush3.msra.mxu0 %v4034_v50  ;;  %4799 = vmatmul.mubr.f32.gmra.mxu1 %v5766_v43  ;;  %v6247_v43 = vld [vmem:[#allocation2 + $0xc1] sm:$0xff] }
  0xb2   : > { %4878 = vmatprep.mubr.f32.mxu0 %v5828_v25  ;;  %4921 = vmatprep.subr.mxu1 %v4017_v20  ;;  %v4014_v25 = vld [vmem:[%s7052_s3 + $0x2b8] sm:$0xff]  ;;  %v4012_v50 = vld [vmem:[%s7052_s3 + $0x2a8] sm:$0xff] }
  0xb3   : > { %4879 = vmatmul.mubr.f32.gmra.mxu0 %v5836_v33  ;;  %4922 = vmatpush3.msra.mxu1 %v4017_v20  ;;  %v6271_v33 = vld [vmem:[#allocation2 + $0xe1] sm:$0xff]  ;;  %v2092_v20 = vld [vmem:[#allocation2 + $0x111] sm:$0xff] }
  0xb4   : > { %5001 = vmatprep.subr.mxu0 %v4033_v14  ;;  %5330 = vmatprep.mubr.msk.f32.mxu1 %vm5878_vm1, %v5762_v39  ;;  %v6253_v39 = vld [vmem:[#allocation2 + $0xc9] sm:$0xff] }
  0xb5   : > { %5002 = vmatpush3.msra.mxu0 %v4033_v14  ;;  %4802 = vmatmul.mubr.f32.gmra.mxu1 %v5791_v57  ;;  %v4031_v57 = vld [vmem:[%s7052_s3 + $0x340] sm:$0xff]  ;;  %v4028_v14 = vld [vmem:[%s7052_s3 + $0x328] sm:$0xff] }
  0xb6   : > { %4881 = vmatprep.mubr.f32.mxu0 %v5852_v40  ;;  %4923 = vmatprep.subr.mxu1 %v4016_v37  ;;  %v4030_v40 = vld [vmem:[%s7052_s3 + $0x338] sm:$0xff] }
  0xb7   : > { %4882 = vmatmul.mubr.f32.gmra.mxu0 %v5860_v47  ;;  %4924 = vmatpush3.msra.mxu1 %v4016_v37  ;;  %v6277_v47 = vld [vmem:[#allocation2 + $0xf0] sm:$0xff]  ;;  %v6303_v37 = vld [vmem:[#allocation2 + $0x120] sm:$0xff] }
  0xb8   : > { %5003 = vmatprep.subr.mxu0 %v4032_v24  ;;  %4804 = vmatprep.mubr.f32.mxu1 %v6015_v46 }
  0xb9   : > { %5004 = vmatpush3.msra.mxu0 %v4032_v24  ;;  %4805 = vmatmul.mubr.f32.gmra.mxu1 %v6018_v42  ;;  %v6305_v24 = vld [vmem:[#allocation2 + $0x128] sm:$0xff] }
  0xba   : > { %4884 = vmatprep.mubr.f32.mxu0 %v6247_v43  ;;  %4925 = vmatprep.subr.mxu1 %v4015_v54 }
  0xbb   : > { %4885 = vmatmul.mubr.f32.gmra.mxu0 %v6253_v39  ;;  %4926 = vmatpush3.msra.mxu1 %v4015_v54  ;;  %v2093_v54 = vld [vmem:[#allocation2 + $0x121] sm:$0xff] }
  0xbc   : > { %5005 = vmatprep.subr.mxu0 %v4031_v57  ;;  %4807 = vmatprep.mubr.f32.mxu1 %v6259_v0 }
  0xbd   : > { %5006 = vmatpush3.msra.mxu0 %v4031_v57  ;;  %4808 = vmatmul.mubr.f32.gmra.mxu1 %v6262_v11  ;;  %v4011_v57 = vld [vmem:[%s7052_s3 + $0x2a0] sm:$0xff] }
  0xbe   : > { %4887 = vmatprep.mubr.f32.mxu0 %v6265_v16  ;;  %4927 = vmatprep.subr.mxu1 %v4014_v25 }
  0xbf   : > { %4888 = vmatmul.mubr.f32.gmra.mxu0 %v6271_v33  ;;  %4928 = vmatpush3.msra.mxu1 %v4014_v25  ;;  %v2094_v25 = vld [vmem:[#allocation2 + $0x129] sm:$0xff] }
  0xc0   : > { %5007 = vmatprep.subr.mxu0 %v4030_v40  ;;  %4810 = vmatprep.mubr.f32.mxu1 %v6277_v47 }
  0xc1   : > { %5008 = vmatpush3.msra.mxu0 %v4030_v40  ;;  %4811 = vmatmul.mubr.f32.gmra.mxu1 %v6280_v26  ;;  %v4027_v40 = vld [vmem:[%s7052_s3 + $0x320] sm:$0xff] }
  0xc2   : > { %4890 = vmatprep.mubr.f32.mxu0 %v2089_v30  ;;  %4929 = vmatprep.subr.mxu1 %v4013_v60  ;;  %v6315_v30 = vld [vmem:[#allocation2 + $0x138] sm:$0xff] }
  0xc3   : > { %4891 = vmatmul.mubr.f32.gmra.mxu0 %v2090_v59  ;;  %4930 = vmatpush3.msra.mxu1 %v4013_v60  ;;  %v6317_v60 = vld [vmem:[#allocation2 + $0x140] sm:$0xff] }
  0xc4   : > { %5009 = vmatprep.subr.mxu0 %v4029_v15  ;;  %4813 = vmatprep.mubr.f32.mxu1 %v6291_v52  ;;  %v2095_v59 = vld [vmem:[#allocation2 + $0x139] sm:$0xff] }
  0xc5   : > { %5010 = vmatpush3.msra.mxu0 %v4029_v15  ;;  %4814 = vmatmul.mubr.f32.gmra.mxu1 %v6293_v13  ;;  %v4010_v15 = vld [vmem:[%s7052_s3 + $0x298] sm:$0xff] }
  0xc6   : > { %4893 = vmatprep.mubr.f32.mxu0 %v2091_v28  ;;  %4931 = vmatprep.subr.mxu1 %v4012_v50  ;;  %v2096_v28 = vld [vmem:[#allocation2 + $0x141] sm:$0xff] }
  0xc7   : > { %4894 = vmatmul.mubr.f32.gmra.mxu0 %v2092_v20  ;;  %4932 = vmatpush3.msra.mxu1 %v4012_v50  ;;  %v4026_v50 = vld [vmem:[%s7052_s3 + $0x318] sm:$0xff]  ;;  %v4009_v20 = vld [vmem:[%s7052_s3 + $0x290] sm:$0xff] }
  0xc8   : > { %5011 = vmatprep.subr.mxu0 %v4028_v14  ;;  %4816 = vmatprep.mubr.f32.mxu1 %v6303_v37 }
  0xc9   : > { %5012 = vmatpush3.msra.mxu0 %v4028_v14  ;;  %4817 = vmatmul.mubr.f32.gmra.mxu1 %v6305_v24  ;;  %v5291_v14 = vld [vmem:[#allocation2 + $0x150] sm:$0xff] }
  0xca   : > { %4896 = vmatprep.mubr.f32.mxu0 %v2093_v54  ;;  %4933 = vmatprep.subr.mxu1 %v4011_v57  ;;  %v5292_v54 = vld [vmem:[#allocation2 + $0x158] sm:$0xff] }
  0xcb   : > { %4897 = vmatmul.mubr.f32.gmra.mxu0 %v2094_v25  ;;  %4934 = vmatpush3.msra.mxu1 %v4011_v57  ;;  %v4025_v57 = vld [vmem:[%s7052_s3 + $0x310] sm:$0xff]  ;;  %v7076_v25 = vrot.slane %v6136_v58, 7  ;;  %v4007_v58 = vld [vmem:[%s7052_s3 + $0x280] sm:$0xff] }
  0xcc   : > { %5013 = vmatprep.subr.mxu0 %v4027_v40  ;;  %4819 = vmatprep.mubr.f32.mxu1 %v6315_v30 }
  0xcd   : > { %5014 = vmatpush3.msra.mxu0 %v4027_v40  ;;  %4820 = vmatmul.mubr.f32.gmra.mxu1 %v6317_v60  ;;  %v907_v40 = vsel %vm510_vm0, %v7076_v25, 0.0 }
  0xce   : > { %4899 = vmatprep.mubr.f32.mxu0 %v2095_v59  ;;  %4935 = vmatprep.subr.mxu1 %v4010_v15  ;;  %v4008_v59 = vld [vmem:[%s7052_s3 + $0x288] sm:$0xff]  ;;  %911 = vst [vmem:[#allocation2 + $0x1a8] sm:$0x3] %v907_v40  ;;  %v4065_v40 = vld [vmem:[%s7052_s3 + $0x450] sm:$0xff] }
  0xcf   : > { %4900 = vmatmul.mubr.f32.gmra.mxu0 %v2096_v28  ;;  %4936 = vmatpush3.msra.mxu1 %v4010_v15  ;;  %v2690_v15 = vld [vmem:[#allocation2 + $0x78] sm:$0xff]  ;;  %v4051_v28 = vld [vmem:[%s7052_s3 + $0x3e0] sm:$0xff] }
  0xd0   : > { %5015 = vmatprep.subr.mxu0 %v4026_v50  ;;  %4822 = vmatprep.mubr.f32.mxu1 %v5291_v14 }
  0xd1   : > { %5016 = vmatpush3.msra.mxu0 %v4026_v50  ;;  %4823 = vmatmul.mubr.f32.gmra.mxu1 %v5292_v54  ;;  %v2692_v50 = vld [vmem:[#allocation2 + $0x90] sm:$0xff]  ;;  %v2694_v54 = vld [vmem:[#allocation2 + $0xa8] sm:$0xff] }
  0xd2   : > { %4902 = vmatprep.mubr.f32.mxu0 %v5822_v21  ;;  %4937 = vmatprep.subr.mxu1 %v4009_v20  ;;  %v4024_v21 = vld [vmem:[%s7052_s3 + $0x308] sm:$0xff] }
  0xd3   : > { %4903 = vmatmul.mubr.f32.gmra.mxu0 %v5830_v27  ;;  %4938 = vmatpush3.msra.mxu1 %v4009_v20  ;;  %v6350_v27 = vld [vmem:[#allocation2 + $0x181] sm:$0xff]  ;;  %v4050_v20 = vld [vmem:[%s7052_s3 + $0x3d8] sm:$0xff] }
  0xd4   : > { %5017 = vmatprep.subr.mxu0 %v4025_v57  ;;  %5332 = vmatprep.mubr.msk.f32.mxu1 %vm5878_vm1, %v5751_v32  ;;  %v6358_v32 = vld [vmem:[#allocation2 + $0x189] sm:$0xff] }
  0xd5   : > { %5018 = vmatpush3.msra.mxu0 %v4025_v57  ;;  %4826 = vmatmul.mubr.f32.gmra.mxu1 %v5771_v45  ;;  %v4023_v45 = vld [vmem:[%s7052_s3 + $0x300] sm:$0xff]  ;;  %v4049_v57 = vld [vmem:[%s7052_s3 + $0x3d0] sm:$0xff] }
  0xd6   : > { %4905 = vmatprep.mubr.f32.mxu0 %v5846_v36  ;;  %4939 = vmatprep.subr.mxu1 %v4008_v59  ;;  %v4054_v36 = vld [vmem:[%s7052_s3 + $0x3f8] sm:$0xff] }
  0xd7   : > { %4906 = vmatmul.mubr.f32.gmra.mxu0 %v5854_v44  ;;  %4940 = vmatpush3.msra.mxu1 %v4008_v59  ;;  %v4070_v44 = vld [vmem:[%s7052_s3 + $0x478] sm:$0xff] }
  0xd8   : > { %5019 = vmatprep.subr.mxu0 %v4024_v21  ;;  %5334 = vmatprep.mubr.msk.f32.mxu1 %vm5878_vm1, %v5925_v38  ;;  %v2686_v38 = vld [vmem:[#allocation2 + $0x48] sm:$0xff] }
  0xd9   : > { %5020 = vmatpush3.msra.mxu0 %v4024_v21  ;;  %4829 = vmatmul.mubr.f32.gmra.mxu1 %v5938_v51  ;;  %v4053_v51 = vld [vmem:[%s7052_s3 + $0x3f0] sm:$0xff] }
  0xda   : > { %4908 = vmatprep.mubr.f32.mxu0 %v6350_v27  ;;  %4941 = vmatprep.subr.mxu1 %v4007_v58 }
  0xdb   : > { %4909 = vmatmul.mubr.f32.gmra.mxu0 %v6358_v32  ;;  %4942 = vmatpush3.msra.mxu1 %v4007_v58 }
  0xdc   : > { %5021 = vmatprep.subr.mxu0 %v4023_v45  ;;  %4943 = vmatprep.mubr.f32.mxu1 %v5891_v2  ;;  %v2687_v2 = vld [vmem:[#allocation2 + $0x50] sm:$0xff] }
  0xdd   : > { %5022 = vmatpush3.msra.mxu0 %v4023_v45  ;;  %4944 = vmatmul.mubr.f32.vlgmr.msra.gmra.mxu1 %v5901_v18  ;;  %v4069_v18 = vld [vmem:[%s7052_s3 + $0x470] sm:$0xff] }
  0xde   : > { %5023 = vmatprep.mubr.f32.mxu0 %v6173_v10  ;;  %5071 = vmatprep.subr.mxu1 %v4054_v36  ;;  %v2688_v10 = vld [vmem:[#allocation2 + $0x60] sm:$0xff] }
  0xdf   : > { %5024 = vmatmul.mubr.f32.vlgmr.msra.gmra.mxu0 %v6175_v1  ;;  %5072 = vmatpush3.msra.mxu1 %v4054_v36  ;;  %v4052_v1 = vld [vmem:[%s7052_s3 + $0x3e8] sm:$0xff] }
  0xe0   : > { %5151 = vmatprep.subr.mxu0 %v4070_v44  ;;  %4946 = vmatprep.mubr.f32.mxu1 %v5911_v5  ;;  %v2689_v5 = vld [vmem:[#allocation2 + $0x68] sm:$0xff] }
  0xe1   : > { %5152 = vmatpush3.msra.mxu0 %v4070_v44  ;;  %4947 = vmatmul.mubr.f32.gmra.mxu1 %v5919_v6  ;;  %v4068_v6 = vld [vmem:[%s7052_s3 + $0x468] sm:$0xff] }
  0xe2   : > { %5026 = vmatprep.mubr.f32.mxu0 %v2686_v38  ;;  %5073 = vmatprep.subr.mxu1 %v4053_v51 }
  0xe3   : > { %5027 = vmatmul.mubr.f32.gmra.mxu0 %v2687_v2  ;;  %5074 = vmatpush3.msra.mxu1 %v4053_v51  ;;  %v7078_v2 = vld [vmem:[#allocation4_spill] sm:$0xff] }
  0xe4   : > { %5153 = vmatprep.subr.mxu0 %v4069_v18  ;;  %4949 = vmatprep.mubr.f32.mxu1 %v5929_v48  ;;  %v2691_v48 = vld [vmem:[#allocation2 + $0x80] sm:$0xff] }
  0xe5   : > { %5154 = vmatpush3.msra.mxu0 %v4069_v18  ;;  %4950 = vmatmul.mubr.f32.gmra.mxu1 %v5944_v55  ;;  %v4067_v55 = vld [vmem:[%s7052_s3 + $0x460] sm:$0xff] }
  0xe6   : > { %5029 = vmatprep.mubr.f32.mxu0 %v2688_v10  ;;  %5075 = vmatprep.subr.mxu1 %v4052_v1  ;;  %v7079_v18 = vld [vmem:[#allocation5_spill] sm:$0xff] }
  0xe7   : > { %5030 = vmatmul.mubr.f32.gmra.mxu0 %v2689_v5  ;;  %5076 = vmatpush3.msra.mxu1 %v4052_v1 }
  0xe8   : > { %5155 = vmatprep.subr.mxu0 %v4068_v6  ;;  %4952 = vmatprep.mubr.f32.mxu1 %v5953_v61  ;;  %v2693_v61 = vld [vmem:[#allocation2 + $0x98] sm:$0xff] }
  0xe9   : > { %5156 = vmatpush3.msra.mxu0 %v4068_v6  ;;  %4953 = vmatmul.mubr.f32.gmra.mxu1 %v5961_v12  ;;  %v4066_v12 = vld [vmem:[%s7052_s3 + $0x458] sm:$0xff]  ;;  %v7080_v6 = vld [vmem:[#allocation6_spill] sm:$0xff] }
  0xea   : > { %5032 = vmatprep.mubr.f32.mxu0 %v2690_v15  ;;  %5077 = vmatprep.subr.mxu1 %v4051_v28  ;;  %v7081_v15 = vld [vmem:[#allocation7_spill] sm:$0xff] }
  0xeb   : > { %5033 = vmatmul.mubr.f32.gmra.mxu0 %v2691_v48  ;;  %5078 = vmatpush3.msra.mxu1 %v4051_v28  ;;  %v2708_v28 = vld [vmem:[#allocation2 + $0x150] sm:$0xff]  ;;  %v4042_v48 = vld [vmem:[%s7052_s3 + $0x398] sm:$0xff] }
  0xec   : > { %5157 = vmatprep.subr.mxu0 %v4067_v55  ;;  %4955 = vmatprep.mubr.f32.mxu1 %v5969_v7 }
  0xed   : > { %5158 = vmatpush3.msra.mxu0 %v4067_v55  ;;  %4956 = vmatmul.mubr.f32.gmra.mxu1 %v5977_v49  ;;  %v2695_v49 = vld [vmem:[#allocation2 + $0xb0] sm:$0xff] }
  0xee   : > { %5035 = vmatprep.mubr.f32.mxu0 %v2692_v50  ;;  %5079 = vmatprep.subr.mxu1 %v4050_v20  ;;  %v6408_v14 = vpop.f32.mrf.mxu1  ;;  %v2709_v50 = vld [vmem:[#allocation2 + $0x158] sm:$0xff] }
  0xef   : > { %5036 = vmatmul.mubr.f32.gmra.mxu0 %v2693_v61  ;;  %5080 = vmatpush3.msra.mxu1 %v4050_v20  ;;  %v6413_v7 = vpop.f32.mrf.mxu0  ;;  %v2710_v61 = vld [vmem:[#allocation2 + $0x168] sm:$0xff] }
  0xf0   : > { %5159 = vmatprep.subr.mxu0 %v4066_v12  ;;  %4958 = vmatprep.mubr.f32.mxu1 %v5985_v63  ;;  %v6416_v25 = vpop.f32.mrf.mxu1  ;;  %v4048_v63 = vld [vmem:[%s7052_s3 + $0x3c8] sm:$0xff] }
  0xf1   : > { %5160 = vmatpush3.msra.mxu0 %v4066_v12  ;;  %4959 = vmatmul.mubr.f32.gmra.mxu1 %v5993_v22  ;;  %v6422_v59 = vpop.f32.mrf.mxu0  ;;  %v4064_v22 = vld [vmem:[%s7052_s3 + $0x448] sm:$0xff] }
  0xf2   : > { %5038 = vmatprep.mubr.f32.mxu0 %v2694_v54  ;;  %5081 = vmatprep.subr.mxu1 %v4049_v57  ;;  %v7082_v54 = vld [vmem:[#allocation8_spill] sm:$0xff] }
  0xf3   : > { %5039 = vmatmul.mubr.f32.gmra.mxu0 %v2695_v49  ;;  %5082 = vmatpush3.msra.mxu1 %v4049_v57  ;;  %v6427_v21 = vpop.f32.mrf.mxu1  ;;  %v4057_v57 = vld [vmem:[%s7052_s3 + $0x410] sm:$0xff] }
  0xf4   : > { %5161 = vmatprep.subr.mxu0 %v4065_v40  ;;  %4961 = vmatprep.mubr.f32.mxu1 %v6001_v4  ;;  %v4047_v4 = vld [vmem:[%s7052_s3 + $0x3c0] sm:$0xff] }
  0xf5   : > { %5162 = vmatpush3.msra.mxu0 %v4065_v40  ;;  %4962 = vmatmul.mubr.f32.gmra.mxu1 %v6009_v34  ;;  %v6434_v58 = vpop.f32.mrf.mxu0  ;;  %v6436_v45 = vpop.f32.mrf.mxu1  ;;  %v4063_v34 = vld [vmem:[%s7052_s3 + $0x440] sm:$0xff]  ;;  %v4040_v40 = vld [vmem:[%s7052_s3 + $0x388] sm:$0xff] }
  0xf6   : > { %5041 = vmatprep.mubr.f32.mxu0 %v6015_v46  ;;  %5083 = vmatprep.subr.mxu1 %v4048_v63 }
  0xf7   : > { %5042 = vmatmul.mubr.f32.gmra.mxu0 %v6018_v42  ;;  %5084 = vmatpush3.msra.mxu1 %v4048_v63  ;;  %v6443_v36 = vpop.f32.mrf.mxu0  ;;  %v4046_v42 = vld [vmem:[%s7052_s3 + $0x3b8] sm:$0xff] }
  0xf8   : > { %5163 = vmatprep.subr.mxu0 %v4064_v22  ;;  %4964 = vmatprep.mubr.f32.mxu1 %v6021_v53 }
  0xf9   : > { %5164 = vmatpush3.msra.mxu0 %v4064_v22  ;;  %4965 = vmatmul.mubr.f32.gmra.mxu1 %v6027_v56  ;;  %v6450_v46 = vpop.f32.mrf.mxu1  ;;  %v4062_v56 = vld [vmem:[%s7052_s3 + $0x438] sm:$0xff]  ;;  %v7083_v22 = vld [vmem:[#allocation9_spill] sm:$0xff] }
  0xfa   : > { %5044 = vmatprep.mubr.f32.mxu0 %v6259_v0  ;;  %5085 = vmatprep.subr.mxu1 %v4047_v4 }
  0xfb   : > { %5045 = vmatmul.mubr.f32.gmra.mxu0 %v6262_v11  ;;  %5086 = vmatpush3.msra.mxu1 %v4047_v4  ;;  %v6457_v53 = vpop.f32.mrf.mxu0  ;;  %v6459_v44 = vpop.f32.mrf.mxu1  ;;  %v4045_v11 = vld [vmem:[%s7052_s3 + $0x3b0] sm:$0xff]  ;;  %v4056_v4 = vld [vmem:[%s7052_s3 + $0x408] sm:$0xff] }
  0xfc   : > { %5165 = vmatprep.subr.mxu0 %v4063_v34  ;;  %4967 = vmatprep.mubr.f32.mxu1 %v6035_v3 }
  0xfd   : > { %5166 = vmatpush3.msra.mxu0 %v4063_v34  ;;  %4968 = vmatmul.mubr.f32.gmra.mxu1 %v6040_v19  ;;  %v6466_v0 = vpop.f32.mrf.mxu0  ;;  %v7077_v19 = vld [vmem:[#allocation3_spill] sm:$0xff] }
  0xfe   : > { %5047 = vmatprep.mubr.f32.mxu0 %v6277_v47  ;;  %5087 = vmatprep.subr.mxu1 %v4046_v42  ;;  %v4061_v47 = vld [vmem:[%s7052_s3 + $0x430] sm:$0xff] }
  0xff   : > { %5048 = vmatmul.mubr.f32.gmra.mxu0 %v6280_v26  ;;  %5088 = vmatpush3.msra.mxu1 %v4046_v42  ;;  %v6473_v3 = vpop.f32.mrf.mxu1  ;;  %v6556_v42 = vld [vmem:[#allocation2 + $0x182] sm:$0xff] }
 0x100   : > { %5167 = vmatprep.subr.mxu0 %v4062_v56  ;;  %4970 = vmatprep.mubr.f32.mxu1 %v6047_v35  ;;  %v4044_v35 = vld [vmem:[%s7052_s3 + $0x3a8] sm:$0xff] }
 0x101   : > { %5168 = vmatpush3.msra.mxu0 %v4062_v56  ;;  %4971 = vmatmul.mubr.f32.gmra.mxu1 %v7077_v19  ;;  %v6480_v38 = vpop.f32.mrf.mxu0  ;;  %v6482_v26 = vpop.f32.mrf.mxu1  ;;  %v5293_v56 = vld [vmem:[#allocation2 + $0x180] sm:$0xff]  ;;  %v5294_v19 = vld [vmem:[#allocation2 + $0x188] sm:$0xff] }
 0x102   : > { %5050 = vmatprep.mubr.f32.mxu0 %v6291_v52  ;;  %5089 = vmatprep.subr.mxu1 %v4045_v11  ;;  %v4060_v52 = vld [vmem:[%s7052_s3 + $0x428] sm:$0xff] }
 0x103   : > { %5051 = vmatmul.mubr.f32.gmra.mxu0 %v6293_v13  ;;  %5090 = vmatpush3.msra.mxu1 %v4045_v11  ;;  %v6489_v51 = vpop.f32.mrf.mxu0  ;;  %v4043_v13 = vld [vmem:[%s7052_s3 + $0x3a0] sm:$0xff]  ;;  %v6558_v11 = vld [vmem:[#allocation2 + $0x18a] sm:$0xff] }
 0x104   : > { %5169 = vmatprep.subr.mxu0 %v4061_v47  ;;  %4973 = vmatprep.mubr.f32.mxu1 %v7078_v2 }
 0x105   : > { %5170 = vmatpush3.msra.mxu0 %v4061_v47  ;;  %4974 = vmatmul.mubr.f32.gmra.mxu1 %v7079_v18  ;;  %v6496_v10 = vpop.f32.mrf.mxu1  ;;  %v4055_v18 = vld [vmem:[%s7052_s3 + $0x400] sm:$0xff] }
 0x106   : > { %5053 = vmatprep.mubr.f32.mxu0 %v6303_v37  ;;  %5091 = vmatprep.subr.mxu1 %v4044_v35  ;;  %v4059_v37 = vld [vmem:[%s7052_s3 + $0x420] sm:$0xff] }
 0x107   : > { %5054 = vmatmul.mubr.f32.gmra.mxu0 %v6305_v24  ;;  %5092 = vmatpush3.msra.mxu1 %v4044_v35  ;;  %v6503_v1 = vpop.f32.mrf.mxu0  ;;  %v6505_v5 = vpop.f32.mrf.mxu1 }
 0x108   : > { %5171 = vmatprep.subr.mxu0 %v4060_v52  ;;  %4976 = vmatprep.mubr.f32.mxu1 %v7080_v6  ;;  %v3296_v6 = vld [vmem:[#allocation2 + $0x32] sm:$0xff] }
 0x109   : > { %5172 = vmatpush3.msra.mxu0 %v4060_v52  ;;  %4977 = vmatmul.mubr.f32.gmra.mxu1 %v7081_v15  ;;  %v6512_v24 = vpop.f32.mrf.mxu0  ;;  %v7084_v52 = vld [vmem:[#allocation10_spill] sm:$0xff] }
 0x10a   : > { %5056 = vmatprep.mubr.f32.mxu0 %v6315_v30  ;;  %5093 = vmatprep.subr.mxu1 %v4043_v13  ;;  %v4058_v30 = vld [vmem:[%s7052_s3 + $0x418] sm:$0xff]  ;;  %v2992_v15 = vld [vmem:[#allocation2 + $0x49] sm:$0xff] }
 0x10b   : > { %5057 = vmatmul.mubr.f32.gmra.mxu0 %v6317_v60  ;;  %5094 = vmatpush3.msra.mxu1 %v4043_v13  ;;  %v6519_v55 = vpop.f32.mrf.mxu1 }
 0x10c   : > { %5173 = vmatprep.subr.mxu0 %v4059_v37  ;;  %4979 = vmatprep.mubr.f32.mxu1 %v6098_v9  ;;  %v4041_v9 = vld [vmem:[%s7052_s3 + $0x390] sm:$0xff] }
 0x10d   : > { %5174 = vmatpush3.msra.mxu0 %v4059_v37  ;;  %4980 = vmatmul.mubr.f32.gmra.mxu1 %v6110_v17  ;;  %v6526_v60 = vpop.f32.mrf.mxu0  ;;  %v6528_v20 = vpop.f32.mrf.mxu1  ;;  %v2711_v17 = vld [vmem:[#allocation2 + $0x170] sm:$0xff]  ;;  %v3297_v37 = vld [vmem:[#allocation2 + $0x3a] sm:$0xff] }
 0x10e   : > { %5059 = vmatprep.mubr.f32.mxu0 %v2708_v28  ;;  %5095 = vmatprep.subr.mxu1 %v4042_v48 }
 0x10f   : > { %5060 = vmatmul.mubr.f32.gmra.mxu0 %v2709_v50  ;;  %5096 = vmatpush3.msra.mxu1 %v4042_v48  ;;  %v6533_v12 = vpop.f32.mrf.mxu0  ;;  %v3298_v48 = vld [vmem:[#allocation2 + $0x4a] sm:$0xff] }
 0x110   : > { %5175 = vmatprep.subr.mxu0 %v4058_v30  ;;  %4982 = vmatprep.mubr.f32.mxu1 %v6121_v31  ;;  %v2993_v50 = vld [vmem:[#allocation2 + $0x51] sm:$0xff] }
 0x111   : > { %5176 = vmatpush3.msra.mxu0 %v4058_v30  ;;  %4983 = vmatmul.mubr.f32.gmra.mxu1 %v7082_v54  ;;  %v6540_v49 = vpop.f32.mrf.mxu1 }
 0x112   : > { %5062 = vmatprep.mubr.f32.mxu0 %v2710_v61  ;;  %5097 = vmatprep.subr.mxu1 %v4041_v9  ;;  %v2994_v61 = vld [vmem:[#allocation2 + $0x61] sm:$0xff] }
 0x113   : > { %5063 = vmatmul.mubr.f32.gmra.mxu0 %v2711_v17  ;;  %5098 = vmatpush3.msra.mxu1 %v4041_v9  ;;  %v6545_v63 = vpop.f32.mrf.mxu0  ;;  %v6547_v31 = vpop.f32.mrf.mxu1 }
 0x114   : > { %5177 = vmatprep.subr.mxu0 %v4057_v57  ;;  %4985 = vmatprep.mubr.f32.mxu1 %v7083_v22  ;;  %v2995_v22 = vld [vmem:[#allocation2 + $0x69] sm:$0xff] }
 0x115   : > { %5178 = vmatpush3.msra.mxu0 %v4057_v57  ;;  %4986 = vmatmul.mubr.f32.gmra.mxu1 %v6147_v23  ;;  %v6554_v34 = vpop.f32.mrf.mxu0  ;;  %v4039_v23 = vld [vmem:[%s7052_s3 + $0x380] sm:$0xff] }
 0x116   : > { %5065 = vmatprep.mubr.f32.mxu0 %v5293_v56  ;;  %5099 = vmatprep.subr.mxu1 %v4040_v40 }
 0x117   : > { %5066 = vmatmul.mubr.f32.gmra.mxu0 %v5294_v19  ;;  %5100 = vmatpush3.msra.mxu1 %v4040_v40  ;;  %v6560_v47 = vpop.f32.mrf.mxu1  ;;  %v2996_v19 = vld [vmem:[#allocation2 + $0x79] sm:$0xff] }
 0x118   : > { %5179 = vmatprep.subr.mxu0 %v4056_v4  ;;  %4988 = vmatprep.mubr.f32.mxu1 %v6556_v42 }
 0x119   : > { %5180 = vmatpush3.msra.mxu0 %v4056_v4  ;;  %4989 = vmatmul.mubr.f32.gmra.mxu1 %v6558_v11  ;;  %v6567_v35 = vpop.f32.mrf.mxu0  ;;  %v6569_v2 = vpop.f32.mrf.mxu1 }
 0x11a   : > { %5336 = vmatprep.mubr.msk.f32.mxu0 %vm5878_vm1, %v7084_v52  ;;  %5101 = vmatprep.subr.mxu1 %v4039_v23 }
 0x11b   : > { %5069 = vmatmul.mubr.f32.gmra.mxu0 %v6163_v41  ;;  %5102 = vmatpush3.msra.mxu1 %v4039_v23  ;;  %v6578_v13 = vpop.f32.mrf.mxu0 }
 0x11c   : > { %5181 = vmatprep.subr.mxu0 %v4055_v18  ;;  %5103 = vmatprep.mubr.f32.mxu1 %v6177_v29  ;;  %v3299_v29 = vld [vmem:[#allocation2 + $0x52] sm:$0xff] }
 0x11d   : > { %5182 = vmatpush3.msra.mxu0 %v4055_v18  ;;  %v4625_v28 = vpop.f32.mrf.mxu1  ;;  %5104 = vmatmul.mubr.f32.vlgmr.msra.gmra.mxu1 %v6183_v8  ;;  %v3300_v8 = vld [vmem:[#allocation2 + $0x62] sm:$0xff]  ;;  %v3301_v18 = vld [vmem:[#allocation2 + $0x6a] sm:$0xff] }
 0x11e   : > { %v1306_v62 = vadd.f32 %v4625_v28, %v6413_v7  ;;  %5183 = vmatprep.mubr.f32.mxu0 %v3296_v6  ;;  %5106 = vmatprep.mubr.f32.mxu1 %v2992_v15  ;;  %v3302_v15 = vld [vmem:[#allocation2 + $0x7a] sm:$0xff] }
 0x11f   : > { %v4705_v41 = vpop.f32.mrf.mxu0  ;;  %5184 = vmatmul.mubr.f32.vlgmr.msra.gmra.mxu0 %v3297_v37  ;;  %v1300_v30 = vpop.f32.mrf.mxu1  ;;  %v2997_v28 = vld [vmem:[#allocation2 + $0x81] sm:$0xff] }
 0x120   : > { %v6583_v9 = vadd.f32 %v4705_v41, %v1306_v62  ;;  %v1301_v17 = vadd.f32 %v1300_v30, %v6422_v59  ;;  %5186 = vmatprep.mubr.f32.mxu0 %v3298_v48  ;;  %v3303_v30 = vld [vmem:[#allocation2 + $0x82] sm:$0xff] }
 0x121   : > { %v1574_v54 = vpop.f32.mrf.mxu0  ;;  %v4628_v57 = vpop.f32.mrf.mxu1  ;;  %5107 = vmatmul.mubr.f32.gmra.mxu1 %v2993_v50  ;;  %v2998_v50 = vld [vmem:[#allocation2 + $0x91] sm:$0xff] }
 0x122   : > { %v6586_v40 = vadd.f32 %v1574_v54, %v1301_v17  ;;  %v1316_v7 = vadd.f32 %v4628_v57, %v6434_v58  ;;  %5109 = vmatprep.mubr.f32.mxu1 %v2994_v61  ;;  %v2999_v57 = vld [vmem:[#allocation2 + $0x99] sm:$0xff] }
 0x123   : > { %v4708_v4 = vpop.f32.mrf.mxu0  ;;  %5187 = vmatmul.mubr.f32.gmra.mxu0 %v3299_v29  ;;  %v1310_v56 = vpop.f32.mrf.mxu1  ;;  %v3304_v29 = vld [vmem:[#allocation2 + $0x92] sm:$0xff] }
 0x124   : > { %v6589_v23 = vadd.f32 %v4708_v4, %v1316_v7  ;;  %v1311_v59 = vadd.f32 %v1310_v56, %v6443_v36  ;;  %5189 = vmatprep.mubr.f32.mxu0 %v3300_v8  ;;  %v3305_v56 = vld [vmem:[#allocation2 + $0x9a] sm:$0xff] }
 0x125   : > { %v1584_v52 = vpop.f32.mrf.mxu0  ;;  %v4631_v6 = vpop.f32.mrf.mxu1  ;;  %5110 = vmatmul.mubr.f32.gmra.mxu1 %v2995_v22  ;;  %v3000_v22 = vld [vmem:[#allocation2 + $0xa9] sm:$0xff] }
 0x126   : > { %v6592_v37 = vadd.f32 %v1584_v52, %v1311_v59  ;;  %v1326_v58 = vadd.f32 %v4631_v6, %v6457_v53  ;;  %5112 = vmatprep.mubr.f32.mxu1 %v2996_v19  ;;  %v3001_v6 = vld [vmem:[#allocation2 + $0xb1] sm:$0xff] }
 0x127   : > { %v4711_v48 = vpop.f32.mrf.mxu0  ;;  %5190 = vmatmul.mubr.f32.gmra.mxu0 %v3301_v18  ;;  %v1320_v62 = vpop.f32.mrf.mxu1  ;;  %v3306_v18 = vld [vmem:[#allocation2 + $0xaa] sm:$0xff] }
 0x128   : > { %v6595_v41 = vadd.f32 %v4711_v48, %v1326_v58  ;;  %v1321_v36 = vadd.f32 %v1320_v62, %v6466_v0  ;;  %5192 = vmatprep.mubr.f32.mxu0 %v3302_v15 }
 0x129   : > { %v1594_v61 = vpop.f32.mrf.mxu0  ;;  %v4634_v17 = vpop.f32.mrf.mxu1  ;;  %5113 = vmatmul.mubr.f32.gmra.mxu1 %v2997_v28 }
 0x12a   : > { %v6598_v54 = vadd.f32 %v1594_v61, %v1321_v36  ;;  %v1336_v53 = vadd.f32 %v4634_v17, %v6480_v38  ;;  %5115 = vmatprep.mubr.f32.mxu1 %v2998_v50  ;;  %v3308_v36 = vld [vmem:[#allocation2 + $0xc2] sm:$0xff] }
 0x12b   : > { %v4714_v8 = vpop.f32.mrf.mxu0  ;;  %5193 = vmatmul.mubr.f32.gmra.mxu0 %v3303_v30  ;;  %v1330_v7 = vpop.f32.mrf.mxu1 }
 0x12c   : > { %v6601_v4 = vadd.f32 %v4714_v8, %v1336_v53  ;;  %v1331_v0 = vadd.f32 %v1330_v7, %v6489_v51  ;;  %5195 = vmatprep.mubr.f32.mxu0 %v3304_v29  ;;  %v3307_v51 = vld [vmem:[#allocation2 + $0xb2] sm:$0xff]  ;;  %v3310_v7 = vld [vmem:[#allocation2 + $0xda] sm:$0xff] }
 0x12d   : > { %v1604_v19 = vpop.f32.mrf.mxu0  ;;  %v4637_v59 = vpop.f32.mrf.mxu1  ;;  %5116 = vmatmul.mubr.f32.gmra.mxu1 %v2999_v57 }
 0x12e   : > { %v6604_v52 = vadd.f32 %v1604_v19, %v1331_v0  ;;  %v1346_v38 = vadd.f32 %v4637_v59, %v6503_v1  ;;  %5118 = vmatprep.mubr.f32.mxu1 %v3000_v22  ;;  %v3311_v59 = vld [vmem:[#allocation2 + $0xe2] sm:$0xff] }
 0x12f   : > { %v4717_v15 = vpop.f32.mrf.mxu0  ;;  %5196 = vmatmul.mubr.f32.gmra.mxu0 %v3305_v56  ;;  %v1340_v58 = vpop.f32.mrf.mxu1  ;;  %v3006_v56 = vld [vmem:[#allocation2 + $0xf1] sm:$0xff] }
 0x130   : > { %v6607_v28 = vadd.f32 %v4717_v15, %v1346_v38  ;;  %v1341_v48 = vadd.f32 %v1340_v58, %v6512_v24  ;;  %5198 = vmatprep.mubr.f32.mxu0 %v3306_v18  ;;  %v3309_v24 = vld [vmem:[#allocation2 + $0xca] sm:$0xff] }
 0x131   : > { %v1614_v62 = vpop.f32.mrf.mxu0  ;;  %v4640_v50 = vpop.f32.mrf.mxu1  ;;  %5119 = vmatmul.mubr.f32.gmra.mxu1 %v3001_v6 }
 0x132   : > { %v6610_v30 = vadd.f32 %v1614_v62, %v1341_v48  ;;  %v1356_v61 = vadd.f32 %v4640_v50, %v6526_v60  ;;  %5121 = vmatprep.mubr.f32.mxu1 %v6247_v43  ;;  %v3008_v48 = vld [vmem:[#allocation2 + $0x109] sm:$0xff]  ;;  %v3313_v62 = vld [vmem:[#allocation2 + $0xfa] sm:$0xff] }
 0x133   : > { %v4720_v1 = vpop.f32.mrf.mxu0  ;;  %5199 = vmatmul.mubr.f32.gmra.mxu0 %v3307_v51  ;;  %v1350_v17 = vpop.f32.mrf.mxu1 }
 0x134   : > { %v6614_v29 = vadd.f32 %v4720_v1, %v1356_v61  ;;  %v1351_v53 = vadd.f32 %v1350_v17, %v6533_v12  ;;  %5201 = vmatprep.mubr.f32.mxu0 %v3308_v36  ;;  %v3009_v1 = vld [vmem:[#allocation2 + $0x111] sm:$0xff] }
 0x135   : > { %v1624_v57 = vpop.f32.mrf.mxu0  ;;  %v4643_v8 = vpop.f32.mrf.mxu1  ;;  %5122 = vmatmul.mubr.f32.gmra.mxu1 %v6253_v39  ;;  %v3312_v39 = vld [vmem:[#allocation2 + $0xf2] sm:$0xff] }
 0x136   : > { %v6618_v22 = vadd.f32 %v1624_v57, %v1351_v53  ;;  %v1366_v60 = vadd.f32 %v4643_v8, %v6545_v63  ;;  %5124 = vmatprep.mubr.f32.mxu1 %v6265_v16  ;;  %v3007_v16 = vld [vmem:[#allocation2 + $0xf9] sm:$0xff] }
 0x137   : > { %v4723_v43 = vpop.f32.mrf.mxu0  ;;  %5202 = vmatmul.mubr.f32.gmra.mxu0 %v3309_v24  ;;  %v1360_v0 = vpop.f32.mrf.mxu1  ;;  %v3010_v24 = vld [vmem:[#allocation2 + $0x121] sm:$0xff]  ;;  %v3315_v8 = vld [vmem:[#allocation2 + $0x112] sm:$0xff] }
 0x138   : > { %v6622_v19 = vadd.f32 %v4723_v43, %v1366_v60  ;;  %v1361_v12 = vadd.f32 %v1360_v0, %v6554_v34  ;;  %5204 = vmatprep.mubr.f32.mxu0 %v3310_v7  ;;  %v3316_v43 = vld [vmem:[#allocation2 + $0x122] sm:$0xff] }
 0x139   : > { %v1634_v18 = vpop.f32.mrf.mxu0  ;;  %v4646_v38 = vpop.f32.mrf.mxu1  ;;  %5125 = vmatmul.mubr.f32.gmra.mxu1 %v6271_v33  ;;  %v3314_v33 = vld [vmem:[#allocation2 + $0x10a] sm:$0xff] }
 0x13a   : > { %v6626_v6 = vadd.f32 %v1634_v18, %v1361_v12  ;;  %v1376_v63 = vadd.f32 %v4646_v38, %v6567_v35  ;;  %5127 = vmatprep.mubr.f32.mxu1 %v3006_v56  ;;  %v3011_v56 = vld [vmem:[#allocation2 + $0x129] sm:$0xff]  ;;  %v3012_v18 = vld [vmem:[#allocation2 + $0x139] sm:$0xff] }
 0x13b   : > { %v4726_v15 = vpop.f32.mrf.mxu0  ;;  %5205 = vmatmul.mubr.f32.gmra.mxu0 %v3311_v59  ;;  %v1370_v58 = vpop.f32.mrf.mxu1 }
 0x13c   : > { %v6629_v51 = vadd.f32 %v4726_v15, %v1376_v63  ;;  %v1371_v34 = vadd.f32 %v1370_v58, %v6578_v13  ;;  %5207 = vmatprep.mubr.f32.mxu0 %v3312_v39  ;;  %v3317_v39 = vld [vmem:[#allocation2 + $0x12a] sm:$0xff]  ;;  %v3318_v15 = vld [vmem:[#allocation2 + $0x13a] sm:$0xff] }
 0x13d   : > { %v1644_v50 = vpop.f32.mrf.mxu0  ;;  %v4649_v36 = vpop.f32.mrf.mxu1  ;;  %5128 = vmatmul.mubr.f32.gmra.mxu1 %v3007_v16 }
 0x13e   : > { %v6632_v61 = vadd.f32 %v1644_v50, %v1371_v34  ;;  %v1386_v35 = vadd.f32 %v4649_v36, %v6408_v14  ;;  %5130 = vmatprep.mubr.f32.mxu1 %v3008_v48  ;;  %v3013_v48 = vld [vmem:[#allocation2 + $0x141] sm:$0xff]  ;;  %v3014_v50 = vld [vmem:[#allocation2 + $0x151] sm:$0xff] }
 0x13f   : > { %v4729_v17 = vpop.f32.mrf.mxu0  ;;  %5208 = vmatmul.mubr.f32.gmra.mxu0 %v3313_v62  ;;  %v1380_v53 = vpop.f32.mrf.mxu1 }
 0x140   : > { %v6635_v57 = vadd.f32 %v4729_v17, %v1386_v35  ;;  %v1381_v13 = vadd.f32 %v1380_v53, %v6416_v25  ;;  %5210 = vmatprep.mubr.f32.mxu0 %v3314_v33  ;;  %v3319_v33 = vld [vmem:[#allocation2 + $0x142] sm:$0xff]  ;;  %v3320_v17 = vld [vmem:[#allocation2 + $0x152] sm:$0xff] }
 0x141   : > { %v1654_v7 = vpop.f32.mrf.mxu0  ;;  %v4652_v60 = vpop.f32.mrf.mxu1  ;;  %5131 = vmatmul.mubr.f32.gmra.mxu1 %v3009_v1 }
 0x142   : > { %v6638_v0 = vadd.f32 %v1654_v7, %v1381_v13  ;;  %v1396_v14 = vadd.f32 %v4652_v60, %v6427_v21  ;;  %5133 = vmatprep.mubr.f32.mxu1 %v3010_v24  ;;  %v3015_v24 = vld [vmem:[#allocation2 + $0x159] sm:$0xff]  ;;  %v3016_v7 = vld [vmem:[#allocation2 + $0x169] sm:$0xff] }
 0x143   : > { %v4732_v12 = vpop.f32.mrf.mxu0  ;;  %5211 = vmatmul.mubr.f32.gmra.mxu0 %v3315_v8  ;;  %v1390_v59 = vpop.f32.mrf.mxu1 }
 0x144   : > { %v6641_v38 = vadd.f32 %v4732_v12, %v1396_v14  ;;  %v1391_v25 = vadd.f32 %v1390_v59, %v6436_v45  ;;  %5213 = vmatprep.mubr.f32.mxu0 %v3316_v43  ;;  %v3321_v43 = vld [vmem:[#allocation2 + $0x15a] sm:$0xff]  ;;  %v3322_v12 = vld [vmem:[#allocation2 + $0x16a] sm:$0xff] }
 0x145   : > { %v1664_v63 = vpop.f32.mrf.mxu0  ;;  %v4655_v16 = vpop.f32.mrf.mxu1  ;;  %5134 = vmatmul.mubr.f32.gmra.mxu1 %v3011_v56 }
 0x146   : > { %v6644_v58 = vadd.f32 %v1664_v63, %v1391_v25  ;;  %v1406_v21 = vadd.f32 %v4655_v16, %v6450_v46  ;;  %5136 = vmatprep.mubr.f32.mxu1 %v3012_v18  ;;  %v3017_v18 = vld [vmem:[#allocation2 + $0x171] sm:$0xff] }
 0x147   : > { %v4735_v34 = vpop.f32.mrf.mxu0  ;;  %5214 = vmatmul.mubr.f32.gmra.mxu0 %v3317_v39  ;;  %v1400_v62 = vpop.f32.mrf.mxu1 }
 0x148   : > { %v6647_v36 = vadd.f32 %v4735_v34, %v1406_v21  ;;  %v1401_v45 = vadd.f32 %v1400_v62, %v6459_v44  ;;  %5216 = vmatprep.mubr.f32.mxu0 %v3318_v15 }
 0x149   : > { %v1674_v35 = vpop.f32.mrf.mxu0  ;;  %v4658_v1 = vpop.f32.mrf.mxu1  ;;  %5137 = vmatmul.mubr.f32.gmra.mxu1 %v3013_v48 }
 0x14a   : > { %v6650_v53 = vadd.f32 %v1674_v35, %v1401_v45  ;;  %v1416_v46 = vadd.f32 %v4658_v1, %v6473_v3  ;;  %5139 = vmatprep.mubr.f32.mxu1 %v3014_v50  ;;  %v3020_v50 = vld [vmem:[#allocation2 + $0x199] sm:$0xff] }
 0x14b   : > { %v4738_v13 = vpop.f32.mrf.mxu0  ;;  %5217 = vmatmul.mubr.f32.gmra.mxu0 %v3319_v33  ;;  %v1410_v8 = vpop.f32.mrf.mxu1  ;;  %v3326_v1 = vld [vmem:[#allocation2 + $0x19a] sm:$0xff] }
 0x14c   : > { %v6653_v60 = vadd.f32 %v4738_v13, %v1416_v46  ;;  %v1411_v44 = vadd.f32 %v1410_v8, %v6482_v26  ;;  %5219 = vmatprep.mubr.f32.mxu0 %v3320_v17  ;;  %v3323_v26 = vld [vmem:[#allocation2 + $0x172] sm:$0xff] }
 0x14d   : > { %v1684_v14 = vpop.f32.mrf.mxu0  ;;  %v4661_v56 = vpop.f32.mrf.mxu1  ;;  %5140 = vmatmul.mubr.f32.gmra.mxu1 %v3015_v24 }
 0x14e   : > { %v6656_v59 = vadd.f32 %v1684_v14, %v1411_v44  ;;  %v1426_v3 = vadd.f32 %v4661_v56, %v6496_v10  ;;  %5142 = vmatprep.mubr.f32.mxu1 %v3016_v7 }
 0x14f   : > { %v4741_v25 = vpop.f32.mrf.mxu0  ;;  %5220 = vmatmul.mubr.f32.gmra.mxu0 %v3321_v43  ;;  %v1420_v39 = vpop.f32.mrf.mxu1 }
 0x150   : > { %v6659_v63 = vadd.f32 %v4741_v25, %v1426_v3  ;;  %v1421_v16 = vadd.f32 %v1420_v39, %v6505_v5  ;;  %5222 = vmatprep.mubr.f32.mxu0 %v3322_v12 }
 0x151   : > { %v1694_v15 = vpop.f32.mrf.mxu0  ;;  %v4664_v21 = vpop.f32.mrf.mxu1  ;;  %5143 = vmatmul.mubr.f32.gmra.mxu1 %v3017_v18 }
 0x152   : > { %v6662_v48 = vadd.f32 %v1694_v15, %v1421_v16  ;;  %v1436_v34 = vadd.f32 %v4664_v21, %v6519_v55  ;;  %5145 = vmatprep.mubr.f32.mxu1 %v6350_v27  ;;  %v3021_v27 = vld [vmem:[#allocation2 + $0x1a1] sm:$0xff] }
 0x153   : > { %v4744_v10 = vpop.f32.mrf.mxu0  ;;  %5223 = vmatmul.mubr.f32.gmra.mxu0 %v3323_v26  ;;  %v1430_v62 = vpop.f32.mrf.mxu1 }
 0x154   : > { %v6666_v45 = vadd.f32 %v4744_v10, %v1436_v34  ;;  %v1431_v33 = vadd.f32 %v1430_v62, %v6528_v20  ;;  %5225 = vmatprep.mubr.f32.mxu0 %v6556_v42  ;;  %v3327_v42 = vld [vmem:[#allocation2 + $0x1a2] sm:$0xff] }
 0x155   : > { %v1704_v5 = vpop.f32.mrf.mxu0  ;;  %v4667_v35 = vpop.f32.mrf.mxu1  ;;  %5146 = vmatmul.mubr.f32.gmra.mxu1 %v6358_v32 }
 0x156   : > { %v6671_v17 = vadd.f32 %v1704_v5, %v1431_v33  ;;  %v1446_v55 = vadd.f32 %v4667_v35, %v6540_v49  ;;  %5148 = vmatprep.mubr.f32.mxu1 %v3020_v50 }
 0x157   : > { %v4747_v46 = vpop.f32.mrf.mxu0  ;;  %5226 = vmatmul.mubr.f32.gmra.mxu0 %v6558_v11  ;;  %v1440_v24 = vpop.f32.mrf.mxu1 }
 0x158   : > { %v6675_v13 = vadd.f32 %v4747_v46, %v1446_v55  ;;  %v1441_v20 = vadd.f32 %v1440_v24, %v6547_v31  ;;  %5228 = vmatprep.mubr.f32.mxu0 %v3326_v1 }
 0x159   : > { %v1714_v8 = vpop.f32.mrf.mxu0  ;;  %v4670_v7 = vpop.f32.mrf.mxu1  ;;  %5149 = vmatmul.mubr.f32.gmra.mxu1 %v3021_v27 }
 0x15a   : > { %v6678_v32 = vadd.f32 %v1714_v8, %v1441_v20  ;;  %v1456_v44 = vadd.f32 %v4670_v7, %v6560_v47 }
 0x15b   : > { %v4750_v49 = vpop.f32.mrf.mxu0  ;;  %5229 = vmatmul.mubr.f32.gmra.mxu0 %v3327_v42  ;;  %v1450_v43 = vpop.f32.mrf.mxu1 }
 0x15c   : > { %v6681_v14 = vadd.f32 %v4750_v49, %v1456_v44  ;;  %v1451_v11 = vadd.f32 %v1450_v43, %v6569_v2 }
 0x15d   : > { %v1724_v56 = vpop.f32.mrf.mxu0  ;;  %v4785_v12 = vpop.f32.mrf.mxu1 }
 0x15e   : > { %v6684_v3 = vadd.f32 %v1724_v56, %v1451_v11  ;;  %v2040_v31 = vadd.f32 %v4785_v12, %v6583_v9 }
 0x15f   : > { %v4865_v18 = vpop.f32.mrf.mxu0  ;;  %v1880_v25 = vpop.f32.mrf.mxu1 }
 0x160   : > { %v6687_v39 = vadd.f32 %v4865_v18, %v2040_v31  ;;  %v2039_v16 = vadd.f32 %v1880_v25, %v6586_v40 }
 0x161   : > { %v2186_v47 = vpop.f32.mrf.mxu0  ;;  %v4788_v26 = vpop.f32.mrf.mxu1 }
 0x162   : > { %v6690_v15 = vadd.f32 %v2186_v47, %v2039_v16  ;;  %v2042_v21 = vadd.f32 %v4788_v26, %v6589_v23 }
 0x163   : > { %v4868_v34 = vpop.f32.mrf.mxu0  ;;  %v1890_v2 = vpop.f32.mrf.mxu1 }
 0x164   : > { %v6693_v10 = vadd.f32 %v4868_v34, %v2042_v21  ;;  %v2041_v62 = vadd.f32 %v1890_v2, %v6592_v37 }
 0x165   : > { %v2196_v50 = vpop.f32.mrf.mxu0  ;;  %v4791_v9 = vpop.f32.mrf.mxu1 }
 0x166   : > { %v6696_v33 = vadd.f32 %v2196_v50, %v2041_v62  ;;  %v2044_v5 = vadd.f32 %v4791_v9, %v6595_v41 }
 0x167   : > { %v4871_v35 = vpop.f32.mrf.mxu0  ;;  %v1900_v40 = vpop.f32.mrf.mxu1 }
 0x168   : > { %v6699_v1 = vadd.f32 %v4871_v35, %v2044_v5  ;;  %v2043_v55 = vadd.f32 %v1900_v40, %v6598_v54 }
 0x169   : > { %v2206_v27 = vpop.f32.mrf.mxu0  ;;  %v4794_v23 = vpop.f32.mrf.mxu1 }
 0x16a   : > { %v6702_v46 = vadd.f32 %v2206_v27, %v2043_v55  ;;  %v2046_v24 = vadd.f32 %v4794_v23, %v6601_v4 }
 0x16b   : > { %v4874_v20 = vpop.f32.mrf.mxu0  ;;  %v1910_v37 = vpop.f32.mrf.mxu1 }
 0x16c   : > { %v6705_v42 = vadd.f32 %v4874_v20, %v2046_v24  ;;  %v2045_v8 = vadd.f32 %v1910_v37, %v6604_v52 }
 0x16d   : > { %v2216_v7 = vpop.f32.mrf.mxu0  ;;  %v4797_v41 = vpop.f32.mrf.mxu1 }
 0x16e   : > { %v6708_v44 = vadd.f32 %v2216_v7, %v2045_v8  ;;  %v2048_v49 = vadd.f32 %v4797_v41, %v6607_v28 }
 0x16f   : > { %v4877_v43 = vpop.f32.mrf.mxu0  ;;  %v1920_v54 = vpop.f32.mrf.mxu1 }
 0x170   : > { %v6711_v11 = vadd.f32 %v4877_v43, %v2048_v49  ;;  %v2047_v56 = vadd.f32 %v1920_v54, %v6610_v30 }
 0x171   : > { %v2226_v12 = vpop.f32.mrf.mxu0  ;;  %v4800_v4 = vpop.f32.mrf.mxu1 }
 0x172   : > { %v6714_v31 = vadd.f32 %v2226_v12, %v2047_v56  ;;  %v2050_v18 = vadd.f32 %v4800_v4, %v6614_v29 }
 0x173   : > { %v4880_v25 = vpop.f32.mrf.mxu0  ;;  %v1930_v52 = vpop.f32.mrf.mxu1 }
 0x174   : > { %v6717_v16 = vadd.f32 %v4880_v25, %v2050_v18  ;;  %v2049_v47 = vadd.f32 %v1930_v52, %v6618_v22 }
 0x175   : > { %v2236_v26 = vpop.f32.mrf.mxu0  ;;  %v4803_v28 = vpop.f32.mrf.mxu1 }
 0x176   : > { %v6720_v21 = vadd.f32 %v2236_v26, %v2049_v47  ;;  %v2052_v34 = vadd.f32 %v4803_v28, %v6622_v19 }
 0x177   : > { %v4883_v2 = vpop.f32.mrf.mxu0  ;;  %v1940_v30 = vpop.f32.mrf.mxu1 }
 0x178   : > { %v6723_v62 = vadd.f32 %v4883_v2, %v2052_v34  ;;  %v2051_v50 = vadd.f32 %v1940_v30, %v6626_v6 }
 0x179   : > { %v2246_v9 = vpop.f32.mrf.mxu0  ;;  %v4806_v29 = vpop.f32.mrf.mxu1 }
 0x17a   : > { %v6726_v5 = vadd.f32 %v2246_v9, %v2051_v50  ;;  %v2054_v35 = vadd.f32 %v4806_v29, %v6629_v51 }
 0x17b   : > { %v4886_v40 = vpop.f32.mrf.mxu0  ;;  %v1950_v22 = vpop.f32.mrf.mxu1 }
 0x17c   : > { %v6729_v55 = vadd.f32 %v4886_v40, %v2054_v35  ;;  %v2053_v27 = vadd.f32 %v1950_v22, %v6632_v61 }
 0x17d   : > { %v2256_v23 = vpop.f32.mrf.mxu0  ;;  %v4809_v19 = vpop.f32.mrf.mxu1 }
 0x17e   : > { %v6732_v24 = vadd.f32 %v2256_v23, %v2053_v27  ;;  %v2056_v20 = vadd.f32 %v4809_v19, %v6635_v57 }
 0x17f   : > { %v4889_v37 = vpop.f32.mrf.mxu0  ;;  %v1960_v6 = vpop.f32.mrf.mxu1 }
 0x180   : > { %v6735_v8 = vadd.f32 %v4889_v37, %v2056_v20  ;;  %v2055_v7 = vadd.f32 %v1960_v6, %v6638_v0 }
 0x181   : > { %v2266_v41 = vpop.f32.mrf.mxu0  ;;  %v4812_v51 = vpop.f32.mrf.mxu1 }
 0x182   : > { %v6738_v49 = vadd.f32 %v2266_v41, %v2055_v7  ;;  %v2058_v43 = vadd.f32 %v4812_v51, %v6641_v38 }
 0x183   : > { %v4892_v54 = vpop.f32.mrf.mxu0  ;;  %v1970_v61 = vpop.f32.mrf.mxu1 }
 0x184   : > { %v6741_v56 = vadd.f32 %v4892_v54, %v2058_v43  ;;  %v2057_v12 = vadd.f32 %v1970_v61, %v6644_v58 }
 0x185   : > { %v2276_v4 = vpop.f32.mrf.mxu0  ;;  %v4815_v57 = vpop.f32.mrf.mxu1 }
 0x186   : > { %7085 = vst [vmem:[#allocation3_spill] sm:$0xff] %v6741_v56  ;;  %v6744_v18 = vadd.f32 %v2276_v4, %v2057_v12  ;;  %v2060_v25 = vadd.f32 %v4815_v57, %v6647_v36 }
 0x187   : > { %v4895_v52 = vpop.f32.mrf.mxu0  ;;  %v1980_v0 = vpop.f32.mrf.mxu1 }
 0x188   : > { %7086 = vst [vmem:[#allocation4_spill] sm:$0xff] %v6744_v18  ;;  %v6747_v47 = vadd.f32 %v4895_v52, %v2060_v25  ;;  %v2059_v26 = vadd.f32 %v1980_v0, %v6650_v53 }
 0x189   : > { %v2286_v28 = vpop.f32.mrf.mxu0  ;;  %v4818_v38 = vpop.f32.mrf.mxu1 }
 0x18a   : > { %7087 = vst [vmem:[#allocation5_spill] sm:$0xff] %v6747_v47  ;;  %v6750_v34 = vadd.f32 %v2286_v28, %v2059_v26  ;;  %v2062_v2 = vadd.f32 %v4818_v38, %v6653_v60 }
 0x18b   : > { %v4898_v30 = vpop.f32.mrf.mxu0  ;;  %v1990_v58 = vpop.f32.mrf.mxu1 }
 0x18c   : > { %7088 = vst [vmem:[#allocation6_spill] sm:$0xff] %v6750_v34  ;;  %v6753_v50 = vadd.f32 %v4898_v30, %v2062_v2  ;;  %v2061_v9 = vadd.f32 %v1990_v58, %v6656_v59 }
 0x18d   : > { %v2296_v29 = vpop.f32.mrf.mxu0  ;;  %v4821_v36 = vpop.f32.mrf.mxu1 }
 0x18e   : > { %7089 = vst [vmem:[#allocation7_spill] sm:$0xff] %v6753_v50  ;;  %v6756_v35 = vadd.f32 %v2296_v29, %v2061_v9  ;;  %v2064_v40 = vadd.f32 %v4821_v36, %v6659_v63 }
 0x18f   : > { %v4901_v22 = vpop.f32.mrf.mxu0  ;;  %v2000_v53 = vpop.f32.mrf.mxu1 }
 0x190   : > { %7090 = vst [vmem:[#allocation8_spill] sm:$0xff] %v6756_v35  ;;  %v6759_v27 = vadd.f32 %v4901_v22, %v2064_v40  ;;  %v2063_v23 = vadd.f32 %v2000_v53, %v6662_v48 }
 0x191   : > { %v2306_v19 = vpop.f32.mrf.mxu0  ;;  %v4824_v60 = vpop.f32.mrf.mxu1 }
 0x192   : > { %7091 = vst [vmem:[#allocation9_spill] sm:$0xff] %v6759_v27  ;;  %v6762_v20 = vadd.f32 %v2306_v19, %v2063_v23  ;;  %v2066_v37 = vadd.f32 %v4824_v60, %v6666_v45 }
 0x193   : > { %v4904_v6 = vpop.f32.mrf.mxu0  ;;  %v2010_v59 = vpop.f32.mrf.mxu1 }
 0x194   : > { %7092 = vst [vmem:[#allocation10_spill] sm:$0xff] %v6762_v20  ;;  %v6765_v7 = vadd.f32 %v4904_v6, %v2066_v37  ;;  %v2065_v41 = vadd.f32 %v2010_v59, %v6671_v17 }
 0x195   : > { %v2316_v51 = vpop.f32.mrf.mxu0  ;;  %v4827_v63 = vpop.f32.mrf.mxu1 }
 0x196   : > { %7093 = vst [vmem:[#allocation11_spill] sm:$0xff] %v6765_v7  ;;  %v6768_v43 = vadd.f32 %v2316_v51, %v2065_v41  ;;  %v2068_v54 = vadd.f32 %v4827_v63, %v6675_v13 }
 0x197   : > { %v4907_v61 = vpop.f32.mrf.mxu0  ;;  %v2020_v48 = vpop.f32.mrf.mxu1 }
 0x198   : > { %7094 = vst [vmem:[#allocation12_spill] sm:$0xff] %v6768_v43  ;;  %v6771_v12 = vadd.f32 %v4907_v61, %v2068_v54  ;;  %v2067_v4 = vadd.f32 %v2020_v48, %v6678_v32 }
 0x199   : > { %v2326_v57 = vpop.f32.mrf.mxu0  ;;  %v4830_v45 = vpop.f32.mrf.mxu1 }
 0x19a   : > { %7095 = vst [vmem:[#allocation13_spill] sm:$0xff] %v6771_v12  ;;  %v6774_v25 = vadd.f32 %v2326_v57, %v2067_v4  ;;  %v2070_v52 = vadd.f32 %v4830_v45, %v6681_v14 }
 0x19b   : > { %v4910_v0 = vpop.f32.mrf.mxu0  ;;  %v2030_v17 = vpop.f32.mrf.mxu1 }
 0x19c   : > { %7096 = vst [vmem:[#allocation14_spill] sm:$0xff] %v6774_v25  ;;  %v6777_v26 = vadd.f32 %v4910_v0, %v2070_v52  ;;  %v2069_v28 = vadd.f32 %v2030_v17, %v6684_v3 }
 0x19d   : > { %v2336_v38 = vpop.f32.mrf.mxu0  ;;  %v4945_v13 = vpop.f32.mrf.mxu1 }
 0x19e   : > { %7097 = vst [vmem:[#allocation15_spill] sm:$0xff] %v6777_v26  ;;  %v6780_v2 = vadd.f32 %v2336_v38, %v2069_v28 }
 0x19f   : > { %v6782_v30 = vpop.f32.mrf.mxu0  ;;  %v2492_v58 = vpop.f32.mrf.mxu1 }
 0x1a0   : > { %7098 = vst [vmem:[#allocation16_spill] sm:$0xff] %v6780_v2 }
 0x1a1   : > { %v6784_v32 = vpop.f32.mrf.mxu0  ;;  %v4948_v9 = vpop.f32.mrf.mxu1 }
 0x1a3   : > { %v6786_v29 = vpop.f32.mrf.mxu0  ;;  %v6788_v36 = vpop.f32.mrf.mxu1 }
 0x1a5   : > { %v6790_v14 = vpop.f32.mrf.mxu0  ;;  %v6792_v40 = vpop.f32.mrf.mxu1 }
 0x1a7   : > { %v6794_v22 = vpop.f32.mrf.mxu0  ;;  %v6796_v3 = vpop.f32.mrf.mxu1 }
 0x1a9   : > { %v6798_v53 = vpop.f32.mrf.mxu0  ;;  %v6800_v23 = vpop.f32.mrf.mxu1 }
 0x1ab   : > { %v6802_v19 = vpop.f32.mrf.mxu0  ;;  %v6804_v60 = vpop.f32.mrf.mxu1 }
 0x1ad   : > { %v6806_v37 = vpop.f32.mrf.mxu0  ;;  %v6808_v6 = vpop.f32.mrf.mxu1 }
 0x1af   : > { %v6810_v59 = vpop.f32.mrf.mxu0  ;;  %v6812_v41 = vpop.f32.mrf.mxu1 }
 0x1b1   : > { %v6814_v51 = vpop.f32.mrf.mxu0  ;;  %v6816_v63 = vpop.f32.mrf.mxu1 }
 0x1b3   : > { %v6818_v54 = vpop.f32.mrf.mxu0  ;;  %v6820_v61 = vpop.f32.mrf.mxu1 }
 0x1b5   : > { %v6822_v48 = vpop.f32.mrf.mxu0  ;;  %v6824_v4 = vpop.f32.mrf.mxu1 }
 0x1b7   : > { %v6826_v57 = vpop.f32.mrf.mxu0  ;;  %v6828_v45 = vpop.f32.mrf.mxu1 }
 0x1b9   : > { %v6830_v52 = vpop.f32.mrf.mxu0  ;;  %v6832_v0 = vpop.f32.mrf.mxu1 }
 0x1bb   : > { %v6834_v17 = vpop.f32.mrf.mxu0  ;;  %v6836_v28 = vpop.f32.mrf.mxu1 }
 0x1bd   : > { %v6838_v38 = vpop.f32.mrf.mxu0  ;;  %v6840_v2 = vpop.f32.mrf.mxu1 }
 0x1bf   : > { %v6842_v26 = vpop.f32.mrf.mxu0  ;;  %v6844_v25 = vpop.f32.mrf.mxu1 }
 0x1c1   : > { %v6846_v12 = vpop.f32.mrf.mxu0  ;;  %v6848_v43 = vpop.f32.mrf.mxu1 }
 0x1c2   : > { %7099 = vst [vmem:[#allocation17_spill] sm:$0xff] %v6846_v12  ;;  %7100 = vst [vmem:[#allocation18_spill] sm:$0xff] %v6848_v43 }
 0x1c3   : > { %v6850_v7 = vpop.f32.mrf.mxu0  ;;  %v6852_v20 = vpop.f32.mrf.mxu1 }
 0x1c4   : > { %7101 = vst [vmem:[#allocation19_spill] sm:$0xff] %v6850_v7  ;;  %7102 = vst [vmem:[#allocation20_spill] sm:$0xff] %v6852_v20 }
 0x1c5   : > { %v6854_v27 = vpop.f32.mrf.mxu0  ;;  %v6856_v35 = vpop.f32.mrf.mxu1 }
 0x1c6   : > { %7103 = vst [vmem:[#allocation21_spill] sm:$0xff] %v6854_v27  ;;  %7104 = vst [vmem:[#allocation22_spill] sm:$0xff] %v6856_v35 }
 0x1c7   : > { %v6858_v50 = vpop.f32.mrf.mxu0  ;;  %v6860_v34 = vpop.f32.mrf.mxu1 }
 0x1c8   : > { %7105 = vst [vmem:[#allocation23_spill] sm:$0xff] %v6858_v50  ;;  %7106 = vst [vmem:[#allocation24_spill] sm:$0xff] %v6860_v34 }
 0x1c9   : > { %v6862_v47 = vpop.f32.mrf.mxu0  ;;  %v6864_v18 = vpop.f32.mrf.mxu1 }
 0x1ca   : > { %7107 = vst [vmem:[#allocation25_spill] sm:$0xff] %v6862_v47  ;;  %7108 = vst [vmem:[#allocation26_spill] sm:$0xff] %v6864_v18 }
 0x1cb   : > { %v6866_v56 = vpop.f32.mrf.mxu0  ;;  %v6868_v12 = vpop.f32.mrf.mxu1 }
 0x1cc   : > { %7109 = vst [vmem:[#allocation27_spill] sm:$0xff] %v6866_v56  ;;  %7110 = vst [vmem:[#allocation28_spill] sm:$0xff] %v6868_v12 }
 0x1cd   : > { %v6870_v43 = vpop.f32.mrf.mxu0  ;;  %v6872_v7 = vpop.f32.mrf.mxu1 }
 0x1ce   : > { %7111 = vst [vmem:[#allocation29_spill] sm:$0xff] %v6870_v43  ;;  %7112 = vst [vmem:[#allocation30_spill] sm:$0xff] %v6872_v7 }
 0x1cf   : > { %v6874_v20 = vpop.f32.mrf.mxu0  ;;  %v6876_v27 = vpop.f32.mrf.mxu1 }
 0x1d0   : > { %7113 = vst [vmem:[#allocation31_spill] sm:$0xff] %v6874_v20  ;;  %7114 = vst [vmem:[#allocation32_spill] sm:$0xff] %v6876_v27  ;;  %v2652_v20 = vadd.f32 %v4945_v13, %v6687_v39  ;;  %v2653_v39 = vadd.f32 %v6788_v36, %v6696_v33 }
 0x1d1   : > { %v6878_v35 = vpop.f32.mrf.mxu0  ;;  %v6880_v50 = vpop.f32.mrf.mxu1 }
 0x1d2   : > { %7115 = vst [vmem:[#allocation33_spill] sm:$0xff] %v6878_v35  ;;  %7116 = vst [vmem:[#allocation34_spill] sm:$0xff] %v6880_v50  ;;  %v2651_v50 = vadd.f32 %v2492_v58, %v6690_v15  ;;  %v2656_v15 = vadd.f32 %v6792_v40, %v6699_v1  ;;  %v2960_v33 = vadd.f32 %v6790_v14, %v2653_v39 }
 0x1d3   : > { %v6882_v34 = vpop.f32.mrf.mxu0  ;;  %v6884_v47 = vpop.f32.mrf.mxu1  ;;  %v2655_v1 = vadd.f32 %v6796_v3, %v6702_v46  ;;  %v2658_v14 = vadd.f32 %v6800_v23, %v6705_v42  ;;  %v2657_v46 = vadd.f32 %v6804_v60, %v6708_v44 }
 0x1d4   : > { %7117 = vst [vmem:[#allocation35_spill] sm:$0xff] %v6882_v34  ;;  %7118 = vst [vmem:[#allocation36_spill] sm:$0xff] %v6884_v47  ;;  %v2963_v36 = vadd.f32 %v6794_v22, %v2656_v15 }
 0x1d5   : > { %v6886_v18 = vpop.f32.mrf.mxu0  ;;  %v6888_v56 = vpop.f32.mrf.mxu1  ;;  %v2965_v44 = vadd.f32 %v6802_v19, %v2658_v14 }
 0x1d6   : > { %7119 = vst [vmem:[#allocation37_spill] sm:$0xff] %v6886_v18  ;;  %7120 = vst [vmem:[#allocation38_spill] sm:$0xff] %v6888_v56  ;;  %v2959_v18 = vadd.f32 %v6782_v30, %v2652_v20  ;;  %v2654_v56 = vadd.f32 %v4948_v9, %v6693_v10 }
 0x1d7   : > { %v6890_v12 = vpop.f32.mrf.mxu0  ;;  %v6892_v43 = vpop.f32.mrf.mxu1 }
 0x1d8   : > { %7121 = vst [vmem:[#allocation39_spill] sm:$0xff] %v6890_v12  ;;  %7122 = vst [vmem:[#allocation40_spill] sm:$0xff] %v6892_v43  ;;  %v2958_v43 = vadd.f32 %v6784_v32, %v2651_v50  ;;  %v2961_v30 = vadd.f32 %v6786_v29, %v2654_v56 }
 0x1d9   : > { %v6895_v27 = vpop.f32.mrf.mxu0  ;;  %v6897_v35 = vpop.f32.mrf.mxu1 }
 0x1db   : > { %v6900_v34 = vpop.f32.mrf.mxu0  ;;  %v6902_v47 = vpop.f32.mrf.mxu1 }
 0x1dc   : > { %7123 = vst [vmem:[#allocation41_spill] sm:$0xff] %v6900_v34 }
 0x1dd   : > { %v6906_v12 = vpop.f32.mrf.mxu0  ;;  %v5105_v7 = vpop.f32.mrf.mxu1 }
 0x1de   : > { %7124 = vst [vmem:[#allocation42_spill] sm:$0xff] %v6906_v12  ;;  %v3265_v13 = vadd.f32 %v5105_v7, %v2959_v18 }
 0x1df   : > { %v5185_v20 = vpop.f32.mrf.mxu0  ;;  %v3105_v10 = vpop.f32.mrf.mxu1 }
 0x1e0   : > { %v3571_v58 = vadd.f32 %v5185_v20, %v3265_v13  ;;  %v3264_v50 = vadd.f32 %v3105_v10, %v2958_v43  ;;  %v2962_v20 = vadd.f32 %v6798_v53, %v2655_v1  ;;  %v2964_v53 = vadd.f32 %v6806_v37, %v2657_v46 }
 0x1e1   : > { %v3411_v32 = vpop.f32.mrf.mxu0  ;;  %v5108_v9 = vpop.f32.mrf.mxu1 }
 0x1e2   : > { %3603 = vst [vmem:[%s6917_s12 + $0x8] sm:$0xff] %v3571_v58  ;;  %v3570_v18 = vadd.f32 %v3411_v32, %v3264_v50  ;;  %v3267_v7 = vadd.f32 %v5108_v9, %v2961_v30  ;;  %v3672_v40 = vmul.f32 %v3571_v58, %v3571_v58  ;;  %v2660_v30 = vadd.f32 %v6808_v6, %v6711_v11 }
 0x1e3   : > { %v5188_v12 = vpop.f32.mrf.mxu0  ;;  %v3115_v34 = vpop.f32.mrf.mxu1  ;;  %v2659_v6 = vadd.f32 %v6812_v41, %v6714_v31 }
 0x1e4   : > { %3602 = vst [vmem:[%s6917_s12] sm:$0xff] %v3570_v18  ;;  %v3634_v56 = vadd.f32 %v3571_v58, %v3570_v18  ;;  %v3671_v43 = vmul.f32 %v3570_v18, %v3570_v18  ;;  %v3573_v29 = vadd.f32 %v5188_v12, %v3267_v7  ;;  %v3266_v13 = vadd.f32 %v3115_v34, %v2960_v33 }
 0x1e5   : > { %v3421_v3 = vpop.f32.mrf.mxu0  ;;  %v5111_v39 = vpop.f32.mrf.mxu1  ;;  %v2967_v11 = vadd.f32 %v6810_v59, %v2660_v30  ;;  %v2662_v7 = vadd.f32 %v6816_v63, %v6717_v16 }
 0x1e6   : > { %v3703_v22 = vadd.f32 %v3672_v40, %v3671_v43  ;;  %3605 = vst [vmem:[%s6917_s12 + $0x18] sm:$0xff] %v3573_v29  ;;  %v3572_v15 = vadd.f32 %v3421_v3, %v3266_v13  ;;  %v3269_v10 = vadd.f32 %v5111_v39, %v2963_v36  ;;  %v3674_v9 = vmul.f32 %v3573_v29, %v3573_v29 }
 0x1e7   : > { %v5191_v12 = vpop.f32.mrf.mxu0  ;;  %v3125_v34 = vpop.f32.mrf.mxu1  ;;  %v2966_v39 = vadd.f32 %v6814_v51, %v2659_v6 }
 0x1e8   : > { %3604 = vst [vmem:[%s6917_s12 + $0x10] sm:$0xff] %v3572_v15  ;;  %v3635_v58 = vadd.f32 %v3634_v56, %v3572_v15  ;;  %v3673_v42 = vmul.f32 %v3572_v15, %v3572_v15  ;;  %v3575_v23 = vadd.f32 %v5191_v12, %v3269_v10  ;;  %v3268_v50 = vadd.f32 %v3125_v34, %v2962_v20 }
 0x1e9   : > { %v3431_v60 = vpop.f32.mrf.mxu0  ;;  %v5114_v32 = vpop.f32.mrf.mxu1  ;;  %v2969_v20 = vadd.f32 %v6818_v54, %v2662_v7 }
 0x1ea   : > { %v3704_v33 = vadd.f32 %v3703_v22, %v3673_v42  ;;  %3607 = vst [vmem:[%s6917_s12 + $0x28] sm:$0xff] %v3575_v23  ;;  %v3574_v1 = vadd.f32 %v3431_v60, %v3268_v50  ;;  %v3636_v18 = vadd.f32 %v3635_v58, %v3573_v29  ;;  %v3271_v36 = vadd.f32 %v5114_v32, %v2965_v44 }
 0x1eb   : > { %v5194_v40 = vpop.f32.mrf.mxu0  ;;  %v3135_v19 = vpop.f32.mrf.mxu1  ;;  %v2661_v29 = vadd.f32 %v6820_v61, %v6720_v21  ;;  %v3676_v59 = vmul.f32 %v3575_v23, %v3575_v23  ;;  %v2664_v22 = vadd.f32 %v6824_v4, %v6723_v62  ;;  %v2663_v58 = vadd.f32 %v6828_v45, %v6726_v5 }
 0x1ec   : > { %3606 = vst [vmem:[%s6917_s12 + $0x20] sm:$0xff] %v3574_v1  ;;  %v3637_v37 = vadd.f32 %v3636_v18, %v3574_v1  ;;  %v3675_v56 = vmul.f32 %v3574_v1, %v3574_v1  ;;  %v3705_v43 = vadd.f32 %v3704_v33, %v3674_v9  ;;  %v3270_v13 = vadd.f32 %v3135_v19, %v2964_v53 }
 0x1ed   : > { %v3577_v14 = vadd.f32 %v5194_v40, %v3271_v36  ;;  %v3441_v46 = vpop.f32.mrf.mxu0  ;;  %v5117_v31 = vpop.f32.mrf.mxu1  ;;  %v2968_v34 = vadd.f32 %v6822_v48, %v2661_v29  ;;  %v2971_v44 = vadd.f32 %v6826_v57, %v2664_v22  ;;  %v2666_v48 = vadd.f32 %v6832_v0, %v6729_v55  ;;  %v7126_v22 = vld [vmem:[#allocation18_spill] sm:$0xff] }
 0x1ee   : > { %v3706_v41 = vadd.f32 %v3705_v43, %v3675_v56  ;;  %v3576_v3 = vadd.f32 %v3441_v46, %v3270_v13  ;;  %v3638_v16 = vadd.f32 %v3637_v37, %v3575_v23  ;;  %v3273_v63 = vadd.f32 %v5117_v31, %v2967_v11 }
 0x1ef   : > { %3609 = vst [vmem:[%s6917_s12 + $0x38] sm:$0xff] %v3577_v14  ;;  %v5197_v15 = vpop.f32.mrf.mxu0  ;;  %v3145_v10 = vpop.f32.mrf.mxu1  ;;  %v3678_v23 = vmul.f32 %v3577_v14, %v3577_v14  ;;  %v2970_v6 = vadd.f32 %v6830_v52, %v2663_v58  ;;  %v2665_v57 = vadd.f32 %v6836_v28, %v6732_v24  ;;  %v2668_v55 = vadd.f32 %v6840_v2, %v6735_v8  ;;  %v7129_v58 = vld [vmem:[#allocation20_spill] sm:$0xff] }
 0x1f0   : > { %3608 = vst [vmem:[%s6917_s12 + $0x30] sm:$0xff] %v3576_v3  ;;  %v3639_v21 = vadd.f32 %v3638_v16, %v3576_v3  ;;  %v3677_v61 = vmul.f32 %v3576_v3, %v3576_v3  ;;  %v3707_v30 = vadd.f32 %v3706_v41, %v3676_v59  ;;  %v3579_v12 = vadd.f32 %v5197_v15, %v3273_v63 }
 0x1f1   : > { %v3272_v51 = vadd.f32 %v3145_v10, %v2966_v39  ;;  %v3451_v54 = vpop.f32.mrf.mxu0  ;;  %v5120_v42 = vpop.f32.mrf.mxu1  ;;  %v2973_v43 = vadd.f32 %v6834_v17, %v2666_v48  ;;  %v2972_v46 = vadd.f32 %v6838_v38, %v2665_v57  ;;  %v2667_v8 = vadd.f32 %v6844_v25, %v6738_v49  ;;  %v7132_v48 = vld [vmem:[#allocation19_spill] sm:$0xff]  ;;  %v7133_v57 = vld [vmem:[#allocation21_spill] sm:$0xff] }
 0x1f2   : > { %v3708_v62 = vadd.f32 %v3707_v30, %v3677_v61  ;;  %3611 = vst [vmem:[%s6917_s12 + $0x48] sm:$0xff] %v3579_v12  ;;  %v3640_v4 = vadd.f32 %v3639_v21, %v3577_v14  ;;  %v3275_v50 = vadd.f32 %v5120_v42, %v2969_v20  ;;  %v3680_v0 = vmul.f32 %v3579_v12, %v3579_v12  ;;  %v7125_v20 = vld [vmem:[#allocation3_spill] sm:$0xff] }
 0x1f3   : > { %v3578_v53 = vadd.f32 %v3451_v54, %v3272_v51  ;;  %v5200_v60 = vpop.f32.mrf.mxu0  ;;  %v3155_v32 = vpop.f32.mrf.mxu1  ;;  %v2975_v41 = vadd.f32 %v6842_v26, %v2668_v55  ;;  %v2670_v15 = vadd.f32 %v7126_v22, %v7125_v20  ;;  %v7135_v55 = vld [vmem:[#allocation24_spill] sm:$0xff] }
 0x1f4   : > { %v3709_v9 = vadd.f32 %v3708_v62, %v3678_v23  ;;  %v3581_v5 = vadd.f32 %v5200_v60, %v3275_v50  ;;  %v3274_v45 = vadd.f32 %v3155_v32, %v2968_v34  ;;  %v7128_v34 = vld [vmem:[#allocation4_spill] sm:$0xff]  ;;  %v7130_v23 = vld [vmem:[#allocation5_spill] sm:$0xff]  ;;  %v7131_v62 = vld [vmem:[#allocation22_spill] sm:$0xff] }
 0x1f5   : > { %3610 = vst [vmem:[%s6917_s12 + $0x40] sm:$0xff] %v3578_v53  ;;  %v3641_v33 = vadd.f32 %v3640_v4, %v3578_v53  ;;  %v3679_v1 = vmul.f32 %v3578_v53, %v3578_v53  ;;  %v3461_v18 = vpop.f32.mrf.mxu0  ;;  %v5123_v11 = vpop.f32.mrf.mxu1  ;;  %v2669_v51 = vadd.f32 %v7129_v58, %v7128_v34  ;;  %v2672_v4 = vadd.f32 %v7131_v62, %v7130_v23  ;;  %v7141_v20 = vld [vmem:[#allocation28_spill] sm:$0xff]  ;;  %v7144_v34 = vld [vmem:[#allocation27_spill] sm:$0xff] }
 0x1f6   : > { %3613 = vst [vmem:[%s6917_s12 + $0x58] sm:$0xff] %v3581_v5  ;;  %v3580_v7 = vadd.f32 %v3461_v18, %v3274_v45  ;;  %v3277_v36 = vadd.f32 %v5123_v11, %v2971_v44  ;;  %v3682_v17 = vmul.f32 %v3581_v5, %v3581_v5 }
 0x1f7   : > { %v3710_v40 = vadd.f32 %v3709_v9, %v3679_v1  ;;  %v3642_v19 = vadd.f32 %v3641_v33, %v3579_v12  ;;  %v5203_v37 = vpop.f32.mrf.mxu0  ;;  %v3165_v56 = vpop.f32.mrf.mxu1  ;;  %v7127_v12 = vld [vmem:[#allocation17_spill] sm:$0xff]  ;;  %v2977_v9 = vadd.f32 %v7132_v48, %v2670_v15 }
 0x1f8   : > { %3612 = vst [vmem:[%s6917_s12 + $0x50] sm:$0xff] %v3580_v7  ;;  %v3681_v13 = vmul.f32 %v3580_v7, %v3580_v7  ;;  %v3583_v52 = vadd.f32 %v5203_v37, %v3277_v36  ;;  %v3276_v29 = vadd.f32 %v3165_v56, %v2970_v6  ;;  %v2974_v26 = vadd.f32 %v7127_v12, %v2667_v8  ;;  %v7134_v36 = vld [vmem:[#allocation6_spill] sm:$0xff]  ;;  %v7136_v37 = vld [vmem:[#allocation23_spill] sm:$0xff] }
 0x1f9   : > { %v3643_v59 = vadd.f32 %v3642_v19, %v3580_v7  ;;  %v3711_v24 = vadd.f32 %v3710_v40, %v3680_v0  ;;  %v3471_v28 = vpop.f32.mrf.mxu0  ;;  %v5126_v14 = vpop.f32.mrf.mxu1  ;;  %v2976_v7 = vadd.f32 %v7133_v57, %v2669_v51  ;;  %v2671_v0 = vadd.f32 %v7135_v55, %v7134_v36  ;;  %v7150_v36 = vld [vmem:[#allocation34_spill] sm:$0xff] }
 0x1fa   : > { %3615 = vst [vmem:[%s6917_s12 + $0x68] sm:$0xff] %v3583_v52  ;;  %v3582_v2 = vadd.f32 %v3471_v28, %v3276_v29  ;;  %v3279_v31 = vadd.f32 %v5126_v14, %v2973_v43  ;;  %v3684_v50 = vmul.f32 %v3583_v52, %v3583_v52  ;;  %v2979_v56 = vadd.f32 %v7136_v37, %v2672_v4  ;;  %v7138_v28 = vld [vmem:[#allocation26_spill] sm:$0xff] }
 0x1fb   : > { %v3712_v3 = vadd.f32 %v3711_v24, %v3681_v13  ;;  %v3644_v16 = vadd.f32 %v3643_v59, %v3581_v5  ;;  %v5206_v63 = vpop.f32.mrf.mxu0  ;;  %v3175_v39 = vpop.f32.mrf.mxu1  ;;  %v7137_v24 = vld [vmem:[#allocation7_spill] sm:$0xff] }
 0x1fc   : > { %3614 = vst [vmem:[%s6917_s12 + $0x60] sm:$0xff] %v3582_v2  ;;  %v3683_v10 = vmul.f32 %v3582_v2, %v3582_v2  ;;  %v3585_v38 = vadd.f32 %v5206_v63, %v3279_v31  ;;  %v3278_v21 = vadd.f32 %v3175_v39, %v2972_v46  ;;  %v2674_v14 = vadd.f32 %v7138_v28, %v7137_v24  ;;  %v7140_v39 = vld [vmem:[#allocation8_spill] sm:$0xff] }
 0x1fd   : > { %v3645_v61 = vadd.f32 %v3644_v16, %v3582_v2  ;;  %v3713_v49 = vadd.f32 %v3712_v3, %v3682_v17  ;;  %v3481_v25 = vpop.f32.mrf.mxu0  ;;  %v5129_v30 = vpop.f32.mrf.mxu1  ;;  %v7139_v16 = vld [vmem:[#allocation25_spill] sm:$0xff]  ;;  %v2673_v22 = vadd.f32 %v7141_v20, %v7140_v39  ;;  %v7153_v24 = vld [vmem:[#allocation36_spill] sm:$0xff]  ;;  %v7156_v39 = vld [vmem:[#allocation35_spill] sm:$0xff] }
 0x1fe   : > { %3617 = vst [vmem:[%s6917_s12 + $0x78] sm:$0xff] %v3585_v38  ;;  %v3584_v54 = vadd.f32 %v3481_v25, %v3278_v21  ;;  %v3281_v42 = vadd.f32 %v5129_v30, %v2975_v41  ;;  %v3686_v43 = vmul.f32 %v3585_v38, %v3585_v38  ;;  %v2978_v63 = vadd.f32 %v7139_v16, %v2671_v0  ;;  %v7143_v21 = vld [vmem:[#allocation30_spill] sm:$0xff] }
 0x1ff   : > { %v3714_v44 = vadd.f32 %v3713_v49, %v3683_v10  ;;  %v3646_v53 = vadd.f32 %v3645_v61, %v3583_v52  ;;  %v5209_v60 = vpop.f32.mrf.mxu0  ;;  %v3185_v32 = vpop.f32.mrf.mxu1  ;;  %v2981_v58 = vadd.f32 %v7144_v34, %v2674_v14 }
 0x200   : > { %3616 = vst [vmem:[%s6917_s12 + $0x70] sm:$0xff] %v3584_v54  ;;  %v3685_v5 = vmul.f32 %v3584_v54, %v3584_v54  ;;  %v3587_v45 = vadd.f32 %v5209_v60, %v3281_v42  ;;  %v3280_v33 = vadd.f32 %v3185_v32, %v2974_v26  ;;  %v7146_v60 = vld [vmem:[#allocation10_spill] sm:$0xff]  ;;  %v7147_v32 = vld [vmem:[#allocation32_spill] sm:$0xff] }
 0x201   : > { %v3647_v1 = vadd.f32 %v3646_v53, %v3584_v54  ;;  %v3715_v18 = vadd.f32 %v3714_v44, %v3684_v50  ;;  %v3491_v11 = vpop.f32.mrf.mxu0  ;;  %v5132_v6 = vpop.f32.mrf.mxu1  ;;  %v7145_v44 = vld [vmem:[#allocation29_spill] sm:$0xff]  ;;  %v2675_v48 = vadd.f32 %v7147_v32, %v7146_v60 }
 0x202   : > { %3619 = vst [vmem:[%s6917_s12 + $0x88] sm:$0xff] %v3587_v45  ;;  %v3586_v40 = vadd.f32 %v3491_v11, %v3280_v33  ;;  %v3283_v19 = vadd.f32 %v5132_v6, %v2977_v9  ;;  %v3688_v49 = vmul.f32 %v3587_v45, %v3587_v45  ;;  %v2980_v53 = vadd.f32 %v7145_v44, %v2673_v22 }
 0x203   : > { %v3716_v13 = vadd.f32 %v3715_v18, %v3685_v5  ;;  %v3648_v52 = vadd.f32 %v3647_v1, %v3585_v38  ;;  %v5212_v29 = vpop.f32.mrf.mxu0  ;;  %v3195_v59 = vpop.f32.mrf.mxu1  ;;  %v7142_v38 = vld [vmem:[#allocation9_spill] sm:$0xff] }
 0x204   : > { %3618 = vst [vmem:[%s6917_s12 + $0x80] sm:$0xff] %v3586_v40  ;;  %v3687_v46 = vmul.f32 %v3586_v40, %v3586_v40  ;;  %v3589_v8 = vadd.f32 %v5212_v29, %v3283_v19  ;;  %v3282_v2 = vadd.f32 %v3195_v59, %v2976_v7  ;;  %v2676_v61 = vadd.f32 %v7143_v21, %v7142_v38  ;;  %v7149_v7 = vld [vmem:[#allocation11_spill] sm:$0xff]  ;;  %v7152_v59 = vld [vmem:[#allocation12_spill] sm:$0xff] }
 0x205   : > { %v3649_v31 = vadd.f32 %v3648_v52, %v3586_v40  ;;  %v3717_v41 = vadd.f32 %v3716_v13, %v3686_v43  ;;  %v3501_v17 = vpop.f32.mrf.mxu0  ;;  %v5135_v3 = vpop.f32.mrf.mxu1  ;;  %v2678_v55 = vadd.f32 %v7150_v36, %v7149_v7  ;;  %v7151_v52 = vld [vmem:[#allocation33_spill] sm:$0xff]  ;;  %v2677_v28 = vadd.f32 %v7153_v24, %v7152_v59  ;;  %v7164_v59 = vld [vmem:[#allocation42_spill] sm:$0xff] }
 0x206   : > { %3621 = vst [vmem:[%s6917_s12 + $0x98] sm:$0xff] %v3589_v8  ;;  %v3588_v15 = vadd.f32 %v3501_v17, %v3282_v2  ;;  %v3285_v10 = vadd.f32 %v5135_v3, %v2979_v56  ;;  %v3690_v1 = vmul.f32 %v3589_v8, %v3589_v8  ;;  %v2982_v29 = vadd.f32 %v7151_v52, %v2675_v48  ;;  %v7155_v2 = vld [vmem:[#allocation38_spill] sm:$0xff] }
 0x207   : > { %v3718_v25 = vadd.f32 %v3717_v41, %v3687_v46  ;;  %v3650_v30 = vadd.f32 %v3649_v31, %v3587_v45  ;;  %v5215_v12 = vpop.f32.mrf.mxu0  ;;  %v3205_v26 = vpop.f32.mrf.mxu1  ;;  %v7148_v45 = vld [vmem:[#allocation31_spill] sm:$0xff]  ;;  %v2985_v20 = vadd.f32 %v7156_v39, %v2678_v55 }
 0x208   : > { %3620 = vst [vmem:[%s6917_s12 + $0x90] sm:$0xff] %v3588_v15  ;;  %v3689_v51 = vmul.f32 %v3588_v15, %v3588_v15  ;;  %v3591_v54 = vadd.f32 %v5215_v12, %v3285_v10  ;;  %v3284_v42 = vadd.f32 %v3205_v26, %v2978_v63  ;;  %v2983_v33 = vadd.f32 %v7148_v45, %v2676_v61  ;;  %v7158_v12 = vld [vmem:[#allocation14_spill] sm:$0xff]  ;;  %v7159_v26 = vld [vmem:[#allocation40_spill] sm:$0xff] }
 0x209   : > { %v3651_v23 = vadd.f32 %v3650_v30, %v3588_v15  ;;  %v3719_v62 = vadd.f32 %v3718_v25, %v3688_v49  ;;  %v3511_v4 = vpop.f32.mrf.mxu0  ;;  %v5138_v50 = vpop.f32.mrf.mxu1  ;;  %v7157_v25 = vld [vmem:[#allocation37_spill] sm:$0xff]  ;;  %v2679_v34 = vadd.f32 %v7159_v26, %v7158_v12 }
 0x20a   : > { %3623 = vst [vmem:[%s6917_s12 + $0xa8] sm:$0xff] %v3591_v54  ;;  %v3590_v9 = vadd.f32 %v3511_v4, %v3284_v42  ;;  %v3287_v5 = vadd.f32 %v5138_v50, %v2981_v58  ;;  %v3692_v41 = vmul.f32 %v3591_v54, %v3591_v54  ;;  %v2984_v30 = vadd.f32 %v7157_v25, %v2677_v28 }
 0x20b   : > { %v3720_v18 = vadd.f32 %v3719_v62, %v3689_v51  ;;  %v3652_v11 = vadd.f32 %v3651_v23, %v3589_v8  ;;  %v5218_v6 = vpop.f32.mrf.mxu0  ;;  %v3215_v57 = vpop.f32.mrf.mxu1  ;;  %v7154_v8 = vld [vmem:[#allocation13_spill] sm:$0xff] }
 0x20c   : > { %3622 = vst [vmem:[%s6917_s12 + $0xa0] sm:$0xff] %v3590_v9  ;;  %v3691_v0 = vmul.f32 %v3590_v9, %v3590_v9  ;;  %v3593_v40 = vadd.f32 %v5218_v6, %v3287_v5  ;;  %v3286_v19 = vadd.f32 %v3215_v57, %v2980_v53  ;;  %v2680_v31 = vadd.f32 %v7155_v2, %v7154_v8  ;;  %v7161_v53 = vld [vmem:[#allocation15_spill] sm:$0xff] }
 0x20d   : > { %v3653_v37 = vadd.f32 %v3652_v11, %v3590_v9  ;;  %v3721_v56 = vadd.f32 %v3720_v18, %v3690_v1  ;;  %v3521_v43 = vpop.f32.mrf.mxu0  ;;  %v5141_v13 = vpop.f32.mrf.mxu1  ;;  %v2682_v60 = vadd.f32 %v6897_v35, %v7161_v53  ;;  %v2986_v18 = vadd.f32 %v6895_v27, %v2679_v34  ;;  %v7162_v11 = vld [vmem:[#allocation16_spill] sm:$0xff] }
 0x20e   : > { %3625 = vst [vmem:[%s6917_s12 + $0xb8] sm:$0xff] %v3593_v40  ;;  %v3592_v14 = vadd.f32 %v3521_v43, %v3286_v19  ;;  %v3289_v46 = vadd.f32 %v5141_v13, %v2983_v33  ;;  %v3694_v23 = vmul.f32 %v3593_v40, %v3593_v40  ;;  %v2681_v6 = vadd.f32 %v6902_v47, %v7162_v11  ;;  %v7163_v19 = vld [vmem:[#allocation41_spill] sm:$0xff] }
 0x20f   : > { %v3722_v17 = vadd.f32 %v3721_v56, %v3691_v0  ;;  %v3654_v3 = vadd.f32 %v3653_v37, %v3591_v54  ;;  %v5221_v16 = vpop.f32.mrf.mxu0  ;;  %v3225_v63 = vpop.f32.mrf.mxu1  ;;  %v7160_v54 = vld [vmem:[#allocation39_spill] sm:$0xff]  ;;  %v2989_v37 = vadd.f32 %v7163_v19, %v2682_v60 }
 0x210   : > { %3624 = vst [vmem:[%s6917_s12 + $0xb0] sm:$0xff] %v3592_v14  ;;  %v3693_v22 = vmul.f32 %v3592_v14, %v3592_v14  ;;  %v3595_v15 = vadd.f32 %v5221_v16, %v3289_v46  ;;  %v3288_v10 = vadd.f32 %v3225_v63, %v2982_v29  ;;  %v2987_v42 = vadd.f32 %v7160_v54, %v2680_v31 }
 0x211   : > { %v3655_v38 = vadd.f32 %v3654_v3, %v3592_v14  ;;  %v3723_v21 = vadd.f32 %v3722_v17, %v3692_v41  ;;  %v3531_v61 = vpop.f32.mrf.mxu0  ;;  %v5144_v49 = vpop.f32.mrf.mxu1  ;;  %v2988_v24 = vadd.f32 %v7164_v59, %v2681_v6 }
 0x212   : > { %3627 = vst [vmem:[%s6917_s12 + $0xc8] sm:$0xff] %v3595_v15  ;;  %v3594_v58 = vadd.f32 %v3531_v61, %v3288_v10  ;;  %v3291_v51 = vadd.f32 %v5144_v49, %v2985_v20  ;;  %v3696_v36 = vmul.f32 %v3595_v15, %v3595_v15 }
 0x213   : > { %v3724_v62 = vadd.f32 %v3723_v21, %v3693_v22  ;;  %v3656_v4 = vadd.f32 %v3655_v38, %v3593_v40  ;;  %v5224_v50 = vpop.f32.mrf.mxu0  ;;  %v3235_v44 = vpop.f32.mrf.mxu1 }
 0x214   : > { %3626 = vst [vmem:[%s6917_s12 + $0xc0] sm:$0xff] %v3594_v58  ;;  %v3695_v32 = vmul.f32 %v3594_v58, %v3594_v58  ;;  %v3597_v48 = vadd.f32 %v5224_v50, %v3291_v51  ;;  %v3290_v9 = vadd.f32 %v3235_v44, %v2984_v30 }
 0x215   : > { %v3657_v5 = vadd.f32 %v3656_v4, %v3594_v58  ;;  %v3725_v45 = vadd.f32 %v3724_v62, %v3694_v23  ;;  %v3541_v33 = vpop.f32.mrf.mxu0  ;;  %v5147_v1 = vpop.f32.mrf.mxu1 }
 0x216   : > { %3629 = vst [vmem:[%s6917_s12 + $0xd8] sm:$0xff] %v3597_v48  ;;  %v3596_v57 = vadd.f32 %v3541_v33, %v3290_v9  ;;  %v3293_v7 = vadd.f32 %v5147_v1, %v2987_v42  ;;  %v3698_v46 = vmul.f32 %v3597_v48, %v3597_v48 }
 0x217   : > { %v3726_v35 = vadd.f32 %v3725_v45, %v3695_v32  ;;  %v3658_v55 = vadd.f32 %v3657_v5, %v3595_v15  ;;  %v5227_v0 = vpop.f32.mrf.mxu0  ;;  %v3245_v40 = vpop.f32.mrf.mxu1 }
 0x218   : > { %3628 = vst [vmem:[%s6917_s12 + $0xd0] sm:$0xff] %v3596_v57  ;;  %v3697_v56 = vmul.f32 %v3596_v57, %v3596_v57  ;;  %v3599_v43 = vadd.f32 %v5227_v0, %v3293_v7  ;;  %v3292_v13 = vadd.f32 %v3245_v40, %v2986_v18 }
 0x219   : > { %v3659_v27 = vadd.f32 %v3658_v55, %v3596_v57  ;;  %v3727_v52 = vadd.f32 %v3726_v35, %v3696_v36  ;;  %v3551_v29 = vpop.f32.mrf.mxu0  ;;  %v5150_v47 = vpop.f32.mrf.mxu1 }
 0x21a   : > { %3631 = vst [vmem:[%s6917_s12 + $0xe8] sm:$0xff] %v3599_v43  ;;  %v3598_v28 = vadd.f32 %v3551_v29, %v3292_v13  ;;  %v3295_v14 = vadd.f32 %v5150_v47, %v2989_v37  ;;  %v3700_v15 = vmul.f32 %v3599_v43, %v3599_v43 }
 0x21b   : > { %v3728_v8 = vadd.f32 %v3727_v52, %v3697_v56  ;;  %v3660_v2 = vadd.f32 %v3659_v27, %v3597_v48  ;;  %v5230_v31 = vpop.f32.mrf.mxu0  ;;  %v3255_v41 = vpop.f32.mrf.mxu1 }
 0x21c   : > { %3630 = vst [vmem:[%s6917_s12 + $0xe0] sm:$0xff] %v3598_v28  ;;  %v3699_v17 = vmul.f32 %v3598_v28, %v3598_v28  ;;  %v3601_v3 = vadd.f32 %v5230_v31, %v3295_v14  ;;  %v3294_v16 = vadd.f32 %v3255_v41, %v2988_v24 }
 0x21d   : > { %v3661_v63 = vadd.f32 %v3660_v2, %v3598_v28  ;;  %v3729_v39 = vadd.f32 %v3728_v8, %v3698_v46  ;;  %v3561_v20 = vpop.f32.mrf.mxu0 }
 0x21e   : > { %3633 = vst [vmem:[%s6917_s12 + $0xf8] sm:$0xff] %v3601_v3  ;;  %v3600_v22 = vadd.f32 %v3561_v20, %v3294_v16  ;;  %v3702_v25 = vmul.f32 %v3601_v3, %v3601_v3 }
 0x21f   : > { %v3730_v10 = vadd.f32 %v3729_v39, %v3699_v17  ;;  %v3662_v38 = vadd.f32 %v3661_v63, %v3599_v43 }
 0x220   : > { %3632 = vst [vmem:[%s6917_s12 + $0xf0] sm:$0xff] %v3600_v22  ;;  %v3701_v21 = vmul.f32 %v3600_v22, %v3600_v22 }
 0x221   : > { %v3663_v61 = vadd.f32 %v3662_v38, %v3600_v22  ;;  %v3731_v49 = vadd.f32 %v3730_v10, %v3700_v15 }
 0x223   : > { %v3664_v30 = vadd.f32 %v3663_v61, %v3601_v3  ;;  %v3732_v12 = vadd.f32 %v3731_v49, %v3701_v21 }
 0x225   : > { %v3665_v26 = vrot.slane %v3664_v30, 4  ;;  %v3733_v34 = vadd.f32 %v3732_v12, %v3702_v25 }
 0x227   : > { %v3666_v58 = vadd.f32 %v3665_v26, %v3664_v30  ;;  %v3734_v51 = vrot.slane %v3733_v34, 4 }
 0x229   : > { %v3667_v54 = vrot.slane %v3666_v58, 2  ;;  %v3735_v42 = vadd.f32 %v3734_v51, %v3733_v34 }
 0x22b   : > { %v3668_v23 = vadd.f32 %v3667_v54, %v3666_v58  ;;  %v3736_v62 = vrot.slane %v3735_v42, 2 }
 0x22d   : > { %v3669_v4 = vrot.slane %v3668_v23, 1  ;;  %v3737_v50 = vadd.f32 %v3736_v62, %v3735_v42 }
 0x22f   : > { %v3738_v44 = vrot.slane %v3737_v50, 1  ;;  %v3670_v53 = vadd.f32 %v3669_v4, %v3668_v23 }
 0x231   : > { %v3739_v60 = vadd.f32 %v3738_v44, %v3737_v50 }
 0x233   : > { %v3740_v32 = vsel %vm510_vm0, %v3670_v53, %v3739_v60 }
 0x234   : > { %3741 = vst [vmem:[%s475_s15] sm:$0x3] %v3740_v32 }
 0x235 PF: > { %s18_s26 = sadd.s32 1, %s5359_s26   ;;  %s7165_s24 = smov %s5355_s25 }
 0x236   : > { %p15_p5 = scmp.ge.s32.totalorder %s18_s26, 4   ;;  %s7166_s25 = smov %s7168_s27 }
 0x238   :  { %17 = sbr.rel (!%p15_p5) target bundleno = 2 (0x2), region = 104 }

</bundles_post_ra>
